<compile_context>
chip_gen: v7x
topology: tpu7x:2x2x1
jax: 0.10.0
libtpu: 0.0.40
codegen_flags: <defaults>
</compile_context>

<pallas_src>
import jax
import jax.numpy as jnp
from jax.experimental import pallas as pl
from jax.experimental.pallas import tpu as pltpu

# ----------------------------- model config (small, deterministic) -----------------------------
B = 2                 # batch
T_IMG = 1             # images per sample
F_FRAMES = 1          # frames (only F=1 supported, as in the module)
C, H, W = 3, 16, 16   # image channels / spatial
PATCH = 4
NUM_PATCHES = (H // PATCH) * (W // PATCH)          # 16
PATCH_DIM = C * PATCH * PATCH                      # 48
VIS_DIM = 32                                       # vis_dim

# PerceiverResampler
PR_DEPTH = 2
PR_HEADS = 4
PR_DIM_HEAD = 8
PR_HD = PR_HEADS * PR_DIM_HEAD                     # 32
NUM_LATENTS = 8

# Language model
VOCAB = 64
VOCAB_PAD = 128                                    # lane-dense lm_head output (multiple of 128)
T_TXT = 8
LANG_DIM = 32                                      # lang hidden size
N_LAYERS = 2
CROSS_EVERY = 1                                    # cross_attn_every_n_layers
LM_HEADS = 4
LM_DIM_HEAD = 8
LM_HD = LM_HEADS * LM_DIM_HEAD                     # 32
XATTN_HEADS = 4
XATTN_DIM_HEAD = 8
XATTN_HD = XATTN_HEADS * XATTN_DIM_HEAD            # 32

N_IMGS = B * T_IMG * F_FRAMES                      # rows fed to the vision encoder
S_VIS = F_FRAMES * NUM_PATCHES                     # perceiver key length from vision features
MEDIA_LEN = T_IMG * NUM_LATENTS                    # flattened media tokens per sample

MEDIA_TOKEN_ID = 50   # <image> token id (set via set_special_token_ids in the real module)
NEG_INF = -1e30


# ----------------------------------------- in-kernel helpers -----------------------------------------
def _ln_f32(x, g, b):
    """LayerNorm over last dim in f32 (eps=1e-5, PyTorch default)."""
    mu = jnp.mean(x, axis=-1, keepdims=True)
    var = jnp.mean(jnp.square(x - mu), axis=-1, keepdims=True)
    return (x - mu) * jax.lax.rsqrt(var + 1e-5) * g + b


def _attend(q_h, k_h, v_h, bias=None):
    """Single-head attention batched over the leading dim.
       q (B,Q,dh) / k,v (B,K,dh) in bf16; softmax in f32; EUP reciprocal on the (B,Q,dh) output."""
    sim = jnp.einsum('bqd,bkd->bqk', q_h, k_h, preferred_element_type=jnp.float32)
    if bias is not None:
        sim = sim + bias
    p = jnp.exp(sim - jnp.max(sim, axis=-1, keepdims=True))
    inv = pl.reciprocal(jnp.sum(p, axis=-1, keepdims=True), approx=True)
    o = jnp.einsum('bqk,bkd->bqd', p.astype(jnp.bfloat16), v_h,
                   preferred_element_type=jnp.float32)
    return o * inv


# ----------------------------------------- Pallas kernels -----------------------------------------
def _vision_kernel(patches_ref, pw_ref, bp_ref, lat0_ref,
                   nm_g_ref, nm_b_ref, nl_g_ref, nl_b_ref,
                   wq_ref, wkv_ref, wo_ref,
                   fg_ref, fb_ref, w1_ref, w2_ref,
                   fin_g_ref, fin_b_ref, o_ref):
    """Frozen vision-encoder stub (patch embed) + full PerceiverResampler (all layers + final
       LayerNorm) fused into one kernel.  grid=(1,): the whole (B*T_img) batch at once."""
    # patch embedding: one lane-dense (N*P, PD) @ (PD, D) matmul; patch bias + pos folded into bp.
    emb = jnp.dot(patches_ref[...], pw_ref[...], preferred_element_type=jnp.float32)
    x = emb.reshape(N_IMGS, S_VIS, VIS_DIM) + bp_ref[...][None]                    # (BT, S, D) f32

    lat = jnp.broadcast_to(lat0_ref[...][None], (N_IMGS, NUM_LATENTS, VIS_DIM))    # (BT, n, D)
    scale = PR_DIM_HEAD ** -0.5

    for l in range(PR_DEPTH):                                                      # static unroll
        # ---- PerceiverAttention: latents attend to concat([norm(x), norm(latents)]) ----
        # (kv over the two pieces handled with a joint-max two-piece softmax, identical math)
        xn = _ln_f32(x, nm_g_ref[l], nm_b_ref[l]).astype(jnp.bfloat16)
        latn = _ln_f32(lat, nl_g_ref[l], nl_b_ref[l]).astype(jnp.bfloat16)
        xn2d = xn.reshape(-1, VIS_DIM)
        latn2d = latn.reshape(-1, VIS_DIM)
        # fused-head projections: single 2-D bf16 matmuls, f32 accumulation
        q = jnp.dot(latn2d, wq_ref[l], preferred_element_type=jnp.float32) * scale
        q = q.reshape(N_IMGS, NUM_LATENTS, PR_HD).astype(jnp.bfloat16)
        kv_x = jnp.dot(xn2d, wkv_ref[l], preferred_element_type=jnp.float32)
        kv_x = kv_x.reshape(N_IMGS, S_VIS, 2 * PR_HD).astype(jnp.bfloat16)
        kv_l = jnp.dot(latn2d, wkv_ref[l], preferred_element_type=jnp.float32)
        kv_l = kv_l.reshape(N_IMGS, NUM_LATENTS, 2 * PR_HD).astype(jnp.bfloat16)

        heads = []
        for hh in range(PR_HEADS):                                                 # static unroll
            ks = slice(hh * PR_DIM_HEAD, (hh + 1) * PR_DIM_HEAD)
            vs = slice(PR_HD + hh * PR_DIM_HEAD, PR_HD + (hh + 1) * PR_DIM_HEAD)
            sim_x = jnp.einsum('bqd,bkd->bqk', q[:, :, ks], kv_x[:, :, ks],
                               preferred_element_type=jnp.float32)                 # (BT, n, S)
            sim_l = jnp.einsum('bqd,bkd->bqk', q[:, :, ks], kv_l[:, :, ks],
                               preferred_element_type=jnp.float32)                 # (BT, n, n)
            m = jnp.maximum(jnp.max(sim_x, axis=-1, keepdims=True),
                            jnp.max(sim_l, axis=-1, keepdims=True))
            p_x = jnp.exp(sim_x - m)
            p_l = jnp.exp(sim_l - m)
            inv = pl.reciprocal(jnp.sum(p_x, axis=-1, keepdims=True)
                                + jnp.sum(p_l, axis=-1, keepdims=True), approx=True)
            o = (jnp.einsum('bqk,bkd->bqd', p_x.astype(jnp.bfloat16), kv_x[:, :, vs],
                            preferred_element_type=jnp.float32)
                 + jnp.einsum('bqk,bkd->bqd', p_l.astype(jnp.bfloat16), kv_l[:, :, vs],
                              preferred_element_type=jnp.float32))
            heads.append(o * inv)                                                   # reciprocal on (B,n,dh)
        o_cat = jnp.concatenate(heads, axis=-1).reshape(-1, PR_HD).astype(jnp.bfloat16)
        lat = lat + jnp.dot(o_cat, wo_ref[l],
                            preferred_element_type=jnp.float32).reshape(N_IMGS, NUM_LATENTS, VIS_DIM)

        # ---- FeedForward: LN -> Linear -> GELU -> Linear, residual ----
        # TODO(synk): PyTorch nn.GELU() is exact (erf); tanh approximation used for robust lowering.
        ffn_in = _ln_f32(lat, fg_ref[l], fb_ref[l]).astype(jnp.bfloat16).reshape(-1, VIS_DIM)
        h1 = jax.nn.gelu(jnp.dot(ffn_in, w1_ref[l], preferred_element_type=jnp.float32),
                         approximate=True)
        lat = lat + jnp.dot(h1.astype(jnp.bfloat16), w2_ref[l],
                            preferred_element_type=jnp.float32).reshape(N_IMGS, NUM_LATENTS, VIS_DIM)

    # PerceiverResampler final LayerNorm, fused into the same kernel.
    o_ref[...] = _ln_f32(lat.reshape(-1, VIS_DIM), fin_g_ref[...], fin_b_ref[...])


def _lang_kernel(x_ref, sbias_ref, xbias_ref, keep_ref, media_ref,
                 xng_ref, xnb_ref, xwq_ref, xwkv_ref, xwo_ref,
                 xfg_ref, xfb_ref, xw1_ref, xw2_ref,
                 dl1g_ref, dl1b_ref, dwqkv_ref, dwo_ref,
                 dl2g_ref, dl2b_ref, dw1_ref, dw2_ref,
                 fing_ref, finb_ref, head_ref, o_ref):
    """The whole conditioned language model fused into one kernel:
       [GatedCrossAttentionBlock -> causal self-attn decoder layer] x N_LAYERS -> final LN -> lm_head.
       tanh(attn_gate)/tanh(ff_gate) were pre-folded into xwo/xw2 in prepare_params()."""
    x = x_ref[...]                                   # (B*T, D_lang) f32
    media = media_ref[...]                           # (B, M, D_vis) bf16 (perceiver tokens)
    sbias = sbias_ref[...]                           # (B, T, T)  causal+padding, shared across heads
    xbias = xbias_ref[...]                           # (B, T, M)  media-location mask, shared across heads
    keep = keep_ref[...]                             # (B*T, 1)   zero for text before any media

    xa_scale = XATTN_DIM_HEAD ** -0.5
    sa_scale = LM_DIM_HEAD ** -0.5
    xi = 0
    for li in range(N_LAYERS):                        # static unroll over decoder layers
        # -------- gated cross-attention block (inserted every CROSS_EVERY layers) --------
        if (li + 1) % CROSS_EVERY == 0:
            xn = _ln_f32(x, xng_ref[xi], xnb_ref[xi]).astype(jnp.bfloat16)
            q = jnp.dot(xn, xwq_ref[xi], preferred_element_type=jnp.float32) * xa_scale
            q = q.reshape(B, T_TXT, XATTN_HD).astype(jnp.bfloat16)
            kv = jnp.dot(media.reshape(-1, VIS_DIM), xwkv_ref[xi],
                         preferred_element_type=jnp.float32)
            kv = kv.reshape(B, MEDIA_LEN, 2 * XATTN_HD).astype(jnp.bfloat16)
            heads = []
            for hh in range(XATTN_HEADS):
                ks = slice(hh * XATTN_DIM_HEAD, (hh + 1) * XATTN_DIM_HEAD)
                vs = slice(XATTN_HD + hh * XATTN_DIM_HEAD, XATTN_HD + (hh + 1) * XATTN_DIM_HEAD)
                heads.append(_attend(q[:, :, ks], kv[:, :, ks], kv[:, :, vs], xbias))
            o_cat = jnp.concatenate(heads, axis=-1).reshape(-1, XATTN_HD).astype(jnp.bfloat16)
            attn = jnp.dot(o_cat, xwo_ref[xi], preferred_element_type=jnp.float32)
            x = x + attn * keep                       # zero rows with no preceding media, gated, residual
            ffn_in = _ln_f32(x, xfg_ref[xi], xfb_ref[xi]).astype(jnp.bfloat16)
            h1 = jax.nn.gelu(jnp.dot(ffn_in, xw1_ref[xi], preferred_element_type=jnp.float32),
                             approximate=True)
            x = x + jnp.dot(h1.astype(jnp.bfloat16), xw2_ref[xi], preferred_element_type=jnp.float32)
            xi += 1

        # -------- synthetic pre-LN causal self-attention decoder layer --------
        xn = _ln_f32(x, dl1g_ref[li], dl1b_ref[li]).astype(jnp.bfloat16)
        qkv = jnp.dot(xn, dwqkv_ref[li], preferred_element_type=jnp.float32)        # fused QKV matmul
        q = (qkv[:, :LM_HD] * sa_scale).reshape(B, T_TXT, LM_HD).astype(jnp.bfloat16)
        k = qkv[:, LM_HD:2 * LM_HD].reshape(B, T_TXT, LM_HD).astype(jnp.bfloat16)
        v = qkv[:, 2 * LM_HD:].reshape(B, T_TXT, LM_HD).astype(jnp.bfloat16)
        heads = []
        for hh in range(LM_HEADS):
            ks = slice(hh * LM_DIM_HEAD, (hh + 1) * LM_DIM_HEAD)
            heads.append(_attend(q[:, :, ks], k[:, :, ks], v[:, :, ks], sbias))
        o_cat = jnp.concatenate(heads, axis=-1).reshape(-1, LM_HD).astype(jnp.bfloat16)
        x = x + jnp.dot(o_cat, dwo_ref[li], preferred_element_type=jnp.float32)
        ffn_in = _ln_f32(x, dl2g_ref[li], dl2b_ref[li]).astype(jnp.bfloat16)
        h1 = jax.nn.gelu(jnp.dot(ffn_in, dw1_ref[li], preferred_element_type=jnp.float32),
                         approximate=True)
        x = x + jnp.dot(h1.astype(jnp.bfloat16), dw2_ref[li], preferred_element_type=jnp.float32)

    # -------- final LayerNorm + lm_head, lane-dense output (VOCAB padded to 128) --------
    xn = _ln_f32(x, fing_ref[...], finb_ref[...]).astype(jnp.bfloat16)
    o_ref[...] = jnp.dot(xn, head_ref[...], preferred_element_type=jnp.float32)


# ----------------------------------------- pallas_call wrappers -----------------------------------------
def _full_spec(a):
    shape = tuple(a.shape)
    nd = len(shape)
    return pl.BlockSpec(shape, lambda *_, _nd=nd: (0,) * _nd)


def _fused_call(kernel, args, out_shape):
    """Single-invocation pallas_call (grid=(1,)): all (tiny) operands resident in VMEM,
       no per-batch grid steps, no intermediate HBM round-trips."""
    out_nd = len(out_shape.shape)
    return pl.pallas_call(
        kernel,
        out_shape=out_shape,
        grid=(1,),
        in_specs=[_full_spec(a) for a in args],
        out_specs=pl.BlockSpec(tuple(out_shape.shape), lambda *_, _nd=out_nd: (0,) * _nd),
        compiler_params=pltpu.CompilerParams(dimension_semantics=("arbitrary",)),
    )(*args)


def vision_forward(vp, patches_bf16):
    args = (patches_bf16, vp["patch_w"], vp["bias_pos"], vp["latents"],
            vp["nm_g"], vp["nm_b"], vp["nl_g"], vp["nl_b"],
            vp["wq"], vp["wkv"], vp["wo"],
            vp["fg"], vp["fb"], vp["w1"], vp["w2"],
            vp["norm_g"], vp["norm_b"])
    return _fused_call(_vision_kernel, args,
                       jax.ShapeDtypeStruct((N_IMGS * NUM_LATENTS, VIS_DIM), jnp.float32))


def lang_forward(lp, input_ids, attention_mask, vis_tokens, media_locations):
    b, t = input_ids.shape
    t_img = vis_tokens.shape[1]
    x0 = lp["token_emb"][input_ids].reshape(b * t, LANG_DIM)     # embedding gather (XLA glue)

    # causal + padding self-attn mask, built once, shared across layers and heads (un-broadcast)
    causal = jnp.tril(jnp.ones((t, t), dtype=bool))
    pad = attention_mask.astype(bool)
    sbias = jnp.where(causal[None] & pad[:, None, :], 0.0, NEG_INF).astype(jnp.float32)   # (B, T, T)

    # MaskedCrossAttention mask (only_attend_immediate_media=True), built once in JAX glue
    text_time = jnp.cumsum(media_locations.astype(jnp.int32), axis=-1)                    # (B, T)
    media_time = jnp.repeat(jnp.arange(t_img, dtype=jnp.int32) + 1, NUM_LATENTS)          # (T_img*n,)
    xbias = jnp.where(text_time[:, :, None] == media_time[None, None, :],
                      0.0, NEG_INF).astype(jnp.float32)                                   # (B, T, T_img*n)
    keep = (text_time > 0).astype(jnp.float32).reshape(b * t, 1)

    media = vis_tokens.reshape(b, t_img * NUM_LATENTS, VIS_DIM).astype(jnp.bfloat16)

    xa, dc = lp["xattn"], lp["dec"]
    args = (x0, sbias, xbias, keep, media,
            xa["ng"], xa["nb"], xa["wq"], xa["wkv"], xa["wo"],
            xa["fg"], xa["fb"], xa["w1"], xa["w2"],
            dc["ln1g"], dc["ln1b"], dc["wqkv"], dc["wo"],
            dc["ln2g"], dc["ln2b"], dc["w1"], dc["w2"],
            lp["final_g"], lp["final_b"], lp["head"])
    logits_pad = _fused_call(_lang_kernel, args,
                             jax.ShapeDtypeStruct((b * t, VOCAB_PAD), jnp.float32))
    return logits_pad[:, :VOCAB].reshape(b, t, VOCAB)


def flamingo_forward(prep, vision_x, lang_x, attention_mask):
    """Flamingo.forward: _encode_vision_x + _condition_media_locations + conditioned LM -> logits."""
    b, t_img, f = vision_x.shape[:3]
    assert f == 1, "Only single frame supported"
    # _encode_vision_x (frozen / no-grad): patchify in XLA glue, then one fused vision kernel.
    # TODO(synk): the real vision_encoder is an externally injected HF CLIP model; replaced by a
    # patch-embedding ViT stub with the same (b*T*F, v, vis_dim) last_hidden_state contract.
    n = b * t_img * f
    patches = vision_x.reshape(n, C, H // PATCH, PATCH, W // PATCH, PATCH)
    patches = patches.transpose(0, 2, 4, 1, 3, 5).reshape(n * NUM_PATCHES, PATCH_DIM)
    vis_flat = vision_forward(prep["vision"], patches.astype(jnp.bfloat16))
    vis_tokens = vis_flat.reshape(b, t_img, NUM_LATENTS, VIS_DIM)
    # _condition_media_locations
    media_locations = lang_x == MEDIA_TOKEN_ID
    # conditioned language model (gated cross-attn every CROSS_EVERY layers) -> logits
    return lang_forward(prep["lang"], lang_x, attention_mask, vis_tokens, media_locations)


# ----------------------------------------- parameter init & packing -----------------------------------------
def init_params(key):
    keys = jax.random.split(key, 256)
    counter = [0]

    def nxt():
        k = keys[counter[0]]
        counter[0] += 1
        return k

    def wgt(shape, scale=0.02):
        return jax.random.normal(nxt(), shape, jnp.float32) * scale

    def ln(d):
        return jnp.ones((1, d), jnp.float32), jnp.zeros((1, d), jnp.float32)

    vision_encoder = dict(patch_w=wgt((PATCH_DIM, VIS_DIM)),
                          patch_b=wgt((1, VIS_DIM)),
                          pos_emb=wgt((NUM_PATCHES, VIS_DIM)))

    def perceiver_layer_params():
        nm_g, nm_b = ln(VIS_DIM)
        nl_g, nl_b = ln(VIS_DIM)
        f_g, f_b = ln(VIS_DIM)
        return dict(
            attn=dict(nm_g=nm_g, nm_b=nm_b, nl_g=nl_g, nl_b=nl_b,
                      wq=wgt((VIS_DIM, PR_HD)), wk=wgt((VIS_DIM, PR_HD)),
                      wv=wgt((VIS_DIM, PR_HD)), wo=wgt((PR_HD, VIS_DIM))),
            ff=dict(g=f_g, b=f_b, w1=wgt((VIS_DIM, 4 * VIS_DIM)), w2=wgt((4 * VIS_DIM, VIS_DIM))))

    pr_ng, pr_nb = ln(VIS_DIM)
    perceiver = dict(latents=wgt((NUM_LATENTS, VIS_DIM), 1.0),
                     layers=[perceiver_layer_params() for _ in range(PR_DEPTH)],
                     norm_g=pr_ng, norm_b=pr_nb)

    def xattn_block_params():
        n_g, n_b = ln(LANG_DIM)
        f_g, f_b = ln(LANG_DIM)
        return dict(
            attn=dict(norm_g=n_g, norm_b=n_b,
                      wq=wgt((LANG_DIM, XATTN_HD)), wk=wgt((VIS_DIM, XATTN_HD)),
                      wv=wgt((VIS_DIM, XATTN_HD)), wo=wgt((XATTN_HD, LANG_DIM))),
            ff=dict(g=f_g, b=f_b, w1=wgt((LANG_DIM, 4 * LANG_DIM)), w2=wgt((4 * LANG_DIM, LANG_DIM))),
            # NOTE: real __init__ zero-inits the tanh gates (cross-attn inert); 0.1 keeps the
            # vision path numerically alive in this synthetic kernel.
            attn_gate=jnp.array(0.1, jnp.float32), ff_gate=jnp.array(0.1, jnp.float32))

    def dec_layer_params():
        l1g, l1b = ln(LANG_DIM)
        l2g, l2b = ln(LANG_DIM)
        return dict(ln1_g=l1g, ln1_b=l1b,
                    wq=wgt((LANG_DIM, LM_HD)), wk=wgt((LANG_DIM, LM_HD)),
                    wv=wgt((LANG_DIM, LM_HD)), wo=wgt((LM_HD, LANG_DIM)),
                    ln2_g=l2g, ln2_b=l2b,
                    w1=wgt((LANG_DIM, 4 * LANG_DIM)), w2=wgt((4 * LANG_DIM, LANG_DIM)))

    layers = [dict(xattn=xattn_block_params() if (i + 1) % CROSS_EVERY == 0 else None,
                   decoder=dec_layer_params()) for i in range(N_LAYERS)]
    f_g, f_b = ln(LANG_DIM)
    lang = dict(token_emb=wgt((VOCAB, LANG_DIM)), layers=layers,
                final_g=f_g, final_b=f_b, lm_head=wgt((LANG_DIM, VOCAB)))
    return dict(vision_encoder=vision_encoder, perceiver=perceiver, lang=lang)


def prepare_params(p):
    """One-time weight preprocessing, hoisted out of the per-step forward (review item):
       bf16 casts, tanh-gate folds, K|V / Q|K|V packing, per-layer stacking, patch-bias+pos fold,
       lm_head vocab padding to 128 lanes."""
    bf = lambda w: w.astype(jnp.bfloat16)
    st = lambda xs: jnp.stack(xs, axis=0)

    ve, pr, lg = p["vision_encoder"], p["perceiver"], p["lang"]
    pls = pr["layers"]
    vision = dict(
        patch_w=bf(ve["patch_w"]),
        bias_pos=ve["patch_b"] + ve["pos_emb"],                      # (P, D): patch bias + pos folded
        latents=pr["latents"],
        nm_g=st([l["attn"]["nm_g"] for l in pls]), nm_b=st([l["attn"]["nm_b"] for l in pls]),
        nl_g=st([l["attn"]["nl_g"] for l in pls]), nl_b=st([l["attn"]["nl_b"] for l in pls]),
        wq=bf(st([l["attn"]["wq"] for l in pls])),
        wkv=bf(st([jnp.concatenate([l["attn"]["wk"], l["attn"]["wv"]], axis=1) for l in pls])),
        wo=bf(st([l["attn"]["wo"] for l in pls])),
        fg=st([l["ff"]["g"] for l in pls]), fb=st([l["ff"]["b"] for l in pls]),
        w1=bf(st([l["ff"]["w1"] for l in pls])), w2=bf(st([l["ff"]["w2"] for l in pls])),
        norm_g=pr["norm_g"], norm_b=pr["norm_b"],
    )

    xls = [l["xattn"] for l in lg["layers"] if l["xattn"] is not None]
    assert xls, "fused lang kernel expects at least one gated cross-attn layer"
    xattn = dict(
        ng=st([x["attn"]["norm_g"] for x in xls]), nb=st([x["attn"]["norm_b"] for x in xls]),
        wq=bf(st([x["attn"]["wq"] for x in xls])),
        wkv=bf(st([jnp.concatenate([x["attn"]["wk"], x["attn"]["wv"]], axis=1) for x in xls])),
        wo=bf(st([x["attn"]["wo"] * jnp.tanh(x["attn_gate"]) for x in xls])),   # gate folded
        fg=st([x["ff"]["g"] for x in xls]), fb=st([x["ff"]["b"] for x in xls]),
        w1=bf(st([x["ff"]["w1"] for x in xls])),
        w2=bf(st([x["ff"]["w2"] * jnp.tanh(x["ff_gate"]) for x in xls])),       # gate folded
    )
    dls = [l["decoder"] for l in lg["layers"]]
    dec = dict(
        ln1g=st([d["ln1_g"] for d in dls]), ln1b=st([d["ln1_b"] for d in dls]),
        wqkv=bf(st([jnp.concatenate([d["wq"], d["wk"], d["wv"]], axis=1) for d in dls])),
        wo=bf(st([d["wo"] for d in dls])),
        ln2g=st([d["ln2_g"] for d in dls]), ln2b=st([d["ln2_b"] for d in dls]),
        w1=bf(st([d["w1"] for d in dls])), w2=bf(st([d["w2"] for d in dls])),
    )
    head = jnp.zeros((LANG_DIM, VOCAB_PAD), jnp.float32).at[:, :VOCAB].set(lg["lm_head"])
    lang = dict(token_emb=lg["token_emb"], xattn=xattn, dec=dec,
                final_g=lg["final_g"], final_b=lg["final_b"], head=bf(head))
    return dict(vision=vision, lang=lang)


# ----------------------------------------- main -----------------------------------------
if __name__ == "__main__":
    key = jax.random.PRNGKey(0)
    pkey, vkey, lkey = jax.random.split(key, 3)
    prep = prepare_params(init_params(pkey))           # weight packing / casts done once, not per step

    vision_x = jax.random.normal(vkey, (B, T_IMG, F_FRAMES, C, H, W), jnp.float32)
    lang_x = jax.random.randint(lkey, (B, T_TXT), 0, VOCAB, dtype=jnp.int32)
    lang_x = lang_x.at[:, 0].set(MEDIA_TOKEN_ID)       # <image> token at the start of each sequence
    attention_mask = jnp.ones((B, T_TXT), jnp.int32)

    logits = jax.jit(flamingo_forward)(prep, vision_x, lang_x, attention_mask)
    logits = jax.block_until_ready(logits)

    assert logits.shape == (B, T_TXT, VOCAB), logits.shape
    assert bool(jnp.all(jnp.isfinite(logits)))
    print("KERNEL_OK")
</pallas_src>

<mosaic_0001>
module attributes {stable_mosaic.version = 11 : i64} {
  func.func @_lang_kernel(%arg0: i32, %arg1: memref<16x32xf32, #tpu.memory_space<vmem>>, %arg2: memref<2x8x8xf32, #tpu.memory_space<vmem>>, %arg3: memref<2x8x8xf32, #tpu.memory_space<vmem>>, %arg4: memref<16x1xf32, #tpu.memory_space<vmem>>, %arg5: memref<2x8x32xbf16, #tpu.memory_space<vmem>>, %arg6: memref<2x1x32xf32, #tpu.memory_space<vmem>>, %arg7: memref<2x1x32xf32, #tpu.memory_space<vmem>>, %arg8: memref<2x32x32xbf16, #tpu.memory_space<vmem>>, %arg9: memref<2x32x64xbf16, #tpu.memory_space<vmem>>, %arg10: memref<2x32x32xbf16, #tpu.memory_space<vmem>>, %arg11: memref<2x1x32xf32, #tpu.memory_space<vmem>>, %arg12: memref<2x1x32xf32, #tpu.memory_space<vmem>>, %arg13: memref<2x32x128xbf16, #tpu.memory_space<vmem>>, %arg14: memref<2x128x32xbf16, #tpu.memory_space<vmem>>, %arg15: memref<2x1x32xf32, #tpu.memory_space<vmem>>, %arg16: memref<2x1x32xf32, #tpu.memory_space<vmem>>, %arg17: memref<2x32x96xbf16, #tpu.memory_space<vmem>>, %arg18: memref<2x32x32xbf16, #tpu.memory_space<vmem>>, %arg19: memref<2x1x32xf32, #tpu.memory_space<vmem>>, %arg20: memref<2x1x32xf32, #tpu.memory_space<vmem>>, %arg21: memref<2x32x128xbf16, #tpu.memory_space<vmem>>, %arg22: memref<2x128x32xbf16, #tpu.memory_space<vmem>>, %arg23: memref<1x32xf32, #tpu.memory_space<vmem>>, %arg24: memref<1x32xf32, #tpu.memory_space<vmem>>, %arg25: memref<32x128xbf16, #tpu.memory_space<vmem>>, %arg26: memref<16x128xf32, #tpu.memory_space<vmem>>) attributes {dimension_semantics = [#tpu.dimension_semantics<arbitrary>], iteration_bounds = array<i64: 1>, scalar_prefetch = 0 : i64, scratch_operands = 0 : i64, tpu.core_type = #tpu.core_type<tc>, window_params = [{pipeline_mode = #tpu.pipeline_mode<synchronous>, transform_indices = @transform_0, window_bounds = array<i64: 16, 32>}, {pipeline_mode = #tpu.pipeline_mode<synchronous>, transform_indices = @transform_1, window_bounds = array<i64: 2, 8, 8>}, {pipeline_mode = #tpu.pipeline_mode<synchronous>, transform_indices = @transform_2, window_bounds = array<i64: 2, 8, 8>}, {pipeline_mode = #tpu.pipeline_mode<synchronous>, transform_indices = @transform_3, window_bounds = array<i64: 16, 1>}, {pipeline_mode = #tpu.pipeline_mode<synchronous>, transform_indices = @transform_4, window_bounds = array<i64: 2, 8, 32>}, {pipeline_mode = #tpu.pipeline_mode<synchronous>, transform_indices = @transform_5, window_bounds = array<i64: 2, 1, 32>}, {pipeline_mode = #tpu.pipeline_mode<synchronous>, transform_indices = @transform_6, window_bounds = array<i64: 2, 1, 32>}, {pipeline_mode = #tpu.pipeline_mode<synchronous>, transform_indices = @transform_7, window_bounds = array<i64: 2, 32, 32>}, {pipeline_mode = #tpu.pipeline_mode<synchronous>, transform_indices = @transform_8, window_bounds = array<i64: 2, 32, 64>}, {pipeline_mode = #tpu.pipeline_mode<synchronous>, transform_indices = @transform_9, window_bounds = array<i64: 2, 32, 32>}, {pipeline_mode = #tpu.pipeline_mode<synchronous>, transform_indices = @transform_10, window_bounds = array<i64: 2, 1, 32>}, {pipeline_mode = #tpu.pipeline_mode<synchronous>, transform_indices = @transform_11, window_bounds = array<i64: 2, 1, 32>}, {pipeline_mode = #tpu.pipeline_mode<synchronous>, transform_indices = @transform_12, window_bounds = array<i64: 2, 32, 128>}, {pipeline_mode = #tpu.pipeline_mode<synchronous>, transform_indices = @transform_13, window_bounds = array<i64: 2, 128, 32>}, {pipeline_mode = #tpu.pipeline_mode<synchronous>, transform_indices = @transform_14, window_bounds = array<i64: 2, 1, 32>}, {pipeline_mode = #tpu.pipeline_mode<synchronous>, transform_indices = @transform_15, window_bounds = array<i64: 2, 1, 32>}, {pipeline_mode = #tpu.pipeline_mode<synchronous>, transform_indices = @transform_16, window_bounds = array<i64: 2, 32, 96>}, {pipeline_mode = #tpu.pipeline_mode<synchronous>, transform_indices = @transform_17, window_bounds = array<i64: 2, 32, 32>}, {pipeline_mode = #tpu.pipeline_mode<synchronous>, transform_indices = @transform_18, window_bounds = array<i64: 2, 1, 32>}, {pipeline_mode = #tpu.pipeline_mode<synchronous>, transform_indices = @transform_19, window_bounds = array<i64: 2, 1, 32>}, {pipeline_mode = #tpu.pipeline_mode<synchronous>, transform_indices = @transform_20, window_bounds = array<i64: 2, 32, 128>}, {pipeline_mode = #tpu.pipeline_mode<synchronous>, transform_indices = @transform_21, window_bounds = array<i64: 2, 128, 32>}, {pipeline_mode = #tpu.pipeline_mode<synchronous>, transform_indices = @transform_22, window_bounds = array<i64: 1, 32>}, {pipeline_mode = #tpu.pipeline_mode<synchronous>, transform_indices = @transform_23, window_bounds = array<i64: 1, 32>}, {pipeline_mode = #tpu.pipeline_mode<synchronous>, transform_indices = @transform_24, window_bounds = array<i64: 32, 128>}, {pipeline_mode = #tpu.pipeline_mode<synchronous>, transform_indices = @transform_25, window_bounds = array<i64: 16, 128>}]} {
    %c0 = arith.constant 0 : index
    %c0_0 = arith.constant 0 : index
    %0 = vector.load %arg1[%c0, %c0_0] : memref<16x32xf32, #tpu.memory_space<vmem>>, vector<16x32xf32>
    %c0_1 = arith.constant 0 : index
    %c0_2 = arith.constant 0 : index
    %c0_3 = arith.constant 0 : index
    %1 = vector.load %arg5[%c0_1, %c0_2, %c0_3] : memref<2x8x32xbf16, #tpu.memory_space<vmem>>, vector<2x8x32xbf16>
    %c0_4 = arith.constant 0 : index
    %c0_5 = arith.constant 0 : index
    %c0_6 = arith.constant 0 : index
    %2 = vector.load %arg2[%c0_4, %c0_5, %c0_6] : memref<2x8x8xf32, #tpu.memory_space<vmem>>, vector<2x8x8xf32>
    %c0_7 = arith.constant 0 : index
    %c0_8 = arith.constant 0 : index
    %c0_9 = arith.constant 0 : index
    %3 = vector.load %arg3[%c0_7, %c0_8, %c0_9] : memref<2x8x8xf32, #tpu.memory_space<vmem>>, vector<2x8x8xf32>
    %c0_10 = arith.constant 0 : index
    %c0_11 = arith.constant 0 : index
    %4 = vector.load %arg4[%c0_10, %c0_11] : memref<16x1xf32, #tpu.memory_space<vmem>>, vector<16x1xf32>
    %c0_12 = arith.constant 0 : index
    %c0_13 = arith.constant 0 : index
    %c0_14 = arith.constant 0 : index
    %5 = vector.load %arg6[%c0_12, %c0_13, %c0_14] : memref<2x1x32xf32, #tpu.memory_space<vmem>>, vector<1x1x32xf32>
    %6 = vector.shape_cast %5 : vector<1x1x32xf32> to vector<1x32xf32>
    %c0_15 = arith.constant 0 : index
    %c0_16 = arith.constant 0 : index
    %c0_17 = arith.constant 0 : index
    %7 = vector.load %arg7[%c0_15, %c0_16, %c0_17] : memref<2x1x32xf32, #tpu.memory_space<vmem>>, vector<1x1x32xf32>
    %8 = vector.shape_cast %7 : vector<1x1x32xf32> to vector<1x32xf32>
    %cst = arith.constant dense<0.000000e+00> : vector<16xf32>
    %9 = vector.multi_reduction <add>, %0, %cst [1] : vector<16x32xf32> to vector<16xf32>
    %10 = vector.shape_cast %9 : vector<16xf32> to vector<16x1xf32>
    %cst_18 = arith.constant 3.200000e+01 : f32
    %11 = vector.broadcast %cst_18 : f32 to vector<16x1xf32>
    %12 = arith.divf %10, %11 : vector<16x1xf32>
    %13 = vector.broadcast %12 : vector<16x1xf32> to vector<16x32xf32>
    %14 = arith.subf %0, %13 : vector<16x32xf32>
    %15 = arith.mulf %14, %14 : vector<16x32xf32>
    %cst_19 = arith.constant dense<0.000000e+00> : vector<16xf32>
    %16 = vector.multi_reduction <add>, %15, %cst_19 [1] : vector<16x32xf32> to vector<16xf32>
    %17 = vector.shape_cast %16 : vector<16xf32> to vector<16x1xf32>
    %cst_20 = arith.constant 3.200000e+01 : f32
    %18 = vector.broadcast %cst_20 : f32 to vector<16x1xf32>
    %19 = arith.divf %17, %18 : vector<16x1xf32>
    %20 = vector.broadcast %12 : vector<16x1xf32> to vector<16x32xf32>
    %21 = arith.subf %0, %20 : vector<16x32xf32>
    %cst_21 = arith.constant 9.99999974E-6 : f32
    %22 = vector.broadcast %cst_21 : f32 to vector<16x1xf32>
    %23 = arith.addf %19, %22 : vector<16x1xf32>
    %24 = math.rsqrt %23 : vector<16x1xf32>
    %25 = vector.broadcast %24 : vector<16x1xf32> to vector<16x32xf32>
    %26 = arith.mulf %21, %25 : vector<16x32xf32>
    %27 = vector.broadcast %6 : vector<1x32xf32> to vector<16x32xf32>
    %28 = arith.mulf %26, %27 : vector<16x32xf32>
    %29 = vector.broadcast %8 : vector<1x32xf32> to vector<16x32xf32>
    %30 = arith.addf %28, %29 : vector<16x32xf32>
    %31 = arith.truncf %30 : vector<16x32xf32> to vector<16x32xbf16>
    %c0_22 = arith.constant 0 : index
    %c0_23 = arith.constant 0 : index
    %c0_24 = arith.constant 0 : index
    %32 = vector.load %arg8[%c0_22, %c0_23, %c0_24] : memref<2x32x32xbf16, #tpu.memory_space<vmem>>, vector<1x32x32xbf16>
    %33 = vector.shape_cast %32 : vector<1x32x32xbf16> to vector<32x32xbf16>
    %cst_25 = arith.constant dense<0.000000e+00> : vector<16x32xf32>
    %34 = tpu.matmul %31, %33, %cst_25 {dimension_numbers = #tpu.dot_dimension_numbers<[1], [0], [0], [1], [0, 0, 1, 1], [], []>} : vector<16x32xbf16>, vector<32x32xbf16>, vector<16x32xf32> -> vector<16x32xf32>
    %cst_26 = arith.constant 0.353553385 : f32
    %35 = vector.broadcast %cst_26 : f32 to vector<16x32xf32>
    %36 = arith.mulf %34, %35 : vector<16x32xf32>
    %37 = vector.shape_cast %36 : vector<16x32xf32> to vector<2x8x32xf32>
    %38 = arith.truncf %37 : vector<2x8x32xf32> to vector<2x8x32xbf16>
    %39 = vector.shape_cast %1 : vector<2x8x32xbf16> to vector<16x32xbf16>
    %c0_27 = arith.constant 0 : index
    %c0_28 = arith.constant 0 : index
    %c0_29 = arith.constant 0 : index
    %40 = vector.load %arg9[%c0_27, %c0_28, %c0_29] : memref<2x32x64xbf16, #tpu.memory_space<vmem>>, vector<1x32x64xbf16>
    %41 = vector.shape_cast %40 : vector<1x32x64xbf16> to vector<32x64xbf16>
    %cst_30 = arith.constant dense<0.000000e+00> : vector<16x64xf32>
    %42 = tpu.matmul %39, %41, %cst_30 {dimension_numbers = #tpu.dot_dimension_numbers<[1], [0], [0], [1], [0, 0, 1, 1], [], []>} : vector<16x32xbf16>, vector<32x64xbf16>, vector<16x64xf32> -> vector<16x64xf32>
    %43 = vector.shape_cast %42 : vector<16x64xf32> to vector<2x8x64xf32>
    %44 = arith.truncf %43 : vector<2x8x64xf32> to vector<2x8x64xbf16>
    %45 = vector.extract_strided_slice %38 {offsets = [0, 0, 0], sizes = [2, 8, 8], strides = [1, 1, 1]} : vector<2x8x32xbf16> to vector<2x8x8xbf16>
    %46 = vector.extract_strided_slice %44 {offsets = [0, 0, 0], sizes = [2, 8, 8], strides = [1, 1, 1]} : vector<2x8x64xbf16> to vector<2x8x8xbf16>
    %47 = vector.extract_strided_slice %44 {offsets = [0, 0, 32], sizes = [2, 8, 8], strides = [1, 1, 1]} : vector<2x8x64xbf16> to vector<2x8x8xbf16>
    "tpu.trace_start"() <{level = 10 : i32, message = "bqd,bkd->bqk"}> : () -> ()
    %cst_31 = arith.constant dense<0.000000e+00> : vector<2x8x8xf32>
    %48 = tpu.matmul %45, %46, %cst_31 {dimension_numbers = #tpu.dot_dimension_numbers<[2], [2], [1], [1], [0, 0, 0, 1, 1, 1], [0], [0]>} : vector<2x8x8xbf16>, vector<2x8x8xbf16>, vector<2x8x8xf32> -> vector<2x8x8xf32>
    "tpu.trace_stop"() : () -> ()
    %49 = arith.addf %48, %3 : vector<2x8x8xf32>
    %cst_32 = arith.constant dense<0xFF800000> : vector<2x8xf32>
    %50 = vector.multi_reduction <maximumf>, %49, %cst_32 [2] : vector<2x8x8xf32> to vector<2x8xf32>
    %51 = vector.shape_cast %50 : vector<2x8xf32> to vector<2x8x1xf32>
    %52 = vector.broadcast %51 : vector<2x8x1xf32> to vector<2x8x8xf32>
    %53 = arith.subf %49, %52 : vector<2x8x8xf32>
    %54 = math.exp %53 : vector<2x8x8xf32>
    %cst_33 = arith.constant dense<0.000000e+00> : vector<2x8xf32>
    %55 = vector.multi_reduction <add>, %54, %cst_33 [2] : vector<2x8x8xf32> to vector<2x8xf32>
    %56 = vector.shape_cast %55 : vector<2x8xf32> to vector<2x8x1xf32>
    %57 = tpu.reciprocal %56 {approx = true} : vector<2x8x1xf32> -> vector<2x8x1xf32>
    %58 = arith.truncf %54 : vector<2x8x8xf32> to vector<2x8x8xbf16>
    "tpu.trace_start"() <{level = 10 : i32, message = "bqk,bkd->bqd"}> : () -> ()
    %cst_34 = arith.constant dense<0.000000e+00> : vector<2x8x8xf32>
    %59 = tpu.matmul %58, %47, %cst_34 {dimension_numbers = #tpu.dot_dimension_numbers<[2], [1], [1], [2], [0, 0, 0, 1, 1, 2], [0], [0]>} : vector<2x8x8xbf16>, vector<2x8x8xbf16>, vector<2x8x8xf32> -> vector<2x8x8xf32>
    "tpu.trace_stop"() : () -> ()
    %60 = vector.broadcast %57 : vector<2x8x1xf32> to vector<2x8x8xf32>
    %61 = arith.mulf %59, %60 : vector<2x8x8xf32>
    %62 = vector.extract_strided_slice %38 {offsets = [0, 0, 8], sizes = [2, 8, 8], strides = [1, 1, 1]} : vector<2x8x32xbf16> to vector<2x8x8xbf16>
    %63 = vector.extract_strided_slice %44 {offsets = [0, 0, 8], sizes = [2, 8, 8], strides = [1, 1, 1]} : vector<2x8x64xbf16> to vector<2x8x8xbf16>
    %64 = vector.extract_strided_slice %44 {offsets = [0, 0, 40], sizes = [2, 8, 8], strides = [1, 1, 1]} : vector<2x8x64xbf16> to vector<2x8x8xbf16>
    "tpu.trace_start"() <{level = 10 : i32, message = "bqd,bkd->bqk"}> : () -> ()
    %cst_35 = arith.constant dense<0.000000e+00> : vector<2x8x8xf32>
    %65 = tpu.matmul %62, %63, %cst_35 {dimension_numbers = #tpu.dot_dimension_numbers<[2], [2], [1], [1], [0, 0, 0, 1, 1, 1], [0], [0]>} : vector<2x8x8xbf16>, vector<2x8x8xbf16>, vector<2x8x8xf32> -> vector<2x8x8xf32>
    "tpu.trace_stop"() : () -> ()
    %66 = arith.addf %65, %3 : vector<2x8x8xf32>
    %cst_36 = arith.constant dense<0xFF800000> : vector<2x8xf32>
    %67 = vector.multi_reduction <maximumf>, %66, %cst_36 [2] : vector<2x8x8xf32> to vector<2x8xf32>
    %68 = vector.shape_cast %67 : vector<2x8xf32> to vector<2x8x1xf32>
    %69 = vector.broadcast %68 : vector<2x8x1xf32> to vector<2x8x8xf32>
    %70 = arith.subf %66, %69 : vector<2x8x8xf32>
    %71 = math.exp %70 : vector<2x8x8xf32>
    %cst_37 = arith.constant dense<0.000000e+00> : vector<2x8xf32>
    %72 = vector.multi_reduction <add>, %71, %cst_37 [2] : vector<2x8x8xf32> to vector<2x8xf32>
    %73 = vector.shape_cast %72 : vector<2x8xf32> to vector<2x8x1xf32>
    %74 = tpu.reciprocal %73 {approx = true} : vector<2x8x1xf32> -> vector<2x8x1xf32>
    %75 = arith.truncf %71 : vector<2x8x8xf32> to vector<2x8x8xbf16>
    "tpu.trace_start"() <{level = 10 : i32, message = "bqk,bkd->bqd"}> : () -> ()
    %cst_38 = arith.constant dense<0.000000e+00> : vector<2x8x8xf32>
    %76 = tpu.matmul %75, %64, %cst_38 {dimension_numbers = #tpu.dot_dimension_numbers<[2], [1], [1], [2], [0, 0, 0, 1, 1, 2], [0], [0]>} : vector<2x8x8xbf16>, vector<2x8x8xbf16>, vector<2x8x8xf32> -> vector<2x8x8xf32>
    "tpu.trace_stop"() : () -> ()
    %77 = vector.broadcast %74 : vector<2x8x1xf32> to vector<2x8x8xf32>
    %78 = arith.mulf %76, %77 : vector<2x8x8xf32>
    %79 = vector.extract_strided_slice %38 {offsets = [0, 0, 16], sizes = [2, 8, 8], strides = [1, 1, 1]} : vector<2x8x32xbf16> to vector<2x8x8xbf16>
    %80 = vector.extract_strided_slice %44 {offsets = [0, 0, 16], sizes = [2, 8, 8], strides = [1, 1, 1]} : vector<2x8x64xbf16> to vector<2x8x8xbf16>
    %81 = vector.extract_strided_slice %44 {offsets = [0, 0, 48], sizes = [2, 8, 8], strides = [1, 1, 1]} : vector<2x8x64xbf16> to vector<2x8x8xbf16>
    "tpu.trace_start"() <{level = 10 : i32, message = "bqd,bkd->bqk"}> : () -> ()
    %cst_39 = arith.constant dense<0.000000e+00> : vector<2x8x8xf32>
    %82 = tpu.matmul %79, %80, %cst_39 {dimension_numbers = #tpu.dot_dimension_numbers<[2], [2], [1], [1], [0, 0, 0, 1, 1, 1], [0], [0]>} : vector<2x8x8xbf16>, vector<2x8x8xbf16>, vector<2x8x8xf32> -> vector<2x8x8xf32>
    "tpu.trace_stop"() : () -> ()
    %83 = arith.addf %82, %3 : vector<2x8x8xf32>
    %cst_40 = arith.constant dense<0xFF800000> : vector<2x8xf32>
    %84 = vector.multi_reduction <maximumf>, %83, %cst_40 [2] : vector<2x8x8xf32> to vector<2x8xf32>
    %85 = vector.shape_cast %84 : vector<2x8xf32> to vector<2x8x1xf32>
    %86 = vector.broadcast %85 : vector<2x8x1xf32> to vector<2x8x8xf32>
    %87 = arith.subf %83, %86 : vector<2x8x8xf32>
    %88 = math.exp %87 : vector<2x8x8xf32>
    %cst_41 = arith.constant dense<0.000000e+00> : vector<2x8xf32>
    %89 = vector.multi_reduction <add>, %88, %cst_41 [2] : vector<2x8x8xf32> to vector<2x8xf32>
    %90 = vector.shape_cast %89 : vector<2x8xf32> to vector<2x8x1xf32>
    %91 = tpu.reciprocal %90 {approx = true} : vector<2x8x1xf32> -> vector<2x8x1xf32>
    %92 = arith.truncf %88 : vector<2x8x8xf32> to vector<2x8x8xbf16>
    "tpu.trace_start"() <{level = 10 : i32, message = "bqk,bkd->bqd"}> : () -> ()
    %cst_42 = arith.constant dense<0.000000e+00> : vector<2x8x8xf32>
    %93 = tpu.matmul %92, %81, %cst_42 {dimension_numbers = #tpu.dot_dimension_numbers<[2], [1], [1], [2], [0, 0, 0, 1, 1, 2], [0], [0]>} : vector<2x8x8xbf16>, vector<2x8x8xbf16>, vector<2x8x8xf32> -> vector<2x8x8xf32>
    "tpu.trace_stop"() : () -> ()
    %94 = vector.broadcast %91 : vector<2x8x1xf32> to vector<2x8x8xf32>
    %95 = arith.mulf %93, %94 : vector<2x8x8xf32>
    %96 = vector.extract_strided_slice %38 {offsets = [0, 0, 24], sizes = [2, 8, 8], strides = [1, 1, 1]} : vector<2x8x32xbf16> to vector<2x8x8xbf16>
    %97 = vector.extract_strided_slice %44 {offsets = [0, 0, 24], sizes = [2, 8, 8], strides = [1, 1, 1]} : vector<2x8x64xbf16> to vector<2x8x8xbf16>
    %98 = vector.extract_strided_slice %44 {offsets = [0, 0, 56], sizes = [2, 8, 8], strides = [1, 1, 1]} : vector<2x8x64xbf16> to vector<2x8x8xbf16>
    "tpu.trace_start"() <{level = 10 : i32, message = "bqd,bkd->bqk"}> : () -> ()
    %cst_43 = arith.constant dense<0.000000e+00> : vector<2x8x8xf32>
    %99 = tpu.matmul %96, %97, %cst_43 {dimension_numbers = #tpu.dot_dimension_numbers<[2], [2], [1], [1], [0, 0, 0, 1, 1, 1], [0], [0]>} : vector<2x8x8xbf16>, vector<2x8x8xbf16>, vector<2x8x8xf32> -> vector<2x8x8xf32>
    "tpu.trace_stop"() : () -> ()
    %100 = arith.addf %99, %3 : vector<2x8x8xf32>
    %cst_44 = arith.constant dense<0xFF800000> : vector<2x8xf32>
    %101 = vector.multi_reduction <maximumf>, %100, %cst_44 [2] : vector<2x8x8xf32> to vector<2x8xf32>
    %102 = vector.shape_cast %101 : vector<2x8xf32> to vector<2x8x1xf32>
    %103 = vector.broadcast %102 : vector<2x8x1xf32> to vector<2x8x8xf32>
    %104 = arith.subf %100, %103 : vector<2x8x8xf32>
    %105 = math.exp %104 : vector<2x8x8xf32>
    %cst_45 = arith.constant dense<0.000000e+00> : vector<2x8xf32>
    %106 = vector.multi_reduction <add>, %105, %cst_45 [2] : vector<2x8x8xf32> to vector<2x8xf32>
    %107 = vector.shape_cast %106 : vector<2x8xf32> to vector<2x8x1xf32>
    %108 = tpu.reciprocal %107 {approx = true} : vector<2x8x1xf32> -> vector<2x8x1xf32>
    %109 = arith.truncf %105 : vector<2x8x8xf32> to vector<2x8x8xbf16>
    "tpu.trace_start"() <{level = 10 : i32, message = "bqk,bkd->bqd"}> : () -> ()
    %cst_46 = arith.constant dense<0.000000e+00> : vector<2x8x8xf32>
    %110 = tpu.matmul %109, %98, %cst_46 {dimension_numbers = #tpu.dot_dimension_numbers<[2], [1], [1], [2], [0, 0, 0, 1, 1, 2], [0], [0]>} : vector<2x8x8xbf16>, vector<2x8x8xbf16>, vector<2x8x8xf32> -> vector<2x8x8xf32>
    "tpu.trace_stop"() : () -> ()
    %111 = vector.broadcast %108 : vector<2x8x1xf32> to vector<2x8x8xf32>
    %112 = arith.mulf %110, %111 : vector<2x8x8xf32>
    %113 = tpu.concatenate %61, %78, %95, %112 in 2 : vector<2x8x8xf32>, vector<2x8x8xf32>, vector<2x8x8xf32>, vector<2x8x8xf32> -> vector<2x8x32xf32>
    %114 = vector.shape_cast %113 : vector<2x8x32xf32> to vector<16x32xf32>
    %115 = arith.truncf %114 : vector<16x32xf32> to vector<16x32xbf16>
    %c0_47 = arith.constant 0 : index
    %c0_48 = arith.constant 0 : index
    %c0_49 = arith.constant 0 : index
    %116 = vector.load %arg10[%c0_47, %c0_48, %c0_49] : memref<2x32x32xbf16, #tpu.memory_space<vmem>>, vector<1x32x32xbf16>
    %117 = vector.shape_cast %116 : vector<1x32x32xbf16> to vector<32x32xbf16>
    %cst_50 = arith.constant dense<0.000000e+00> : vector<16x32xf32>
    %118 = tpu.matmul %115, %117, %cst_50 {dimension_numbers = #tpu.dot_dimension_numbers<[1], [0], [0], [1], [0, 0, 1, 1], [], []>} : vector<16x32xbf16>, vector<32x32xbf16>, vector<16x32xf32> -> vector<16x32xf32>
    %119 = vector.broadcast %4 : vector<16x1xf32> to vector<16x32xf32>
    %120 = arith.mulf %118, %119 : vector<16x32xf32>
    %121 = arith.addf %0, %120 : vector<16x32xf32>
    %c0_51 = arith.constant 0 : index
    %c0_52 = arith.constant 0 : index
    %c0_53 = arith.constant 0 : index
    %122 = vector.load %arg11[%c0_51, %c0_52, %c0_53] : memref<2x1x32xf32, #tpu.memory_space<vmem>>, vector<1x1x32xf32>
    %123 = vector.shape_cast %122 : vector<1x1x32xf32> to vector<1x32xf32>
    %c0_54 = arith.constant 0 : index
    %c0_55 = arith.constant 0 : index
    %c0_56 = arith.constant 0 : index
    %124 = vector.load %arg12[%c0_54, %c0_55, %c0_56] : memref<2x1x32xf32, #tpu.memory_space<vmem>>, vector<1x1x32xf32>
    %125 = vector.shape_cast %124 : vector<1x1x32xf32> to vector<1x32xf32>
    %cst_57 = arith.constant dense<0.000000e+00> : vector<16xf32>
    %126 = vector.multi_reduction <add>, %121, %cst_57 [1] : vector<16x32xf32> to vector<16xf32>
    %127 = vector.shape_cast %126 : vector<16xf32> to vector<16x1xf32>
    %cst_58 = arith.constant 3.200000e+01 : f32
    %128 = vector.broadcast %cst_58 : f32 to vector<16x1xf32>
    %129 = arith.divf %127, %128 : vector<16x1xf32>
    %130 = vector.broadcast %129 : vector<16x1xf32> to vector<16x32xf32>
    %131 = arith.subf %121, %130 : vector<16x32xf32>
    %132 = arith.mulf %131, %131 : vector<16x32xf32>
    %cst_59 = arith.constant dense<0.000000e+00> : vector<16xf32>
    %133 = vector.multi_reduction <add>, %132, %cst_59 [1] : vector<16x32xf32> to vector<16xf32>
    %134 = vector.shape_cast %133 : vector<16xf32> to vector<16x1xf32>
    %cst_60 = arith.constant 3.200000e+01 : f32
    %135 = vector.broadcast %cst_60 : f32 to vector<16x1xf32>
    %136 = arith.divf %134, %135 : vector<16x1xf32>
    %137 = vector.broadcast %129 : vector<16x1xf32> to vector<16x32xf32>
    %138 = arith.subf %121, %137 : vector<16x32xf32>
    %cst_61 = arith.constant 9.99999974E-6 : f32
    %139 = vector.broadcast %cst_61 : f32 to vector<16x1xf32>
    %140 = arith.addf %136, %139 : vector<16x1xf32>
    %141 = math.rsqrt %140 : vector<16x1xf32>
    %142 = vector.broadcast %141 : vector<16x1xf32> to vector<16x32xf32>
    %143 = arith.mulf %138, %142 : vector<16x32xf32>
    %144 = vector.broadcast %123 : vector<1x32xf32> to vector<16x32xf32>
    %145 = arith.mulf %143, %144 : vector<16x32xf32>
    %146 = vector.broadcast %125 : vector<1x32xf32> to vector<16x32xf32>
    %147 = arith.addf %145, %146 : vector<16x32xf32>
    %148 = arith.truncf %147 : vector<16x32xf32> to vector<16x32xbf16>
    %c0_62 = arith.constant 0 : index
    %c0_63 = arith.constant 0 : index
    %c0_64 = arith.constant 0 : index
    %149 = vector.load %arg13[%c0_62, %c0_63, %c0_64] : memref<2x32x128xbf16, #tpu.memory_space<vmem>>, vector<1x32x128xbf16>
    %150 = vector.shape_cast %149 : vector<1x32x128xbf16> to vector<32x128xbf16>
    %cst_65 = arith.constant dense<0.000000e+00> : vector<16x128xf32>
    %151 = tpu.matmul %148, %150, %cst_65 {dimension_numbers = #tpu.dot_dimension_numbers<[1], [0], [0], [1], [0, 0, 1, 1], [], []>} : vector<16x32xbf16>, vector<32x128xbf16>, vector<16x128xf32> -> vector<16x128xf32>
    %152 = arith.mulf %151, %151 : vector<16x128xf32>
    %153 = arith.mulf %151, %152 : vector<16x128xf32>
    %cst_66 = arith.constant 4.471500e-02 : f32
    %154 = vector.broadcast %cst_66 : f32 to vector<16x128xf32>
    %155 = arith.mulf %154, %153 : vector<16x128xf32>
    %156 = arith.addf %151, %155 : vector<16x128xf32>
    %cst_67 = arith.constant 0.797884583 : f32
    %157 = vector.broadcast %cst_67 : f32 to vector<16x128xf32>
    %158 = arith.mulf %157, %156 : vector<16x128xf32>
    %159 = math.tanh %158 : vector<16x128xf32>
    %cst_68 = arith.constant 1.000000e+00 : f32
    %160 = vector.broadcast %cst_68 : f32 to vector<16x128xf32>
    %161 = arith.addf %160, %159 : vector<16x128xf32>
    %cst_69 = arith.constant 5.000000e-01 : f32
    %162 = vector.broadcast %cst_69 : f32 to vector<16x128xf32>
    %163 = arith.mulf %162, %161 : vector<16x128xf32>
    %164 = arith.mulf %151, %163 : vector<16x128xf32>
    %165 = arith.truncf %164 : vector<16x128xf32> to vector<16x128xbf16>
    %c0_70 = arith.constant 0 : index
    %c0_71 = arith.constant 0 : index
    %c0_72 = arith.constant 0 : index
    %166 = vector.load %arg14[%c0_70, %c0_71, %c0_72] : memref<2x128x32xbf16, #tpu.memory_space<vmem>>, vector<1x128x32xbf16>
    %167 = vector.shape_cast %166 : vector<1x128x32xbf16> to vector<128x32xbf16>
    %cst_73 = arith.constant dense<0.000000e+00> : vector<16x32xf32>
    %168 = tpu.matmul %165, %167, %cst_73 {dimension_numbers = #tpu.dot_dimension_numbers<[1], [0], [0], [1], [0, 0, 1, 1], [], []>} : vector<16x128xbf16>, vector<128x32xbf16>, vector<16x32xf32> -> vector<16x32xf32>
    %169 = arith.addf %121, %168 : vector<16x32xf32>
    %c0_74 = arith.constant 0 : index
    %c0_75 = arith.constant 0 : index
    %c0_76 = arith.constant 0 : index
    %170 = vector.load %arg15[%c0_74, %c0_75, %c0_76] : memref<2x1x32xf32, #tpu.memory_space<vmem>>, vector<1x1x32xf32>
    %171 = vector.shape_cast %170 : vector<1x1x32xf32> to vector<1x32xf32>
    %c0_77 = arith.constant 0 : index
    %c0_78 = arith.constant 0 : index
    %c0_79 = arith.constant 0 : index
    %172 = vector.load %arg16[%c0_77, %c0_78, %c0_79] : memref<2x1x32xf32, #tpu.memory_space<vmem>>, vector<1x1x32xf32>
    %173 = vector.shape_cast %172 : vector<1x1x32xf32> to vector<1x32xf32>
    %cst_80 = arith.constant dense<0.000000e+00> : vector<16xf32>
    %174 = vector.multi_reduction <add>, %169, %cst_80 [1] : vector<16x32xf32> to vector<16xf32>
    %175 = vector.shape_cast %174 : vector<16xf32> to vector<16x1xf32>
    %cst_81 = arith.constant 3.200000e+01 : f32
    %176 = vector.broadcast %cst_81 : f32 to vector<16x1xf32>
    %177 = arith.divf %175, %176 : vector<16x1xf32>
    %178 = vector.broadcast %177 : vector<16x1xf32> to vector<16x32xf32>
    %179 = arith.subf %169, %178 : vector<16x32xf32>
    %180 = arith.mulf %179, %179 : vector<16x32xf32>
    %cst_82 = arith.constant dense<0.000000e+00> : vector<16xf32>
    %181 = vector.multi_reduction <add>, %180, %cst_82 [1] : vector<16x32xf32> to vector<16xf32>
    %182 = vector.shape_cast %181 : vector<16xf32> to vector<16x1xf32>
    %cst_83 = arith.constant 3.200000e+01 : f32
    %183 = vector.broadcast %cst_83 : f32 to vector<16x1xf32>
    %184 = arith.divf %182, %183 : vector<16x1xf32>
    %185 = vector.broadcast %177 : vector<16x1xf32> to vector<16x32xf32>
    %186 = arith.subf %169, %185 : vector<16x32xf32>
    %cst_84 = arith.constant 9.99999974E-6 : f32
    %187 = vector.broadcast %cst_84 : f32 to vector<16x1xf32>
    %188 = arith.addf %184, %187 : vector<16x1xf32>
    %189 = math.rsqrt %188 : vector<16x1xf32>
    %190 = vector.broadcast %189 : vector<16x1xf32> to vector<16x32xf32>
    %191 = arith.mulf %186, %190 : vector<16x32xf32>
    %192 = vector.broadcast %171 : vector<1x32xf32> to vector<16x32xf32>
    %193 = arith.mulf %191, %192 : vector<16x32xf32>
    %194 = vector.broadcast %173 : vector<1x32xf32> to vector<16x32xf32>
    %195 = arith.addf %193, %194 : vector<16x32xf32>
    %196 = arith.truncf %195 : vector<16x32xf32> to vector<16x32xbf16>
    %c0_85 = arith.constant 0 : index
    %c0_86 = arith.constant 0 : index
    %c0_87 = arith.constant 0 : index
    %197 = vector.load %arg17[%c0_85, %c0_86, %c0_87] : memref<2x32x96xbf16, #tpu.memory_space<vmem>>, vector<1x32x96xbf16>
    %198 = vector.shape_cast %197 : vector<1x32x96xbf16> to vector<32x96xbf16>
    %cst_88 = arith.constant dense<0.000000e+00> : vector<16x96xf32>
    %199 = tpu.matmul %196, %198, %cst_88 {dimension_numbers = #tpu.dot_dimension_numbers<[1], [0], [0], [1], [0, 0, 1, 1], [], []>} : vector<16x32xbf16>, vector<32x96xbf16>, vector<16x96xf32> -> vector<16x96xf32>
    %200 = vector.extract_strided_slice %199 {offsets = [0, 0], sizes = [16, 32], strides = [1, 1]} : vector<16x96xf32> to vector<16x32xf32>
    %cst_89 = arith.constant 0.353553385 : f32
    %201 = vector.broadcast %cst_89 : f32 to vector<16x32xf32>
    %202 = arith.mulf %200, %201 : vector<16x32xf32>
    %203 = vector.shape_cast %202 : vector<16x32xf32> to vector<2x8x32xf32>
    %204 = arith.truncf %203 : vector<2x8x32xf32> to vector<2x8x32xbf16>
    %205 = vector.extract_strided_slice %199 {offsets = [0, 32], sizes = [16, 32], strides = [1, 1]} : vector<16x96xf32> to vector<16x32xf32>
    %206 = vector.shape_cast %205 : vector<16x32xf32> to vector<2x8x32xf32>
    %207 = arith.truncf %206 : vector<2x8x32xf32> to vector<2x8x32xbf16>
    %208 = vector.extract_strided_slice %199 {offsets = [0, 64], sizes = [16, 32], strides = [1, 1]} : vector<16x96xf32> to vector<16x32xf32>
    %209 = vector.shape_cast %208 : vector<16x32xf32> to vector<2x8x32xf32>
    %210 = arith.truncf %209 : vector<2x8x32xf32> to vector<2x8x32xbf16>
    %211 = vector.extract_strided_slice %204 {offsets = [0, 0, 0], sizes = [2, 8, 8], strides = [1, 1, 1]} : vector<2x8x32xbf16> to vector<2x8x8xbf16>
    %212 = vector.extract_strided_slice %207 {offsets = [0, 0, 0], sizes = [2, 8, 8], strides = [1, 1, 1]} : vector<2x8x32xbf16> to vector<2x8x8xbf16>
    %213 = vector.extract_strided_slice %210 {offsets = [0, 0, 0], sizes = [2, 8, 8], strides = [1, 1, 1]} : vector<2x8x32xbf16> to vector<2x8x8xbf16>
    "tpu.trace_start"() <{level = 10 : i32, message = "bqd,bkd->bqk"}> : () -> ()
    %cst_90 = arith.constant dense<0.000000e+00> : vector<2x8x8xf32>
    %214 = tpu.matmul %211, %212, %cst_90 {dimension_numbers = #tpu.dot_dimension_numbers<[2], [2], [1], [1], [0, 0, 0, 1, 1, 1], [0], [0]>} : vector<2x8x8xbf16>, vector<2x8x8xbf16>, vector<2x8x8xf32> -> vector<2x8x8xf32>
    "tpu.trace_stop"() : () -> ()
    %215 = arith.addf %214, %2 : vector<2x8x8xf32>
    %cst_91 = arith.constant dense<0xFF800000> : vector<2x8xf32>
    %216 = vector.multi_reduction <maximumf>, %215, %cst_91 [2] : vector<2x8x8xf32> to vector<2x8xf32>
    %217 = vector.shape_cast %216 : vector<2x8xf32> to vector<2x8x1xf32>
    %218 = vector.broadcast %217 : vector<2x8x1xf32> to vector<2x8x8xf32>
    %219 = arith.subf %215, %218 : vector<2x8x8xf32>
    %220 = math.exp %219 : vector<2x8x8xf32>
    %cst_92 = arith.constant dense<0.000000e+00> : vector<2x8xf32>
    %221 = vector.multi_reduction <add>, %220, %cst_92 [2] : vector<2x8x8xf32> to vector<2x8xf32>
    %222 = vector.shape_cast %221 : vector<2x8xf32> to vector<2x8x1xf32>
    %223 = tpu.reciprocal %222 {approx = true} : vector<2x8x1xf32> -> vector<2x8x1xf32>
    %224 = arith.truncf %220 : vector<2x8x8xf32> to vector<2x8x8xbf16>
    "tpu.trace_start"() <{level = 10 : i32, message = "bqk,bkd->bqd"}> : () -> ()
    %cst_93 = arith.constant dense<0.000000e+00> : vector<2x8x8xf32>
    %225 = tpu.matmul %224, %213, %cst_93 {dimension_numbers = #tpu.dot_dimension_numbers<[2], [1], [1], [2], [0, 0, 0, 1, 1, 2], [0], [0]>} : vector<2x8x8xbf16>, vector<2x8x8xbf16>, vector<2x8x8xf32> -> vector<2x8x8xf32>
    "tpu.trace_stop"() : () -> ()
    %226 = vector.broadcast %223 : vector<2x8x1xf32> to vector<2x8x8xf32>
    %227 = arith.mulf %225, %226 : vector<2x8x8xf32>
    %228 = vector.extract_strided_slice %204 {offsets = [0, 0, 8], sizes = [2, 8, 8], strides = [1, 1, 1]} : vector<2x8x32xbf16> to vector<2x8x8xbf16>
    %229 = vector.extract_strided_slice %207 {offsets = [0, 0, 8], sizes = [2, 8, 8], strides = [1, 1, 1]} : vector<2x8x32xbf16> to vector<2x8x8xbf16>
    %230 = vector.extract_strided_slice %210 {offsets = [0, 0, 8], sizes = [2, 8, 8], strides = [1, 1, 1]} : vector<2x8x32xbf16> to vector<2x8x8xbf16>
    "tpu.trace_start"() <{level = 10 : i32, message = "bqd,bkd->bqk"}> : () -> ()
    %cst_94 = arith.constant dense<0.000000e+00> : vector<2x8x8xf32>
    %231 = tpu.matmul %228, %229, %cst_94 {dimension_numbers = #tpu.dot_dimension_numbers<[2], [2], [1], [1], [0, 0, 0, 1, 1, 1], [0], [0]>} : vector<2x8x8xbf16>, vector<2x8x8xbf16>, vector<2x8x8xf32> -> vector<2x8x8xf32>
    "tpu.trace_stop"() : () -> ()
    %232 = arith.addf %231, %2 : vector<2x8x8xf32>
    %cst_95 = arith.constant dense<0xFF800000> : vector<2x8xf32>
    %233 = vector.multi_reduction <maximumf>, %232, %cst_95 [2] : vector<2x8x8xf32> to vector<2x8xf32>
    %234 = vector.shape_cast %233 : vector<2x8xf32> to vector<2x8x1xf32>
    %235 = vector.broadcast %234 : vector<2x8x1xf32> to vector<2x8x8xf32>
    %236 = arith.subf %232, %235 : vector<2x8x8xf32>
    %237 = math.exp %236 : vector<2x8x8xf32>
    %cst_96 = arith.constant dense<0.000000e+00> : vector<2x8xf32>
    %238 = vector.multi_reduction <add>, %237, %cst_96 [2] : vector<2x8x8xf32> to vector<2x8xf32>
    %239 = vector.shape_cast %238 : vector<2x8xf32> to vector<2x8x1xf32>
    %240 = tpu.reciprocal %239 {approx = true} : vector<2x8x1xf32> -> vector<2x8x1xf32>
    %241 = arith.truncf %237 : vector<2x8x8xf32> to vector<2x8x8xbf16>
    "tpu.trace_start"() <{level = 10 : i32, message = "bqk,bkd->bqd"}> : () -> ()
    %cst_97 = arith.constant dense<0.000000e+00> : vector<2x8x8xf32>
    %242 = tpu.matmul %241, %230, %cst_97 {dimension_numbers = #tpu.dot_dimension_numbers<[2], [1], [1], [2], [0, 0, 0, 1, 1, 2], [0], [0]>} : vector<2x8x8xbf16>, vector<2x8x8xbf16>, vector<2x8x8xf32> -> vector<2x8x8xf32>
    "tpu.trace_stop"() : () -> ()
    %243 = vector.broadcast %240 : vector<2x8x1xf32> to vector<2x8x8xf32>
    %244 = arith.mulf %242, %243 : vector<2x8x8xf32>
    %245 = vector.extract_strided_slice %204 {offsets = [0, 0, 16], sizes = [2, 8, 8], strides = [1, 1, 1]} : vector<2x8x32xbf16> to vector<2x8x8xbf16>
    %246 = vector.extract_strided_slice %207 {offsets = [0, 0, 16], sizes = [2, 8, 8], strides = [1, 1, 1]} : vector<2x8x32xbf16> to vector<2x8x8xbf16>
    %247 = vector.extract_strided_slice %210 {offsets = [0, 0, 16], sizes = [2, 8, 8], strides = [1, 1, 1]} : vector<2x8x32xbf16> to vector<2x8x8xbf16>
    "tpu.trace_start"() <{level = 10 : i32, message = "bqd,bkd->bqk"}> : () -> ()
    %cst_98 = arith.constant dense<0.000000e+00> : vector<2x8x8xf32>
    %248 = tpu.matmul %245, %246, %cst_98 {dimension_numbers = #tpu.dot_dimension_numbers<[2], [2], [1], [1], [0, 0, 0, 1, 1, 1], [0], [0]>} : vector<2x8x8xbf16>, vector<2x8x8xbf16>, vector<2x8x8xf32> -> vector<2x8x8xf32>
    "tpu.trace_stop"() : () -> ()
    %249 = arith.addf %248, %2 : vector<2x8x8xf32>
    %cst_99 = arith.constant dense<0xFF800000> : vector<2x8xf32>
    %250 = vector.multi_reduction <maximumf>, %249, %cst_99 [2] : vector<2x8x8xf32> to vector<2x8xf32>
    %251 = vector.shape_cast %250 : vector<2x8xf32> to vector<2x8x1xf32>
    %252 = vector.broadcast %251 : vector<2x8x1xf32> to vector<2x8x8xf32>
    %253 = arith.subf %249, %252 : vector<2x8x8xf32>
    %254 = math.exp %253 : vector<2x8x8xf32>
    %cst_100 = arith.constant dense<0.000000e+00> : vector<2x8xf32>
    %255 = vector.multi_reduction <add>, %254, %cst_100 [2] : vector<2x8x8xf32> to vector<2x8xf32>
    %256 = vector.shape_cast %255 : vector<2x8xf32> to vector<2x8x1xf32>
    %257 = tpu.reciprocal %256 {approx = true} : vector<2x8x1xf32> -> vector<2x8x1xf32>
    %258 = arith.truncf %254 : vector<2x8x8xf32> to vector<2x8x8xbf16>
    "tpu.trace_start"() <{level = 10 : i32, message = "bqk,bkd->bqd"}> : () -> ()
    %cst_101 = arith.constant dense<0.000000e+00> : vector<2x8x8xf32>
    %259 = tpu.matmul %258, %247, %cst_101 {dimension_numbers = #tpu.dot_dimension_numbers<[2], [1], [1], [2], [0, 0, 0, 1, 1, 2], [0], [0]>} : vector<2x8x8xbf16>, vector<2x8x8xbf16>, vector<2x8x8xf32> -> vector<2x8x8xf32>
    "tpu.trace_stop"() : () -> ()
    %260 = vector.broadcast %257 : vector<2x8x1xf32> to vector<2x8x8xf32>
    %261 = arith.mulf %259, %260 : vector<2x8x8xf32>
    %262 = vector.extract_strided_slice %204 {offsets = [0, 0, 24], sizes = [2, 8, 8], strides = [1, 1, 1]} : vector<2x8x32xbf16> to vector<2x8x8xbf16>
    %263 = vector.extract_strided_slice %207 {offsets = [0, 0, 24], sizes = [2, 8, 8], strides = [1, 1, 1]} : vector<2x8x32xbf16> to vector<2x8x8xbf16>
    %264 = vector.extract_strided_slice %210 {offsets = [0, 0, 24], sizes = [2, 8, 8], strides = [1, 1, 1]} : vector<2x8x32xbf16> to vector<2x8x8xbf16>
    "tpu.trace_start"() <{level = 10 : i32, message = "bqd,bkd->bqk"}> : () -> ()
    %cst_102 = arith.constant dense<0.000000e+00> : vector<2x8x8xf32>
    %265 = tpu.matmul %262, %263, %cst_102 {dimension_numbers = #tpu.dot_dimension_numbers<[2], [2], [1], [1], [0, 0, 0, 1, 1, 1], [0], [0]>} : vector<2x8x8xbf16>, vector<2x8x8xbf16>, vector<2x8x8xf32> -> vector<2x8x8xf32>
    "tpu.trace_stop"() : () -> ()
    %266 = arith.addf %265, %2 : vector<2x8x8xf32>
    %cst_103 = arith.constant dense<0xFF800000> : vector<2x8xf32>
    %267 = vector.multi_reduction <maximumf>, %266, %cst_103 [2] : vector<2x8x8xf32> to vector<2x8xf32>
    %268 = vector.shape_cast %267 : vector<2x8xf32> to vector<2x8x1xf32>
    %269 = vector.broadcast %268 : vector<2x8x1xf32> to vector<2x8x8xf32>
    %270 = arith.subf %266, %269 : vector<2x8x8xf32>
    %271 = math.exp %270 : vector<2x8x8xf32>
    %cst_104 = arith.constant dense<0.000000e+00> : vector<2x8xf32>
    %272 = vector.multi_reduction <add>, %271, %cst_104 [2] : vector<2x8x8xf32> to vector<2x8xf32>
    %273 = vector.shape_cast %272 : vector<2x8xf32> to vector<2x8x1xf32>
    %274 = tpu.reciprocal %273 {approx = true} : vector<2x8x1xf32> -> vector<2x8x1xf32>
    %275 = arith.truncf %271 : vector<2x8x8xf32> to vector<2x8x8xbf16>
    "tpu.trace_start"() <{level = 10 : i32, message = "bqk,bkd->bqd"}> : () -> ()
    %cst_105 = arith.constant dense<0.000000e+00> : vector<2x8x8xf32>
    %276 = tpu.matmul %275, %264, %cst_105 {dimension_numbers = #tpu.dot_dimension_numbers<[2], [1], [1], [2], [0, 0, 0, 1, 1, 2], [0], [0]>} : vector<2x8x8xbf16>, vector<2x8x8xbf16>, vector<2x8x8xf32> -> vector<2x8x8xf32>
    "tpu.trace_stop"() : () -> ()
    %277 = vector.broadcast %274 : vector<2x8x1xf32> to vector<2x8x8xf32>
    %278 = arith.mulf %276, %277 : vector<2x8x8xf32>
    %279 = tpu.concatenate %227, %244, %261, %278 in 2 : vector<2x8x8xf32>, vector<2x8x8xf32>, vector<2x8x8xf32>, vector<2x8x8xf32> -> vector<2x8x32xf32>
    %280 = vector.shape_cast %279 : vector<2x8x32xf32> to vector<16x32xf32>
    %281 = arith.truncf %280 : vector<16x32xf32> to vector<16x32xbf16>
    %c0_106 = arith.constant 0 : index
    %c0_107 = arith.constant 0 : index
    %c0_108 = arith.constant 0 : index
    %282 = vector.load %arg18[%c0_106, %c0_107, %c0_108] : memref<2x32x32xbf16, #tpu.memory_space<vmem>>, vector<1x32x32xbf16>
    %283 = vector.shape_cast %282 : vector<1x32x32xbf16> to vector<32x32xbf16>
    %cst_109 = arith.constant dense<0.000000e+00> : vector<16x32xf32>
    %284 = tpu.matmul %281, %283, %cst_109 {dimension_numbers = #tpu.dot_dimension_numbers<[1], [0], [0], [1], [0, 0, 1, 1], [], []>} : vector<16x32xbf16>, vector<32x32xbf16>, vector<16x32xf32> -> vector<16x32xf32>
    %285 = arith.addf %169, %284 : vector<16x32xf32>
    %c0_110 = arith.constant 0 : index
    %c0_111 = arith.constant 0 : index
    %c0_112 = arith.constant 0 : index
    %286 = vector.load %arg19[%c0_110, %c0_111, %c0_112] : memref<2x1x32xf32, #tpu.memory_space<vmem>>, vector<1x1x32xf32>
    %287 = vector.shape_cast %286 : vector<1x1x32xf32> to vector<1x32xf32>
    %c0_113 = arith.constant 0 : index
    %c0_114 = arith.constant 0 : index
    %c0_115 = arith.constant 0 : index
    %288 = vector.load %arg20[%c0_113, %c0_114, %c0_115] : memref<2x1x32xf32, #tpu.memory_space<vmem>>, vector<1x1x32xf32>
    %289 = vector.shape_cast %288 : vector<1x1x32xf32> to vector<1x32xf32>
    %cst_116 = arith.constant dense<0.000000e+00> : vector<16xf32>
    %290 = vector.multi_reduction <add>, %285, %cst_116 [1] : vector<16x32xf32> to vector<16xf32>
    %291 = vector.shape_cast %290 : vector<16xf32> to vector<16x1xf32>
    %cst_117 = arith.constant 3.200000e+01 : f32
    %292 = vector.broadcast %cst_117 : f32 to vector<16x1xf32>
    %293 = arith.divf %291, %292 : vector<16x1xf32>
    %294 = vector.broadcast %293 : vector<16x1xf32> to vector<16x32xf32>
    %295 = arith.subf %285, %294 : vector<16x32xf32>
    %296 = arith.mulf %295, %295 : vector<16x32xf32>
    %cst_118 = arith.constant dense<0.000000e+00> : vector<16xf32>
    %297 = vector.multi_reduction <add>, %296, %cst_118 [1] : vector<16x32xf32> to vector<16xf32>
    %298 = vector.shape_cast %297 : vector<16xf32> to vector<16x1xf32>
    %cst_119 = arith.constant 3.200000e+01 : f32
    %299 = vector.broadcast %cst_119 : f32 to vector<16x1xf32>
    %300 = arith.divf %298, %299 : vector<16x1xf32>
    %301 = vector.broadcast %293 : vector<16x1xf32> to vector<16x32xf32>
    %302 = arith.subf %285, %301 : vector<16x32xf32>
    %cst_120 = arith.constant 9.99999974E-6 : f32
    %303 = vector.broadcast %cst_120 : f32 to vector<16x1xf32>
    %304 = arith.addf %300, %303 : vector<16x1xf32>
    %305 = math.rsqrt %304 : vector<16x1xf32>
    %306 = vector.broadcast %305 : vector<16x1xf32> to vector<16x32xf32>
    %307 = arith.mulf %302, %306 : vector<16x32xf32>
    %308 = vector.broadcast %287 : vector<1x32xf32> to vector<16x32xf32>
    %309 = arith.mulf %307, %308 : vector<16x32xf32>
    %310 = vector.broadcast %289 : vector<1x32xf32> to vector<16x32xf32>
    %311 = arith.addf %309, %310 : vector<16x32xf32>
    %312 = arith.truncf %311 : vector<16x32xf32> to vector<16x32xbf16>
    %c0_121 = arith.constant 0 : index
    %c0_122 = arith.constant 0 : index
    %c0_123 = arith.constant 0 : index
    %313 = vector.load %arg21[%c0_121, %c0_122, %c0_123] : memref<2x32x128xbf16, #tpu.memory_space<vmem>>, vector<1x32x128xbf16>
    %314 = vector.shape_cast %313 : vector<1x32x128xbf16> to vector<32x128xbf16>
    %cst_124 = arith.constant dense<0.000000e+00> : vector<16x128xf32>
    %315 = tpu.matmul %312, %314, %cst_124 {dimension_numbers = #tpu.dot_dimension_numbers<[1], [0], [0], [1], [0, 0, 1, 1], [], []>} : vector<16x32xbf16>, vector<32x128xbf16>, vector<16x128xf32> -> vector<16x128xf32>
    %316 = arith.mulf %315, %315 : vector<16x128xf32>
    %317 = arith.mulf %315, %316 : vector<16x128xf32>
    %cst_125 = arith.constant 4.471500e-02 : f32
    %318 = vector.broadcast %cst_125 : f32 to vector<16x128xf32>
    %319 = arith.mulf %318, %317 : vector<16x128xf32>
    %320 = arith.addf %315, %319 : vector<16x128xf32>
    %cst_126 = arith.constant 0.797884583 : f32
    %321 = vector.broadcast %cst_126 : f32 to vector<16x128xf32>
    %322 = arith.mulf %321, %320 : vector<16x128xf32>
    %323 = math.tanh %322 : vector<16x128xf32>
    %cst_127 = arith.constant 1.000000e+00 : f32
    %324 = vector.broadcast %cst_127 : f32 to vector<16x128xf32>
    %325 = arith.addf %324, %323 : vector<16x128xf32>
    %cst_128 = arith.constant 5.000000e-01 : f32
    %326 = vector.broadcast %cst_128 : f32 to vector<16x128xf32>
    %327 = arith.mulf %326, %325 : vector<16x128xf32>
    %328 = arith.mulf %315, %327 : vector<16x128xf32>
    %329 = arith.truncf %328 : vector<16x128xf32> to vector<16x128xbf16>
    %c0_129 = arith.constant 0 : index
    %c0_130 = arith.constant 0 : index
    %c0_131 = arith.constant 0 : index
    %330 = vector.load %arg22[%c0_129, %c0_130, %c0_131] : memref<2x128x32xbf16, #tpu.memory_space<vmem>>, vector<1x128x32xbf16>
    %331 = vector.shape_cast %330 : vector<1x128x32xbf16> to vector<128x32xbf16>
    %cst_132 = arith.constant dense<0.000000e+00> : vector<16x32xf32>
    %332 = tpu.matmul %329, %331, %cst_132 {dimension_numbers = #tpu.dot_dimension_numbers<[1], [0], [0], [1], [0, 0, 1, 1], [], []>} : vector<16x128xbf16>, vector<128x32xbf16>, vector<16x32xf32> -> vector<16x32xf32>
    %333 = arith.addf %285, %332 : vector<16x32xf32>
    %c1 = arith.constant 1 : index
    %c0_133 = arith.constant 0 : index
    %c0_134 = arith.constant 0 : index
    %334 = vector.load %arg6[%c1, %c0_133, %c0_134] : memref<2x1x32xf32, #tpu.memory_space<vmem>>, vector<1x1x32xf32>
    %335 = vector.shape_cast %334 : vector<1x1x32xf32> to vector<1x32xf32>
    %c1_135 = arith.constant 1 : index
    %c0_136 = arith.constant 0 : index
    %c0_137 = arith.constant 0 : index
    %336 = vector.load %arg7[%c1_135, %c0_136, %c0_137] : memref<2x1x32xf32, #tpu.memory_space<vmem>>, vector<1x1x32xf32>
    %337 = vector.shape_cast %336 : vector<1x1x32xf32> to vector<1x32xf32>
    %cst_138 = arith.constant dense<0.000000e+00> : vector<16xf32>
    %338 = vector.multi_reduction <add>, %333, %cst_138 [1] : vector<16x32xf32> to vector<16xf32>
    %339 = vector.shape_cast %338 : vector<16xf32> to vector<16x1xf32>
    %cst_139 = arith.constant 3.200000e+01 : f32
    %340 = vector.broadcast %cst_139 : f32 to vector<16x1xf32>
    %341 = arith.divf %339, %340 : vector<16x1xf32>
    %342 = vector.broadcast %341 : vector<16x1xf32> to vector<16x32xf32>
    %343 = arith.subf %333, %342 : vector<16x32xf32>
    %344 = arith.mulf %343, %343 : vector<16x32xf32>
    %cst_140 = arith.constant dense<0.000000e+00> : vector<16xf32>
    %345 = vector.multi_reduction <add>, %344, %cst_140 [1] : vector<16x32xf32> to vector<16xf32>
    %346 = vector.shape_cast %345 : vector<16xf32> to vector<16x1xf32>
    %cst_141 = arith.constant 3.200000e+01 : f32
    %347 = vector.broadcast %cst_141 : f32 to vector<16x1xf32>
    %348 = arith.divf %346, %347 : vector<16x1xf32>
    %349 = vector.broadcast %341 : vector<16x1xf32> to vector<16x32xf32>
    %350 = arith.subf %333, %349 : vector<16x32xf32>
    %cst_142 = arith.constant 9.99999974E-6 : f32
    %351 = vector.broadcast %cst_142 : f32 to vector<16x1xf32>
    %352 = arith.addf %348, %351 : vector<16x1xf32>
    %353 = math.rsqrt %352 : vector<16x1xf32>
    %354 = vector.broadcast %353 : vector<16x1xf32> to vector<16x32xf32>
    %355 = arith.mulf %350, %354 : vector<16x32xf32>
    %356 = vector.broadcast %335 : vector<1x32xf32> to vector<16x32xf32>
    %357 = arith.mulf %355, %356 : vector<16x32xf32>
    %358 = vector.broadcast %337 : vector<1x32xf32> to vector<16x32xf32>
    %359 = arith.addf %357, %358 : vector<16x32xf32>
    %360 = arith.truncf %359 : vector<16x32xf32> to vector<16x32xbf16>
    %c1_143 = arith.constant 1 : index
    %c0_144 = arith.constant 0 : index
    %c0_145 = arith.constant 0 : index
    %361 = vector.load %arg8[%c1_143, %c0_144, %c0_145] : memref<2x32x32xbf16, #tpu.memory_space<vmem>>, vector<1x32x32xbf16>
    %362 = vector.shape_cast %361 : vector<1x32x32xbf16> to vector<32x32xbf16>
    %cst_146 = arith.constant dense<0.000000e+00> : vector<16x32xf32>
    %363 = tpu.matmul %360, %362, %cst_146 {dimension_numbers = #tpu.dot_dimension_numbers<[1], [0], [0], [1], [0, 0, 1, 1], [], []>} : vector<16x32xbf16>, vector<32x32xbf16>, vector<16x32xf32> -> vector<16x32xf32>
    %cst_147 = arith.constant 0.353553385 : f32
    %364 = vector.broadcast %cst_147 : f32 to vector<16x32xf32>
    %365 = arith.mulf %363, %364 : vector<16x32xf32>
    %366 = vector.shape_cast %365 : vector<16x32xf32> to vector<2x8x32xf32>
    %367 = arith.truncf %366 : vector<2x8x32xf32> to vector<2x8x32xbf16>
    %368 = vector.shape_cast %1 : vector<2x8x32xbf16> to vector<16x32xbf16>
    %c1_148 = arith.constant 1 : index
    %c0_149 = arith.constant 0 : index
    %c0_150 = arith.constant 0 : index
    %369 = vector.load %arg9[%c1_148, %c0_149, %c0_150] : memref<2x32x64xbf16, #tpu.memory_space<vmem>>, vector<1x32x64xbf16>
    %370 = vector.shape_cast %369 : vector<1x32x64xbf16> to vector<32x64xbf16>
    %cst_151 = arith.constant dense<0.000000e+00> : vector<16x64xf32>
    %371 = tpu.matmul %368, %370, %cst_151 {dimension_numbers = #tpu.dot_dimension_numbers<[1], [0], [0], [1], [0, 0, 1, 1], [], []>} : vector<16x32xbf16>, vector<32x64xbf16>, vector<16x64xf32> -> vector<16x64xf32>
    %372 = vector.shape_cast %371 : vector<16x64xf32> to vector<2x8x64xf32>
    %373 = arith.truncf %372 : vector<2x8x64xf32> to vector<2x8x64xbf16>
    %374 = vector.extract_strided_slice %367 {offsets = [0, 0, 0], sizes = [2, 8, 8], strides = [1, 1, 1]} : vector<2x8x32xbf16> to vector<2x8x8xbf16>
    %375 = vector.extract_strided_slice %373 {offsets = [0, 0, 0], sizes = [2, 8, 8], strides = [1, 1, 1]} : vector<2x8x64xbf16> to vector<2x8x8xbf16>
    %376 = vector.extract_strided_slice %373 {offsets = [0, 0, 32], sizes = [2, 8, 8], strides = [1, 1, 1]} : vector<2x8x64xbf16> to vector<2x8x8xbf16>
    "tpu.trace_start"() <{level = 10 : i32, message = "bqd,bkd->bqk"}> : () -> ()
    %cst_152 = arith.constant dense<0.000000e+00> : vector<2x8x8xf32>
    %377 = tpu.matmul %374, %375, %cst_152 {dimension_numbers = #tpu.dot_dimension_numbers<[2], [2], [1], [1], [0, 0, 0, 1, 1, 1], [0], [0]>} : vector<2x8x8xbf16>, vector<2x8x8xbf16>, vector<2x8x8xf32> -> vector<2x8x8xf32>
    "tpu.trace_stop"() : () -> ()
    %378 = arith.addf %377, %3 : vector<2x8x8xf32>
    %cst_153 = arith.constant dense<0xFF800000> : vector<2x8xf32>
    %379 = vector.multi_reduction <maximumf>, %378, %cst_153 [2] : vector<2x8x8xf32> to vector<2x8xf32>
    %380 = vector.shape_cast %379 : vector<2x8xf32> to vector<2x8x1xf32>
    %381 = vector.broadcast %380 : vector<2x8x1xf32> to vector<2x8x8xf32>
    %382 = arith.subf %378, %381 : vector<2x8x8xf32>
    %383 = math.exp %382 : vector<2x8x8xf32>
    %cst_154 = arith.constant dense<0.000000e+00> : vector<2x8xf32>
    %384 = vector.multi_reduction <add>, %383, %cst_154 [2] : vector<2x8x8xf32> to vector<2x8xf32>
    %385 = vector.shape_cast %384 : vector<2x8xf32> to vector<2x8x1xf32>
    %386 = tpu.reciprocal %385 {approx = true} : vector<2x8x1xf32> -> vector<2x8x1xf32>
    %387 = arith.truncf %383 : vector<2x8x8xf32> to vector<2x8x8xbf16>
    "tpu.trace_start"() <{level = 10 : i32, message = "bqk,bkd->bqd"}> : () -> ()
    %cst_155 = arith.constant dense<0.000000e+00> : vector<2x8x8xf32>
    %388 = tpu.matmul %387, %376, %cst_155 {dimension_numbers = #tpu.dot_dimension_numbers<[2], [1], [1], [2], [0, 0, 0, 1, 1, 2], [0], [0]>} : vector<2x8x8xbf16>, vector<2x8x8xbf16>, vector<2x8x8xf32> -> vector<2x8x8xf32>
    "tpu.trace_stop"() : () -> ()
    %389 = vector.broadcast %386 : vector<2x8x1xf32> to vector<2x8x8xf32>
    %390 = arith.mulf %388, %389 : vector<2x8x8xf32>
    %391 = vector.extract_strided_slice %367 {offsets = [0, 0, 8], sizes = [2, 8, 8], strides = [1, 1, 1]} : vector<2x8x32xbf16> to vector<2x8x8xbf16>
    %392 = vector.extract_strided_slice %373 {offsets = [0, 0, 8], sizes = [2, 8, 8], strides = [1, 1, 1]} : vector<2x8x64xbf16> to vector<2x8x8xbf16>
    %393 = vector.extract_strided_slice %373 {offsets = [0, 0, 40], sizes = [2, 8, 8], strides = [1, 1, 1]} : vector<2x8x64xbf16> to vector<2x8x8xbf16>
    "tpu.trace_start"() <{level = 10 : i32, message = "bqd,bkd->bqk"}> : () -> ()
    %cst_156 = arith.constant dense<0.000000e+00> : vector<2x8x8xf32>
    %394 = tpu.matmul %391, %392, %cst_156 {dimension_numbers = #tpu.dot_dimension_numbers<[2], [2], [1], [1], [0, 0, 0, 1, 1, 1], [0], [0]>} : vector<2x8x8xbf16>, vector<2x8x8xbf16>, vector<2x8x8xf32> -> vector<2x8x8xf32>
    "tpu.trace_stop"() : () -> ()
    %395 = arith.addf %394, %3 : vector<2x8x8xf32>
    %cst_157 = arith.constant dense<0xFF800000> : vector<2x8xf32>
    %396 = vector.multi_reduction <maximumf>, %395, %cst_157 [2] : vector<2x8x8xf32> to vector<2x8xf32>
    %397 = vector.shape_cast %396 : vector<2x8xf32> to vector<2x8x1xf32>
    %398 = vector.broadcast %397 : vector<2x8x1xf32> to vector<2x8x8xf32>
    %399 = arith.subf %395, %398 : vector<2x8x8xf32>
    %400 = math.exp %399 : vector<2x8x8xf32>
    %cst_158 = arith.constant dense<0.000000e+00> : vector<2x8xf32>
    %401 = vector.multi_reduction <add>, %400, %cst_158 [2] : vector<2x8x8xf32> to vector<2x8xf32>
    %402 = vector.shape_cast %401 : vector<2x8xf32> to vector<2x8x1xf32>
    %403 = tpu.reciprocal %402 {approx = true} : vector<2x8x1xf32> -> vector<2x8x1xf32>
    %404 = arith.truncf %400 : vector<2x8x8xf32> to vector<2x8x8xbf16>
    "tpu.trace_start"() <{level = 10 : i32, message = "bqk,bkd->bqd"}> : () -> ()
    %cst_159 = arith.constant dense<0.000000e+00> : vector<2x8x8xf32>
    %405 = tpu.matmul %404, %393, %cst_159 {dimension_numbers = #tpu.dot_dimension_numbers<[2], [1], [1], [2], [0, 0, 0, 1, 1, 2], [0], [0]>} : vector<2x8x8xbf16>, vector<2x8x8xbf16>, vector<2x8x8xf32> -> vector<2x8x8xf32>
    "tpu.trace_stop"() : () -> ()
    %406 = vector.broadcast %403 : vector<2x8x1xf32> to vector<2x8x8xf32>
    %407 = arith.mulf %405, %406 : vector<2x8x8xf32>
    %408 = vector.extract_strided_slice %367 {offsets = [0, 0, 16], sizes = [2, 8, 8], strides = [1, 1, 1]} : vector<2x8x32xbf16> to vector<2x8x8xbf16>
    %409 = vector.extract_strided_slice %373 {offsets = [0, 0, 16], sizes = [2, 8, 8], strides = [1, 1, 1]} : vector<2x8x64xbf16> to vector<2x8x8xbf16>
    %410 = vector.extract_strided_slice %373 {offsets = [0, 0, 48], sizes = [2, 8, 8], strides = [1, 1, 1]} : vector<2x8x64xbf16> to vector<2x8x8xbf16>
    "tpu.trace_start"() <{level = 10 : i32, message = "bqd,bkd->bqk"}> : () -> ()
    %cst_160 = arith.constant dense<0.000000e+00> : vector<2x8x8xf32>
    %411 = tpu.matmul %408, %409, %cst_160 {dimension_numbers = #tpu.dot_dimension_numbers<[2], [2], [1], [1], [0, 0, 0, 1, 1, 1], [0], [0]>} : vector<2x8x8xbf16>, vector<2x8x8xbf16>, vector<2x8x8xf32> -> vector<2x8x8xf32>
    "tpu.trace_stop"() : () -> ()
    %412 = arith.addf %411, %3 : vector<2x8x8xf32>
    %cst_161 = arith.constant dense<0xFF800000> : vector<2x8xf32>
    %413 = vector.multi_reduction <maximumf>, %412, %cst_161 [2] : vector<2x8x8xf32> to vector<2x8xf32>
    %414 = vector.shape_cast %413 : vector<2x8xf32> to vector<2x8x1xf32>
    %415 = vector.broadcast %414 : vector<2x8x1xf32> to vector<2x8x8xf32>
    %416 = arith.subf %412, %415 : vector<2x8x8xf32>
    %417 = math.exp %416 : vector<2x8x8xf32>
    %cst_162 = arith.constant dense<0.000000e+00> : vector<2x8xf32>
    %418 = vector.multi_reduction <add>, %417, %cst_162 [2] : vector<2x8x8xf32> to vector<2x8xf32>
    %419 = vector.shape_cast %418 : vector<2x8xf32> to vector<2x8x1xf32>
    %420 = tpu.reciprocal %419 {approx = true} : vector<2x8x1xf32> -> vector<2x8x1xf32>
    %421 = arith.truncf %417 : vector<2x8x8xf32> to vector<2x8x8xbf16>
    "tpu.trace_start"() <{level = 10 : i32, message = "bqk,bkd->bqd"}> : () -> ()
    %cst_163 = arith.constant dense<0.000000e+00> : vector<2x8x8xf32>
    %422 = tpu.matmul %421, %410, %cst_163 {dimension_numbers = #tpu.dot_dimension_numbers<[2], [1], [1], [2], [0, 0, 0, 1, 1, 2], [0], [0]>} : vector<2x8x8xbf16>, vector<2x8x8xbf16>, vector<2x8x8xf32> -> vector<2x8x8xf32>
    "tpu.trace_stop"() : () -> ()
    %423 = vector.broadcast %420 : vector<2x8x1xf32> to vector<2x8x8xf32>
    %424 = arith.mulf %422, %423 : vector<2x8x8xf32>
    %425 = vector.extract_strided_slice %367 {offsets = [0, 0, 24], sizes = [2, 8, 8], strides = [1, 1, 1]} : vector<2x8x32xbf16> to vector<2x8x8xbf16>
    %426 = vector.extract_strided_slice %373 {offsets = [0, 0, 24], sizes = [2, 8, 8], strides = [1, 1, 1]} : vector<2x8x64xbf16> to vector<2x8x8xbf16>
    %427 = vector.extract_strided_slice %373 {offsets = [0, 0, 56], sizes = [2, 8, 8], strides = [1, 1, 1]} : vector<2x8x64xbf16> to vector<2x8x8xbf16>
    "tpu.trace_start"() <{level = 10 : i32, message = "bqd,bkd->bqk"}> : () -> ()
    %cst_164 = arith.constant dense<0.000000e+00> : vector<2x8x8xf32>
    %428 = tpu.matmul %425, %426, %cst_164 {dimension_numbers = #tpu.dot_dimension_numbers<[2], [2], [1], [1], [0, 0, 0, 1, 1, 1], [0], [0]>} : vector<2x8x8xbf16>, vector<2x8x8xbf16>, vector<2x8x8xf32> -> vector<2x8x8xf32>
    "tpu.trace_stop"() : () -> ()
    %429 = arith.addf %428, %3 : vector<2x8x8xf32>
    %cst_165 = arith.constant dense<0xFF800000> : vector<2x8xf32>
    %430 = vector.multi_reduction <maximumf>, %429, %cst_165 [2] : vector<2x8x8xf32> to vector<2x8xf32>
    %431 = vector.shape_cast %430 : vector<2x8xf32> to vector<2x8x1xf32>
    %432 = vector.broadcast %431 : vector<2x8x1xf32> to vector<2x8x8xf32>
    %433 = arith.subf %429, %432 : vector<2x8x8xf32>
    %434 = math.exp %433 : vector<2x8x8xf32>
    %cst_166 = arith.constant dense<0.000000e+00> : vector<2x8xf32>
    %435 = vector.multi_reduction <add>, %434, %cst_166 [2] : vector<2x8x8xf32> to vector<2x8xf32>
    %436 = vector.shape_cast %435 : vector<2x8xf32> to vector<2x8x1xf32>
    %437 = tpu.reciprocal %436 {approx = true} : vector<2x8x1xf32> -> vector<2x8x1xf32>
    %438 = arith.truncf %434 : vector<2x8x8xf32> to vector<2x8x8xbf16>
    "tpu.trace_start"() <{level = 10 : i32, message = "bqk,bkd->bqd"}> : () -> ()
    %cst_167 = arith.constant dense<0.000000e+00> : vector<2x8x8xf32>
    %439 = tpu.matmul %438, %427, %cst_167 {dimension_numbers = #tpu.dot_dimension_numbers<[2], [1], [1], [2], [0, 0, 0, 1, 1, 2], [0], [0]>} : vector<2x8x8xbf16>, vector<2x8x8xbf16>, vector<2x8x8xf32> -> vector<2x8x8xf32>
    "tpu.trace_stop"() : () -> ()
    %440 = vector.broadcast %437 : vector<2x8x1xf32> to vector<2x8x8xf32>
    %441 = arith.mulf %439, %440 : vector<2x8x8xf32>
    %442 = tpu.concatenate %390, %407, %424, %441 in 2 : vector<2x8x8xf32>, vector<2x8x8xf32>, vector<2x8x8xf32>, vector<2x8x8xf32> -> vector<2x8x32xf32>
    %443 = vector.shape_cast %442 : vector<2x8x32xf32> to vector<16x32xf32>
    %444 = arith.truncf %443 : vector<16x32xf32> to vector<16x32xbf16>
    %c1_168 = arith.constant 1 : index
    %c0_169 = arith.constant 0 : index
    %c0_170 = arith.constant 0 : index
    %445 = vector.load %arg10[%c1_168, %c0_169, %c0_170] : memref<2x32x32xbf16, #tpu.memory_space<vmem>>, vector<1x32x32xbf16>
    %446 = vector.shape_cast %445 : vector<1x32x32xbf16> to vector<32x32xbf16>
    %cst_171 = arith.constant dense<0.000000e+00> : vector<16x32xf32>
    %447 = tpu.matmul %444, %446, %cst_171 {dimension_numbers = #tpu.dot_dimension_numbers<[1], [0], [0], [1], [0, 0, 1, 1], [], []>} : vector<16x32xbf16>, vector<32x32xbf16>, vector<16x32xf32> -> vector<16x32xf32>
    %448 = vector.broadcast %4 : vector<16x1xf32> to vector<16x32xf32>
    %449 = arith.mulf %447, %448 : vector<16x32xf32>
    %450 = arith.addf %333, %449 : vector<16x32xf32>
    %c1_172 = arith.constant 1 : index
    %c0_173 = arith.constant 0 : index
    %c0_174 = arith.constant 0 : index
    %451 = vector.load %arg11[%c1_172, %c0_173, %c0_174] : memref<2x1x32xf32, #tpu.memory_space<vmem>>, vector<1x1x32xf32>
    %452 = vector.shape_cast %451 : vector<1x1x32xf32> to vector<1x32xf32>
    %c1_175 = arith.constant 1 : index
    %c0_176 = arith.constant 0 : index
    %c0_177 = arith.constant 0 : index
    %453 = vector.load %arg12[%c1_175, %c0_176, %c0_177] : memref<2x1x32xf32, #tpu.memory_space<vmem>>, vector<1x1x32xf32>
    %454 = vector.shape_cast %453 : vector<1x1x32xf32> to vector<1x32xf32>
    %cst_178 = arith.constant dense<0.000000e+00> : vector<16xf32>
    %455 = vector.multi_reduction <add>, %450, %cst_178 [1] : vector<16x32xf32> to vector<16xf32>
    %456 = vector.shape_cast %455 : vector<16xf32> to vector<16x1xf32>
    %cst_179 = arith.constant 3.200000e+01 : f32
    %457 = vector.broadcast %cst_179 : f32 to vector<16x1xf32>
    %458 = arith.divf %456, %457 : vector<16x1xf32>
    %459 = vector.broadcast %458 : vector<16x1xf32> to vector<16x32xf32>
    %460 = arith.subf %450, %459 : vector<16x32xf32>
    %461 = arith.mulf %460, %460 : vector<16x32xf32>
    %cst_180 = arith.constant dense<0.000000e+00> : vector<16xf32>
    %462 = vector.multi_reduction <add>, %461, %cst_180 [1] : vector<16x32xf32> to vector<16xf32>
    %463 = vector.shape_cast %462 : vector<16xf32> to vector<16x1xf32>
    %cst_181 = arith.constant 3.200000e+01 : f32
    %464 = vector.broadcast %cst_181 : f32 to vector<16x1xf32>
    %465 = arith.divf %463, %464 : vector<16x1xf32>
    %466 = vector.broadcast %458 : vector<16x1xf32> to vector<16x32xf32>
    %467 = arith.subf %450, %466 : vector<16x32xf32>
    %cst_182 = arith.constant 9.99999974E-6 : f32
    %468 = vector.broadcast %cst_182 : f32 to vector<16x1xf32>
    %469 = arith.addf %465, %468 : vector<16x1xf32>
    %470 = math.rsqrt %469 : vector<16x1xf32>
    %471 = vector.broadcast %470 : vector<16x1xf32> to vector<16x32xf32>
    %472 = arith.mulf %467, %471 : vector<16x32xf32>
    %473 = vector.broadcast %452 : vector<1x32xf32> to vector<16x32xf32>
    %474 = arith.mulf %472, %473 : vector<16x32xf32>
    %475 = vector.broadcast %454 : vector<1x32xf32> to vector<16x32xf32>
    %476 = arith.addf %474, %475 : vector<16x32xf32>
    %477 = arith.truncf %476 : vector<16x32xf32> to vector<16x32xbf16>
    %c1_183 = arith.constant 1 : index
    %c0_184 = arith.constant 0 : index
    %c0_185 = arith.constant 0 : index
    %478 = vector.load %arg13[%c1_183, %c0_184, %c0_185] : memref<2x32x128xbf16, #tpu.memory_space<vmem>>, vector<1x32x128xbf16>
    %479 = vector.shape_cast %478 : vector<1x32x128xbf16> to vector<32x128xbf16>
    %cst_186 = arith.constant dense<0.000000e+00> : vector<16x128xf32>
    %480 = tpu.matmul %477, %479, %cst_186 {dimension_numbers = #tpu.dot_dimension_numbers<[1], [0], [0], [1], [0, 0, 1, 1], [], []>} : vector<16x32xbf16>, vector<32x128xbf16>, vector<16x128xf32> -> vector<16x128xf32>
    %481 = arith.mulf %480, %480 : vector<16x128xf32>
    %482 = arith.mulf %480, %481 : vector<16x128xf32>
    %cst_187 = arith.constant 4.471500e-02 : f32
    %483 = vector.broadcast %cst_187 : f32 to vector<16x128xf32>
    %484 = arith.mulf %483, %482 : vector<16x128xf32>
    %485 = arith.addf %480, %484 : vector<16x128xf32>
    %cst_188 = arith.constant 0.797884583 : f32
    %486 = vector.broadcast %cst_188 : f32 to vector<16x128xf32>
    %487 = arith.mulf %486, %485 : vector<16x128xf32>
    %488 = math.tanh %487 : vector<16x128xf32>
    %cst_189 = arith.constant 1.000000e+00 : f32
    %489 = vector.broadcast %cst_189 : f32 to vector<16x128xf32>
    %490 = arith.addf %489, %488 : vector<16x128xf32>
    %cst_190 = arith.constant 5.000000e-01 : f32
    %491 = vector.broadcast %cst_190 : f32 to vector<16x128xf32>
    %492 = arith.mulf %491, %490 : vector<16x128xf32>
    %493 = arith.mulf %480, %492 : vector<16x128xf32>
    %494 = arith.truncf %493 : vector<16x128xf32> to vector<16x128xbf16>
    %c1_191 = arith.constant 1 : index
    %c0_192 = arith.constant 0 : index
    %c0_193 = arith.constant 0 : index
    %495 = vector.load %arg14[%c1_191, %c0_192, %c0_193] : memref<2x128x32xbf16, #tpu.memory_space<vmem>>, vector<1x128x32xbf16>
    %496 = vector.shape_cast %495 : vector<1x128x32xbf16> to vector<128x32xbf16>
    %cst_194 = arith.constant dense<0.000000e+00> : vector<16x32xf32>
    %497 = tpu.matmul %494, %496, %cst_194 {dimension_numbers = #tpu.dot_dimension_numbers<[1], [0], [0], [1], [0, 0, 1, 1], [], []>} : vector<16x128xbf16>, vector<128x32xbf16>, vector<16x32xf32> -> vector<16x32xf32>
    %498 = arith.addf %450, %497 : vector<16x32xf32>
    %c1_195 = arith.constant 1 : index
    %c0_196 = arith.constant 0 : index
    %c0_197 = arith.constant 0 : index
    %499 = vector.load %arg15[%c1_195, %c0_196, %c0_197] : memref<2x1x32xf32, #tpu.memory_space<vmem>>, vector<1x1x32xf32>
    %500 = vector.shape_cast %499 : vector<1x1x32xf32> to vector<1x32xf32>
    %c1_198 = arith.constant 1 : index
    %c0_199 = arith.constant 0 : index
    %c0_200 = arith.constant 0 : index
    %501 = vector.load %arg16[%c1_198, %c0_199, %c0_200] : memref<2x1x32xf32, #tpu.memory_space<vmem>>, vector<1x1x32xf32>
    %502 = vector.shape_cast %501 : vector<1x1x32xf32> to vector<1x32xf32>
    %cst_201 = arith.constant dense<0.000000e+00> : vector<16xf32>
    %503 = vector.multi_reduction <add>, %498, %cst_201 [1] : vector<16x32xf32> to vector<16xf32>
    %504 = vector.shape_cast %503 : vector<16xf32> to vector<16x1xf32>
    %cst_202 = arith.constant 3.200000e+01 : f32
    %505 = vector.broadcast %cst_202 : f32 to vector<16x1xf32>
    %506 = arith.divf %504, %505 : vector<16x1xf32>
    %507 = vector.broadcast %506 : vector<16x1xf32> to vector<16x32xf32>
    %508 = arith.subf %498, %507 : vector<16x32xf32>
    %509 = arith.mulf %508, %508 : vector<16x32xf32>
    %cst_203 = arith.constant dense<0.000000e+00> : vector<16xf32>
    %510 = vector.multi_reduction <add>, %509, %cst_203 [1] : vector<16x32xf32> to vector<16xf32>
    %511 = vector.shape_cast %510 : vector<16xf32> to vector<16x1xf32>
    %cst_204 = arith.constant 3.200000e+01 : f32
    %512 = vector.broadcast %cst_204 : f32 to vector<16x1xf32>
    %513 = arith.divf %511, %512 : vector<16x1xf32>
    %514 = vector.broadcast %506 : vector<16x1xf32> to vector<16x32xf32>
    %515 = arith.subf %498, %514 : vector<16x32xf32>
    %cst_205 = arith.constant 9.99999974E-6 : f32
    %516 = vector.broadcast %cst_205 : f32 to vector<16x1xf32>
    %517 = arith.addf %513, %516 : vector<16x1xf32>
    %518 = math.rsqrt %517 : vector<16x1xf32>
    %519 = vector.broadcast %518 : vector<16x1xf32> to vector<16x32xf32>
    %520 = arith.mulf %515, %519 : vector<16x32xf32>
    %521 = vector.broadcast %500 : vector<1x32xf32> to vector<16x32xf32>
    %522 = arith.mulf %520, %521 : vector<16x32xf32>
    %523 = vector.broadcast %502 : vector<1x32xf32> to vector<16x32xf32>
    %524 = arith.addf %522, %523 : vector<16x32xf32>
    %525 = arith.truncf %524 : vector<16x32xf32> to vector<16x32xbf16>
    %c1_206 = arith.constant 1 : index
    %c0_207 = arith.constant 0 : index
    %c0_208 = arith.constant 0 : index
    %526 = vector.load %arg17[%c1_206, %c0_207, %c0_208] : memref<2x32x96xbf16, #tpu.memory_space<vmem>>, vector<1x32x96xbf16>
    %527 = vector.shape_cast %526 : vector<1x32x96xbf16> to vector<32x96xbf16>
    %cst_209 = arith.constant dense<0.000000e+00> : vector<16x96xf32>
    %528 = tpu.matmul %525, %527, %cst_209 {dimension_numbers = #tpu.dot_dimension_numbers<[1], [0], [0], [1], [0, 0, 1, 1], [], []>} : vector<16x32xbf16>, vector<32x96xbf16>, vector<16x96xf32> -> vector<16x96xf32>
    %529 = vector.extract_strided_slice %528 {offsets = [0, 0], sizes = [16, 32], strides = [1, 1]} : vector<16x96xf32> to vector<16x32xf32>
    %cst_210 = arith.constant 0.353553385 : f32
    %530 = vector.broadcast %cst_210 : f32 to vector<16x32xf32>
    %531 = arith.mulf %529, %530 : vector<16x32xf32>
    %532 = vector.shape_cast %531 : vector<16x32xf32> to vector<2x8x32xf32>
    %533 = arith.truncf %532 : vector<2x8x32xf32> to vector<2x8x32xbf16>
    %534 = vector.extract_strided_slice %528 {offsets = [0, 32], sizes = [16, 32], strides = [1, 1]} : vector<16x96xf32> to vector<16x32xf32>
    %535 = vector.shape_cast %534 : vector<16x32xf32> to vector<2x8x32xf32>
    %536 = arith.truncf %535 : vector<2x8x32xf32> to vector<2x8x32xbf16>
    %537 = vector.extract_strided_slice %528 {offsets = [0, 64], sizes = [16, 32], strides = [1, 1]} : vector<16x96xf32> to vector<16x32xf32>
    %538 = vector.shape_cast %537 : vector<16x32xf32> to vector<2x8x32xf32>
    %539 = arith.truncf %538 : vector<2x8x32xf32> to vector<2x8x32xbf16>
    %540 = vector.extract_strided_slice %533 {offsets = [0, 0, 0], sizes = [2, 8, 8], strides = [1, 1, 1]} : vector<2x8x32xbf16> to vector<2x8x8xbf16>
    %541 = vector.extract_strided_slice %536 {offsets = [0, 0, 0], sizes = [2, 8, 8], strides = [1, 1, 1]} : vector<2x8x32xbf16> to vector<2x8x8xbf16>
    %542 = vector.extract_strided_slice %539 {offsets = [0, 0, 0], sizes = [2, 8, 8], strides = [1, 1, 1]} : vector<2x8x32xbf16> to vector<2x8x8xbf16>
    "tpu.trace_start"() <{level = 10 : i32, message = "bqd,bkd->bqk"}> : () -> ()
    %cst_211 = arith.constant dense<0.000000e+00> : vector<2x8x8xf32>
    %543 = tpu.matmul %540, %541, %cst_211 {dimension_numbers = #tpu.dot_dimension_numbers<[2], [2], [1], [1], [0, 0, 0, 1, 1, 1], [0], [0]>} : vector<2x8x8xbf16>, vector<2x8x8xbf16>, vector<2x8x8xf32> -> vector<2x8x8xf32>
    "tpu.trace_stop"() : () -> ()
    %544 = arith.addf %543, %2 : vector<2x8x8xf32>
    %cst_212 = arith.constant dense<0xFF800000> : vector<2x8xf32>
    %545 = vector.multi_reduction <maximumf>, %544, %cst_212 [2] : vector<2x8x8xf32> to vector<2x8xf32>
    %546 = vector.shape_cast %545 : vector<2x8xf32> to vector<2x8x1xf32>
    %547 = vector.broadcast %546 : vector<2x8x1xf32> to vector<2x8x8xf32>
    %548 = arith.subf %544, %547 : vector<2x8x8xf32>
    %549 = math.exp %548 : vector<2x8x8xf32>
    %cst_213 = arith.constant dense<0.000000e+00> : vector<2x8xf32>
    %550 = vector.multi_reduction <add>, %549, %cst_213 [2] : vector<2x8x8xf32> to vector<2x8xf32>
    %551 = vector.shape_cast %550 : vector<2x8xf32> to vector<2x8x1xf32>
    %552 = tpu.reciprocal %551 {approx = true} : vector<2x8x1xf32> -> vector<2x8x1xf32>
    %553 = arith.truncf %549 : vector<2x8x8xf32> to vector<2x8x8xbf16>
    "tpu.trace_start"() <{level = 10 : i32, message = "bqk,bkd->bqd"}> : () -> ()
    %cst_214 = arith.constant dense<0.000000e+00> : vector<2x8x8xf32>
    %554 = tpu.matmul %553, %542, %cst_214 {dimension_numbers = #tpu.dot_dimension_numbers<[2], [1], [1], [2], [0, 0, 0, 1, 1, 2], [0], [0]>} : vector<2x8x8xbf16>, vector<2x8x8xbf16>, vector<2x8x8xf32> -> vector<2x8x8xf32>
    "tpu.trace_stop"() : () -> ()
    %555 = vector.broadcast %552 : vector<2x8x1xf32> to vector<2x8x8xf32>
    %556 = arith.mulf %554, %555 : vector<2x8x8xf32>
    %557 = vector.extract_strided_slice %533 {offsets = [0, 0, 8], sizes = [2, 8, 8], strides = [1, 1, 1]} : vector<2x8x32xbf16> to vector<2x8x8xbf16>
    %558 = vector.extract_strided_slice %536 {offsets = [0, 0, 8], sizes = [2, 8, 8], strides = [1, 1, 1]} : vector<2x8x32xbf16> to vector<2x8x8xbf16>
    %559 = vector.extract_strided_slice %539 {offsets = [0, 0, 8], sizes = [2, 8, 8], strides = [1, 1, 1]} : vector<2x8x32xbf16> to vector<2x8x8xbf16>
    "tpu.trace_start"() <{level = 10 : i32, message = "bqd,bkd->bqk"}> : () -> ()
    %cst_215 = arith.constant dense<0.000000e+00> : vector<2x8x8xf32>
    %560 = tpu.matmul %557, %558, %cst_215 {dimension_numbers = #tpu.dot_dimension_numbers<[2], [2], [1], [1], [0, 0, 0, 1, 1, 1], [0], [0]>} : vector<2x8x8xbf16>, vector<2x8x8xbf16>, vector<2x8x8xf32> -> vector<2x8x8xf32>
    "tpu.trace_stop"() : () -> ()
    %561 = arith.addf %560, %2 : vector<2x8x8xf32>
    %cst_216 = arith.constant dense<0xFF800000> : vector<2x8xf32>
    %562 = vector.multi_reduction <maximumf>, %561, %cst_216 [2] : vector<2x8x8xf32> to vector<2x8xf32>
    %563 = vector.shape_cast %562 : vector<2x8xf32> to vector<2x8x1xf32>
    %564 = vector.broadcast %563 : vector<2x8x1xf32> to vector<2x8x8xf32>
    %565 = arith.subf %561, %564 : vector<2x8x8xf32>
    %566 = math.exp %565 : vector<2x8x8xf32>
    %cst_217 = arith.constant dense<0.000000e+00> : vector<2x8xf32>
    %567 = vector.multi_reduction <add>, %566, %cst_217 [2] : vector<2x8x8xf32> to vector<2x8xf32>
    %568 = vector.shape_cast %567 : vector<2x8xf32> to vector<2x8x1xf32>
    %569 = tpu.reciprocal %568 {approx = true} : vector<2x8x1xf32> -> vector<2x8x1xf32>
    %570 = arith.truncf %566 : vector<2x8x8xf32> to vector<2x8x8xbf16>
    "tpu.trace_start"() <{level = 10 : i32, message = "bqk,bkd->bqd"}> : () -> ()
    %cst_218 = arith.constant dense<0.000000e+00> : vector<2x8x8xf32>
    %571 = tpu.matmul %570, %559, %cst_218 {dimension_numbers = #tpu.dot_dimension_numbers<[2], [1], [1], [2], [0, 0, 0, 1, 1, 2], [0], [0]>} : vector<2x8x8xbf16>, vector<2x8x8xbf16>, vector<2x8x8xf32> -> vector<2x8x8xf32>
    "tpu.trace_stop"() : () -> ()
    %572 = vector.broadcast %569 : vector<2x8x1xf32> to vector<2x8x8xf32>
    %573 = arith.mulf %571, %572 : vector<2x8x8xf32>
    %574 = vector.extract_strided_slice %533 {offsets = [0, 0, 16], sizes = [2, 8, 8], strides = [1, 1, 1]} : vector<2x8x32xbf16> to vector<2x8x8xbf16>
    %575 = vector.extract_strided_slice %536 {offsets = [0, 0, 16], sizes = [2, 8, 8], strides = [1, 1, 1]} : vector<2x8x32xbf16> to vector<2x8x8xbf16>
    %576 = vector.extract_strided_slice %539 {offsets = [0, 0, 16], sizes = [2, 8, 8], strides = [1, 1, 1]} : vector<2x8x32xbf16> to vector<2x8x8xbf16>
    "tpu.trace_start"() <{level = 10 : i32, message = "bqd,bkd->bqk"}> : () -> ()
    %cst_219 = arith.constant dense<0.000000e+00> : vector<2x8x8xf32>
    %577 = tpu.matmul %574, %575, %cst_219 {dimension_numbers = #tpu.dot_dimension_numbers<[2], [2], [1], [1], [0, 0, 0, 1, 1, 1], [0], [0]>} : vector<2x8x8xbf16>, vector<2x8x8xbf16>, vector<2x8x8xf32> -> vector<2x8x8xf32>
    "tpu.trace_stop"() : () -> ()
    %578 = arith.addf %577, %2 : vector<2x8x8xf32>
    %cst_220 = arith.constant dense<0xFF800000> : vector<2x8xf32>
    %579 = vector.multi_reduction <maximumf>, %578, %cst_220 [2] : vector<2x8x8xf32> to vector<2x8xf32>
    %580 = vector.shape_cast %579 : vector<2x8xf32> to vector<2x8x1xf32>
    %581 = vector.broadcast %580 : vector<2x8x1xf32> to vector<2x8x8xf32>
    %582 = arith.subf %578, %581 : vector<2x8x8xf32>
    %583 = math.exp %582 : vector<2x8x8xf32>
    %cst_221 = arith.constant dense<0.000000e+00> : vector<2x8xf32>
    %584 = vector.multi_reduction <add>, %583, %cst_221 [2] : vector<2x8x8xf32> to vector<2x8xf32>
    %585 = vector.shape_cast %584 : vector<2x8xf32> to vector<2x8x1xf32>
    %586 = tpu.reciprocal %585 {approx = true} : vector<2x8x1xf32> -> vector<2x8x1xf32>
    %587 = arith.truncf %583 : vector<2x8x8xf32> to vector<2x8x8xbf16>
    "tpu.trace_start"() <{level = 10 : i32, message = "bqk,bkd->bqd"}> : () -> ()
    %cst_222 = arith.constant dense<0.000000e+00> : vector<2x8x8xf32>
    %588 = tpu.matmul %587, %576, %cst_222 {dimension_numbers = #tpu.dot_dimension_numbers<[2], [1], [1], [2], [0, 0, 0, 1, 1, 2], [0], [0]>} : vector<2x8x8xbf16>, vector<2x8x8xbf16>, vector<2x8x8xf32> -> vector<2x8x8xf32>
    "tpu.trace_stop"() : () -> ()
    %589 = vector.broadcast %586 : vector<2x8x1xf32> to vector<2x8x8xf32>
    %590 = arith.mulf %588, %589 : vector<2x8x8xf32>
    %591 = vector.extract_strided_slice %533 {offsets = [0, 0, 24], sizes = [2, 8, 8], strides = [1, 1, 1]} : vector<2x8x32xbf16> to vector<2x8x8xbf16>
    %592 = vector.extract_strided_slice %536 {offsets = [0, 0, 24], sizes = [2, 8, 8], strides = [1, 1, 1]} : vector<2x8x32xbf16> to vector<2x8x8xbf16>
    %593 = vector.extract_strided_slice %539 {offsets = [0, 0, 24], sizes = [2, 8, 8], strides = [1, 1, 1]} : vector<2x8x32xbf16> to vector<2x8x8xbf16>
    "tpu.trace_start"() <{level = 10 : i32, message = "bqd,bkd->bqk"}> : () -> ()
    %cst_223 = arith.constant dense<0.000000e+00> : vector<2x8x8xf32>
    %594 = tpu.matmul %591, %592, %cst_223 {dimension_numbers = #tpu.dot_dimension_numbers<[2], [2], [1], [1], [0, 0, 0, 1, 1, 1], [0], [0]>} : vector<2x8x8xbf16>, vector<2x8x8xbf16>, vector<2x8x8xf32> -> vector<2x8x8xf32>
    "tpu.trace_stop"() : () -> ()
    %595 = arith.addf %594, %2 : vector<2x8x8xf32>
    %cst_224 = arith.constant dense<0xFF800000> : vector<2x8xf32>
    %596 = vector.multi_reduction <maximumf>, %595, %cst_224 [2] : vector<2x8x8xf32> to vector<2x8xf32>
    %597 = vector.shape_cast %596 : vector<2x8xf32> to vector<2x8x1xf32>
    %598 = vector.broadcast %597 : vector<2x8x1xf32> to vector<2x8x8xf32>
    %599 = arith.subf %595, %598 : vector<2x8x8xf32>
    %600 = math.exp %599 : vector<2x8x8xf32>
    %cst_225 = arith.constant dense<0.000000e+00> : vector<2x8xf32>
    %601 = vector.multi_reduction <add>, %600, %cst_225 [2] : vector<2x8x8xf32> to vector<2x8xf32>
    %602 = vector.shape_cast %601 : vector<2x8xf32> to vector<2x8x1xf32>
    %603 = tpu.reciprocal %602 {approx = true} : vector<2x8x1xf32> -> vector<2x8x1xf32>
    %604 = arith.truncf %600 : vector<2x8x8xf32> to vector<2x8x8xbf16>
    "tpu.trace_start"() <{level = 10 : i32, message = "bqk,bkd->bqd"}> : () -> ()
    %cst_226 = arith.constant dense<0.000000e+00> : vector<2x8x8xf32>
    %605 = tpu.matmul %604, %593, %cst_226 {dimension_numbers = #tpu.dot_dimension_numbers<[2], [1], [1], [2], [0, 0, 0, 1, 1, 2], [0], [0]>} : vector<2x8x8xbf16>, vector<2x8x8xbf16>, vector<2x8x8xf32> -> vector<2x8x8xf32>
    "tpu.trace_stop"() : () -> ()
    %606 = vector.broadcast %603 : vector<2x8x1xf32> to vector<2x8x8xf32>
    %607 = arith.mulf %605, %606 : vector<2x8x8xf32>
    %608 = tpu.concatenate %556, %573, %590, %607 in 2 : vector<2x8x8xf32>, vector<2x8x8xf32>, vector<2x8x8xf32>, vector<2x8x8xf32> -> vector<2x8x32xf32>
    %609 = vector.shape_cast %608 : vector<2x8x32xf32> to vector<16x32xf32>
    %610 = arith.truncf %609 : vector<16x32xf32> to vector<16x32xbf16>
    %c1_227 = arith.constant 1 : index
    %c0_228 = arith.constant 0 : index
    %c0_229 = arith.constant 0 : index
    %611 = vector.load %arg18[%c1_227, %c0_228, %c0_229] : memref<2x32x32xbf16, #tpu.memory_space<vmem>>, vector<1x32x32xbf16>
    %612 = vector.shape_cast %611 : vector<1x32x32xbf16> to vector<32x32xbf16>
    %cst_230 = arith.constant dense<0.000000e+00> : vector<16x32xf32>
    %613 = tpu.matmul %610, %612, %cst_230 {dimension_numbers = #tpu.dot_dimension_numbers<[1], [0], [0], [1], [0, 0, 1, 1], [], []>} : vector<16x32xbf16>, vector<32x32xbf16>, vector<16x32xf32> -> vector<16x32xf32>
    %614 = arith.addf %498, %613 : vector<16x32xf32>
    %c1_231 = arith.constant 1 : index
    %c0_232 = arith.constant 0 : index
    %c0_233 = arith.constant 0 : index
    %615 = vector.load %arg19[%c1_231, %c0_232, %c0_233] : memref<2x1x32xf32, #tpu.memory_space<vmem>>, vector<1x1x32xf32>
    %616 = vector.shape_cast %615 : vector<1x1x32xf32> to vector<1x32xf32>
    %c1_234 = arith.constant 1 : index
    %c0_235 = arith.constant 0 : index
    %c0_236 = arith.constant 0 : index
    %617 = vector.load %arg20[%c1_234, %c0_235, %c0_236] : memref<2x1x32xf32, #tpu.memory_space<vmem>>, vector<1x1x32xf32>
    %618 = vector.shape_cast %617 : vector<1x1x32xf32> to vector<1x32xf32>
    %cst_237 = arith.constant dense<0.000000e+00> : vector<16xf32>
    %619 = vector.multi_reduction <add>, %614, %cst_237 [1] : vector<16x32xf32> to vector<16xf32>
    %620 = vector.shape_cast %619 : vector<16xf32> to vector<16x1xf32>
    %cst_238 = arith.constant 3.200000e+01 : f32
    %621 = vector.broadcast %cst_238 : f32 to vector<16x1xf32>
    %622 = arith.divf %620, %621 : vector<16x1xf32>
    %623 = vector.broadcast %622 : vector<16x1xf32> to vector<16x32xf32>
    %624 = arith.subf %614, %623 : vector<16x32xf32>
    %625 = arith.mulf %624, %624 : vector<16x32xf32>
    %cst_239 = arith.constant dense<0.000000e+00> : vector<16xf32>
    %626 = vector.multi_reduction <add>, %625, %cst_239 [1] : vector<16x32xf32> to vector<16xf32>
    %627 = vector.shape_cast %626 : vector<16xf32> to vector<16x1xf32>
    %cst_240 = arith.constant 3.200000e+01 : f32
    %628 = vector.broadcast %cst_240 : f32 to vector<16x1xf32>
    %629 = arith.divf %627, %628 : vector<16x1xf32>
    %630 = vector.broadcast %622 : vector<16x1xf32> to vector<16x32xf32>
    %631 = arith.subf %614, %630 : vector<16x32xf32>
    %cst_241 = arith.constant 9.99999974E-6 : f32
    %632 = vector.broadcast %cst_241 : f32 to vector<16x1xf32>
    %633 = arith.addf %629, %632 : vector<16x1xf32>
    %634 = math.rsqrt %633 : vector<16x1xf32>
    %635 = vector.broadcast %634 : vector<16x1xf32> to vector<16x32xf32>
    %636 = arith.mulf %631, %635 : vector<16x32xf32>
    %637 = vector.broadcast %616 : vector<1x32xf32> to vector<16x32xf32>
    %638 = arith.mulf %636, %637 : vector<16x32xf32>
    %639 = vector.broadcast %618 : vector<1x32xf32> to vector<16x32xf32>
    %640 = arith.addf %638, %639 : vector<16x32xf32>
    %641 = arith.truncf %640 : vector<16x32xf32> to vector<16x32xbf16>
    %c1_242 = arith.constant 1 : index
    %c0_243 = arith.constant 0 : index
    %c0_244 = arith.constant 0 : index
    %642 = vector.load %arg21[%c1_242, %c0_243, %c0_244] : memref<2x32x128xbf16, #tpu.memory_space<vmem>>, vector<1x32x128xbf16>
    %643 = vector.shape_cast %642 : vector<1x32x128xbf16> to vector<32x128xbf16>
    %cst_245 = arith.constant dense<0.000000e+00> : vector<16x128xf32>
    %644 = tpu.matmul %641, %643, %cst_245 {dimension_numbers = #tpu.dot_dimension_numbers<[1], [0], [0], [1], [0, 0, 1, 1], [], []>} : vector<16x32xbf16>, vector<32x128xbf16>, vector<16x128xf32> -> vector<16x128xf32>
    %645 = arith.mulf %644, %644 : vector<16x128xf32>
    %646 = arith.mulf %644, %645 : vector<16x128xf32>
    %cst_246 = arith.constant 4.471500e-02 : f32
    %647 = vector.broadcast %cst_246 : f32 to vector<16x128xf32>
    %648 = arith.mulf %647, %646 : vector<16x128xf32>
    %649 = arith.addf %644, %648 : vector<16x128xf32>
    %cst_247 = arith.constant 0.797884583 : f32
    %650 = vector.broadcast %cst_247 : f32 to vector<16x128xf32>
    %651 = arith.mulf %650, %649 : vector<16x128xf32>
    %652 = math.tanh %651 : vector<16x128xf32>
    %cst_248 = arith.constant 1.000000e+00 : f32
    %653 = vector.broadcast %cst_248 : f32 to vector<16x128xf32>
    %654 = arith.addf %653, %652 : vector<16x128xf32>
    %cst_249 = arith.constant 5.000000e-01 : f32
    %655 = vector.broadcast %cst_249 : f32 to vector<16x128xf32>
    %656 = arith.mulf %655, %654 : vector<16x128xf32>
    %657 = arith.mulf %644, %656 : vector<16x128xf32>
    %658 = arith.truncf %657 : vector<16x128xf32> to vector<16x128xbf16>
    %c1_250 = arith.constant 1 : index
    %c0_251 = arith.constant 0 : index
    %c0_252 = arith.constant 0 : index
    %659 = vector.load %arg22[%c1_250, %c0_251, %c0_252] : memref<2x128x32xbf16, #tpu.memory_space<vmem>>, vector<1x128x32xbf16>
    %660 = vector.shape_cast %659 : vector<1x128x32xbf16> to vector<128x32xbf16>
    %cst_253 = arith.constant dense<0.000000e+00> : vector<16x32xf32>
    %661 = tpu.matmul %658, %660, %cst_253 {dimension_numbers = #tpu.dot_dimension_numbers<[1], [0], [0], [1], [0, 0, 1, 1], [], []>} : vector<16x128xbf16>, vector<128x32xbf16>, vector<16x32xf32> -> vector<16x32xf32>
    %662 = arith.addf %614, %661 : vector<16x32xf32>
    %c0_254 = arith.constant 0 : index
    %c0_255 = arith.constant 0 : index
    %663 = vector.load %arg23[%c0_254, %c0_255] : memref<1x32xf32, #tpu.memory_space<vmem>>, vector<1x32xf32>
    %c0_256 = arith.constant 0 : index
    %c0_257 = arith.constant 0 : index
    %664 = vector.load %arg24[%c0_256, %c0_257] : memref<1x32xf32, #tpu.memory_space<vmem>>, vector<1x32xf32>
    %cst_258 = arith.constant dense<0.000000e+00> : vector<16xf32>
    %665 = vector.multi_reduction <add>, %662, %cst_258 [1] : vector<16x32xf32> to vector<16xf32>
    %666 = vector.shape_cast %665 : vector<16xf32> to vector<16x1xf32>
    %cst_259 = arith.constant 3.200000e+01 : f32
    %667 = vector.broadcast %cst_259 : f32 to vector<16x1xf32>
    %668 = arith.divf %666, %667 : vector<16x1xf32>
    %669 = vector.broadcast %668 : vector<16x1xf32> to vector<16x32xf32>
    %670 = arith.subf %662, %669 : vector<16x32xf32>
    %671 = arith.mulf %670, %670 : vector<16x32xf32>
    %cst_260 = arith.constant dense<0.000000e+00> : vector<16xf32>
    %672 = vector.multi_reduction <add>, %671, %cst_260 [1] : vector<16x32xf32> to vector<16xf32>
    %673 = vector.shape_cast %672 : vector<16xf32> to vector<16x1xf32>
    %cst_261 = arith.constant 3.200000e+01 : f32
    %674 = vector.broadcast %cst_261 : f32 to vector<16x1xf32>
    %675 = arith.divf %673, %674 : vector<16x1xf32>
    %676 = vector.broadcast %668 : vector<16x1xf32> to vector<16x32xf32>
    %677 = arith.subf %662, %676 : vector<16x32xf32>
    %cst_262 = arith.constant 9.99999974E-6 : f32
    %678 = vector.broadcast %cst_262 : f32 to vector<16x1xf32>
    %679 = arith.addf %675, %678 : vector<16x1xf32>
    %680 = math.rsqrt %679 : vector<16x1xf32>
    %681 = vector.broadcast %680 : vector<16x1xf32> to vector<16x32xf32>
    %682 = arith.mulf %677, %681 : vector<16x32xf32>
    %683 = vector.broadcast %663 : vector<1x32xf32> to vector<16x32xf32>
    %684 = arith.mulf %682, %683 : vector<16x32xf32>
    %685 = vector.broadcast %664 : vector<1x32xf32> to vector<16x32xf32>
    %686 = arith.addf %684, %685 : vector<16x32xf32>
    %687 = arith.truncf %686 : vector<16x32xf32> to vector<16x32xbf16>
    %c0_263 = arith.constant 0 : index
    %c0_264 = arith.constant 0 : index
    %688 = vector.load %arg25[%c0_263, %c0_264] : memref<32x128xbf16, #tpu.memory_space<vmem>>, vector<32x128xbf16>
    %cst_265 = arith.constant dense<0.000000e+00> : vector<16x128xf32>
    %689 = tpu.matmul %687, %688, %cst_265 {dimension_numbers = #tpu.dot_dimension_numbers<[1], [0], [0], [1], [0, 0, 1, 1], [], []>} : vector<16x32xbf16>, vector<32x128xbf16>, vector<16x128xf32> -> vector<16x128xf32>
    %c0_266 = arith.constant 0 : index
    %c0_267 = arith.constant 0 : index
    %690 = vector.load %arg26[%c0_266, %c0_267] : memref<16x128xf32, #tpu.memory_space<vmem>>, vector<16x128xf32>
    tpu.vector_store %arg26[%c0_266, %c0_267], %689 {strides = array<i32>} : memref<16x128xf32, #tpu.memory_space<vmem>>, vector<16x128xf32>,
    return
  }
  func.func @transform_0(%arg0: i32) -> (i32, i32) {
    %c0_i32 = arith.constant 0 : i32
    %c0_i32_0 = arith.constant 0 : i32
    %c0_i32_1 = arith.constant 0 : i32
    return %c0_i32, %c0_i32_0 : i32, i32
  }
  func.func @transform_1(%arg0: i32) -> (i32, i32, i32) {
    %c0_i32 = arith.constant 0 : i32
    %c0_i32_0 = arith.constant 0 : i32
    %c0_i32_1 = arith.constant 0 : i32
    %c0_i32_2 = arith.constant 0 : i32
    return %c0_i32, %c0_i32_0, %c0_i32_1 : i32, i32, i32
  }
  func.func @transform_2(%arg0: i32) -> (i32, i32, i32) {
    %c0_i32 = arith.constant 0 : i32
    %c0_i32_0 = arith.constant 0 : i32
    %c0_i32_1 = arith.constant 0 : i32
    %c0_i32_2 = arith.constant 0 : i32
    return %c0_i32, %c0_i32_0, %c0_i32_1 : i32, i32, i32
  }
  func.func @transform_3(%arg0: i32) -> (i32, i32) {
    %c0_i32 = arith.constant 0 : i32
    %c0_i32_0 = arith.constant 0 : i32
    %c0_i32_1 = arith.constant 0 : i32
    return %c0_i32, %c0_i32_0 : i32, i32
  }
  func.func @transform_4(%arg0: i32) -> (i32, i32, i32) {
    %c0_i32 = arith.constant 0 : i32
    %c0_i32_0 = arith.constant 0 : i32
    %c0_i32_1 = arith.constant 0 : i32
    %c0_i32_2 = arith.constant 0 : i32
    return %c0_i32, %c0_i32_0, %c0_i32_1 : i32, i32, i32
  }
  func.func @transform_5(%arg0: i32) -> (i32, i32, i32) {
    %c0_i32 = arith.constant 0 : i32
    %c0_i32_0 = arith.constant 0 : i32
    %c0_i32_1 = arith.constant 0 : i32
    %c0_i32_2 = arith.constant 0 : i32
    return %c0_i32, %c0_i32_0, %c0_i32_1 : i32, i32, i32
  }
  func.func @transform_6(%arg0: i32) -> (i32, i32, i32) {
    %c0_i32 = arith.constant 0 : i32
    %c0_i32_0 = arith.constant 0 : i32
    %c0_i32_1 = arith.constant 0 : i32
    %c0_i32_2 = arith.constant 0 : i32
    return %c0_i32, %c0_i32_0, %c0_i32_1 : i32, i32, i32
  }
  func.func @transform_7(%arg0: i32) -> (i32, i32, i32) {
    %c0_i32 = arith.constant 0 : i32
    %c0_i32_0 = arith.constant 0 : i32
    %c0_i32_1 = arith.constant 0 : i32
    %c0_i32_2 = arith.constant 0 : i32
    return %c0_i32, %c0_i32_0, %c0_i32_1 : i32, i32, i32
  }
  func.func @transform_8(%arg0: i32) -> (i32, i32, i32) {
    %c0_i32 = arith.constant 0 : i32
    %c0_i32_0 = arith.constant 0 : i32
    %c0_i32_1 = arith.constant 0 : i32
    %c0_i32_2 = arith.constant 0 : i32
    return %c0_i32, %c0_i32_0, %c0_i32_1 : i32, i32, i32
  }
  func.func @transform_9(%arg0: i32) -> (i32, i32, i32) {
    %c0_i32 = arith.constant 0 : i32
    %c0_i32_0 = arith.constant 0 : i32
    %c0_i32_1 = arith.constant 0 : i32
    %c0_i32_2 = arith.constant 0 : i32
    return %c0_i32, %c0_i32_0, %c0_i32_1 : i32, i32, i32
  }
  func.func @transform_10(%arg0: i32) -> (i32, i32, i32) {
    %c0_i32 = arith.constant 0 : i32
    %c0_i32_0 = arith.constant 0 : i32
    %c0_i32_1 = arith.constant 0 : i32
    %c0_i32_2 = arith.constant 0 : i32
    return %c0_i32, %c0_i32_0, %c0_i32_1 : i32, i32, i32
  }
  func.func @transform_11(%arg0: i32) -> (i32, i32, i32) {
    %c0_i32 = arith.constant 0 : i32
    %c0_i32_0 = arith.constant 0 : i32
    %c0_i32_1 = arith.constant 0 : i32
    %c0_i32_2 = arith.constant 0 : i32
    return %c0_i32, %c0_i32_0, %c0_i32_1 : i32, i32, i32
  }
  func.func @transform_12(%arg0: i32) -> (i32, i32, i32) {
    %c0_i32 = arith.constant 0 : i32
    %c0_i32_0 = arith.constant 0 : i32
    %c0_i32_1 = arith.constant 0 : i32
    %c0_i32_2 = arith.constant 0 : i32
    return %c0_i32, %c0_i32_0, %c0_i32_1 : i32, i32, i32
  }
  func.func @transform_13(%arg0: i32) -> (i32, i32, i32) {
    %c0_i32 = arith.constant 0 : i32
    %c0_i32_0 = arith.constant 0 : i32
    %c0_i32_1 = arith.constant 0 : i32
    %c0_i32_2 = arith.constant 0 : i32
    return %c0_i32, %c0_i32_0, %c0_i32_1 : i32, i32, i32
  }
  func.func @transform_14(%arg0: i32) -> (i32, i32, i32) {
    %c0_i32 = arith.constant 0 : i32
    %c0_i32_0 = arith.constant 0 : i32
    %c0_i32_1 = arith.constant 0 : i32
    %c0_i32_2 = arith.constant 0 : i32
    return %c0_i32, %c0_i32_0, %c0_i32_1 : i32, i32, i32
  }
  func.func @transform_15(%arg0: i32) -> (i32, i32, i32) {
    %c0_i32 = arith.constant 0 : i32
    %c0_i32_0 = arith.constant 0 : i32
    %c0_i32_1 = arith.constant 0 : i32
    %c0_i32_2 = arith.constant 0 : i32
    return %c0_i32, %c0_i32_0, %c0_i32_1 : i32, i32, i32
  }
  func.func @transform_16(%arg0: i32) -> (i32, i32, i32) {
    %c0_i32 = arith.constant 0 : i32
    %c0_i32_0 = arith.constant 0 : i32
    %c0_i32_1 = arith.constant 0 : i32
    %c0_i32_2 = arith.constant 0 : i32
    return %c0_i32, %c0_i32_0, %c0_i32_1 : i32, i32, i32
  }
  func.func @transform_17(%arg0: i32) -> (i32, i32, i32) {
    %c0_i32 = arith.constant 0 : i32
    %c0_i32_0 = arith.constant 0 : i32
    %c0_i32_1 = arith.constant 0 : i32
    %c0_i32_2 = arith.constant 0 : i32
    return %c0_i32, %c0_i32_0, %c0_i32_1 : i32, i32, i32
  }
  func.func @transform_18(%arg0: i32) -> (i32, i32, i32) {
    %c0_i32 = arith.constant 0 : i32
    %c0_i32_0 = arith.constant 0 : i32
    %c0_i32_1 = arith.constant 0 : i32
    %c0_i32_2 = arith.constant 0 : i32
    return %c0_i32, %c0_i32_0, %c0_i32_1 : i32, i32, i32
  }
  func.func @transform_19(%arg0: i32) -> (i32, i32, i32) {
    %c0_i32 = arith.constant 0 : i32
    %c0_i32_0 = arith.constant 0 : i32
    %c0_i32_1 = arith.constant 0 : i32
    %c0_i32_2 = arith.constant 0 : i32
    return %c0_i32, %c0_i32_0, %c0_i32_1 : i32, i32, i32
  }
  func.func @transform_20(%arg0: i32) -> (i32, i32, i32) {
    %c0_i32 = arith.constant 0 : i32
    %c0_i32_0 = arith.constant 0 : i32
    %c0_i32_1 = arith.constant 0 : i32
    %c0_i32_2 = arith.constant 0 : i32
    return %c0_i32, %c0_i32_0, %c0_i32_1 : i32, i32, i32
  }
  func.func @transform_21(%arg0: i32) -> (i32, i32, i32) {
    %c0_i32 = arith.constant 0 : i32
    %c0_i32_0 = arith.constant 0 : i32
    %c0_i32_1 = arith.constant 0 : i32
    %c0_i32_2 = arith.constant 0 : i32
    return %c0_i32, %c0_i32_0, %c0_i32_1 : i32, i32, i32
  }
  func.func @transform_22(%arg0: i32) -> (i32, i32) {
    %c0_i32 = arith.constant 0 : i32
    %c0_i32_0 = arith.constant 0 : i32
    %c0_i32_1 = arith.constant 0 : i32
    return %c0_i32, %c0_i32_0 : i32, i32
  }
  func.func @transform_23(%arg0: i32) -> (i32, i32) {
    %c0_i32 = arith.constant 0 : i32
    %c0_i32_0 = arith.constant 0 : i32
    %c0_i32_1 = arith.constant 0 : i32
    return %c0_i32, %c0_i32_0 : i32, i32
  }
  func.func @transform_24(%arg0: i32) -> (i32, i32) {
    %c0_i32 = arith.constant 0 : i32
    %c0_i32_0 = arith.constant 0 : i32
    %c0_i32_1 = arith.constant 0 : i32
    return %c0_i32, %c0_i32_0 : i32, i32
  }
  func.func @transform_25(%arg0: i32) -> (i32, i32) {
    %c0_i32 = arith.constant 0 : i32
    %c0_i32_0 = arith.constant 0 : i32
    %c0_i32_1 = arith.constant 0 : i32
    return %c0_i32, %c0_i32_0 : i32, i32
  }
}

module attributes {stable_mosaic.version = 11 : i64} {
  func.func @_vision_kernel(%arg0: i32, %arg1: memref<32x48xbf16, #tpu.memory_space<vmem>>, %arg2: memref<48x32xbf16, #tpu.memory_space<vmem>>, %arg3: memref<16x32xf32, #tpu.memory_space<vmem>>, %arg4: memref<8x32xf32, #tpu.memory_space<vmem>>, %arg5: memref<2x1x32xf32, #tpu.memory_space<vmem>>, %arg6: memref<2x1x32xf32, #tpu.memory_space<vmem>>, %arg7: memref<2x1x32xf32, #tpu.memory_space<vmem>>, %arg8: memref<2x1x32xf32, #tpu.memory_space<vmem>>, %arg9: memref<2x32x32xbf16, #tpu.memory_space<vmem>>, %arg10: memref<2x32x64xbf16, #tpu.memory_space<vmem>>, %arg11: memref<2x32x32xbf16, #tpu.memory_space<vmem>>, %arg12: memref<2x1x32xf32, #tpu.memory_space<vmem>>, %arg13: memref<2x1x32xf32, #tpu.memory_space<vmem>>, %arg14: memref<2x32x128xbf16, #tpu.memory_space<vmem>>, %arg15: memref<2x128x32xbf16, #tpu.memory_space<vmem>>, %arg16: memref<1x32xf32, #tpu.memory_space<vmem>>, %arg17: memref<1x32xf32, #tpu.memory_space<vmem>>, %arg18: memref<16x32xf32, #tpu.memory_space<vmem>>) attributes {dimension_semantics = [#tpu.dimension_semantics<arbitrary>], iteration_bounds = array<i64: 1>, scalar_prefetch = 0 : i64, scratch_operands = 0 : i64, tpu.core_type = #tpu.core_type<tc>, window_params = [{pipeline_mode = #tpu.pipeline_mode<synchronous>, transform_indices = @transform_0, window_bounds = array<i64: 32, 48>}, {pipeline_mode = #tpu.pipeline_mode<synchronous>, transform_indices = @transform_1, window_bounds = array<i64: 48, 32>}, {pipeline_mode = #tpu.pipeline_mode<synchronous>, transform_indices = @transform_2, window_bounds = array<i64: 16, 32>}, {pipeline_mode = #tpu.pipeline_mode<synchronous>, transform_indices = @transform_3, window_bounds = array<i64: 8, 32>}, {pipeline_mode = #tpu.pipeline_mode<synchronous>, transform_indices = @transform_4, window_bounds = array<i64: 2, 1, 32>}, {pipeline_mode = #tpu.pipeline_mode<synchronous>, transform_indices = @transform_5, window_bounds = array<i64: 2, 1, 32>}, {pipeline_mode = #tpu.pipeline_mode<synchronous>, transform_indices = @transform_6, window_bounds = array<i64: 2, 1, 32>}, {pipeline_mode = #tpu.pipeline_mode<synchronous>, transform_indices = @transform_7, window_bounds = array<i64: 2, 1, 32>}, {pipeline_mode = #tpu.pipeline_mode<synchronous>, transform_indices = @transform_8, window_bounds = array<i64: 2, 32, 32>}, {pipeline_mode = #tpu.pipeline_mode<synchronous>, transform_indices = @transform_9, window_bounds = array<i64: 2, 32, 64>}, {pipeline_mode = #tpu.pipeline_mode<synchronous>, transform_indices = @transform_10, window_bounds = array<i64: 2, 32, 32>}, {pipeline_mode = #tpu.pipeline_mode<synchronous>, transform_indices = @transform_11, window_bounds = array<i64: 2, 1, 32>}, {pipeline_mode = #tpu.pipeline_mode<synchronous>, transform_indices = @transform_12, window_bounds = array<i64: 2, 1, 32>}, {pipeline_mode = #tpu.pipeline_mode<synchronous>, transform_indices = @transform_13, window_bounds = array<i64: 2, 32, 128>}, {pipeline_mode = #tpu.pipeline_mode<synchronous>, transform_indices = @transform_14, window_bounds = array<i64: 2, 128, 32>}, {pipeline_mode = #tpu.pipeline_mode<synchronous>, transform_indices = @transform_15, window_bounds = array<i64: 1, 32>}, {pipeline_mode = #tpu.pipeline_mode<synchronous>, transform_indices = @transform_16, window_bounds = array<i64: 1, 32>}, {pipeline_mode = #tpu.pipeline_mode<synchronous>, transform_indices = @transform_17, window_bounds = array<i64: 16, 32>}]} {
    %c0 = arith.constant 0 : index
    %c0_0 = arith.constant 0 : index
    %0 = vector.load %arg1[%c0, %c0_0] : memref<32x48xbf16, #tpu.memory_space<vmem>>, vector<32x48xbf16>
    %c0_1 = arith.constant 0 : index
    %c0_2 = arith.constant 0 : index
    %1 = vector.load %arg2[%c0_1, %c0_2] : memref<48x32xbf16, #tpu.memory_space<vmem>>, vector<48x32xbf16>
    %cst = arith.constant dense<0.000000e+00> : vector<32x32xf32>
    %2 = tpu.matmul %0, %1, %cst {dimension_numbers = #tpu.dot_dimension_numbers<[1], [0], [0], [1], [0, 0, 1, 1], [], []>} : vector<32x48xbf16>, vector<48x32xbf16>, vector<32x32xf32> -> vector<32x32xf32>
    %3 = vector.shape_cast %2 : vector<32x32xf32> to vector<2x16x32xf32>
    %c0_3 = arith.constant 0 : index
    %c0_4 = arith.constant 0 : index
    %4 = vector.load %arg3[%c0_3, %c0_4] : memref<16x32xf32, #tpu.memory_space<vmem>>, vector<16x32xf32>
    %5 = vector.shape_cast %4 : vector<16x32xf32> to vector<1x16x32xf32>
    %6 = vector.broadcast %5 : vector<1x16x32xf32> to vector<2x16x32xf32>
    %7 = arith.addf %3, %6 : vector<2x16x32xf32>
    %c0_5 = arith.constant 0 : index
    %c0_6 = arith.constant 0 : index
    %8 = vector.load %arg4[%c0_5, %c0_6] : memref<8x32xf32, #tpu.memory_space<vmem>>, vector<8x32xf32>
    %9 = vector.shape_cast %8 : vector<8x32xf32> to vector<1x8x32xf32>
    %10 = vector.shape_cast %9 : vector<1x8x32xf32> to vector<1x8x32xf32>
    %11 = vector.broadcast %10 : vector<1x8x32xf32> to vector<2x8x32xf32>
    %c0_7 = arith.constant 0 : index
    %c0_8 = arith.constant 0 : index
    %c0_9 = arith.constant 0 : index
    %12 = vector.load %arg5[%c0_7, %c0_8, %c0_9] : memref<2x1x32xf32, #tpu.memory_space<vmem>>, vector<1x1x32xf32>
    %13 = vector.shape_cast %12 : vector<1x1x32xf32> to vector<1x32xf32>
    %c0_10 = arith.constant 0 : index
    %c0_11 = arith.constant 0 : index
    %c0_12 = arith.constant 0 : index
    %14 = vector.load %arg6[%c0_10, %c0_11, %c0_12] : memref<2x1x32xf32, #tpu.memory_space<vmem>>, vector<1x1x32xf32>
    %15 = vector.shape_cast %14 : vector<1x1x32xf32> to vector<1x32xf32>
    %cst_13 = arith.constant dense<0.000000e+00> : vector<2x16xf32>
    %16 = vector.multi_reduction <add>, %7, %cst_13 [2] : vector<2x16x32xf32> to vector<2x16xf32>
    %17 = vector.shape_cast %16 : vector<2x16xf32> to vector<2x16x1xf32>
    %cst_14 = arith.constant 3.200000e+01 : f32
    %18 = vector.broadcast %cst_14 : f32 to vector<2x16x1xf32>
    %19 = arith.divf %17, %18 : vector<2x16x1xf32>
    %20 = vector.broadcast %19 : vector<2x16x1xf32> to vector<2x16x32xf32>
    %21 = arith.subf %7, %20 : vector<2x16x32xf32>
    %22 = arith.mulf %21, %21 : vector<2x16x32xf32>
    %cst_15 = arith.constant dense<0.000000e+00> : vector<2x16xf32>
    %23 = vector.multi_reduction <add>, %22, %cst_15 [2] : vector<2x16x32xf32> to vector<2x16xf32>
    %24 = vector.shape_cast %23 : vector<2x16xf32> to vector<2x16x1xf32>
    %cst_16 = arith.constant 3.200000e+01 : f32
    %25 = vector.broadcast %cst_16 : f32 to vector<2x16x1xf32>
    %26 = arith.divf %24, %25 : vector<2x16x1xf32>
    %27 = vector.broadcast %19 : vector<2x16x1xf32> to vector<2x16x32xf32>
    %28 = arith.subf %7, %27 : vector<2x16x32xf32>
    %cst_17 = arith.constant 9.99999974E-6 : f32
    %29 = vector.broadcast %cst_17 : f32 to vector<2x16x1xf32>
    %30 = arith.addf %26, %29 : vector<2x16x1xf32>
    %31 = math.rsqrt %30 : vector<2x16x1xf32>
    %32 = vector.broadcast %31 : vector<2x16x1xf32> to vector<2x16x32xf32>
    %33 = arith.mulf %28, %32 : vector<2x16x32xf32>
    %34 = vector.shape_cast %13 : vector<1x32xf32> to vector<1x1x32xf32>
    %35 = vector.broadcast %34 : vector<1x1x32xf32> to vector<2x16x32xf32>
    %36 = arith.mulf %33, %35 : vector<2x16x32xf32>
    %37 = vector.shape_cast %15 : vector<1x32xf32> to vector<1x1x32xf32>
    %38 = vector.broadcast %37 : vector<1x1x32xf32> to vector<2x16x32xf32>
    %39 = arith.addf %36, %38 : vector<2x16x32xf32>
    %40 = arith.truncf %39 : vector<2x16x32xf32> to vector<2x16x32xbf16>
    %c0_18 = arith.constant 0 : index
    %c0_19 = arith.constant 0 : index
    %c0_20 = arith.constant 0 : index
    %41 = vector.load %arg7[%c0_18, %c0_19, %c0_20] : memref<2x1x32xf32, #tpu.memory_space<vmem>>, vector<1x1x32xf32>
    %42 = vector.shape_cast %41 : vector<1x1x32xf32> to vector<1x32xf32>
    %c0_21 = arith.constant 0 : index
    %c0_22 = arith.constant 0 : index
    %c0_23 = arith.constant 0 : index
    %43 = vector.load %arg8[%c0_21, %c0_22, %c0_23] : memref<2x1x32xf32, #tpu.memory_space<vmem>>, vector<1x1x32xf32>
    %44 = vector.shape_cast %43 : vector<1x1x32xf32> to vector<1x32xf32>
    %cst_24 = arith.constant dense<0.000000e+00> : vector<2x8xf32>
    %45 = vector.multi_reduction <add>, %11, %cst_24 [2] : vector<2x8x32xf32> to vector<2x8xf32>
    %46 = vector.shape_cast %45 : vector<2x8xf32> to vector<2x8x1xf32>
    %cst_25 = arith.constant 3.200000e+01 : f32
    %47 = vector.broadcast %cst_25 : f32 to vector<2x8x1xf32>
    %48 = arith.divf %46, %47 : vector<2x8x1xf32>
    %49 = vector.broadcast %48 : vector<2x8x1xf32> to vector<2x8x32xf32>
    %50 = arith.subf %11, %49 : vector<2x8x32xf32>
    %51 = arith.mulf %50, %50 : vector<2x8x32xf32>
    %cst_26 = arith.constant dense<0.000000e+00> : vector<2x8xf32>
    %52 = vector.multi_reduction <add>, %51, %cst_26 [2] : vector<2x8x32xf32> to vector<2x8xf32>
    %53 = vector.shape_cast %52 : vector<2x8xf32> to vector<2x8x1xf32>
    %cst_27 = arith.constant 3.200000e+01 : f32
    %54 = vector.broadcast %cst_27 : f32 to vector<2x8x1xf32>
    %55 = arith.divf %53, %54 : vector<2x8x1xf32>
    %56 = vector.broadcast %48 : vector<2x8x1xf32> to vector<2x8x32xf32>
    %57 = arith.subf %11, %56 : vector<2x8x32xf32>
    %cst_28 = arith.constant 9.99999974E-6 : f32
    %58 = vector.broadcast %cst_28 : f32 to vector<2x8x1xf32>
    %59 = arith.addf %55, %58 : vector<2x8x1xf32>
    %60 = math.rsqrt %59 : vector<2x8x1xf32>
    %61 = vector.broadcast %60 : vector<2x8x1xf32> to vector<2x8x32xf32>
    %62 = arith.mulf %57, %61 : vector<2x8x32xf32>
    %63 = vector.shape_cast %42 : vector<1x32xf32> to vector<1x1x32xf32>
    %64 = vector.broadcast %63 : vector<1x1x32xf32> to vector<2x8x32xf32>
    %65 = arith.mulf %62, %64 : vector<2x8x32xf32>
    %66 = vector.shape_cast %44 : vector<1x32xf32> to vector<1x1x32xf32>
    %67 = vector.broadcast %66 : vector<1x1x32xf32> to vector<2x8x32xf32>
    %68 = arith.addf %65, %67 : vector<2x8x32xf32>
    %69 = arith.truncf %68 : vector<2x8x32xf32> to vector<2x8x32xbf16>
    %70 = vector.shape_cast %40 : vector<2x16x32xbf16> to vector<32x32xbf16>
    %71 = vector.shape_cast %69 : vector<2x8x32xbf16> to vector<16x32xbf16>
    %c0_29 = arith.constant 0 : index
    %c0_30 = arith.constant 0 : index
    %c0_31 = arith.constant 0 : index
    %72 = vector.load %arg9[%c0_29, %c0_30, %c0_31] : memref<2x32x32xbf16, #tpu.memory_space<vmem>>, vector<1x32x32xbf16>
    %73 = vector.shape_cast %72 : vector<1x32x32xbf16> to vector<32x32xbf16>
    %cst_32 = arith.constant dense<0.000000e+00> : vector<16x32xf32>
    %74 = tpu.matmul %71, %73, %cst_32 {dimension_numbers = #tpu.dot_dimension_numbers<[1], [0], [0], [1], [0, 0, 1, 1], [], []>} : vector<16x32xbf16>, vector<32x32xbf16>, vector<16x32xf32> -> vector<16x32xf32>
    %cst_33 = arith.constant 0.353553385 : f32
    %75 = vector.broadcast %cst_33 : f32 to vector<16x32xf32>
    %76 = arith.mulf %74, %75 : vector<16x32xf32>
    %77 = vector.shape_cast %76 : vector<16x32xf32> to vector<2x8x32xf32>
    %78 = arith.truncf %77 : vector<2x8x32xf32> to vector<2x8x32xbf16>
    %c0_34 = arith.constant 0 : index
    %c0_35 = arith.constant 0 : index
    %c0_36 = arith.constant 0 : index
    %79 = vector.load %arg10[%c0_34, %c0_35, %c0_36] : memref<2x32x64xbf16, #tpu.memory_space<vmem>>, vector<1x32x64xbf16>
    %80 = vector.shape_cast %79 : vector<1x32x64xbf16> to vector<32x64xbf16>
    %cst_37 = arith.constant dense<0.000000e+00> : vector<32x64xf32>
    %81 = tpu.matmul %70, %80, %cst_37 {dimension_numbers = #tpu.dot_dimension_numbers<[1], [0], [0], [1], [0, 0, 1, 1], [], []>} : vector<32x32xbf16>, vector<32x64xbf16>, vector<32x64xf32> -> vector<32x64xf32>
    %82 = vector.shape_cast %81 : vector<32x64xf32> to vector<2x16x64xf32>
    %83 = arith.truncf %82 : vector<2x16x64xf32> to vector<2x16x64xbf16>
    %c0_38 = arith.constant 0 : index
    %c0_39 = arith.constant 0 : index
    %c0_40 = arith.constant 0 : index
    %84 = vector.load %arg10[%c0_38, %c0_39, %c0_40] : memref<2x32x64xbf16, #tpu.memory_space<vmem>>, vector<1x32x64xbf16>
    %85 = vector.shape_cast %84 : vector<1x32x64xbf16> to vector<32x64xbf16>
    %cst_41 = arith.constant dense<0.000000e+00> : vector<16x64xf32>
    %86 = tpu.matmul %71, %85, %cst_41 {dimension_numbers = #tpu.dot_dimension_numbers<[1], [0], [0], [1], [0, 0, 1, 1], [], []>} : vector<16x32xbf16>, vector<32x64xbf16>, vector<16x64xf32> -> vector<16x64xf32>
    %87 = vector.shape_cast %86 : vector<16x64xf32> to vector<2x8x64xf32>
    %88 = arith.truncf %87 : vector<2x8x64xf32> to vector<2x8x64xbf16>
    %89 = vector.extract_strided_slice %78 {offsets = [0, 0, 0], sizes = [2, 8, 8], strides = [1, 1, 1]} : vector<2x8x32xbf16> to vector<2x8x8xbf16>
    %90 = vector.extract_strided_slice %83 {offsets = [0, 0, 0], sizes = [2, 16, 8], strides = [1, 1, 1]} : vector<2x16x64xbf16> to vector<2x16x8xbf16>
    "tpu.trace_start"() <{level = 10 : i32, message = "bqd,bkd->bqk"}> : () -> ()
    %cst_42 = arith.constant dense<0.000000e+00> : vector<2x8x16xf32>
    %91 = tpu.matmul %89, %90, %cst_42 {dimension_numbers = #tpu.dot_dimension_numbers<[2], [2], [1], [1], [0, 0, 0, 1, 1, 1], [0], [0]>} : vector<2x8x8xbf16>, vector<2x16x8xbf16>, vector<2x8x16xf32> -> vector<2x8x16xf32>
    "tpu.trace_stop"() : () -> ()
    %92 = vector.extract_strided_slice %78 {offsets = [0, 0, 0], sizes = [2, 8, 8], strides = [1, 1, 1]} : vector<2x8x32xbf16> to vector<2x8x8xbf16>
    %93 = vector.extract_strided_slice %88 {offsets = [0, 0, 0], sizes = [2, 8, 8], strides = [1, 1, 1]} : vector<2x8x64xbf16> to vector<2x8x8xbf16>
    "tpu.trace_start"() <{level = 10 : i32, message = "bqd,bkd->bqk"}> : () -> ()
    %cst_43 = arith.constant dense<0.000000e+00> : vector<2x8x8xf32>
    %94 = tpu.matmul %92, %93, %cst_43 {dimension_numbers = #tpu.dot_dimension_numbers<[2], [2], [1], [1], [0, 0, 0, 1, 1, 1], [0], [0]>} : vector<2x8x8xbf16>, vector<2x8x8xbf16>, vector<2x8x8xf32> -> vector<2x8x8xf32>
    "tpu.trace_stop"() : () -> ()
    %cst_44 = arith.constant dense<0xFF800000> : vector<2x8xf32>
    %95 = vector.multi_reduction <maximumf>, %91, %cst_44 [2] : vector<2x8x16xf32> to vector<2x8xf32>
    %96 = vector.shape_cast %95 : vector<2x8xf32> to vector<2x8x1xf32>
    %cst_45 = arith.constant dense<0xFF800000> : vector<2x8xf32>
    %97 = vector.multi_reduction <maximumf>, %94, %cst_45 [2] : vector<2x8x8xf32> to vector<2x8xf32>
    %98 = vector.shape_cast %97 : vector<2x8xf32> to vector<2x8x1xf32>
    %99 = arith.maximumf %96, %98 : vector<2x8x1xf32>
    %100 = vector.broadcast %99 : vector<2x8x1xf32> to vector<2x8x16xf32>
    %101 = arith.subf %91, %100 : vector<2x8x16xf32>
    %102 = math.exp %101 : vector<2x8x16xf32>
    %103 = vector.broadcast %99 : vector<2x8x1xf32> to vector<2x8x8xf32>
    %104 = arith.subf %94, %103 : vector<2x8x8xf32>
    %105 = math.exp %104 : vector<2x8x8xf32>
    %cst_46 = arith.constant dense<0.000000e+00> : vector<2x8xf32>
    %106 = vector.multi_reduction <add>, %102, %cst_46 [2] : vector<2x8x16xf32> to vector<2x8xf32>
    %107 = vector.shape_cast %106 : vector<2x8xf32> to vector<2x8x1xf32>
    %cst_47 = arith.constant dense<0.000000e+00> : vector<2x8xf32>
    %108 = vector.multi_reduction <add>, %105, %cst_47 [2] : vector<2x8x8xf32> to vector<2x8xf32>
    %109 = vector.shape_cast %108 : vector<2x8xf32> to vector<2x8x1xf32>
    %110 = arith.addf %107, %109 : vector<2x8x1xf32>
    %111 = tpu.reciprocal %110 {approx = true} : vector<2x8x1xf32> -> vector<2x8x1xf32>
    %112 = arith.truncf %102 : vector<2x8x16xf32> to vector<2x8x16xbf16>
    %113 = vector.extract_strided_slice %83 {offsets = [0, 0, 32], sizes = [2, 16, 8], strides = [1, 1, 1]} : vector<2x16x64xbf16> to vector<2x16x8xbf16>
    "tpu.trace_start"() <{level = 10 : i32, message = "bqk,bkd->bqd"}> : () -> ()
    %cst_48 = arith.constant dense<0.000000e+00> : vector<2x8x8xf32>
    %114 = tpu.matmul %112, %113, %cst_48 {dimension_numbers = #tpu.dot_dimension_numbers<[2], [1], [1], [2], [0, 0, 0, 1, 1, 2], [0], [0]>} : vector<2x8x16xbf16>, vector<2x16x8xbf16>, vector<2x8x8xf32> -> vector<2x8x8xf32>
    "tpu.trace_stop"() : () -> ()
    %115 = arith.truncf %105 : vector<2x8x8xf32> to vector<2x8x8xbf16>
    %116 = vector.extract_strided_slice %88 {offsets = [0, 0, 32], sizes = [2, 8, 8], strides = [1, 1, 1]} : vector<2x8x64xbf16> to vector<2x8x8xbf16>
    "tpu.trace_start"() <{level = 10 : i32, message = "bqk,bkd->bqd"}> : () -> ()
    %cst_49 = arith.constant dense<0.000000e+00> : vector<2x8x8xf32>
    %117 = tpu.matmul %115, %116, %cst_49 {dimension_numbers = #tpu.dot_dimension_numbers<[2], [1], [1], [2], [0, 0, 0, 1, 1, 2], [0], [0]>} : vector<2x8x8xbf16>, vector<2x8x8xbf16>, vector<2x8x8xf32> -> vector<2x8x8xf32>
    "tpu.trace_stop"() : () -> ()
    %118 = arith.addf %114, %117 : vector<2x8x8xf32>
    %119 = vector.broadcast %111 : vector<2x8x1xf32> to vector<2x8x8xf32>
    %120 = arith.mulf %118, %119 : vector<2x8x8xf32>
    %121 = vector.extract_strided_slice %78 {offsets = [0, 0, 8], sizes = [2, 8, 8], strides = [1, 1, 1]} : vector<2x8x32xbf16> to vector<2x8x8xbf16>
    %122 = vector.extract_strided_slice %83 {offsets = [0, 0, 8], sizes = [2, 16, 8], strides = [1, 1, 1]} : vector<2x16x64xbf16> to vector<2x16x8xbf16>
    "tpu.trace_start"() <{level = 10 : i32, message = "bqd,bkd->bqk"}> : () -> ()
    %cst_50 = arith.constant dense<0.000000e+00> : vector<2x8x16xf32>
    %123 = tpu.matmul %121, %122, %cst_50 {dimension_numbers = #tpu.dot_dimension_numbers<[2], [2], [1], [1], [0, 0, 0, 1, 1, 1], [0], [0]>} : vector<2x8x8xbf16>, vector<2x16x8xbf16>, vector<2x8x16xf32> -> vector<2x8x16xf32>
    "tpu.trace_stop"() : () -> ()
    %124 = vector.extract_strided_slice %78 {offsets = [0, 0, 8], sizes = [2, 8, 8], strides = [1, 1, 1]} : vector<2x8x32xbf16> to vector<2x8x8xbf16>
    %125 = vector.extract_strided_slice %88 {offsets = [0, 0, 8], sizes = [2, 8, 8], strides = [1, 1, 1]} : vector<2x8x64xbf16> to vector<2x8x8xbf16>
    "tpu.trace_start"() <{level = 10 : i32, message = "bqd,bkd->bqk"}> : () -> ()
    %cst_51 = arith.constant dense<0.000000e+00> : vector<2x8x8xf32>
    %126 = tpu.matmul %124, %125, %cst_51 {dimension_numbers = #tpu.dot_dimension_numbers<[2], [2], [1], [1], [0, 0, 0, 1, 1, 1], [0], [0]>} : vector<2x8x8xbf16>, vector<2x8x8xbf16>, vector<2x8x8xf32> -> vector<2x8x8xf32>
    "tpu.trace_stop"() : () -> ()
    %cst_52 = arith.constant dense<0xFF800000> : vector<2x8xf32>
    %127 = vector.multi_reduction <maximumf>, %123, %cst_52 [2] : vector<2x8x16xf32> to vector<2x8xf32>
    %128 = vector.shape_cast %127 : vector<2x8xf32> to vector<2x8x1xf32>
    %cst_53 = arith.constant dense<0xFF800000> : vector<2x8xf32>
    %129 = vector.multi_reduction <maximumf>, %126, %cst_53 [2] : vector<2x8x8xf32> to vector<2x8xf32>
    %130 = vector.shape_cast %129 : vector<2x8xf32> to vector<2x8x1xf32>
    %131 = arith.maximumf %128, %130 : vector<2x8x1xf32>
    %132 = vector.broadcast %131 : vector<2x8x1xf32> to vector<2x8x16xf32>
    %133 = arith.subf %123, %132 : vector<2x8x16xf32>
    %134 = math.exp %133 : vector<2x8x16xf32>
    %135 = vector.broadcast %131 : vector<2x8x1xf32> to vector<2x8x8xf32>
    %136 = arith.subf %126, %135 : vector<2x8x8xf32>
    %137 = math.exp %136 : vector<2x8x8xf32>
    %cst_54 = arith.constant dense<0.000000e+00> : vector<2x8xf32>
    %138 = vector.multi_reduction <add>, %134, %cst_54 [2] : vector<2x8x16xf32> to vector<2x8xf32>
    %139 = vector.shape_cast %138 : vector<2x8xf32> to vector<2x8x1xf32>
    %cst_55 = arith.constant dense<0.000000e+00> : vector<2x8xf32>
    %140 = vector.multi_reduction <add>, %137, %cst_55 [2] : vector<2x8x8xf32> to vector<2x8xf32>
    %141 = vector.shape_cast %140 : vector<2x8xf32> to vector<2x8x1xf32>
    %142 = arith.addf %139, %141 : vector<2x8x1xf32>
    %143 = tpu.reciprocal %142 {approx = true} : vector<2x8x1xf32> -> vector<2x8x1xf32>
    %144 = arith.truncf %134 : vector<2x8x16xf32> to vector<2x8x16xbf16>
    %145 = vector.extract_strided_slice %83 {offsets = [0, 0, 40], sizes = [2, 16, 8], strides = [1, 1, 1]} : vector<2x16x64xbf16> to vector<2x16x8xbf16>
    "tpu.trace_start"() <{level = 10 : i32, message = "bqk,bkd->bqd"}> : () -> ()
    %cst_56 = arith.constant dense<0.000000e+00> : vector<2x8x8xf32>
    %146 = tpu.matmul %144, %145, %cst_56 {dimension_numbers = #tpu.dot_dimension_numbers<[2], [1], [1], [2], [0, 0, 0, 1, 1, 2], [0], [0]>} : vector<2x8x16xbf16>, vector<2x16x8xbf16>, vector<2x8x8xf32> -> vector<2x8x8xf32>
    "tpu.trace_stop"() : () -> ()
    %147 = arith.truncf %137 : vector<2x8x8xf32> to vector<2x8x8xbf16>
    %148 = vector.extract_strided_slice %88 {offsets = [0, 0, 40], sizes = [2, 8, 8], strides = [1, 1, 1]} : vector<2x8x64xbf16> to vector<2x8x8xbf16>
    "tpu.trace_start"() <{level = 10 : i32, message = "bqk,bkd->bqd"}> : () -> ()
    %cst_57 = arith.constant dense<0.000000e+00> : vector<2x8x8xf32>
    %149 = tpu.matmul %147, %148, %cst_57 {dimension_numbers = #tpu.dot_dimension_numbers<[2], [1], [1], [2], [0, 0, 0, 1, 1, 2], [0], [0]>} : vector<2x8x8xbf16>, vector<2x8x8xbf16>, vector<2x8x8xf32> -> vector<2x8x8xf32>
    "tpu.trace_stop"() : () -> ()
    %150 = arith.addf %146, %149 : vector<2x8x8xf32>
    %151 = vector.broadcast %143 : vector<2x8x1xf32> to vector<2x8x8xf32>
    %152 = arith.mulf %150, %151 : vector<2x8x8xf32>
    %153 = vector.extract_strided_slice %78 {offsets = [0, 0, 16], sizes = [2, 8, 8], strides = [1, 1, 1]} : vector<2x8x32xbf16> to vector<2x8x8xbf16>
    %154 = vector.extract_strided_slice %83 {offsets = [0, 0, 16], sizes = [2, 16, 8], strides = [1, 1, 1]} : vector<2x16x64xbf16> to vector<2x16x8xbf16>
    "tpu.trace_start"() <{level = 10 : i32, message = "bqd,bkd->bqk"}> : () -> ()
    %cst_58 = arith.constant dense<0.000000e+00> : vector<2x8x16xf32>
    %155 = tpu.matmul %153, %154, %cst_58 {dimension_numbers = #tpu.dot_dimension_numbers<[2], [2], [1], [1], [0, 0, 0, 1, 1, 1], [0], [0]>} : vector<2x8x8xbf16>, vector<2x16x8xbf16>, vector<2x8x16xf32> -> vector<2x8x16xf32>
    "tpu.trace_stop"() : () -> ()
    %156 = vector.extract_strided_slice %78 {offsets = [0, 0, 16], sizes = [2, 8, 8], strides = [1, 1, 1]} : vector<2x8x32xbf16> to vector<2x8x8xbf16>
    %157 = vector.extract_strided_slice %88 {offsets = [0, 0, 16], sizes = [2, 8, 8], strides = [1, 1, 1]} : vector<2x8x64xbf16> to vector<2x8x8xbf16>
    "tpu.trace_start"() <{level = 10 : i32, message = "bqd,bkd->bqk"}> : () -> ()
    %cst_59 = arith.constant dense<0.000000e+00> : vector<2x8x8xf32>
    %158 = tpu.matmul %156, %157, %cst_59 {dimension_numbers = #tpu.dot_dimension_numbers<[2], [2], [1], [1], [0, 0, 0, 1, 1, 1], [0], [0]>} : vector<2x8x8xbf16>, vector<2x8x8xbf16>, vector<2x8x8xf32> -> vector<2x8x8xf32>
    "tpu.trace_stop"() : () -> ()
    %cst_60 = arith.constant dense<0xFF800000> : vector<2x8xf32>
    %159 = vector.multi_reduction <maximumf>, %155, %cst_60 [2] : vector<2x8x16xf32> to vector<2x8xf32>
    %160 = vector.shape_cast %159 : vector<2x8xf32> to vector<2x8x1xf32>
    %cst_61 = arith.constant dense<0xFF800000> : vector<2x8xf32>
    %161 = vector.multi_reduction <maximumf>, %158, %cst_61 [2] : vector<2x8x8xf32> to vector<2x8xf32>
    %162 = vector.shape_cast %161 : vector<2x8xf32> to vector<2x8x1xf32>
    %163 = arith.maximumf %160, %162 : vector<2x8x1xf32>
    %164 = vector.broadcast %163 : vector<2x8x1xf32> to vector<2x8x16xf32>
    %165 = arith.subf %155, %164 : vector<2x8x16xf32>
    %166 = math.exp %165 : vector<2x8x16xf32>
    %167 = vector.broadcast %163 : vector<2x8x1xf32> to vector<2x8x8xf32>
    %168 = arith.subf %158, %167 : vector<2x8x8xf32>
    %169 = math.exp %168 : vector<2x8x8xf32>
    %cst_62 = arith.constant dense<0.000000e+00> : vector<2x8xf32>
    %170 = vector.multi_reduction <add>, %166, %cst_62 [2] : vector<2x8x16xf32> to vector<2x8xf32>
    %171 = vector.shape_cast %170 : vector<2x8xf32> to vector<2x8x1xf32>
    %cst_63 = arith.constant dense<0.000000e+00> : vector<2x8xf32>
    %172 = vector.multi_reduction <add>, %169, %cst_63 [2] : vector<2x8x8xf32> to vector<2x8xf32>
    %173 = vector.shape_cast %172 : vector<2x8xf32> to vector<2x8x1xf32>
    %174 = arith.addf %171, %173 : vector<2x8x1xf32>
    %175 = tpu.reciprocal %174 {approx = true} : vector<2x8x1xf32> -> vector<2x8x1xf32>
    %176 = arith.truncf %166 : vector<2x8x16xf32> to vector<2x8x16xbf16>
    %177 = vector.extract_strided_slice %83 {offsets = [0, 0, 48], sizes = [2, 16, 8], strides = [1, 1, 1]} : vector<2x16x64xbf16> to vector<2x16x8xbf16>
    "tpu.trace_start"() <{level = 10 : i32, message = "bqk,bkd->bqd"}> : () -> ()
    %cst_64 = arith.constant dense<0.000000e+00> : vector<2x8x8xf32>
    %178 = tpu.matmul %176, %177, %cst_64 {dimension_numbers = #tpu.dot_dimension_numbers<[2], [1], [1], [2], [0, 0, 0, 1, 1, 2], [0], [0]>} : vector<2x8x16xbf16>, vector<2x16x8xbf16>, vector<2x8x8xf32> -> vector<2x8x8xf32>
    "tpu.trace_stop"() : () -> ()
    %179 = arith.truncf %169 : vector<2x8x8xf32> to vector<2x8x8xbf16>
    %180 = vector.extract_strided_slice %88 {offsets = [0, 0, 48], sizes = [2, 8, 8], strides = [1, 1, 1]} : vector<2x8x64xbf16> to vector<2x8x8xbf16>
    "tpu.trace_start"() <{level = 10 : i32, message = "bqk,bkd->bqd"}> : () -> ()
    %cst_65 = arith.constant dense<0.000000e+00> : vector<2x8x8xf32>
    %181 = tpu.matmul %179, %180, %cst_65 {dimension_numbers = #tpu.dot_dimension_numbers<[2], [1], [1], [2], [0, 0, 0, 1, 1, 2], [0], [0]>} : vector<2x8x8xbf16>, vector<2x8x8xbf16>, vector<2x8x8xf32> -> vector<2x8x8xf32>
    "tpu.trace_stop"() : () -> ()
    %182 = arith.addf %178, %181 : vector<2x8x8xf32>
    %183 = vector.broadcast %175 : vector<2x8x1xf32> to vector<2x8x8xf32>
    %184 = arith.mulf %182, %183 : vector<2x8x8xf32>
    %185 = vector.extract_strided_slice %78 {offsets = [0, 0, 24], sizes = [2, 8, 8], strides = [1, 1, 1]} : vector<2x8x32xbf16> to vector<2x8x8xbf16>
    %186 = vector.extract_strided_slice %83 {offsets = [0, 0, 24], sizes = [2, 16, 8], strides = [1, 1, 1]} : vector<2x16x64xbf16> to vector<2x16x8xbf16>
    "tpu.trace_start"() <{level = 10 : i32, message = "bqd,bkd->bqk"}> : () -> ()
    %cst_66 = arith.constant dense<0.000000e+00> : vector<2x8x16xf32>
    %187 = tpu.matmul %185, %186, %cst_66 {dimension_numbers = #tpu.dot_dimension_numbers<[2], [2], [1], [1], [0, 0, 0, 1, 1, 1], [0], [0]>} : vector<2x8x8xbf16>, vector<2x16x8xbf16>, vector<2x8x16xf32> -> vector<2x8x16xf32>
    "tpu.trace_stop"() : () -> ()
    %188 = vector.extract_strided_slice %78 {offsets = [0, 0, 24], sizes = [2, 8, 8], strides = [1, 1, 1]} : vector<2x8x32xbf16> to vector<2x8x8xbf16>
    %189 = vector.extract_strided_slice %88 {offsets = [0, 0, 24], sizes = [2, 8, 8], strides = [1, 1, 1]} : vector<2x8x64xbf16> to vector<2x8x8xbf16>
    "tpu.trace_start"() <{level = 10 : i32, message = "bqd,bkd->bqk"}> : () -> ()
    %cst_67 = arith.constant dense<0.000000e+00> : vector<2x8x8xf32>
    %190 = tpu.matmul %188, %189, %cst_67 {dimension_numbers = #tpu.dot_dimension_numbers<[2], [2], [1], [1], [0, 0, 0, 1, 1, 1], [0], [0]>} : vector<2x8x8xbf16>, vector<2x8x8xbf16>, vector<2x8x8xf32> -> vector<2x8x8xf32>
    "tpu.trace_stop"() : () -> ()
    %cst_68 = arith.constant dense<0xFF800000> : vector<2x8xf32>
    %191 = vector.multi_reduction <maximumf>, %187, %cst_68 [2] : vector<2x8x16xf32> to vector<2x8xf32>
    %192 = vector.shape_cast %191 : vector<2x8xf32> to vector<2x8x1xf32>
    %cst_69 = arith.constant dense<0xFF800000> : vector<2x8xf32>
    %193 = vector.multi_reduction <maximumf>, %190, %cst_69 [2] : vector<2x8x8xf32> to vector<2x8xf32>
    %194 = vector.shape_cast %193 : vector<2x8xf32> to vector<2x8x1xf32>
    %195 = arith.maximumf %192, %194 : vector<2x8x1xf32>
    %196 = vector.broadcast %195 : vector<2x8x1xf32> to vector<2x8x16xf32>
    %197 = arith.subf %187, %196 : vector<2x8x16xf32>
    %198 = math.exp %197 : vector<2x8x16xf32>
    %199 = vector.broadcast %195 : vector<2x8x1xf32> to vector<2x8x8xf32>
    %200 = arith.subf %190, %199 : vector<2x8x8xf32>
    %201 = math.exp %200 : vector<2x8x8xf32>
    %cst_70 = arith.constant dense<0.000000e+00> : vector<2x8xf32>
    %202 = vector.multi_reduction <add>, %198, %cst_70 [2] : vector<2x8x16xf32> to vector<2x8xf32>
    %203 = vector.shape_cast %202 : vector<2x8xf32> to vector<2x8x1xf32>
    %cst_71 = arith.constant dense<0.000000e+00> : vector<2x8xf32>
    %204 = vector.multi_reduction <add>, %201, %cst_71 [2] : vector<2x8x8xf32> to vector<2x8xf32>
    %205 = vector.shape_cast %204 : vector<2x8xf32> to vector<2x8x1xf32>
    %206 = arith.addf %203, %205 : vector<2x8x1xf32>
    %207 = tpu.reciprocal %206 {approx = true} : vector<2x8x1xf32> -> vector<2x8x1xf32>
    %208 = arith.truncf %198 : vector<2x8x16xf32> to vector<2x8x16xbf16>
    %209 = vector.extract_strided_slice %83 {offsets = [0, 0, 56], sizes = [2, 16, 8], strides = [1, 1, 1]} : vector<2x16x64xbf16> to vector<2x16x8xbf16>
    "tpu.trace_start"() <{level = 10 : i32, message = "bqk,bkd->bqd"}> : () -> ()
    %cst_72 = arith.constant dense<0.000000e+00> : vector<2x8x8xf32>
    %210 = tpu.matmul %208, %209, %cst_72 {dimension_numbers = #tpu.dot_dimension_numbers<[2], [1], [1], [2], [0, 0, 0, 1, 1, 2], [0], [0]>} : vector<2x8x16xbf16>, vector<2x16x8xbf16>, vector<2x8x8xf32> -> vector<2x8x8xf32>
    "tpu.trace_stop"() : () -> ()
    %211 = arith.truncf %201 : vector<2x8x8xf32> to vector<2x8x8xbf16>
    %212 = vector.extract_strided_slice %88 {offsets = [0, 0, 56], sizes = [2, 8, 8], strides = [1, 1, 1]} : vector<2x8x64xbf16> to vector<2x8x8xbf16>
    "tpu.trace_start"() <{level = 10 : i32, message = "bqk,bkd->bqd"}> : () -> ()
    %cst_73 = arith.constant dense<0.000000e+00> : vector<2x8x8xf32>
    %213 = tpu.matmul %211, %212, %cst_73 {dimension_numbers = #tpu.dot_dimension_numbers<[2], [1], [1], [2], [0, 0, 0, 1, 1, 2], [0], [0]>} : vector<2x8x8xbf16>, vector<2x8x8xbf16>, vector<2x8x8xf32> -> vector<2x8x8xf32>
    "tpu.trace_stop"() : () -> ()
    %214 = arith.addf %210, %213 : vector<2x8x8xf32>
    %215 = vector.broadcast %207 : vector<2x8x1xf32> to vector<2x8x8xf32>
    %216 = arith.mulf %214, %215 : vector<2x8x8xf32>
    %217 = tpu.concatenate %120, %152, %184, %216 in 2 : vector<2x8x8xf32>, vector<2x8x8xf32>, vector<2x8x8xf32>, vector<2x8x8xf32> -> vector<2x8x32xf32>
    %218 = vector.shape_cast %217 : vector<2x8x32xf32> to vector<16x32xf32>
    %219 = arith.truncf %218 : vector<16x32xf32> to vector<16x32xbf16>
    %c0_74 = arith.constant 0 : index
    %c0_75 = arith.constant 0 : index
    %c0_76 = arith.constant 0 : index
    %220 = vector.load %arg11[%c0_74, %c0_75, %c0_76] : memref<2x32x32xbf16, #tpu.memory_space<vmem>>, vector<1x32x32xbf16>
    %221 = vector.shape_cast %220 : vector<1x32x32xbf16> to vector<32x32xbf16>
    %cst_77 = arith.constant dense<0.000000e+00> : vector<16x32xf32>
    %222 = tpu.matmul %219, %221, %cst_77 {dimension_numbers = #tpu.dot_dimension_numbers<[1], [0], [0], [1], [0, 0, 1, 1], [], []>} : vector<16x32xbf16>, vector<32x32xbf16>, vector<16x32xf32> -> vector<16x32xf32>
    %223 = vector.shape_cast %222 : vector<16x32xf32> to vector<2x8x32xf32>
    %224 = arith.addf %11, %223 : vector<2x8x32xf32>
    %c0_78 = arith.constant 0 : index
    %c0_79 = arith.constant 0 : index
    %c0_80 = arith.constant 0 : index
    %225 = vector.load %arg12[%c0_78, %c0_79, %c0_80] : memref<2x1x32xf32, #tpu.memory_space<vmem>>, vector<1x1x32xf32>
    %226 = vector.shape_cast %225 : vector<1x1x32xf32> to vector<1x32xf32>
    %c0_81 = arith.constant 0 : index
    %c0_82 = arith.constant 0 : index
    %c0_83 = arith.constant 0 : index
    %227 = vector.load %arg13[%c0_81, %c0_82, %c0_83] : memref<2x1x32xf32, #tpu.memory_space<vmem>>, vector<1x1x32xf32>
    %228 = vector.shape_cast %227 : vector<1x1x32xf32> to vector<1x32xf32>
    %cst_84 = arith.constant dense<0.000000e+00> : vector<2x8xf32>
    %229 = vector.multi_reduction <add>, %224, %cst_84 [2] : vector<2x8x32xf32> to vector<2x8xf32>
    %230 = vector.shape_cast %229 : vector<2x8xf32> to vector<2x8x1xf32>
    %cst_85 = arith.constant 3.200000e+01 : f32
    %231 = vector.broadcast %cst_85 : f32 to vector<2x8x1xf32>
    %232 = arith.divf %230, %231 : vector<2x8x1xf32>
    %233 = vector.broadcast %232 : vector<2x8x1xf32> to vector<2x8x32xf32>
    %234 = arith.subf %224, %233 : vector<2x8x32xf32>
    %235 = arith.mulf %234, %234 : vector<2x8x32xf32>
    %cst_86 = arith.constant dense<0.000000e+00> : vector<2x8xf32>
    %236 = vector.multi_reduction <add>, %235, %cst_86 [2] : vector<2x8x32xf32> to vector<2x8xf32>
    %237 = vector.shape_cast %236 : vector<2x8xf32> to vector<2x8x1xf32>
    %cst_87 = arith.constant 3.200000e+01 : f32
    %238 = vector.broadcast %cst_87 : f32 to vector<2x8x1xf32>
    %239 = arith.divf %237, %238 : vector<2x8x1xf32>
    %240 = vector.broadcast %232 : vector<2x8x1xf32> to vector<2x8x32xf32>
    %241 = arith.subf %224, %240 : vector<2x8x32xf32>
    %cst_88 = arith.constant 9.99999974E-6 : f32
    %242 = vector.broadcast %cst_88 : f32 to vector<2x8x1xf32>
    %243 = arith.addf %239, %242 : vector<2x8x1xf32>
    %244 = math.rsqrt %243 : vector<2x8x1xf32>
    %245 = vector.broadcast %244 : vector<2x8x1xf32> to vector<2x8x32xf32>
    %246 = arith.mulf %241, %245 : vector<2x8x32xf32>
    %247 = vector.shape_cast %226 : vector<1x32xf32> to vector<1x1x32xf32>
    %248 = vector.broadcast %247 : vector<1x1x32xf32> to vector<2x8x32xf32>
    %249 = arith.mulf %246, %248 : vector<2x8x32xf32>
    %250 = vector.shape_cast %228 : vector<1x32xf32> to vector<1x1x32xf32>
    %251 = vector.broadcast %250 : vector<1x1x32xf32> to vector<2x8x32xf32>
    %252 = arith.addf %249, %251 : vector<2x8x32xf32>
    %253 = arith.truncf %252 : vector<2x8x32xf32> to vector<2x8x32xbf16>
    %254 = vector.shape_cast %253 : vector<2x8x32xbf16> to vector<16x32xbf16>
    %c0_89 = arith.constant 0 : index
    %c0_90 = arith.constant 0 : index
    %c0_91 = arith.constant 0 : index
    %255 = vector.load %arg14[%c0_89, %c0_90, %c0_91] : memref<2x32x128xbf16, #tpu.memory_space<vmem>>, vector<1x32x128xbf16>
    %256 = vector.shape_cast %255 : vector<1x32x128xbf16> to vector<32x128xbf16>
    %cst_92 = arith.constant dense<0.000000e+00> : vector<16x128xf32>
    %257 = tpu.matmul %254, %256, %cst_92 {dimension_numbers = #tpu.dot_dimension_numbers<[1], [0], [0], [1], [0, 0, 1, 1], [], []>} : vector<16x32xbf16>, vector<32x128xbf16>, vector<16x128xf32> -> vector<16x128xf32>
    %258 = arith.mulf %257, %257 : vector<16x128xf32>
    %259 = arith.mulf %257, %258 : vector<16x128xf32>
    %cst_93 = arith.constant 4.471500e-02 : f32
    %260 = vector.broadcast %cst_93 : f32 to vector<16x128xf32>
    %261 = arith.mulf %260, %259 : vector<16x128xf32>
    %262 = arith.addf %257, %261 : vector<16x128xf32>
    %cst_94 = arith.constant 0.797884583 : f32
    %263 = vector.broadcast %cst_94 : f32 to vector<16x128xf32>
    %264 = arith.mulf %263, %262 : vector<16x128xf32>
    %265 = math.tanh %264 : vector<16x128xf32>
    %cst_95 = arith.constant 1.000000e+00 : f32
    %266 = vector.broadcast %cst_95 : f32 to vector<16x128xf32>
    %267 = arith.addf %266, %265 : vector<16x128xf32>
    %cst_96 = arith.constant 5.000000e-01 : f32
    %268 = vector.broadcast %cst_96 : f32 to vector<16x128xf32>
    %269 = arith.mulf %268, %267 : vector<16x128xf32>
    %270 = arith.mulf %257, %269 : vector<16x128xf32>
    %271 = arith.truncf %270 : vector<16x128xf32> to vector<16x128xbf16>
    %c0_97 = arith.constant 0 : index
    %c0_98 = arith.constant 0 : index
    %c0_99 = arith.constant 0 : index
    %272 = vector.load %arg15[%c0_97, %c0_98, %c0_99] : memref<2x128x32xbf16, #tpu.memory_space<vmem>>, vector<1x128x32xbf16>
    %273 = vector.shape_cast %272 : vector<1x128x32xbf16> to vector<128x32xbf16>
    %cst_100 = arith.constant dense<0.000000e+00> : vector<16x32xf32>
    %274 = tpu.matmul %271, %273, %cst_100 {dimension_numbers = #tpu.dot_dimension_numbers<[1], [0], [0], [1], [0, 0, 1, 1], [], []>} : vector<16x128xbf16>, vector<128x32xbf16>, vector<16x32xf32> -> vector<16x32xf32>
    %275 = vector.shape_cast %274 : vector<16x32xf32> to vector<2x8x32xf32>
    %276 = arith.addf %224, %275 : vector<2x8x32xf32>
    %c1 = arith.constant 1 : index
    %c0_101 = arith.constant 0 : index
    %c0_102 = arith.constant 0 : index
    %277 = vector.load %arg5[%c1, %c0_101, %c0_102] : memref<2x1x32xf32, #tpu.memory_space<vmem>>, vector<1x1x32xf32>
    %278 = vector.shape_cast %277 : vector<1x1x32xf32> to vector<1x32xf32>
    %c1_103 = arith.constant 1 : index
    %c0_104 = arith.constant 0 : index
    %c0_105 = arith.constant 0 : index
    %279 = vector.load %arg6[%c1_103, %c0_104, %c0_105] : memref<2x1x32xf32, #tpu.memory_space<vmem>>, vector<1x1x32xf32>
    %280 = vector.shape_cast %279 : vector<1x1x32xf32> to vector<1x32xf32>
    %cst_106 = arith.constant dense<0.000000e+00> : vector<2x16xf32>
    %281 = vector.multi_reduction <add>, %7, %cst_106 [2] : vector<2x16x32xf32> to vector<2x16xf32>
    %282 = vector.shape_cast %281 : vector<2x16xf32> to vector<2x16x1xf32>
    %cst_107 = arith.constant 3.200000e+01 : f32
    %283 = vector.broadcast %cst_107 : f32 to vector<2x16x1xf32>
    %284 = arith.divf %282, %283 : vector<2x16x1xf32>
    %285 = vector.broadcast %284 : vector<2x16x1xf32> to vector<2x16x32xf32>
    %286 = arith.subf %7, %285 : vector<2x16x32xf32>
    %287 = arith.mulf %286, %286 : vector<2x16x32xf32>
    %cst_108 = arith.constant dense<0.000000e+00> : vector<2x16xf32>
    %288 = vector.multi_reduction <add>, %287, %cst_108 [2] : vector<2x16x32xf32> to vector<2x16xf32>
    %289 = vector.shape_cast %288 : vector<2x16xf32> to vector<2x16x1xf32>
    %cst_109 = arith.constant 3.200000e+01 : f32
    %290 = vector.broadcast %cst_109 : f32 to vector<2x16x1xf32>
    %291 = arith.divf %289, %290 : vector<2x16x1xf32>
    %292 = vector.broadcast %284 : vector<2x16x1xf32> to vector<2x16x32xf32>
    %293 = arith.subf %7, %292 : vector<2x16x32xf32>
    %cst_110 = arith.constant 9.99999974E-6 : f32
    %294 = vector.broadcast %cst_110 : f32 to vector<2x16x1xf32>
    %295 = arith.addf %291, %294 : vector<2x16x1xf32>
    %296 = math.rsqrt %295 : vector<2x16x1xf32>
    %297 = vector.broadcast %296 : vector<2x16x1xf32> to vector<2x16x32xf32>
    %298 = arith.mulf %293, %297 : vector<2x16x32xf32>
    %299 = vector.shape_cast %278 : vector<1x32xf32> to vector<1x1x32xf32>
    %300 = vector.broadcast %299 : vector<1x1x32xf32> to vector<2x16x32xf32>
    %301 = arith.mulf %298, %300 : vector<2x16x32xf32>
    %302 = vector.shape_cast %280 : vector<1x32xf32> to vector<1x1x32xf32>
    %303 = vector.broadcast %302 : vector<1x1x32xf32> to vector<2x16x32xf32>
    %304 = arith.addf %301, %303 : vector<2x16x32xf32>
    %305 = arith.truncf %304 : vector<2x16x32xf32> to vector<2x16x32xbf16>
    %c1_111 = arith.constant 1 : index
    %c0_112 = arith.constant 0 : index
    %c0_113 = arith.constant 0 : index
    %306 = vector.load %arg7[%c1_111, %c0_112, %c0_113] : memref<2x1x32xf32, #tpu.memory_space<vmem>>, vector<1x1x32xf32>
    %307 = vector.shape_cast %306 : vector<1x1x32xf32> to vector<1x32xf32>
    %c1_114 = arith.constant 1 : index
    %c0_115 = arith.constant 0 : index
    %c0_116 = arith.constant 0 : index
    %308 = vector.load %arg8[%c1_114, %c0_115, %c0_116] : memref<2x1x32xf32, #tpu.memory_space<vmem>>, vector<1x1x32xf32>
    %309 = vector.shape_cast %308 : vector<1x1x32xf32> to vector<1x32xf32>
    %cst_117 = arith.constant dense<0.000000e+00> : vector<2x8xf32>
    %310 = vector.multi_reduction <add>, %276, %cst_117 [2] : vector<2x8x32xf32> to vector<2x8xf32>
    %311 = vector.shape_cast %310 : vector<2x8xf32> to vector<2x8x1xf32>
    %cst_118 = arith.constant 3.200000e+01 : f32
    %312 = vector.broadcast %cst_118 : f32 to vector<2x8x1xf32>
    %313 = arith.divf %311, %312 : vector<2x8x1xf32>
    %314 = vector.broadcast %313 : vector<2x8x1xf32> to vector<2x8x32xf32>
    %315 = arith.subf %276, %314 : vector<2x8x32xf32>
    %316 = arith.mulf %315, %315 : vector<2x8x32xf32>
    %cst_119 = arith.constant dense<0.000000e+00> : vector<2x8xf32>
    %317 = vector.multi_reduction <add>, %316, %cst_119 [2] : vector<2x8x32xf32> to vector<2x8xf32>
    %318 = vector.shape_cast %317 : vector<2x8xf32> to vector<2x8x1xf32>
    %cst_120 = arith.constant 3.200000e+01 : f32
    %319 = vector.broadcast %cst_120 : f32 to vector<2x8x1xf32>
    %320 = arith.divf %318, %319 : vector<2x8x1xf32>
    %321 = vector.broadcast %313 : vector<2x8x1xf32> to vector<2x8x32xf32>
    %322 = arith.subf %276, %321 : vector<2x8x32xf32>
    %cst_121 = arith.constant 9.99999974E-6 : f32
    %323 = vector.broadcast %cst_121 : f32 to vector<2x8x1xf32>
    %324 = arith.addf %320, %323 : vector<2x8x1xf32>
    %325 = math.rsqrt %324 : vector<2x8x1xf32>
    %326 = vector.broadcast %325 : vector<2x8x1xf32> to vector<2x8x32xf32>
    %327 = arith.mulf %322, %326 : vector<2x8x32xf32>
    %328 = vector.shape_cast %307 : vector<1x32xf32> to vector<1x1x32xf32>
    %329 = vector.broadcast %328 : vector<1x1x32xf32> to vector<2x8x32xf32>
    %330 = arith.mulf %327, %329 : vector<2x8x32xf32>
    %331 = vector.shape_cast %309 : vector<1x32xf32> to vector<1x1x32xf32>
    %332 = vector.broadcast %331 : vector<1x1x32xf32> to vector<2x8x32xf32>
    %333 = arith.addf %330, %332 : vector<2x8x32xf32>
    %334 = arith.truncf %333 : vector<2x8x32xf32> to vector<2x8x32xbf16>
    %335 = vector.shape_cast %305 : vector<2x16x32xbf16> to vector<32x32xbf16>
    %336 = vector.shape_cast %334 : vector<2x8x32xbf16> to vector<16x32xbf16>
    %c1_122 = arith.constant 1 : index
    %c0_123 = arith.constant 0 : index
    %c0_124 = arith.constant 0 : index
    %337 = vector.load %arg9[%c1_122, %c0_123, %c0_124] : memref<2x32x32xbf16, #tpu.memory_space<vmem>>, vector<1x32x32xbf16>
    %338 = vector.shape_cast %337 : vector<1x32x32xbf16> to vector<32x32xbf16>
    %cst_125 = arith.constant dense<0.000000e+00> : vector<16x32xf32>
    %339 = tpu.matmul %336, %338, %cst_125 {dimension_numbers = #tpu.dot_dimension_numbers<[1], [0], [0], [1], [0, 0, 1, 1], [], []>} : vector<16x32xbf16>, vector<32x32xbf16>, vector<16x32xf32> -> vector<16x32xf32>
    %cst_126 = arith.constant 0.353553385 : f32
    %340 = vector.broadcast %cst_126 : f32 to vector<16x32xf32>
    %341 = arith.mulf %339, %340 : vector<16x32xf32>
    %342 = vector.shape_cast %341 : vector<16x32xf32> to vector<2x8x32xf32>
    %343 = arith.truncf %342 : vector<2x8x32xf32> to vector<2x8x32xbf16>
    %c1_127 = arith.constant 1 : index
    %c0_128 = arith.constant 0 : index
    %c0_129 = arith.constant 0 : index
    %344 = vector.load %arg10[%c1_127, %c0_128, %c0_129] : memref<2x32x64xbf16, #tpu.memory_space<vmem>>, vector<1x32x64xbf16>
    %345 = vector.shape_cast %344 : vector<1x32x64xbf16> to vector<32x64xbf16>
    %cst_130 = arith.constant dense<0.000000e+00> : vector<32x64xf32>
    %346 = tpu.matmul %335, %345, %cst_130 {dimension_numbers = #tpu.dot_dimension_numbers<[1], [0], [0], [1], [0, 0, 1, 1], [], []>} : vector<32x32xbf16>, vector<32x64xbf16>, vector<32x64xf32> -> vector<32x64xf32>
    %347 = vector.shape_cast %346 : vector<32x64xf32> to vector<2x16x64xf32>
    %348 = arith.truncf %347 : vector<2x16x64xf32> to vector<2x16x64xbf16>
    %c1_131 = arith.constant 1 : index
    %c0_132 = arith.constant 0 : index
    %c0_133 = arith.constant 0 : index
    %349 = vector.load %arg10[%c1_131, %c0_132, %c0_133] : memref<2x32x64xbf16, #tpu.memory_space<vmem>>, vector<1x32x64xbf16>
    %350 = vector.shape_cast %349 : vector<1x32x64xbf16> to vector<32x64xbf16>
    %cst_134 = arith.constant dense<0.000000e+00> : vector<16x64xf32>
    %351 = tpu.matmul %336, %350, %cst_134 {dimension_numbers = #tpu.dot_dimension_numbers<[1], [0], [0], [1], [0, 0, 1, 1], [], []>} : vector<16x32xbf16>, vector<32x64xbf16>, vector<16x64xf32> -> vector<16x64xf32>
    %352 = vector.shape_cast %351 : vector<16x64xf32> to vector<2x8x64xf32>
    %353 = arith.truncf %352 : vector<2x8x64xf32> to vector<2x8x64xbf16>
    %354 = vector.extract_strided_slice %343 {offsets = [0, 0, 0], sizes = [2, 8, 8], strides = [1, 1, 1]} : vector<2x8x32xbf16> to vector<2x8x8xbf16>
    %355 = vector.extract_strided_slice %348 {offsets = [0, 0, 0], sizes = [2, 16, 8], strides = [1, 1, 1]} : vector<2x16x64xbf16> to vector<2x16x8xbf16>
    "tpu.trace_start"() <{level = 10 : i32, message = "bqd,bkd->bqk"}> : () -> ()
    %cst_135 = arith.constant dense<0.000000e+00> : vector<2x8x16xf32>
    %356 = tpu.matmul %354, %355, %cst_135 {dimension_numbers = #tpu.dot_dimension_numbers<[2], [2], [1], [1], [0, 0, 0, 1, 1, 1], [0], [0]>} : vector<2x8x8xbf16>, vector<2x16x8xbf16>, vector<2x8x16xf32> -> vector<2x8x16xf32>
    "tpu.trace_stop"() : () -> ()
    %357 = vector.extract_strided_slice %343 {offsets = [0, 0, 0], sizes = [2, 8, 8], strides = [1, 1, 1]} : vector<2x8x32xbf16> to vector<2x8x8xbf16>
    %358 = vector.extract_strided_slice %353 {offsets = [0, 0, 0], sizes = [2, 8, 8], strides = [1, 1, 1]} : vector<2x8x64xbf16> to vector<2x8x8xbf16>
    "tpu.trace_start"() <{level = 10 : i32, message = "bqd,bkd->bqk"}> : () -> ()
    %cst_136 = arith.constant dense<0.000000e+00> : vector<2x8x8xf32>
    %359 = tpu.matmul %357, %358, %cst_136 {dimension_numbers = #tpu.dot_dimension_numbers<[2], [2], [1], [1], [0, 0, 0, 1, 1, 1], [0], [0]>} : vector<2x8x8xbf16>, vector<2x8x8xbf16>, vector<2x8x8xf32> -> vector<2x8x8xf32>
    "tpu.trace_stop"() : () -> ()
    %cst_137 = arith.constant dense<0xFF800000> : vector<2x8xf32>
    %360 = vector.multi_reduction <maximumf>, %356, %cst_137 [2] : vector<2x8x16xf32> to vector<2x8xf32>
    %361 = vector.shape_cast %360 : vector<2x8xf32> to vector<2x8x1xf32>
    %cst_138 = arith.constant dense<0xFF800000> : vector<2x8xf32>
    %362 = vector.multi_reduction <maximumf>, %359, %cst_138 [2] : vector<2x8x8xf32> to vector<2x8xf32>
    %363 = vector.shape_cast %362 : vector<2x8xf32> to vector<2x8x1xf32>
    %364 = arith.maximumf %361, %363 : vector<2x8x1xf32>
    %365 = vector.broadcast %364 : vector<2x8x1xf32> to vector<2x8x16xf32>
    %366 = arith.subf %356, %365 : vector<2x8x16xf32>
    %367 = math.exp %366 : vector<2x8x16xf32>
    %368 = vector.broadcast %364 : vector<2x8x1xf32> to vector<2x8x8xf32>
    %369 = arith.subf %359, %368 : vector<2x8x8xf32>
    %370 = math.exp %369 : vector<2x8x8xf32>
    %cst_139 = arith.constant dense<0.000000e+00> : vector<2x8xf32>
    %371 = vector.multi_reduction <add>, %367, %cst_139 [2] : vector<2x8x16xf32> to vector<2x8xf32>
    %372 = vector.shape_cast %371 : vector<2x8xf32> to vector<2x8x1xf32>
    %cst_140 = arith.constant dense<0.000000e+00> : vector<2x8xf32>
    %373 = vector.multi_reduction <add>, %370, %cst_140 [2] : vector<2x8x8xf32> to vector<2x8xf32>
    %374 = vector.shape_cast %373 : vector<2x8xf32> to vector<2x8x1xf32>
    %375 = arith.addf %372, %374 : vector<2x8x1xf32>
    %376 = tpu.reciprocal %375 {approx = true} : vector<2x8x1xf32> -> vector<2x8x1xf32>
    %377 = arith.truncf %367 : vector<2x8x16xf32> to vector<2x8x16xbf16>
    %378 = vector.extract_strided_slice %348 {offsets = [0, 0, 32], sizes = [2, 16, 8], strides = [1, 1, 1]} : vector<2x16x64xbf16> to vector<2x16x8xbf16>
    "tpu.trace_start"() <{level = 10 : i32, message = "bqk,bkd->bqd"}> : () -> ()
    %cst_141 = arith.constant dense<0.000000e+00> : vector<2x8x8xf32>
    %379 = tpu.matmul %377, %378, %cst_141 {dimension_numbers = #tpu.dot_dimension_numbers<[2], [1], [1], [2], [0, 0, 0, 1, 1, 2], [0], [0]>} : vector<2x8x16xbf16>, vector<2x16x8xbf16>, vector<2x8x8xf32> -> vector<2x8x8xf32>
    "tpu.trace_stop"() : () -> ()
    %380 = arith.truncf %370 : vector<2x8x8xf32> to vector<2x8x8xbf16>
    %381 = vector.extract_strided_slice %353 {offsets = [0, 0, 32], sizes = [2, 8, 8], strides = [1, 1, 1]} : vector<2x8x64xbf16> to vector<2x8x8xbf16>
    "tpu.trace_start"() <{level = 10 : i32, message = "bqk,bkd->bqd"}> : () -> ()
    %cst_142 = arith.constant dense<0.000000e+00> : vector<2x8x8xf32>
    %382 = tpu.matmul %380, %381, %cst_142 {dimension_numbers = #tpu.dot_dimension_numbers<[2], [1], [1], [2], [0, 0, 0, 1, 1, 2], [0], [0]>} : vector<2x8x8xbf16>, vector<2x8x8xbf16>, vector<2x8x8xf32> -> vector<2x8x8xf32>
    "tpu.trace_stop"() : () -> ()
    %383 = arith.addf %379, %382 : vector<2x8x8xf32>
    %384 = vector.broadcast %376 : vector<2x8x1xf32> to vector<2x8x8xf32>
    %385 = arith.mulf %383, %384 : vector<2x8x8xf32>
    %386 = vector.extract_strided_slice %343 {offsets = [0, 0, 8], sizes = [2, 8, 8], strides = [1, 1, 1]} : vector<2x8x32xbf16> to vector<2x8x8xbf16>
    %387 = vector.extract_strided_slice %348 {offsets = [0, 0, 8], sizes = [2, 16, 8], strides = [1, 1, 1]} : vector<2x16x64xbf16> to vector<2x16x8xbf16>
    "tpu.trace_start"() <{level = 10 : i32, message = "bqd,bkd->bqk"}> : () -> ()
    %cst_143 = arith.constant dense<0.000000e+00> : vector<2x8x16xf32>
    %388 = tpu.matmul %386, %387, %cst_143 {dimension_numbers = #tpu.dot_dimension_numbers<[2], [2], [1], [1], [0, 0, 0, 1, 1, 1], [0], [0]>} : vector<2x8x8xbf16>, vector<2x16x8xbf16>, vector<2x8x16xf32> -> vector<2x8x16xf32>
    "tpu.trace_stop"() : () -> ()
    %389 = vector.extract_strided_slice %343 {offsets = [0, 0, 8], sizes = [2, 8, 8], strides = [1, 1, 1]} : vector<2x8x32xbf16> to vector<2x8x8xbf16>
    %390 = vector.extract_strided_slice %353 {offsets = [0, 0, 8], sizes = [2, 8, 8], strides = [1, 1, 1]} : vector<2x8x64xbf16> to vector<2x8x8xbf16>
    "tpu.trace_start"() <{level = 10 : i32, message = "bqd,bkd->bqk"}> : () -> ()
    %cst_144 = arith.constant dense<0.000000e+00> : vector<2x8x8xf32>
    %391 = tpu.matmul %389, %390, %cst_144 {dimension_numbers = #tpu.dot_dimension_numbers<[2], [2], [1], [1], [0, 0, 0, 1, 1, 1], [0], [0]>} : vector<2x8x8xbf16>, vector<2x8x8xbf16>, vector<2x8x8xf32> -> vector<2x8x8xf32>
    "tpu.trace_stop"() : () -> ()
    %cst_145 = arith.constant dense<0xFF800000> : vector<2x8xf32>
    %392 = vector.multi_reduction <maximumf>, %388, %cst_145 [2] : vector<2x8x16xf32> to vector<2x8xf32>
    %393 = vector.shape_cast %392 : vector<2x8xf32> to vector<2x8x1xf32>
    %cst_146 = arith.constant dense<0xFF800000> : vector<2x8xf32>
    %394 = vector.multi_reduction <maximumf>, %391, %cst_146 [2] : vector<2x8x8xf32> to vector<2x8xf32>
    %395 = vector.shape_cast %394 : vector<2x8xf32> to vector<2x8x1xf32>
    %396 = arith.maximumf %393, %395 : vector<2x8x1xf32>
    %397 = vector.broadcast %396 : vector<2x8x1xf32> to vector<2x8x16xf32>
    %398 = arith.subf %388, %397 : vector<2x8x16xf32>
    %399 = math.exp %398 : vector<2x8x16xf32>
    %400 = vector.broadcast %396 : vector<2x8x1xf32> to vector<2x8x8xf32>
    %401 = arith.subf %391, %400 : vector<2x8x8xf32>
    %402 = math.exp %401 : vector<2x8x8xf32>
    %cst_147 = arith.constant dense<0.000000e+00> : vector<2x8xf32>
    %403 = vector.multi_reduction <add>, %399, %cst_147 [2] : vector<2x8x16xf32> to vector<2x8xf32>
    %404 = vector.shape_cast %403 : vector<2x8xf32> to vector<2x8x1xf32>
    %cst_148 = arith.constant dense<0.000000e+00> : vector<2x8xf32>
    %405 = vector.multi_reduction <add>, %402, %cst_148 [2] : vector<2x8x8xf32> to vector<2x8xf32>
    %406 = vector.shape_cast %405 : vector<2x8xf32> to vector<2x8x1xf32>
    %407 = arith.addf %404, %406 : vector<2x8x1xf32>
    %408 = tpu.reciprocal %407 {approx = true} : vector<2x8x1xf32> -> vector<2x8x1xf32>
    %409 = arith.truncf %399 : vector<2x8x16xf32> to vector<2x8x16xbf16>
    %410 = vector.extract_strided_slice %348 {offsets = [0, 0, 40], sizes = [2, 16, 8], strides = [1, 1, 1]} : vector<2x16x64xbf16> to vector<2x16x8xbf16>
    "tpu.trace_start"() <{level = 10 : i32, message = "bqk,bkd->bqd"}> : () -> ()
    %cst_149 = arith.constant dense<0.000000e+00> : vector<2x8x8xf32>
    %411 = tpu.matmul %409, %410, %cst_149 {dimension_numbers = #tpu.dot_dimension_numbers<[2], [1], [1], [2], [0, 0, 0, 1, 1, 2], [0], [0]>} : vector<2x8x16xbf16>, vector<2x16x8xbf16>, vector<2x8x8xf32> -> vector<2x8x8xf32>
    "tpu.trace_stop"() : () -> ()
    %412 = arith.truncf %402 : vector<2x8x8xf32> to vector<2x8x8xbf16>
    %413 = vector.extract_strided_slice %353 {offsets = [0, 0, 40], sizes = [2, 8, 8], strides = [1, 1, 1]} : vector<2x8x64xbf16> to vector<2x8x8xbf16>
    "tpu.trace_start"() <{level = 10 : i32, message = "bqk,bkd->bqd"}> : () -> ()
    %cst_150 = arith.constant dense<0.000000e+00> : vector<2x8x8xf32>
    %414 = tpu.matmul %412, %413, %cst_150 {dimension_numbers = #tpu.dot_dimension_numbers<[2], [1], [1], [2], [0, 0, 0, 1, 1, 2], [0], [0]>} : vector<2x8x8xbf16>, vector<2x8x8xbf16>, vector<2x8x8xf32> -> vector<2x8x8xf32>
    "tpu.trace_stop"() : () -> ()
    %415 = arith.addf %411, %414 : vector<2x8x8xf32>
    %416 = vector.broadcast %408 : vector<2x8x1xf32> to vector<2x8x8xf32>
    %417 = arith.mulf %415, %416 : vector<2x8x8xf32>
    %418 = vector.extract_strided_slice %343 {offsets = [0, 0, 16], sizes = [2, 8, 8], strides = [1, 1, 1]} : vector<2x8x32xbf16> to vector<2x8x8xbf16>
    %419 = vector.extract_strided_slice %348 {offsets = [0, 0, 16], sizes = [2, 16, 8], strides = [1, 1, 1]} : vector<2x16x64xbf16> to vector<2x16x8xbf16>
    "tpu.trace_start"() <{level = 10 : i32, message = "bqd,bkd->bqk"}> : () -> ()
    %cst_151 = arith.constant dense<0.000000e+00> : vector<2x8x16xf32>
    %420 = tpu.matmul %418, %419, %cst_151 {dimension_numbers = #tpu.dot_dimension_numbers<[2], [2], [1], [1], [0, 0, 0, 1, 1, 1], [0], [0]>} : vector<2x8x8xbf16>, vector<2x16x8xbf16>, vector<2x8x16xf32> -> vector<2x8x16xf32>
    "tpu.trace_stop"() : () -> ()
    %421 = vector.extract_strided_slice %343 {offsets = [0, 0, 16], sizes = [2, 8, 8], strides = [1, 1, 1]} : vector<2x8x32xbf16> to vector<2x8x8xbf16>
    %422 = vector.extract_strided_slice %353 {offsets = [0, 0, 16], sizes = [2, 8, 8], strides = [1, 1, 1]} : vector<2x8x64xbf16> to vector<2x8x8xbf16>
    "tpu.trace_start"() <{level = 10 : i32, message = "bqd,bkd->bqk"}> : () -> ()
    %cst_152 = arith.constant dense<0.000000e+00> : vector<2x8x8xf32>
    %423 = tpu.matmul %421, %422, %cst_152 {dimension_numbers = #tpu.dot_dimension_numbers<[2], [2], [1], [1], [0, 0, 0, 1, 1, 1], [0], [0]>} : vector<2x8x8xbf16>, vector<2x8x8xbf16>, vector<2x8x8xf32> -> vector<2x8x8xf32>
    "tpu.trace_stop"() : () -> ()
    %cst_153 = arith.constant dense<0xFF800000> : vector<2x8xf32>
    %424 = vector.multi_reduction <maximumf>, %420, %cst_153 [2] : vector<2x8x16xf32> to vector<2x8xf32>
    %425 = vector.shape_cast %424 : vector<2x8xf32> to vector<2x8x1xf32>
    %cst_154 = arith.constant dense<0xFF800000> : vector<2x8xf32>
    %426 = vector.multi_reduction <maximumf>, %423, %cst_154 [2] : vector<2x8x8xf32> to vector<2x8xf32>
    %427 = vector.shape_cast %426 : vector<2x8xf32> to vector<2x8x1xf32>
    %428 = arith.maximumf %425, %427 : vector<2x8x1xf32>
    %429 = vector.broadcast %428 : vector<2x8x1xf32> to vector<2x8x16xf32>
    %430 = arith.subf %420, %429 : vector<2x8x16xf32>
    %431 = math.exp %430 : vector<2x8x16xf32>
    %432 = vector.broadcast %428 : vector<2x8x1xf32> to vector<2x8x8xf32>
    %433 = arith.subf %423, %432 : vector<2x8x8xf32>
    %434 = math.exp %433 : vector<2x8x8xf32>
    %cst_155 = arith.constant dense<0.000000e+00> : vector<2x8xf32>
    %435 = vector.multi_reduction <add>, %431, %cst_155 [2] : vector<2x8x16xf32> to vector<2x8xf32>
    %436 = vector.shape_cast %435 : vector<2x8xf32> to vector<2x8x1xf32>
    %cst_156 = arith.constant dense<0.000000e+00> : vector<2x8xf32>
    %437 = vector.multi_reduction <add>, %434, %cst_156 [2] : vector<2x8x8xf32> to vector<2x8xf32>
    %438 = vector.shape_cast %437 : vector<2x8xf32> to vector<2x8x1xf32>
    %439 = arith.addf %436, %438 : vector<2x8x1xf32>
    %440 = tpu.reciprocal %439 {approx = true} : vector<2x8x1xf32> -> vector<2x8x1xf32>
    %441 = arith.truncf %431 : vector<2x8x16xf32> to vector<2x8x16xbf16>
    %442 = vector.extract_strided_slice %348 {offsets = [0, 0, 48], sizes = [2, 16, 8], strides = [1, 1, 1]} : vector<2x16x64xbf16> to vector<2x16x8xbf16>
    "tpu.trace_start"() <{level = 10 : i32, message = "bqk,bkd->bqd"}> : () -> ()
    %cst_157 = arith.constant dense<0.000000e+00> : vector<2x8x8xf32>
    %443 = tpu.matmul %441, %442, %cst_157 {dimension_numbers = #tpu.dot_dimension_numbers<[2], [1], [1], [2], [0, 0, 0, 1, 1, 2], [0], [0]>} : vector<2x8x16xbf16>, vector<2x16x8xbf16>, vector<2x8x8xf32> -> vector<2x8x8xf32>
    "tpu.trace_stop"() : () -> ()
    %444 = arith.truncf %434 : vector<2x8x8xf32> to vector<2x8x8xbf16>
    %445 = vector.extract_strided_slice %353 {offsets = [0, 0, 48], sizes = [2, 8, 8], strides = [1, 1, 1]} : vector<2x8x64xbf16> to vector<2x8x8xbf16>
    "tpu.trace_start"() <{level = 10 : i32, message = "bqk,bkd->bqd"}> : () -> ()
    %cst_158 = arith.constant dense<0.000000e+00> : vector<2x8x8xf32>
    %446 = tpu.matmul %444, %445, %cst_158 {dimension_numbers = #tpu.dot_dimension_numbers<[2], [1], [1], [2], [0, 0, 0, 1, 1, 2], [0], [0]>} : vector<2x8x8xbf16>, vector<2x8x8xbf16>, vector<2x8x8xf32> -> vector<2x8x8xf32>
    "tpu.trace_stop"() : () -> ()
    %447 = arith.addf %443, %446 : vector<2x8x8xf32>
    %448 = vector.broadcast %440 : vector<2x8x1xf32> to vector<2x8x8xf32>
    %449 = arith.mulf %447, %448 : vector<2x8x8xf32>
    %450 = vector.extract_strided_slice %343 {offsets = [0, 0, 24], sizes = [2, 8, 8], strides = [1, 1, 1]} : vector<2x8x32xbf16> to vector<2x8x8xbf16>
    %451 = vector.extract_strided_slice %348 {offsets = [0, 0, 24], sizes = [2, 16, 8], strides = [1, 1, 1]} : vector<2x16x64xbf16> to vector<2x16x8xbf16>
    "tpu.trace_start"() <{level = 10 : i32, message = "bqd,bkd->bqk"}> : () -> ()
    %cst_159 = arith.constant dense<0.000000e+00> : vector<2x8x16xf32>
    %452 = tpu.matmul %450, %451, %cst_159 {dimension_numbers = #tpu.dot_dimension_numbers<[2], [2], [1], [1], [0, 0, 0, 1, 1, 1], [0], [0]>} : vector<2x8x8xbf16>, vector<2x16x8xbf16>, vector<2x8x16xf32> -> vector<2x8x16xf32>
    "tpu.trace_stop"() : () -> ()
    %453 = vector.extract_strided_slice %343 {offsets = [0, 0, 24], sizes = [2, 8, 8], strides = [1, 1, 1]} : vector<2x8x32xbf16> to vector<2x8x8xbf16>
    %454 = vector.extract_strided_slice %353 {offsets = [0, 0, 24], sizes = [2, 8, 8], strides = [1, 1, 1]} : vector<2x8x64xbf16> to vector<2x8x8xbf16>
    "tpu.trace_start"() <{level = 10 : i32, message = "bqd,bkd->bqk"}> : () -> ()
    %cst_160 = arith.constant dense<0.000000e+00> : vector<2x8x8xf32>
    %455 = tpu.matmul %453, %454, %cst_160 {dimension_numbers = #tpu.dot_dimension_numbers<[2], [2], [1], [1], [0, 0, 0, 1, 1, 1], [0], [0]>} : vector<2x8x8xbf16>, vector<2x8x8xbf16>, vector<2x8x8xf32> -> vector<2x8x8xf32>
    "tpu.trace_stop"() : () -> ()
    %cst_161 = arith.constant dense<0xFF800000> : vector<2x8xf32>
    %456 = vector.multi_reduction <maximumf>, %452, %cst_161 [2] : vector<2x8x16xf32> to vector<2x8xf32>
    %457 = vector.shape_cast %456 : vector<2x8xf32> to vector<2x8x1xf32>
    %cst_162 = arith.constant dense<0xFF800000> : vector<2x8xf32>
    %458 = vector.multi_reduction <maximumf>, %455, %cst_162 [2] : vector<2x8x8xf32> to vector<2x8xf32>
    %459 = vector.shape_cast %458 : vector<2x8xf32> to vector<2x8x1xf32>
    %460 = arith.maximumf %457, %459 : vector<2x8x1xf32>
    %461 = vector.broadcast %460 : vector<2x8x1xf32> to vector<2x8x16xf32>
    %462 = arith.subf %452, %461 : vector<2x8x16xf32>
    %463 = math.exp %462 : vector<2x8x16xf32>
    %464 = vector.broadcast %460 : vector<2x8x1xf32> to vector<2x8x8xf32>
    %465 = arith.subf %455, %464 : vector<2x8x8xf32>
    %466 = math.exp %465 : vector<2x8x8xf32>
    %cst_163 = arith.constant dense<0.000000e+00> : vector<2x8xf32>
    %467 = vector.multi_reduction <add>, %463, %cst_163 [2] : vector<2x8x16xf32> to vector<2x8xf32>
    %468 = vector.shape_cast %467 : vector<2x8xf32> to vector<2x8x1xf32>
    %cst_164 = arith.constant dense<0.000000e+00> : vector<2x8xf32>
    %469 = vector.multi_reduction <add>, %466, %cst_164 [2] : vector<2x8x8xf32> to vector<2x8xf32>
    %470 = vector.shape_cast %469 : vector<2x8xf32> to vector<2x8x1xf32>
    %471 = arith.addf %468, %470 : vector<2x8x1xf32>
    %472 = tpu.reciprocal %471 {approx = true} : vector<2x8x1xf32> -> vector<2x8x1xf32>
    %473 = arith.truncf %463 : vector<2x8x16xf32> to vector<2x8x16xbf16>
    %474 = vector.extract_strided_slice %348 {offsets = [0, 0, 56], sizes = [2, 16, 8], strides = [1, 1, 1]} : vector<2x16x64xbf16> to vector<2x16x8xbf16>
    "tpu.trace_start"() <{level = 10 : i32, message = "bqk,bkd->bqd"}> : () -> ()
    %cst_165 = arith.constant dense<0.000000e+00> : vector<2x8x8xf32>
    %475 = tpu.matmul %473, %474, %cst_165 {dimension_numbers = #tpu.dot_dimension_numbers<[2], [1], [1], [2], [0, 0, 0, 1, 1, 2], [0], [0]>} : vector<2x8x16xbf16>, vector<2x16x8xbf16>, vector<2x8x8xf32> -> vector<2x8x8xf32>
    "tpu.trace_stop"() : () -> ()
    %476 = arith.truncf %466 : vector<2x8x8xf32> to vector<2x8x8xbf16>
    %477 = vector.extract_strided_slice %353 {offsets = [0, 0, 56], sizes = [2, 8, 8], strides = [1, 1, 1]} : vector<2x8x64xbf16> to vector<2x8x8xbf16>
    "tpu.trace_start"() <{level = 10 : i32, message = "bqk,bkd->bqd"}> : () -> ()
    %cst_166 = arith.constant dense<0.000000e+00> : vector<2x8x8xf32>
    %478 = tpu.matmul %476, %477, %cst_166 {dimension_numbers = #tpu.dot_dimension_numbers<[2], [1], [1], [2], [0, 0, 0, 1, 1, 2], [0], [0]>} : vector<2x8x8xbf16>, vector<2x8x8xbf16>, vector<2x8x8xf32> -> vector<2x8x8xf32>
    "tpu.trace_stop"() : () -> ()
    %479 = arith.addf %475, %478 : vector<2x8x8xf32>
    %480 = vector.broadcast %472 : vector<2x8x1xf32> to vector<2x8x8xf32>
    %481 = arith.mulf %479, %480 : vector<2x8x8xf32>
    %482 = tpu.concatenate %385, %417, %449, %481 in 2 : vector<2x8x8xf32>, vector<2x8x8xf32>, vector<2x8x8xf32>, vector<2x8x8xf32> -> vector<2x8x32xf32>
    %483 = vector.shape_cast %482 : vector<2x8x32xf32> to vector<16x32xf32>
    %484 = arith.truncf %483 : vector<16x32xf32> to vector<16x32xbf16>
    %c1_167 = arith.constant 1 : index
    %c0_168 = arith.constant 0 : index
    %c0_169 = arith.constant 0 : index
    %485 = vector.load %arg11[%c1_167, %c0_168, %c0_169] : memref<2x32x32xbf16, #tpu.memory_space<vmem>>, vector<1x32x32xbf16>
    %486 = vector.shape_cast %485 : vector<1x32x32xbf16> to vector<32x32xbf16>
    %cst_170 = arith.constant dense<0.000000e+00> : vector<16x32xf32>
    %487 = tpu.matmul %484, %486, %cst_170 {dimension_numbers = #tpu.dot_dimension_numbers<[1], [0], [0], [1], [0, 0, 1, 1], [], []>} : vector<16x32xbf16>, vector<32x32xbf16>, vector<16x32xf32> -> vector<16x32xf32>
    %488 = vector.shape_cast %487 : vector<16x32xf32> to vector<2x8x32xf32>
    %489 = arith.addf %276, %488 : vector<2x8x32xf32>
    %c1_171 = arith.constant 1 : index
    %c0_172 = arith.constant 0 : index
    %c0_173 = arith.constant 0 : index
    %490 = vector.load %arg12[%c1_171, %c0_172, %c0_173] : memref<2x1x32xf32, #tpu.memory_space<vmem>>, vector<1x1x32xf32>
    %491 = vector.shape_cast %490 : vector<1x1x32xf32> to vector<1x32xf32>
    %c1_174 = arith.constant 1 : index
    %c0_175 = arith.constant 0 : index
    %c0_176 = arith.constant 0 : index
    %492 = vector.load %arg13[%c1_174, %c0_175, %c0_176] : memref<2x1x32xf32, #tpu.memory_space<vmem>>, vector<1x1x32xf32>
    %493 = vector.shape_cast %492 : vector<1x1x32xf32> to vector<1x32xf32>
    %cst_177 = arith.constant dense<0.000000e+00> : vector<2x8xf32>
    %494 = vector.multi_reduction <add>, %489, %cst_177 [2] : vector<2x8x32xf32> to vector<2x8xf32>
    %495 = vector.shape_cast %494 : vector<2x8xf32> to vector<2x8x1xf32>
    %cst_178 = arith.constant 3.200000e+01 : f32
    %496 = vector.broadcast %cst_178 : f32 to vector<2x8x1xf32>
    %497 = arith.divf %495, %496 : vector<2x8x1xf32>
    %498 = vector.broadcast %497 : vector<2x8x1xf32> to vector<2x8x32xf32>
    %499 = arith.subf %489, %498 : vector<2x8x32xf32>
    %500 = arith.mulf %499, %499 : vector<2x8x32xf32>
    %cst_179 = arith.constant dense<0.000000e+00> : vector<2x8xf32>
    %501 = vector.multi_reduction <add>, %500, %cst_179 [2] : vector<2x8x32xf32> to vector<2x8xf32>
    %502 = vector.shape_cast %501 : vector<2x8xf32> to vector<2x8x1xf32>
    %cst_180 = arith.constant 3.200000e+01 : f32
    %503 = vector.broadcast %cst_180 : f32 to vector<2x8x1xf32>
    %504 = arith.divf %502, %503 : vector<2x8x1xf32>
    %505 = vector.broadcast %497 : vector<2x8x1xf32> to vector<2x8x32xf32>
    %506 = arith.subf %489, %505 : vector<2x8x32xf32>
    %cst_181 = arith.constant 9.99999974E-6 : f32
    %507 = vector.broadcast %cst_181 : f32 to vector<2x8x1xf32>
    %508 = arith.addf %504, %507 : vector<2x8x1xf32>
    %509 = math.rsqrt %508 : vector<2x8x1xf32>
    %510 = vector.broadcast %509 : vector<2x8x1xf32> to vector<2x8x32xf32>
    %511 = arith.mulf %506, %510 : vector<2x8x32xf32>
    %512 = vector.shape_cast %491 : vector<1x32xf32> to vector<1x1x32xf32>
    %513 = vector.broadcast %512 : vector<1x1x32xf32> to vector<2x8x32xf32>
    %514 = arith.mulf %511, %513 : vector<2x8x32xf32>
    %515 = vector.shape_cast %493 : vector<1x32xf32> to vector<1x1x32xf32>
    %516 = vector.broadcast %515 : vector<1x1x32xf32> to vector<2x8x32xf32>
    %517 = arith.addf %514, %516 : vector<2x8x32xf32>
    %518 = arith.truncf %517 : vector<2x8x32xf32> to vector<2x8x32xbf16>
    %519 = vector.shape_cast %518 : vector<2x8x32xbf16> to vector<16x32xbf16>
    %c1_182 = arith.constant 1 : index
    %c0_183 = arith.constant 0 : index
    %c0_184 = arith.constant 0 : index
    %520 = vector.load %arg14[%c1_182, %c0_183, %c0_184] : memref<2x32x128xbf16, #tpu.memory_space<vmem>>, vector<1x32x128xbf16>
    %521 = vector.shape_cast %520 : vector<1x32x128xbf16> to vector<32x128xbf16>
    %cst_185 = arith.constant dense<0.000000e+00> : vector<16x128xf32>
    %522 = tpu.matmul %519, %521, %cst_185 {dimension_numbers = #tpu.dot_dimension_numbers<[1], [0], [0], [1], [0, 0, 1, 1], [], []>} : vector<16x32xbf16>, vector<32x128xbf16>, vector<16x128xf32> -> vector<16x128xf32>
    %523 = arith.mulf %522, %522 : vector<16x128xf32>
    %524 = arith.mulf %522, %523 : vector<16x128xf32>
    %cst_186 = arith.constant 4.471500e-02 : f32
    %525 = vector.broadcast %cst_186 : f32 to vector<16x128xf32>
    %526 = arith.mulf %525, %524 : vector<16x128xf32>
    %527 = arith.addf %522, %526 : vector<16x128xf32>
    %cst_187 = arith.constant 0.797884583 : f32
    %528 = vector.broadcast %cst_187 : f32 to vector<16x128xf32>
    %529 = arith.mulf %528, %527 : vector<16x128xf32>
    %530 = math.tanh %529 : vector<16x128xf32>
    %cst_188 = arith.constant 1.000000e+00 : f32
    %531 = vector.broadcast %cst_188 : f32 to vector<16x128xf32>
    %532 = arith.addf %531, %530 : vector<16x128xf32>
    %cst_189 = arith.constant 5.000000e-01 : f32
    %533 = vector.broadcast %cst_189 : f32 to vector<16x128xf32>
    %534 = arith.mulf %533, %532 : vector<16x128xf32>
    %535 = arith.mulf %522, %534 : vector<16x128xf32>
    %536 = arith.truncf %535 : vector<16x128xf32> to vector<16x128xbf16>
    %c1_190 = arith.constant 1 : index
    %c0_191 = arith.constant 0 : index
    %c0_192 = arith.constant 0 : index
    %537 = vector.load %arg15[%c1_190, %c0_191, %c0_192] : memref<2x128x32xbf16, #tpu.memory_space<vmem>>, vector<1x128x32xbf16>
    %538 = vector.shape_cast %537 : vector<1x128x32xbf16> to vector<128x32xbf16>
    %cst_193 = arith.constant dense<0.000000e+00> : vector<16x32xf32>
    %539 = tpu.matmul %536, %538, %cst_193 {dimension_numbers = #tpu.dot_dimension_numbers<[1], [0], [0], [1], [0, 0, 1, 1], [], []>} : vector<16x128xbf16>, vector<128x32xbf16>, vector<16x32xf32> -> vector<16x32xf32>
    %540 = vector.shape_cast %539 : vector<16x32xf32> to vector<2x8x32xf32>
    %541 = arith.addf %489, %540 : vector<2x8x32xf32>
    %542 = vector.shape_cast %541 : vector<2x8x32xf32> to vector<16x32xf32>
    %c0_194 = arith.constant 0 : index
    %c0_195 = arith.constant 0 : index
    %543 = vector.load %arg16[%c0_194, %c0_195] : memref<1x32xf32, #tpu.memory_space<vmem>>, vector<1x32xf32>
    %c0_196 = arith.constant 0 : index
    %c0_197 = arith.constant 0 : index
    %544 = vector.load %arg17[%c0_196, %c0_197] : memref<1x32xf32, #tpu.memory_space<vmem>>, vector<1x32xf32>
    %cst_198 = arith.constant dense<0.000000e+00> : vector<16xf32>
    %545 = vector.multi_reduction <add>, %542, %cst_198 [1] : vector<16x32xf32> to vector<16xf32>
    %546 = vector.shape_cast %545 : vector<16xf32> to vector<16x1xf32>
    %cst_199 = arith.constant 3.200000e+01 : f32
    %547 = vector.broadcast %cst_199 : f32 to vector<16x1xf32>
    %548 = arith.divf %546, %547 : vector<16x1xf32>
    %549 = vector.broadcast %548 : vector<16x1xf32> to vector<16x32xf32>
    %550 = arith.subf %542, %549 : vector<16x32xf32>
    %551 = arith.mulf %550, %550 : vector<16x32xf32>
    %cst_200 = arith.constant dense<0.000000e+00> : vector<16xf32>
    %552 = vector.multi_reduction <add>, %551, %cst_200 [1] : vector<16x32xf32> to vector<16xf32>
    %553 = vector.shape_cast %552 : vector<16xf32> to vector<16x1xf32>
    %cst_201 = arith.constant 3.200000e+01 : f32
    %554 = vector.broadcast %cst_201 : f32 to vector<16x1xf32>
    %555 = arith.divf %553, %554 : vector<16x1xf32>
    %556 = vector.broadcast %548 : vector<16x1xf32> to vector<16x32xf32>
    %557 = arith.subf %542, %556 : vector<16x32xf32>
    %cst_202 = arith.constant 9.99999974E-6 : f32
    %558 = vector.broadcast %cst_202 : f32 to vector<16x1xf32>
    %559 = arith.addf %555, %558 : vector<16x1xf32>
    %560 = math.rsqrt %559 : vector<16x1xf32>
    %561 = vector.broadcast %560 : vector<16x1xf32> to vector<16x32xf32>
    %562 = arith.mulf %557, %561 : vector<16x32xf32>
    %563 = vector.broadcast %543 : vector<1x32xf32> to vector<16x32xf32>
    %564 = arith.mulf %562, %563 : vector<16x32xf32>
    %565 = vector.broadcast %544 : vector<1x32xf32> to vector<16x32xf32>
    %566 = arith.addf %564, %565 : vector<16x32xf32>
    %c0_203 = arith.constant 0 : index
    %c0_204 = arith.constant 0 : index
    %567 = vector.load %arg18[%c0_203, %c0_204] : memref<16x32xf32, #tpu.memory_space<vmem>>, vector<16x32xf32>
    tpu.vector_store %arg18[%c0_203, %c0_204], %566 {strides = array<i32>} : memref<16x32xf32, #tpu.memory_space<vmem>>, vector<16x32xf32>,
    return
  }
  func.func @transform_0(%arg0: i32) -> (i32, i32) {
    %c0_i32 = arith.constant 0 : i32
    %c0_i32_0 = arith.constant 0 : i32
    %c0_i32_1 = arith.constant 0 : i32
    return %c0_i32, %c0_i32_0 : i32, i32
  }
  func.func @transform_1(%arg0: i32) -> (i32, i32) {
    %c0_i32 = arith.constant 0 : i32
    %c0_i32_0 = arith.constant 0 : i32
    %c0_i32_1 = arith.constant 0 : i32
    return %c0_i32, %c0_i32_0 : i32, i32
  }
  func.func @transform_2(%arg0: i32) -> (i32, i32) {
    %c0_i32 = arith.constant 0 : i32
    %c0_i32_0 = arith.constant 0 : i32
    %c0_i32_1 = arith.constant 0 : i32
    return %c0_i32, %c0_i32_0 : i32, i32
  }
  func.func @transform_3(%arg0: i32) -> (i32, i32) {
    %c0_i32 = arith.constant 0 : i32
    %c0_i32_0 = arith.constant 0 : i32
    %c0_i32_1 = arith.constant 0 : i32
    return %c0_i32, %c0_i32_0 : i32, i32
  }
  func.func @transform_4(%arg0: i32) -> (i32, i32, i32) {
    %c0_i32 = arith.constant 0 : i32
    %c0_i32_0 = arith.constant 0 : i32
    %c0_i32_1 = arith.constant 0 : i32
    %c0_i32_2 = arith.constant 0 : i32
    return %c0_i32, %c0_i32_0, %c0_i32_1 : i32, i32, i32
  }
  func.func @transform_5(%arg0: i32) -> (i32, i32, i32) {
    %c0_i32 = arith.constant 0 : i32
    %c0_i32_0 = arith.constant 0 : i32
    %c0_i32_1 = arith.constant 0 : i32
    %c0_i32_2 = arith.constant 0 : i32
    return %c0_i32, %c0_i32_0, %c0_i32_1 : i32, i32, i32
  }
  func.func @transform_6(%arg0: i32) -> (i32, i32, i32) {
    %c0_i32 = arith.constant 0 : i32
    %c0_i32_0 = arith.constant 0 : i32
    %c0_i32_1 = arith.constant 0 : i32
    %c0_i32_2 = arith.constant 0 : i32
    return %c0_i32, %c0_i32_0, %c0_i32_1 : i32, i32, i32
  }
  func.func @transform_7(%arg0: i32) -> (i32, i32, i32) {
    %c0_i32 = arith.constant 0 : i32
    %c0_i32_0 = arith.constant 0 : i32
    %c0_i32_1 = arith.constant 0 : i32
    %c0_i32_2 = arith.constant 0 : i32
    return %c0_i32, %c0_i32_0, %c0_i32_1 : i32, i32, i32
  }
  func.func @transform_8(%arg0: i32) -> (i32, i32, i32) {
    %c0_i32 = arith.constant 0 : i32
    %c0_i32_0 = arith.constant 0 : i32
    %c0_i32_1 = arith.constant 0 : i32
    %c0_i32_2 = arith.constant 0 : i32
    return %c0_i32, %c0_i32_0, %c0_i32_1 : i32, i32, i32
  }
  func.func @transform_9(%arg0: i32) -> (i32, i32, i32) {
    %c0_i32 = arith.constant 0 : i32
    %c0_i32_0 = arith.constant 0 : i32
    %c0_i32_1 = arith.constant 0 : i32
    %c0_i32_2 = arith.constant 0 : i32
    return %c0_i32, %c0_i32_0, %c0_i32_1 : i32, i32, i32
  }
  func.func @transform_10(%arg0: i32) -> (i32, i32, i32) {
    %c0_i32 = arith.constant 0 : i32
    %c0_i32_0 = arith.constant 0 : i32
    %c0_i32_1 = arith.constant 0 : i32
    %c0_i32_2 = arith.constant 0 : i32
    return %c0_i32, %c0_i32_0, %c0_i32_1 : i32, i32, i32
  }
  func.func @transform_11(%arg0: i32) -> (i32, i32, i32) {
    %c0_i32 = arith.constant 0 : i32
    %c0_i32_0 = arith.constant 0 : i32
    %c0_i32_1 = arith.constant 0 : i32
    %c0_i32_2 = arith.constant 0 : i32
    return %c0_i32, %c0_i32_0, %c0_i32_1 : i32, i32, i32
  }
  func.func @transform_12(%arg0: i32) -> (i32, i32, i32) {
    %c0_i32 = arith.constant 0 : i32
    %c0_i32_0 = arith.constant 0 : i32
    %c0_i32_1 = arith.constant 0 : i32
    %c0_i32_2 = arith.constant 0 : i32
    return %c0_i32, %c0_i32_0, %c0_i32_1 : i32, i32, i32
  }
  func.func @transform_13(%arg0: i32) -> (i32, i32, i32) {
    %c0_i32 = arith.constant 0 : i32
    %c0_i32_0 = arith.constant 0 : i32
    %c0_i32_1 = arith.constant 0 : i32
    %c0_i32_2 = arith.constant 0 : i32
    return %c0_i32, %c0_i32_0, %c0_i32_1 : i32, i32, i32
  }
  func.func @transform_14(%arg0: i32) -> (i32, i32, i32) {
    %c0_i32 = arith.constant 0 : i32
    %c0_i32_0 = arith.constant 0 : i32
    %c0_i32_1 = arith.constant 0 : i32
    %c0_i32_2 = arith.constant 0 : i32
    return %c0_i32, %c0_i32_0, %c0_i32_1 : i32, i32, i32
  }
  func.func @transform_15(%arg0: i32) -> (i32, i32) {
    %c0_i32 = arith.constant 0 : i32
    %c0_i32_0 = arith.constant 0 : i32
    %c0_i32_1 = arith.constant 0 : i32
    return %c0_i32, %c0_i32_0 : i32, i32
  }
  func.func @transform_16(%arg0: i32) -> (i32, i32) {
    %c0_i32 = arith.constant 0 : i32
    %c0_i32_0 = arith.constant 0 : i32
    %c0_i32_1 = arith.constant 0 : i32
    return %c0_i32, %c0_i32_0 : i32, i32
  }
  func.func @transform_17(%arg0: i32) -> (i32, i32) {
    %c0_i32 = arith.constant 0 : i32
    %c0_i32_0 = arith.constant 0 : i32
    %c0_i32_1 = arith.constant 0 : i32
    return %c0_i32, %c0_i32_0 : i32, i32
  }
}

</mosaic_0001>

<bundles_post_ra>
// kernel: flamingo_forward.2
= control target key start
LH: loop header
LB: loop body
LE: loop exit
PB: predicated region body
PF: predicated region fallthrough
CT: control target
= control target key end

     0   :  { %vm95_vm0 = vcmask 392192   ;;  %vm160_vm1 = vcmask 261120   ;;  %v5971_v27 = vmov 0.0   ;;  %vm5972_vm2 = vmmov 0   ;;  %s5977_s18 = smov 80   ;;  %s5978_s19 = smov 104   ;;  %s7112_s1 = inlined_call_operand.vmem [shape: bf16[48,32], index: 1, kind: input, shape index: {}]   ;;  %s7113_s0 = inlined_call_operand.vmem [shape: bf16[32,48], index: 0, kind: input, shape index: {}]   ;;  %s7114_s3 = inlined_call_operand.vmem [shape: f32[8,32], index: 3, kind: input, shape index: {}]   ;;  %s7115_s2 = inlined_call_operand.vmem [shape: f32[16,32], index: 2, kind: input, shape index: {}]   ;;  %s7116_s8 = inlined_call_operand.vmem [shape: bf16[2,32,32], index: 8, kind: input, shape index: {}]   ;;  %s7117_s9 = inlined_call_operand.vmem [shape: bf16[2,32,64], index: 9, kind: input, shape index: {}]   ;;  %s7118_s6 = inlined_call_operand.vmem [shape: f32[2,1,32], index: 6, kind: input, shape index: {}]   ;;  %s7119_s7 = inlined_call_operand.vmem [shape: f32[2,1,32], index: 7, kind: input, shape index: {}]   ;;  %s7120_s4 = inlined_call_operand.vmem [shape: f32[2,1,32], index: 4, kind: input, shape index: {}]   ;;  %s7121_s5 = inlined_call_operand.vmem [shape: f32[2,1,32], index: 5, kind: input, shape index: {}]   ;;  %s7122_s10 = inlined_call_operand.vmem [shape: bf16[2,32,32], index: 10, kind: input, shape index: {}]   ;;  %s7123_s13 = inlined_call_operand.vmem [shape: bf16[2,32,128], index: 13, kind: input, shape index: {}]   ;;  %s7124_s11 = inlined_call_operand.vmem [shape: f32[2,1,32], index: 11, kind: input, shape index: {}]   ;;  %s7125_s12 = inlined_call_operand.vmem [shape: f32[2,1,32], index: 12, kind: input, shape index: {}]   ;;  %s7126_s14 = inlined_call_operand.vmem [shape: bf16[2,128,32], index: 14, kind: input, shape index: {}]   ;;  %s7127_s15 = inlined_call_operand.vmem [shape: f32[1,32], index: 15, kind: input, shape index: {}]   ;;  %s7128_s16 = inlined_call_operand.vmem [shape: f32[1,32], index: 16, kind: input, shape index: {}]   ;;  %s7129_s17 = inlined_call_operand.vmem [shape: f32[16,32], index: 17, kind: output, shape index: {}]  }
   0x1   :  { %7132 = sst [smem:[#allocation2_spill]] %s7112_s1  ;;  %v157_v4 = vld [vmem:[%s7114_s3] sm:$0xff]  ;;  %v152_v12 = vld [vmem:[%s7115_s2 + $0x8] sm:$0xff]  ;;  %5209 = vmatprep.subr.bf16.mxu0 %v5971_v27  ;;  %5213 = vmatprep.mubr.msk.bf16.mxu0 %vm5972_vm2, %v5971_v27  ;;  %vm449_vm3 = vcmask 64512   ;;  %vm628_vm4 = vcmask 130048   ;;  %vm681_vm5 = vcmask 1043456  }
   0x2   :  { %7133 = sst [smem:[#allocation3_spill]] %s7113_s0  ;;  %s7134_s26 = sld [smem:[#allocation2_spill]]  ;;  %v238_v5 = vsel %vm160_vm1, %v157_v4, 0.0  ;;  %v151_v8 = vld [vmem:[%s7115_s2] sm:$0xff]  ;;  %v5810_v29 = vld [vmem:[%s7116_s8 + $0x8] sm:$0xff]   ;;  %vm2178_vm6 = vcmask 195584  }
   0x3   :  { %s7135_s30 = sld [smem:[#allocation3_spill]]  ;;  %239 = vadd.xlane.f32.xlu0 %v238_v5  ;;  %v5808_v26 = vld [vmem:[%s7116_s8] sm:$0xff]   ;;  %v5811_v30 = vld [vmem:[%s7117_s9 + $0x8] sm:$0xff]   ;;  %s5975_s1 = smov 88  }
   0x4   :  { %v5809_v28 = vld [vmem:[%s7117_s9] sm:$0xff]   ;;  %s5979_s0 = smov 72   ;;  %s5980_s20 = smov 8  }
   0x5   :  { %5210 = vmatpush3.bf16.msra.mxu0 %v5809_v28  ;;  %v4834_v55 = vld [vmem:[%s7118_s6] ss:$0 sm:$0xff]  ;;  %s5981_s21 = smov 16  }
   0x6   :  { %5211 = vmatprep.subr.bf16.mxu0 %v5971_v27  ;;  %v4835_v57 = vld [vmem:[%s7119_s7] ss:$0 sm:$0xff] }
   0x8   :  { %v5803_v0 = vld [vmem:[%s7134_s26] sm:$0xff]   ;;  %v5804_v1 = vld [vmem:[%s7134_s26 + $0x8] sm:$0xff]   ;;  %v5805_v3 = vld [vmem:[%s7134_s26 + $0x10] sm:$0xff]   ;;  %s5982_s26 = smov 24  }
   0x9   :  { %5183 = vmatprep.subr.bf16.mxu1 %v5803_v0  ;;  %v5806_v2 = vld [vmem:[%s7135_s30] sm:$0xff]   ;;  %v5807_v6 = vld [vmem:[%s7135_s30 + $0x8] sm:$0xff]   ;;  %5212 = vmatpush3.bf16.msra.mxu0 %v5811_v30  ;;  %s5976_s30 = smov 112  }
   0xa   :  { %5184 = vmatpush3.bf16.msra.mxu1 %v5803_v0  ;;  %5189 = vmatprep.mubr.msk.bf16.mxu1 %vm95_vm0, %v5806_v2 }
   0xb   :  { %5185 = vmatprep.subr.bf16.mxu1 %v5804_v1  ;;  %5223 = vmatprep.subr.bf16.mxu0 %v5971_v27 }
   0xe   :  { %5186 = vmatpush3.bf16.msra.mxu1 %v5804_v1 }
   0xf   :  { %5187 = vmatprep.subr.bf16.mxu1 %v5805_v3 }
  0x12   :  { %5188 = vmatpush3.bf16.msra.mxu1 %v5805_v3 }
  0x13   :  { %5193 = vmatprep.subr.bf16.mxu1 %v5971_v27 }
  0x15   :  { %5190 = vmatmul.mubr.msk.bf16.vlgmr.msra.gmra.mrb[0].mxu1 %vm95_vm0, %v5807_v6 }
  0x16   :  { %5194 = vmatpush3.bf16.msra.mxu1 %v5808_v26  ;;  %5197 = vmatprep.mubr.msk.bf16.mxu1 %vm5972_vm2, %v5971_v27 }
  0x17   :  { %5195 = vmatprep.subr.bf16.mxu1 %v5971_v27 }
  0x1a   :  { %5196 = vmatpush3.bf16.msra.mxu1 %v5810_v29 }
  0x1b   :  { %5201 = vmatprep.subr.bf16.mxu1 %v5809_v28 }
  0x90   :  { %v240_v7 = vpop.xlane.xlu0 %239 }
  0x91   :  { %v241_v10 = vmul.f32 0.03125, %v240_v7 }
  0x93   :  { %v6099_v19 = vsub.f32 %v157_v4, %v241_v10  ;;  %v4832_v10 = vld [vmem:[%s7120_s4] ss:$0 sm:$0xff] }
  0x95   :  { %v243_v23 = vmul.f32 %v6099_v19, %v6099_v19 }
  0x97   :  { %v244_v25 = vsel %vm160_vm1, %v243_v23, 0.0 }
  0xe8   :  { %v5191_v9 = vpop.f32.mrb[0].mxu1 }
  0xe9   :  { %v136_v11 = vpop.f32.mrb[1].mxu1  ;;  %v155_v20 = vadd.f32 %v5191_v9, %v151_v8 }
  0xea   :  { %v153_v13 = vadd.f32 %v151_v8, %v136_v11  ;;  %v5192_v14 = vpop.f32.mrb[2].mxu1  ;;  %v4896_v11 = vld [vmem:[%s7120_s4 + $0x1] ss:$0 sm:$0xff]  ;;  %s5973_s4 = smov 96  }
  0xeb   :  { %v139_v15 = vpop.f32.mrb[3].mxu1  ;;  %v156_v16 = vadd.f32 %v5192_v14, %v152_v12  ;;  %v167_v24 = vsel %vm160_vm1, %v155_v20, 0.0  ;;  %v4897_v14 = vld [vmem:[%s7121_s5 + $0x1] ss:$0 sm:$0xff] }
  0xec   :  { %v154_v17 = vadd.f32 %v152_v12, %v139_v15  ;;  %v161_v18 = vsel %vm160_vm1, %v153_v13, 0.0 }
  0xed   :  { %162 = vadd.xlane.f32.xlu0 %v161_v18  ;;  %v170_v22 = vsel %vm160_vm1, %v156_v16, 0.0  ;;  %v4833_v18 = vld [vmem:[%s7121_s5] ss:$0 sm:$0xff]  ;;  %s5974_s5 = smov 120  }
  0xee   :  { %v164_v21 = vsel %vm160_vm1, %v154_v17, 0.0 }
  0xef   :  { %165 = vadd.xlane.f32.xlu1 %v164_v21 }
  0xf1   :  { %171 = vadd.xlane.f32.xlu0 %v170_v22 }
  0xf3   :  { %168 = vadd.xlane.f32.xlu1 %v167_v24 }
  0xf7   :  { %245 = vadd.xlane.f32.xlu1 %v244_v25 }
 0x17a   :  { %v163_v31 = vpop.xlane.xlu0 %162 }
 0x17b   :  { %v174_v32 = vmul.f32 0.03125, %v163_v31 }
 0x17c   :  { %v166_v33 = vpop.xlane.xlu1 %165 }
 0x17d   :  { %v178_v34 = vsub.f32 %v153_v13, %v174_v32  ;;  %v175_v35 = vmul.f32 0.03125, %v166_v33 }
 0x17e   :  { %v172_v36 = vpop.xlane.xlu0 %171 }
 0x17f   :  { %v179_v37 = vsub.f32 %v154_v17, %v175_v35  ;;  %v177_v38 = vmul.f32 0.03125, %v172_v36  ;;  %v182_v39 = vmul.f32 %v178_v34, %v178_v34 }
 0x180   :  { %v169_v40 = vpop.xlane.xlu1 %168 }
 0x181   :  { %v6128_v41 = vsub.f32 %v156_v16, %v177_v38  ;;  %v176_v42 = vmul.f32 0.03125, %v169_v40  ;;  %v186_v43 = vsel %vm160_vm1, %v182_v39, 0.0  ;;  %v183_v44 = vmul.f32 %v179_v37, %v179_v37 }
 0x182   :  { %187 = vadd.xlane.f32.xlu0 %v186_v43 }
 0x183   :  { %v180_v45 = vsub.f32 %v155_v20, %v176_v42  ;;  %v189_v46 = vsel %vm160_vm1, %v183_v44, 0.0  ;;  %v185_v47 = vmul.f32 %v6128_v41, %v6128_v41 }
 0x184   :  { %190 = vadd.xlane.f32.xlu1 %v189_v46  ;;  %v246_v48 = vpop.xlane.xlu1 %245 }
 0x185   :  { %v247_v49 = vmul.f32 0.03125, %v246_v48  ;;  %v184_v50 = vmul.f32 %v180_v45, %v180_v45  ;;  %v195_v52 = vsel %vm160_vm1, %v185_v47, 0.0 }
 0x187   :  { %v248_v51 = vadd.f32 1e-05, %v247_v49  ;;  %v192_v53 = vsel %vm160_vm1, %v184_v50, 0.0 }
 0x188   :  { %196 = vadd.xlane.f32.xlu1 %v195_v52  ;;  %193 = vadd.xlane.f32.xlu0 %v192_v53 }
 0x189   :  { %5840 = vrsqrt.f32 %v248_v51 }
 0x193   :  { %v5841_v54 = vpop.eup %5840 }
 0x194   :  { %v250_v56 = vmul.f32 %v5841_v54, %v6099_v19 }
 0x196   :  { %v257_v58 = vmul.f32 %v4834_v55, %v250_v56 }
 0x198   :  { %v264_v59 = vadd.f32 %v4835_v57, %v257_v58 }
 0x19a   :  { %v4996_v60 = vpack.c.bf16 %v264_v59, %v264_v59 }
 0x19c   :  { %5198 = vmatmul.mubr.msk.bf16.vlgmr.msra.gmra.mrb[4].mxu1 %vm160_vm1, %v4996_v60  ;;  %5214 = vmatmul.mubr.msk.bf16.vlgmr.msra.gmra.mrb[0].mxu0 %vm160_vm1, %v4996_v60 }
 0x19d   :  { %5202 = vmatpush3.bf16.msra.mxu1 %v5809_v28  ;;  %5225 = vmatprep.mubr.msk.bf16.mxu0 %vm5972_vm2, %v5971_v27 }
 0x19e   :  { %5203 = vmatprep.subr.bf16.mxu1 %v5811_v30 }
 0x1a1   :  { %5204 = vmatpush3.bf16.msra.mxu1 %v5811_v30 }
 0x1a2   :  { %5217 = vmatprep.subr.bf16.mxu1 %v5971_v27 }
 0x20f   :  { %v188_v61 = vpop.xlane.xlu0 %187 }
 0x210   :  { %v198_v62 = vmul.f32 0.03125, %v188_v61 }
 0x211   :  { %v191_v63 = vpop.xlane.xlu1 %190 }
 0x212   :  { %v202_v0 = vadd.f32 1e-05, %v198_v62  ;;  %v199_v1 = vmul.f32 0.03125, %v191_v63 }
 0x214   :  { %5842 = vrsqrt.f32 %v202_v0  ;;  %v203_v2 = vadd.f32 1e-05, %v199_v1 }
 0x215   :  { %v194_v3 = vpop.xlane.xlu0 %193  ;;  %v197_v4 = vpop.xlane.xlu1 %196 }
 0x216   :  { %5844 = vrsqrt.f32 %v203_v2  ;;  %v200_v5 = vmul.f32 0.03125, %v194_v3  ;;  %v201_v6 = vmul.f32 0.03125, %v197_v4 }
 0x218   :  { %v204_v7 = vadd.f32 1e-05, %v200_v5  ;;  %v205_v8 = vadd.f32 1e-05, %v201_v6 }
 0x21a   :  { %5846 = vrsqrt.f32 %v204_v7 }
 0x21b   :  { %5848 = vrsqrt.f32 %v205_v8 }
 0x21e   :  { %v5843_v9 = vpop.eup %5842 }
 0x21f   :  { %v210_v12 = vmul.f32 %v5843_v9, %v178_v34 }
 0x220   :  { %v5845_v13 = vpop.eup %5844 }
 0x221   :  { %v211_v15 = vmul.f32 %v5845_v13, %v179_v37  ;;  %v220_v16 = vmul.f32 %v4832_v10, %v210_v12  ;;  %v2491_v17 = vmul.f32 %v4896_v11, %v210_v12 }
 0x223   :  { %v221_v19 = vmul.f32 %v4832_v10, %v211_v15  ;;  %v2492_v20 = vmul.f32 %v4896_v11, %v211_v15  ;;  %v6160_v21 = vadd.f32 %v4897_v14, %v2491_v17  ;;  %v230_v25 = vadd.f32 %v4833_v18, %v220_v16 }
 0x224   :  { %v5847_v22 = vpop.eup %5846 }
 0x225   :  { %v5849_v23 = vpop.eup %5848  ;;  %v212_v24 = vmul.f32 %v5847_v22, %v180_v45  ;;  %v231_v26 = vadd.f32 %v4833_v18, %v221_v19  ;;  %v6162_v28 = vadd.f32 %v4897_v14, %v2492_v20 }
 0x226   :  { %v213_v29 = vmul.f32 %v5849_v23, %v6128_v41 }
 0x227   :  { %v234_v30 = vpack.c.bf16 %v231_v26, %v230_v25  ;;  %v222_v31 = vmul.f32 %v4832_v10, %v212_v24  ;;  %v2505_v32 = vpack.c.bf16 %v6162_v28, %v6160_v21  ;;  %v2493_v33 = vmul.f32 %v4896_v11, %v212_v24 }
 0x228   :  { %v223_v34 = vmul.f32 %v4832_v10, %v213_v29  ;;  %v2494_v35 = vmul.f32 %v4896_v11, %v213_v29 }
 0x229   :  { %5205 = vmatprep.mubr.msk.bf16.mxu1 %vm160_vm1, %v234_v30  ;;  %v232_v36 = vadd.f32 %v4833_v18, %v222_v31  ;;  %v6168_v37 = vadd.f32 %v4897_v14, %v2493_v33 }
 0x22a   :  { %v233_v38 = vadd.f32 %v4833_v18, %v223_v34  ;;  %v6170_v39 = vadd.f32 %v4897_v14, %v2494_v35 }
 0x22c   :  { %v235_v40 = vpack.c.bf16 %v233_v38, %v232_v36  ;;  %v2506_v41 = vpack.c.bf16 %v6170_v39, %v6168_v37 }
 0x22e   :  { %5206 = vmatmul.mubr.msk.bf16.vlgmr.msra.gmra.mrb[8].mxu1 %vm160_vm1, %v235_v40 }
 0x22f   :  { %5219 = vmatprep.mubr.msk.bf16.mxu1 %vm5972_vm2, %v5971_v27 }
 0x26f   :  { %v322_v42 = vpop.f32.mrb[4].mxu1  ;;  %v440_v43 = vpop.f32.mrb[0].mxu0 }
 0x270   :  { %v5199_v44 = vpop.f32.mrb[5].mxu1  ;;  %v5215_v45 = vpop.f32.mrb[1].mxu0  ;;  %v329_v59 = vmul.f32 0.35355338, %v322_v42  ;;  %v6189_v61 = vpack.c.bf16 %v440_v43, %v440_v43 }
 0x271   :  { %v325_v46 = vpop.f32.mrb[6].mxu1  ;;  %v443_v47 = vpop.f32.mrb[2].mxu0 }
 0x272   :  { %v5200_v48 = vpop.f32.mrb[7].mxu1  ;;  %v5216_v49 = vpop.f32.mrb[3].mxu0  ;;  %v330_v58 = vmul.f32 0.35355338, %v325_v46  ;;  %v6187_v60 = vpack.c.bf16 %v443_v47, %v443_v47  ;;  %v6193_v63 = vpack.c.bf16 %v329_v59, %v329_v59  ;;  %v543_v1 = vsel %vm449_vm3, %v6189_v61, 0 }
 0x274   :  { %v6191_v62 = vpack.c.bf16 %v330_v58, %v330_v58  ;;  %v586_v0 = vsel %vm449_vm3, %v6187_v60, 0 }
 0x301   :  { %v5207_v50 = vpop.f32.mrb[8].mxu1 }
 0x302   :  { %v389_v51 = vpop.f32.mrb[9].mxu1 }
 0x303   :  { %v5208_v52 = vpop.f32.mrb[10].mxu1 }
 0x304   :  { %v6177_v53 = vpack.c.bf16 %v5208_v52, %v5207_v50  ;;  %v392_v54 = vpop.f32.mrb[11].mxu1 }
 0x305   :  { %v6179_v55 = vpack.c.bf16 %v392_v54, %v389_v51 }
 0x306   :  { %v500_v56 = vsel %vm449_vm3, %v6177_v53, 0 }
 0x307   :  { %5224 = vmatpush3.bf16.xpose.msra.mxu0 %v500_v56  ;;  %v454_v57 = vsel %vm449_vm3, %v6179_v55, 0 }
 0x308   :  { %5218 = vmatpush3.bf16.xpose.msra.mxu1 %v454_v57  ;;  %5235 = vmatprep.subr.bf16.mxu0 %v5971_v27 }
 0x309   :  { %5229 = vmatprep.subr.bf16.mxu1 %v5971_v27 }
 0x30e   :  { %5226 = vmatmul.mubr.msk.bf16.vlgmr.msra.gmra.mrb[4].mxu0 %vm449_vm3, %v6191_v62 }
 0x30f   :  { %5220 = vmatmul.mubr.msk.bf16.vlgmr.msra.gmra.mrb[12].mxu1 %vm449_vm3, %v6193_v63  ;;  %5236 = vmatpush3.bf16.xpose.msra.mxu0 %v586_v0 }
 0x310   :  { %5230 = vmatpush3.bf16.xpose.msra.mxu1 %v543_v1  ;;  %5237 = vmatprep.mubr.msk.bf16.mxu0 %vm5972_vm2, %v5971_v27 }
 0x311   :  { %5231 = vmatprep.mubr.msk.bf16.mxu1 %vm5972_vm2, %v5971_v27  ;;  %5247 = vmatprep.subr.bf16.mxu0 %v5971_v27 }
 0x312   :  { %5241 = vmatprep.subr.bf16.mxu1 %v5971_v27 }
 0x316   :  { %5238 = vmatmul.mubr.msk.bf16.vlgmr.msra.gmra.mrb[8].mxu0 %vm449_vm3, %v6191_v62 }
 0x317   :  { %5232 = vmatmul.mubr.msk.bf16.vlgmr.msra.gmra.mrb[16].mxu1 %vm449_vm3, %v6193_v63  ;;  %5249 = vmatprep.mubr.msk.bf16.mxu0 %vm5972_vm2, %v5971_v27 }
 0x318   :  { %5243 = vmatprep.mubr.msk.bf16.mxu1 %vm5972_vm2, %v5971_v27 }
 0x3e1   :  { %v536_v2 = vpop.f32.mrb[4].mxu0 }
 0x3e2   :  { %v490_v3 = vpop.f32.mrb[12].mxu1  ;;  %v5227_v4 = vpop.f32.mrb[5].mxu0  ;;  %v632_v5 = vsel %vm628_vm4, %v536_v2, -inf }
 0x3e3   :  { %633 = vmax.xlane.f32.xlu1 %v632_v5  ;;  %v5221_v6 = vpop.f32.mrb[13].mxu1  ;;  %v539_v7 = vpop.f32.mrb[6].mxu0  ;;  %v629_v8 = vsel %vm628_vm4, %v490_v3, -inf }
 0x3e4   :  { %v5228_v9 = vpop.f32.mrb[7].mxu0  ;;  %630 = vmax.xlane.f32.xlu0 %v629_v8  ;;  %v493_v10 = vpop.f32.mrb[14].mxu1 }
 0x3e5   :  { %v5222_v11 = vpop.f32.mrb[15].mxu1 }
 0x3e9   :  { %v622_v12 = vpop.f32.mrb[8].mxu0 }
 0x3ea   :  { %v579_v13 = vpop.f32.mrb[16].mxu1  ;;  %v5239_v14 = vpop.f32.mrb[9].mxu0  ;;  %v638_v15 = vsel %vm449_vm3, %v622_v12, -inf }
 0x3eb   :  { %639 = vmax.xlane.f32.xlu1 %v638_v15  ;;  %v5233_v16 = vpop.f32.mrb[17].mxu1  ;;  %v625_v17 = vpop.f32.mrb[10].mxu0  ;;  %v635_v18 = vsel %vm449_vm3, %v579_v13, -inf }
 0x3ec   :  { %v5240_v19 = vpop.f32.mrb[11].mxu0  ;;  %636 = vmax.xlane.f32.xlu0 %v635_v18  ;;  %v582_v20 = vpop.f32.mrb[18].mxu1 }
 0x3ed   :  { %v5234_v22 = vpop.f32.mrb[19].mxu1 }
 0x3fc   :  { %726 = vrot.lane.b32.xlu1 %v6187_v60, %s5973_s4 }
 0x400   :  { %775 = vrot.lane.b32.xlu1 %v6179_v55, %s5973_s4 }
 0x402   :  { %676 = vrot.lane.b32.xlu0 %v6189_v61, %s5973_s4 }
 0x404   :  { %822 = vrot.lane.b32.xlu1 %v6177_v53, %s5973_s4 }
 0x406   :  { %873 = vrot.lane.b32.xlu0 %v6179_v55, %s5974_s5 }
 0x408   :  { %924 = vrot.lane.b32.xlu1 %v6177_v53, %s5974_s5 }
 0x40a   :  { %871 = vrot.lane.b32.xlu0 %v6193_v63, %s5974_s5 }
 0x40c   :  { %922 = vrot.lane.b32.xlu1 %v6191_v62, %s5974_s5 }
 0x40e   :  { %972 = vrot.lane.b32.xlu0 %v6189_v61, %s5974_s5 }
 0x410   :  { %1017 = vrot.lane.b32.xlu1 %v6187_v60, %s5974_s5 }
 0x470   :  { %v634_v23 = vpop.xlane.xlu1 %633 }
 0x471   :  { %v631_v24 = vpop.xlane.xlu0 %630 }
 0x478   :  { %v640_v25 = vpop.xlane.xlu1 %639 }
 0x479   :  { %v642_v26 = vmax.f32 %v634_v23, %v640_v25  ;;  %v637_v29 = vpop.xlane.xlu0 %636 }
 0x47a   :  { %v641_v30 = vmax.f32 %v631_v24, %v637_v29 }
 0x47b   :  { %v650_v31 = vsub.f32 %v622_v12, %v642_v26  ;;  %v644_v43 = vsub.f32 %v536_v2, %v642_v26 }
 0x47c   :  { %v649_v33 = vsub.f32 %v579_v13, %v641_v30  ;;  %v727_v34 = vpop.permute.xlu1 %726  ;;  %v643_v44 = vsub.f32 %v490_v3, %v641_v30 }
 0x47d   :  { %v653_v35 = vmul.f32 1.442695, %v650_v31  ;;  %v732_v36 = vsel %vm681_vm5, %v727_v34, 0  ;;  %v677_v38 = vpop.permute.xlu0 %676  ;;  %v647_v45 = vmul.f32 1.442695, %v644_v43 }
 0x47e   :  { %v651_v40 = vmul.f32 1.442695, %v649_v33  ;;  %v683_v42 = vsel %vm681_vm5, %v677_v38, 0  ;;  %5248 = vmatpush3.bf16.msra.mxu0 %v732_v36  ;;  %v645_v47 = vmul.f32 1.442695, %v643_v44 }
 0x47f   :  { %5242 = vmatpush3.bf16.msra.mxu1 %v683_v42  ;;  %5259 = vmatprep.subr.bf16.mxu0 %v5971_v27  ;;  %5850 = vpow2.f32 %v653_v35 }
 0x480   :  { %5253 = vmatprep.subr.bf16.mxu1 %v5971_v27  ;;  %5852 = vpow2.f32 %v651_v40  ;;  %v776_v46 = vpop.permute.xlu1 %775 }
 0x481   :  { %5854 = vpow2.f32 %v647_v45  ;;  %v874_v57 = vpop.permute.xlu0 %873 }
 0x482   :  { %5856 = vpow2.f32 %v645_v47  ;;  %v879_v4 = vsel %vm449_vm3, %v874_v57, 0 }
 0x484   :  { %v823_v51 = vpop.permute.xlu1 %822 }
 0x485   :  { %v872_v3 = vpop.permute.xlu0 %871 }
 0x488   :  { %v925_v54 = vpop.permute.xlu1 %924 }
 0x489   :  { %v6245_v48 = vpop.eup %5850  ;;  %v930_v1 = vsel %vm449_vm3, %v925_v54, 0  ;;  %v973_v6 = vpop.permute.xlu0 %972 }
 0x48a   :  { %v674_v49 = vpack.c.bf16 %v6245_v48, %v6245_v48  ;;  %v6249_v50 = vpop.eup %5852  ;;  %v975_v8 = vsel %vm449_vm3, %v973_v6, 0 }
 0x48b   :  { %v673_v52 = vpack.c.bf16 %v6249_v50, %v6249_v50  ;;  %v6261_v56 = vpop.eup %5854 }
 0x48c   :  { %5250 = vmatmul.mubr.msk.bf16.vlgmr.msra.gmra.mrb[12].mxu0 %vm449_vm3, %v674_v49  ;;  %v6263_v58 = vpop.eup %5856  ;;  %v672_v59 = vpack.c.bf16 %v6261_v56, %v6261_v56  ;;  %v923_v0 = vpop.permute.xlu1 %922 }
 0x48d   :  { %5260 = vmatpush3.bf16.msra.mxu0 %v823_v51  ;;  %5261 = vmatprep.mubr.msk.bf16.mxu0 %vm5972_vm2, %v5971_v27  ;;  %v671_v2 = vpack.c.bf16 %v6263_v58, %v6263_v58 }
 0x48e   :  { %5244 = vmatmul.mubr.msk.bf16.vlgmr.msra.gmra.mrb[20].mxu1 %vm449_vm3, %v673_v52  ;;  %5271 = vmatprep.subr.bf16.mxu0 %v5971_v27 }
 0x48f   :  { %5254 = vmatpush3.bf16.msra.mxu1 %v776_v46  ;;  %5255 = vmatprep.mubr.msk.bf16.mxu1 %vm5972_vm2, %v5971_v27 }
 0x490   :  { %5265 = vmatprep.subr.bf16.mxu1 %v5971_v27  ;;  %v1018_v5 = vpop.permute.xlu1 %1017 }
 0x491   :  { %v1020_v7 = vsel %vm449_vm3, %v1018_v5, 0 }
 0x498   :  { %5262 = vmatmul.mubr.msk.bf16.vlgmr.msra.gmra.mrb[12].mxu0 %vm628_vm4, %v672_v59 }
 0x499   :  { %5272 = vmatpush3.bf16.xpose.msra.mxu0 %v930_v1  ;;  %5273 = vmatprep.mubr.msk.bf16.mxu0 %vm5972_vm2, %v5971_v27 }
 0x49a   :  { %5256 = vmatmul.mubr.msk.bf16.vlgmr.msra.gmra.mrb[20].mxu1 %vm628_vm4, %v671_v2  ;;  %5283 = vmatprep.subr.bf16.mxu0 %v5971_v27 }
 0x49b   :  { %5266 = vmatpush3.bf16.xpose.msra.mxu1 %v879_v4  ;;  %5267 = vmatprep.mubr.msk.bf16.mxu1 %vm5972_vm2, %v5971_v27 }
 0x49c   :  { %5277 = vmatprep.subr.bf16.mxu1 %v5971_v27 }
 0x4a0   :  { %5274 = vmatmul.mubr.msk.bf16.vlgmr.msra.gmra.mrb[16].mxu0 %vm449_vm3, %v923_v0 }
 0x4a1   :  { %5284 = vmatpush3.bf16.xpose.msra.mxu0 %v1020_v7  ;;  %5285 = vmatprep.mubr.msk.bf16.mxu0 %vm5972_vm2, %v5971_v27 }
 0x4a2   :  { %5268 = vmatmul.mubr.msk.bf16.vlgmr.msra.gmra.mrb[24].mxu1 %vm449_vm3, %v872_v3  ;;  %5295 = vmatprep.subr.bf16.mxu0 %v5971_v27 }
 0x4a3   :  { %5278 = vmatpush3.bf16.xpose.msra.mxu1 %v975_v8  ;;  %5279 = vmatprep.mubr.msk.bf16.mxu1 %vm5972_vm2, %v5971_v27 }
 0x4a4   :  { %5289 = vmatprep.subr.bf16.mxu1 %v5971_v27 }
 0x4a8   :  { %5286 = vmatmul.mubr.msk.bf16.vlgmr.msra.gmra.mrb[20].mxu0 %vm449_vm3, %v923_v0 }
 0x4a9   :  { %5297 = vmatprep.mubr.msk.bf16.mxu0 %vm5972_vm2, %v5971_v27 }
 0x4aa   :  { %5280 = vmatmul.mubr.msk.bf16.vlgmr.msra.gmra.mrb[28].mxu1 %vm449_vm3, %v872_v3 }
 0x4ab   :  { %5291 = vmatprep.mubr.msk.bf16.mxu1 %vm5972_vm2, %v5971_v27 }
 0x56b   :  { %v6295_v9 = vpop.f32.mrb[12].mxu0 }
 0x56c   :  { %v5263_v10 = vpop.f32.mrb[13].mxu0 }
 0x56d   :  { %v6297_v11 = vpop.f32.mrb[20].mxu1  ;;  %v865_v12 = vpop.f32.mrb[14].mxu0 }
 0x56e   :  { %v5257_v13 = vpop.f32.mrb[21].mxu1  ;;  %v5264_v14 = vpop.f32.mrb[15].mxu0 }
 0x56f   :  { %v818_v15 = vpop.f32.mrb[22].mxu1 }
 0x570   :  { %v5258_v16 = vpop.f32.mrb[23].mxu1 }
 0x573   :  { %v966_v17 = vpop.f32.mrb[16].mxu0 }
 0x574   :  { %v5275_v18 = vpop.f32.mrb[17].mxu0  ;;  %v1065_v19 = vsel %vm628_vm4, %v966_v17, -inf }
 0x575   :  { %v915_v20 = vpop.f32.mrb[24].mxu1  ;;  %1066 = vmax.xlane.f32.xlu1 %v1065_v19  ;;  %v969_v22 = vpop.f32.mrb[18].mxu0 }
 0x576   :  { %v5269_v23 = vpop.f32.mrb[25].mxu1  ;;  %v5276_v24 = vpop.f32.mrb[19].mxu0  ;;  %v1062_v25 = vsel %vm628_vm4, %v915_v20, -inf }
 0x577   :  { %1063 = vmax.xlane.f32.xlu0 %v1062_v25  ;;  %v918_v26 = vpop.f32.mrb[26].mxu1 }
 0x578   :  { %v5270_v29 = vpop.f32.mrb[27].mxu1 }
 0x57b   :  { %v1056_v30 = vpop.f32.mrb[20].mxu0 }
 0x57c   :  { %v5287_v31 = vpop.f32.mrb[21].mxu0  ;;  %v1071_v33 = vsel %vm449_vm3, %v1056_v30, -inf }
 0x57d   :  { %v1011_v34 = vpop.f32.mrb[28].mxu1  ;;  %v1059_v35 = vpop.f32.mrb[22].mxu0  ;;  %1072 = vmax.xlane.f32.xlu0 %v1071_v33 }
 0x57e   :  { %v5281_v36 = vpop.f32.mrb[29].mxu1  ;;  %v5288_v38 = vpop.f32.mrb[23].mxu0  ;;  %v1068_v43 = vsel %vm449_vm3, %v1011_v34, -inf }
 0x57f   :  { %v1014_v40 = vpop.f32.mrb[30].mxu1 }
 0x580   :  { %v5282_v42 = vpop.f32.mrb[31].mxu1 }
 0x581   :  { %1069 = vmax.xlane.f32.xlu0 %v1068_v43 }
 0x586   :  { %1156 = vrot.lane.b32.xlu1 %v6187_v60, %s5975_s1 }
 0x58a   :  { %1204 = vrot.lane.b32.xlu1 %v6179_v55, %s5975_s1 }
 0x58e   :  { %1250 = vrot.lane.b32.xlu1 %v6177_v53, %s5975_s1 }
 0x592   :  { %1350 = vrot.lane.b32.xlu1 %v6177_v53, %s5976_s30 }
 0x596   :  { %1348 = vrot.lane.b32.xlu1 %v6191_v62, %s5976_s30 }
 0x597   :  { %1108 = vrot.lane.b32.xlu0 %v6189_v61, %s5975_s1 }
 0x59a   :  { %1443 = vrot.lane.b32.xlu1 %v6187_v60, %s5976_s30 }
 0x59b   :  { %1300 = vrot.lane.b32.xlu0 %v6179_v55, %s5976_s30 }
 0x59f   :  { %1298 = vrot.lane.b32.xlu0 %v6193_v63, %s5976_s30 }
 0x5a3   :  { %1398 = vrot.lane.b32.xlu0 %v6189_v61, %s5976_s30 }
 0x602   :  { %v1067_v44 = vpop.xlane.xlu1 %1066 }
 0x604   :  { %v1064_v45 = vpop.xlane.xlu0 %1063 }
 0x606   :  { %v1157_v46 = vpop.permute.xlu1 %1156 }
 0x607   :  { %v1162_v47 = vsel %vm681_vm5, %v1157_v46, 0 }
 0x608   :  { %5296 = vmatpush3.bf16.msra.mxu0 %v1162_v47 }
 0x609   :  { %5307 = vmatprep.subr.bf16.mxu0 %v5971_v27 }
 0x60a   :  { %v1073_v49 = vpop.xlane.xlu0 %1072  ;;  %v1205_v5 = vpop.permute.xlu1 %1204 }
 0x60b   :  { %v1075_v51 = vmax.f32 %v1067_v44, %v1073_v49 }
 0x60d   :  { %v1083_v52 = vsub.f32 %v1056_v30, %v1075_v51  ;;  %v1077_v4 = vsub.f32 %v966_v17, %v1075_v51 }
 0x60e   :  { %v1070_v54 = vpop.xlane.xlu0 %1069  ;;  %v1251_v13 = vpop.permute.xlu1 %1250 }
 0x60f   :  { %v1086_v57 = vmul.f32 1.442695, %v1083_v52  ;;  %v1074_v59 = vmax.f32 %v1064_v45, %v1070_v54  ;;  %v1080_v6 = vmul.f32 1.442695, %v1077_v4 }
 0x611   :  { %v1082_v0 = vsub.f32 %v1011_v34, %v1074_v59  ;;  %5858 = vpow2.f32 %v1086_v57  ;;  %v1076_v7 = vsub.f32 %v915_v20, %v1074_v59 }
 0x612   :  { %v1109_v1 = vpop.permute.xlu0 %1108  ;;  %v1351_v16 = vpop.permute.xlu1 %1350 }
 0x613   :  { %v1084_v2 = vmul.f32 1.442695, %v1082_v0  ;;  %v1114_v3 = vsel %vm681_vm5, %v1109_v1, 0  ;;  %v1078_v10 = vmul.f32 1.442695, %v1076_v7  ;;  %v1356_v23 = vsel %vm449_vm3, %v1351_v16, 0 }
 0x614   :  { %5290 = vmatpush3.bf16.msra.mxu1 %v1114_v3 }
 0x615   :  { %5301 = vmatprep.subr.bf16.mxu1 %v5971_v27  ;;  %5860 = vpow2.f32 %v1084_v2 }
 0x616   :  { %5862 = vpow2.f32 %v1080_v6  ;;  %v1301_v18 = vpop.permute.xlu0 %1300  ;;  %v1349_v22 = vpop.permute.xlu1 %1348 }
 0x617   :  { %5864 = vpow2.f32 %v1078_v10  ;;  %v1306_v26 = vsel %vm449_vm3, %v1301_v18, 0 }
 0x61a   :  { %v1299_v25 = vpop.permute.xlu0 %1298  ;;  %v1444_v29 = vpop.permute.xlu1 %1443 }
 0x61b   :  { %v6327_v8 = vpop.eup %5858  ;;  %v1446_v30 = vsel %vm449_vm3, %v1444_v29, 0 }
 0x61c   :  { %v1107_v12 = vpack.c.bf16 %v6327_v8, %v6327_v8 }
 0x61e   :  { %5298 = vmatmul.mubr.msk.bf16.vlgmr.msra.gmra.mrb[24].mxu0 %vm449_vm3, %v1107_v12  ;;  %v1399_v31 = vpop.permute.xlu0 %1398 }
 0x61f   :  { %v6332_v14 = vpop.eup %5860  ;;  %5308 = vmatpush3.bf16.msra.mxu0 %v1251_v13  ;;  %5309 = vmatprep.mubr.msk.bf16.mxu0 %vm5972_vm2, %v5971_v27  ;;  %v1401_v33 = vsel %vm449_vm3, %v1399_v31, 0 }
 0x620   :  { %v1106_v15 = vpack.c.bf16 %v6332_v14, %v6332_v14  ;;  %5319 = vmatprep.subr.bf16.mxu0 %v5971_v27  ;;  %v6343_v17 = vpop.eup %5862 }
 0x621   :  { %v1105_v19 = vpack.c.bf16 %v6343_v17, %v6343_v17  ;;  %v6347_v20 = vpop.eup %5864 }
 0x622   :  { %5292 = vmatmul.mubr.msk.bf16.vlgmr.msra.gmra.mrb[32].mxu1 %vm449_vm3, %v1106_v15  ;;  %v1104_v24 = vpack.c.bf16 %v6347_v20, %v6347_v20 }
 0x623   :  { %5302 = vmatpush3.bf16.msra.mxu1 %v1205_v5  ;;  %5303 = vmatprep.mubr.msk.bf16.mxu1 %vm5972_vm2, %v5971_v27 }
 0x624   :  { %5313 = vmatprep.subr.bf16.mxu1 %v5971_v27 }
 0x62a   :  { %5310 = vmatmul.mubr.msk.bf16.vlgmr.msra.gmra.mrb[24].mxu0 %vm628_vm4, %v1105_v19 }
 0x62b   :  { %5320 = vmatpush3.bf16.xpose.msra.mxu0 %v1356_v23  ;;  %5321 = vmatprep.mubr.msk.bf16.mxu0 %vm5972_vm2, %v5971_v27 }
 0x62c   :  { %5331 = vmatprep.subr.bf16.mxu0 %v5971_v27 }
 0x62e   :  { %5304 = vmatmul.mubr.msk.bf16.vlgmr.msra.gmra.mrb[32].mxu1 %vm628_vm4, %v1104_v24 }
 0x62f   :  { %5314 = vmatpush3.bf16.xpose.msra.mxu1 %v1306_v26  ;;  %5315 = vmatprep.mubr.msk.bf16.mxu1 %vm5972_vm2, %v5971_v27 }
 0x630   :  { %5325 = vmatprep.subr.bf16.mxu1 %v5971_v27 }
 0x632   :  { %5322 = vmatmul.mubr.msk.bf16.vlgmr.msra.gmra.mrb[28].mxu0 %vm449_vm3, %v1349_v22 }
 0x633   :  { %5332 = vmatpush3.bf16.xpose.msra.mxu0 %v1446_v30  ;;  %5333 = vmatprep.mubr.msk.bf16.mxu0 %vm5972_vm2, %v5971_v27 }
 0x634   :  { %5343 = vmatprep.subr.bf16.mxu0 %v5971_v27 }
 0x636   :  { %5316 = vmatmul.mubr.msk.bf16.vlgmr.msra.gmra.mrb[36].mxu1 %vm449_vm3, %v1299_v25 }
 0x637   :  { %5326 = vmatpush3.bf16.xpose.msra.mxu1 %v1401_v33  ;;  %5327 = vmatprep.mubr.msk.bf16.mxu1 %vm5972_vm2, %v5971_v27 }
 0x638   :  { %5337 = vmatprep.subr.bf16.mxu1 %v5971_v27 }
 0x63a   :  { %5334 = vmatmul.mubr.msk.bf16.vlgmr.msra.gmra.mrb[32].mxu0 %vm449_vm3, %v1349_v22 }
 0x63b   :  { %5345 = vmatprep.mubr.msk.bf16.mxu0 %vm5972_vm2, %v5971_v27 }
 0x63e   :  { %5328 = vmatmul.mubr.msk.bf16.vlgmr.msra.gmra.mrb[40].mxu1 %vm449_vm3, %v1299_v25 }
 0x63f   :  { %5339 = vmatprep.mubr.msk.bf16.mxu1 %vm5972_vm2, %v5971_v27 }
 0x6fd   :  { %v6377_v34 = vpop.f32.mrb[24].mxu0 }
 0x6fe   :  { %v5311_v35 = vpop.f32.mrb[25].mxu0 }
 0x6ff   :  { %v1293_v36 = vpop.f32.mrb[26].mxu0 }
 0x700   :  { %v5312_v38 = vpop.f32.mrb[27].mxu0 }
 0x701   :  { %v6379_v40 = vpop.f32.mrb[32].mxu1 }
 0x702   :  { %v5305_v42 = vpop.f32.mrb[33].mxu1 }
 0x703   :  { %v1247_v43 = vpop.f32.mrb[34].mxu1 }
 0x704   :  { %v5306_v44 = vpop.f32.mrb[35].mxu1 }
 0x705   :  { %v1392_v45 = vpop.f32.mrb[28].mxu0 }
 0x706   :  { %v5323_v46 = vpop.f32.mrb[29].mxu0  ;;  %v1491_v47 = vsel %vm628_vm4, %v1392_v45, -inf }
 0x707   :  { %1492 = vmax.xlane.f32.xlu1 %v1491_v47  ;;  %v1395_v49 = vpop.f32.mrb[30].mxu0 }
 0x708   :  { %v5324_v51 = vpop.f32.mrb[31].mxu0 }
 0x709   :  { %v1342_v52 = vpop.f32.mrb[36].mxu1 }
 0x70a   :  { %v5317_v54 = vpop.f32.mrb[37].mxu1  ;;  %v1488_v57 = vsel %vm628_vm4, %v1342_v52, -inf }
 0x70b   :  { %1489 = vmax.xlane.f32.xlu0 %v1488_v57  ;;  %v1345_v59 = vpop.f32.mrb[38].mxu1 }
 0x70c   :  { %v5318_v0 = vpop.f32.mrb[39].mxu1 }
 0x70d   :  { %v1482_v1 = vpop.f32.mrb[32].mxu0 }
 0x70e   :  { %v5335_v2 = vpop.f32.mrb[33].mxu0  ;;  %v1497_v3 = vsel %vm449_vm3, %v1482_v1, -inf }
 0x70f   :  { %v1485_v4 = vpop.f32.mrb[34].mxu0  ;;  %1498 = vmax.xlane.f32.xlu0 %v1497_v3 }
 0x710   :  { %v5336_v5 = vpop.f32.mrb[35].mxu0 }
 0x711   :  { %v1437_v6 = vpop.f32.mrb[40].mxu1 }
 0x712   :  { %v5329_v7 = vpop.f32.mrb[41].mxu1  ;;  %v1494_v10 = vsel %vm449_vm3, %v1437_v6, -inf }
 0x713   :  { %1495 = vmax.xlane.f32.xlu0 %v1494_v10  ;;  %v1440_v12 = vpop.f32.mrb[42].mxu1 }
 0x714   :  { %v5330_v13 = vpop.f32.mrb[43].mxu1 }
 0x718   :  { %1582 = vrot.lane.b32.xlu1 %v6187_v60, %s5977_s18 }
 0x71c   :  { %1630 = vrot.lane.b32.xlu1 %v6179_v55, %s5977_s18 }
 0x720   :  { %1676 = vrot.lane.b32.xlu1 %v6177_v53, %s5977_s18 }
 0x724   :  { %1776 = vrot.lane.b32.xlu1 %v6177_v53, %s5978_s19 }
 0x728   :  { %1774 = vrot.lane.b32.xlu1 %v6191_v62, %s5978_s19 }
 0x729   :  { %1534 = vrot.lane.b32.xlu0 %v6189_v61, %s5977_s18 }
 0x72c   :  { %1869 = vrot.lane.b32.xlu1 %v6187_v60, %s5978_s19 }
 0x72d   :  { %1726 = vrot.lane.b32.xlu0 %v6179_v55, %s5978_s19 }
 0x731   :  { %1724 = vrot.lane.b32.xlu0 %v6193_v63, %s5978_s19 }
 0x735   :  { %1824 = vrot.lane.b32.xlu0 %v6189_v61, %s5978_s19 }
 0x794   :  { %v1493_v15 = vpop.xlane.xlu1 %1492 }
 0x798   :  { %v1583_v16 = vpop.permute.xlu1 %1582  ;;  %v1490_v18 = vpop.xlane.xlu0 %1489 }
 0x799   :  { %v1588_v62 = vsel %vm681_vm5, %v1583_v16, 0 }
 0x79a   :  { %5344 = vmatpush3.bf16.msra.mxu0 %v1588_v62 }
 0x79b   :  { %5355 = vmatprep.subr.bf16.mxu0 %v5971_v27 }
 0x79c   :  { %v1499_v19 = vpop.xlane.xlu0 %1498  ;;  %v1631_v35 = vpop.permute.xlu1 %1630 }
 0x79d   :  { %v1501_v22 = vmax.f32 %v1493_v15, %v1499_v19 }
 0x79f   :  { %v1509_v23 = vsub.f32 %v1482_v1, %v1501_v22  ;;  %v1503_v33 = vsub.f32 %v1392_v45, %v1501_v22 }
 0x7a0   :  { %v1496_v24 = vpop.xlane.xlu0 %1495  ;;  %v1677_v46 = vpop.permute.xlu1 %1676 }
 0x7a1   :  { %v1512_v25 = vmul.f32 1.442695, %v1509_v23  ;;  %v1500_v26 = vmax.f32 %v1490_v18, %v1496_v24  ;;  %v1506_v36 = vmul.f32 1.442695, %v1503_v33 }
 0x7a3   :  { %v1508_v29 = vsub.f32 %v1437_v6, %v1500_v26  ;;  %5866 = vpow2.f32 %v1512_v25  ;;  %v1502_v38 = vsub.f32 %v1342_v52, %v1500_v26 }
 0x7a4   :  { %v1535_v63 = vpop.permute.xlu0 %1534  ;;  %v1777_v49 = vpop.permute.xlu1 %1776 }
 0x7a5   :  { %v1510_v30 = vmul.f32 1.442695, %v1508_v29  ;;  %v1540_v31 = vsel %vm681_vm5, %v1535_v63, 0  ;;  %v1504_v43 = vmul.f32 1.442695, %v1502_v38  ;;  %v1782_v0 = vsel %vm449_vm3, %v1777_v49, 0 }
 0x7a6   :  { %5338 = vmatpush3.bf16.msra.mxu1 %v1540_v31 }
 0x7a7   :  { %5349 = vmatprep.subr.bf16.mxu1 %v5971_v27  ;;  %5868 = vpow2.f32 %v1510_v30 }
 0x7a8   :  { %5870 = vpow2.f32 %v1506_v36  ;;  %v1727_v52 = vpop.permute.xlu0 %1726  ;;  %v1775_v59 = vpop.permute.xlu1 %1774 }
 0x7a9   :  { %5872 = vpow2.f32 %v1504_v43  ;;  %v1732_v3 = vsel %vm449_vm3, %v1727_v52, 0 }
 0x7ac   :  { %v1725_v2 = vpop.permute.xlu0 %1724  ;;  %v1870_v4 = vpop.permute.xlu1 %1869 }
 0x7ad   :  { %v6409_v42 = vpop.eup %5866  ;;  %v1872_v5 = vsel %vm449_vm3, %v1870_v4, 0 }
 0x7ae   :  { %v1533_v44 = vpack.c.bf16 %v6409_v42, %v6409_v42 }
 0x7b0   :  { %5346 = vmatmul.mubr.msk.bf16.vlgmr.msra.gmra.mrb[36].mxu0 %vm449_vm3, %v1533_v44  ;;  %v1825_v6 = vpop.permute.xlu0 %1824 }
 0x7b1   :  { %v6414_v47 = vpop.eup %5868  ;;  %5356 = vmatpush3.bf16.msra.mxu0 %v1677_v46  ;;  %5357 = vmatprep.mubr.msk.bf16.mxu0 %vm5972_vm2, %v5971_v27  ;;  %v1827_v7 = vsel %vm449_vm3, %v1825_v6, 0 }
 0x7b2   :  { %v1532_v45 = vpack.c.bf16 %v6414_v47, %v6414_v47  ;;  %5367 = vmatprep.subr.bf16.mxu0 %v5971_v27  ;;  %v6425_v51 = vpop.eup %5870 }
 0x7b3   :  { %v1531_v54 = vpack.c.bf16 %v6425_v51, %v6425_v51  ;;  %v6429_v57 = vpop.eup %5872 }
 0x7b4   :  { %5340 = vmatmul.mubr.msk.bf16.vlgmr.msra.gmra.mrb[44].mxu1 %vm449_vm3, %v1532_v45  ;;  %v1530_v1 = vpack.c.bf16 %v6429_v57, %v6429_v57 }
 0x7b5   :  { %5350 = vmatpush3.bf16.msra.mxu1 %v1631_v35  ;;  %5351 = vmatprep.mubr.msk.bf16.mxu1 %vm5972_vm2, %v5971_v27 }
 0x7b6   :  { %5361 = vmatprep.subr.bf16.mxu1 %v5971_v27 }
 0x7bc   :  { %5358 = vmatmul.mubr.msk.bf16.vlgmr.msra.gmra.mrb[36].mxu0 %vm628_vm4, %v1531_v54 }
 0x7bd   :  { %5368 = vmatpush3.bf16.xpose.msra.mxu0 %v1782_v0  ;;  %5369 = vmatprep.mubr.msk.bf16.mxu0 %vm5972_vm2, %v5971_v27  ;;  %v1517_v0 = vsel %vm628_vm4, %v6425_v51, 0.0 }
 0x7be   :  { %5379 = vmatprep.subr.bf16.mxu0 %v5971_v27 }
 0x7c0   :  { %5352 = vmatmul.mubr.msk.bf16.vlgmr.msra.gmra.mrb[44].mxu1 %vm628_vm4, %v1530_v1  ;;  %v1088_v1 = vsel %vm628_vm4, %v6347_v20, 0.0 }
 0x7c1   :  { %5362 = vmatpush3.bf16.xpose.msra.mxu1 %v1732_v3  ;;  %5363 = vmatprep.mubr.msk.bf16.mxu1 %vm5972_vm2, %v5971_v27 }
 0x7c2   :  { %5373 = vmatprep.subr.bf16.mxu1 %v5971_v27 }
 0x7c4   :  { %5370 = vmatmul.mubr.msk.bf16.vlgmr.msra.gmra.mrb[40].mxu0 %vm449_vm3, %v1775_v59 }
 0x7c5   :  { %5380 = vmatpush3.bf16.xpose.msra.mxu0 %v1872_v5  ;;  %5381 = vmatprep.mubr.msk.bf16.mxu0 %vm5972_vm2, %v5971_v27 }
 0x7c6   :  { %5391 = vmatprep.subr.bf16.mxu0 %v5971_v27 }
 0x7c8   :  { %5364 = vmatmul.mubr.msk.bf16.vlgmr.msra.gmra.mrb[48].mxu1 %vm449_vm3, %v1725_v2 }
 0x7c9   :  { %5374 = vmatpush3.bf16.xpose.msra.mxu1 %v1827_v7  ;;  %5375 = vmatprep.mubr.msk.bf16.mxu1 %vm5972_vm2, %v5971_v27 }
 0x7ca   :  { %5385 = vmatprep.subr.bf16.mxu1 %v5971_v27 }
 0x7cc   :  { %5382 = vmatmul.mubr.msk.bf16.vlgmr.msra.gmra.mrb[44].mxu0 %vm449_vm3, %v1775_v59  ;;  %v1091_v59 = vsel %vm628_vm4, %v6343_v17, 0.0  ;;  %v1520_v17 = vsel %vm449_vm3, %v6414_v47, 0.0 }
 0x7cd   :  { %5393 = vmatprep.mubr.msk.bf16.mxu0 %vm5972_vm2, %v5971_v27 }
 0x7d0   :  { %5376 = vmatmul.mubr.msk.bf16.vlgmr.msra.gmra.mrb[52].mxu1 %vm449_vm3, %v1725_v2 }
 0x7d1   :  { %5387 = vmatprep.mubr.msk.bf16.mxu1 %vm5972_vm2, %v5971_v27 }
 0x88f   :  { %v6459_v10 = vpop.f32.mrb[36].mxu0 }
 0x890   :  { %v5359_v12 = vpop.f32.mrb[37].mxu0 }
 0x891   :  { %v1719_v13 = vpop.f32.mrb[38].mxu0 }
 0x892   :  { %v5360_v15 = vpop.f32.mrb[39].mxu0 }
 0x893   :  { %v6461_v16 = vpop.f32.mrb[44].mxu1 }
 0x894   :  { %v5353_v18 = vpop.f32.mrb[45].mxu1 }
 0x895   :  { %v1673_v62 = vpop.f32.mrb[46].mxu1 }
 0x896   :  { %v5354_v19 = vpop.f32.mrb[47].mxu1 }
 0x897   :  { %v1818_v22 = vpop.f32.mrb[40].mxu0 }
 0x898   :  { %v5371_v23 = vpop.f32.mrb[41].mxu0  ;;  %v1917_v24 = vsel %vm628_vm4, %v1818_v22, -inf }
 0x899   :  { %1918 = vmax.xlane.f32.xlu1 %v1917_v24  ;;  %v1821_v25 = vpop.f32.mrb[42].mxu0 }
 0x89a   :  { %v5372_v26 = vpop.f32.mrb[43].mxu0 }
 0x89b   :  { %v1768_v29 = vpop.f32.mrb[48].mxu1 }
 0x89c   :  { %v5365_v63 = vpop.f32.mrb[49].mxu1  ;;  %v1914_v30 = vsel %vm628_vm4, %v1768_v29, -inf }
 0x89d   :  { %1915 = vmax.xlane.f32.xlu0 %v1914_v30  ;;  %v1771_v31 = vpop.f32.mrb[50].mxu1 }
 0x89e   :  { %v5366_v33 = vpop.f32.mrb[51].mxu1 }
 0x89f   :  { %v1908_v35 = vpop.f32.mrb[44].mxu0 }
 0x8a0   :  { %v5383_v36 = vpop.f32.mrb[45].mxu0  ;;  %v1923_v38 = vsel %vm449_vm3, %v1908_v35, -inf }
 0x8a1   :  { %v1911_v43 = vpop.f32.mrb[46].mxu0  ;;  %1924 = vmax.xlane.f32.xlu0 %v1923_v38  ;;  %v664_v38 = vsel %vm449_vm3, %v6245_v48, 0.0 }
 0x8a2   :  { %v5384_v44 = vpop.f32.mrb[47].mxu0  ;;  %v655_v43 = vsel %vm628_vm4, %v6263_v58, 0.0 }
 0x8a3   :  { %v1863_v46 = vpop.f32.mrb[52].mxu1 }
 0x8a4   :  { %v5377_v45 = vpop.f32.mrb[53].mxu1  ;;  %v1920_v49 = vsel %vm449_vm3, %v1863_v46, -inf }
 0x8a5   :  { %1921 = vmax.xlane.f32.xlu0 %v1920_v49  ;;  %v1866_v52 = vpop.f32.mrb[54].mxu1 }
 0x8a6   :  { %v5378_v54 = vpop.f32.mrb[55].mxu1 }
 0x8aa   :  { %2008 = vrot.lane.b32.xlu1 %v6187_v60, %s5979_s0  ;;  %v1097_v60 = vsel %vm449_vm3, %v6327_v8, 0.0 }
 0x8ae   :  { %2056 = vrot.lane.b32.xlu1 %v6179_v55, %s5979_s0  ;;  %v1523_v55 = vsel %vm449_vm3, %v6409_v42, 0.0 }
 0x8b2   :  { %2102 = vrot.lane.b32.xlu1 %v6177_v53, %s5979_s0  ;;  %v1094_v53 = vsel %vm449_vm3, %v6332_v14, 0.0 }
 0x8bb   :  { %1960 = vrot.lane.b32.xlu0 %v6189_v61, %s5979_s0  ;;  %v1514_v61 = vsel %vm628_vm4, %v6429_v57, 0.0 }
 0x8d6   :  { %1092 = vadd.xlane.f32.xlu1 %v1091_v59 }
 0x8da   :  { %1518 = vadd.xlane.f32.xlu1 %v1517_v0  ;;  %1089 = vadd.xlane.f32.xlu0 %v1088_v1 }
 0x8de   :  { %1524 = vadd.xlane.f32.xlu1 %v1523_v55  ;;  %1095 = vadd.xlane.f32.xlu0 %v1094_v53 }
 0x8e2   :  { %1098 = vadd.xlane.f32.xlu0 %v1097_v60 }
 0x8e6   :  { %1515 = vadd.xlane.f32.xlu0 %v1514_v61 }
 0x8ea   :  { %1521 = vadd.xlane.f32.xlu0 %v1520_v17 }
 0x926   :  { %v1919_v20 = vpop.xlane.xlu1 %1918 }
 0x92a   :  { %v2009_v51 = vpop.permute.xlu1 %2008  ;;  %v1916_v42 = vpop.xlane.xlu0 %1915 }
 0x92b   :  { %v2014_v2 = vsel %vm681_vm5, %v2009_v51, 0 }
 0x92c   :  { %5392 = vmatpush3.bf16.msra.mxu0 %v2014_v2 }
 0x92d   :  { %5403 = vmatprep.subr.bf16.mxu0 %v5971_v27 }
 0x92e   :  { %v1925_v14 = vpop.xlane.xlu0 %1924  ;;  %v2057_v19 = vpop.permute.xlu1 %2056 }
 0x92f   :  { %v1927_v3 = vmax.f32 %v1919_v20, %v1925_v14 }
 0x931   :  { %v1929_v8 = vsub.f32 %v1818_v22, %v1927_v3  ;;  %v1935_v4 = vsub.f32 %v1908_v35, %v1927_v3  ;;  %v658_v35 = vsel %vm628_vm4, %v6261_v56, 0.0  ;;  %v661_v56 = vsel %vm449_vm3, %v6249_v50, 0.0 }
 0x932   :  { %v1922_v5 = vpop.xlane.xlu0 %1921 }
 0x933   :  { %v1932_v6 = vmul.f32 1.442695, %v1929_v8  ;;  %v1938_v57 = vmul.f32 1.442695, %v1935_v4  ;;  %v1926_v7 = vmax.f32 %v1916_v42, %v1922_v5 }
 0x935   :  { %5874 = vpow2.f32 %v1932_v6  ;;  %v1928_v12 = vsub.f32 %v1768_v29, %v1926_v7  ;;  %v1934_v47 = vsub.f32 %v1863_v46, %v1926_v7  ;;  %v2103_v29 = vpop.permute.xlu1 %2102 }
 0x936   :  { %5876 = vpow2.f32 %v1938_v57  ;;  %v1961_v13 = vpop.permute.xlu0 %1960 }
 0x937   :  { %v1930_v15 = vmul.f32 1.442695, %v1928_v12  ;;  %v1936_v18 = vmul.f32 1.442695, %v1934_v47  ;;  %v1966_v62 = vsel %vm681_vm5, %v1961_v13, 0 }
 0x938   :  { %5386 = vmatpush3.bf16.msra.mxu1 %v1966_v62 }
 0x939   :  { %5878 = vpow2.f32 %v1930_v15  ;;  %5397 = vmatprep.subr.bf16.mxu1 %v5971_v27 }
 0x93a   :  { %5880 = vpow2.f32 %v1936_v18 }
 0x93f   :  { %v5875_v22 = vpop.eup %5874 }
 0x940   :  { %v5877_v23 = vpop.eup %5876  ;;  %v1943_v24 = vsel %vm628_vm4, %v5875_v22, 0.0  ;;  %v1957_v44 = vpack.c.bf16 %v5875_v22, %v5875_v22 }
 0x941   :  { %1944 = vadd.xlane.f32.xlu1 %v1943_v24  ;;  %v1959_v25 = vpack.c.bf16 %v5877_v23, %v5877_v23  ;;  %v1949_v30 = vsel %vm449_vm3, %v5877_v23, 0.0 }
 0x943   :  { %v5879_v26 = vpop.eup %5878  ;;  %5394 = vmatmul.mubr.msk.bf16.vlgmr.msra.gmra.mrb[48].mxu0 %vm449_vm3, %v1959_v25 }
 0x944   :  { %v5881_v63 = vpop.eup %5880  ;;  %5404 = vmatpush3.bf16.msra.mxu0 %v2103_v29  ;;  %v1940_v31 = vsel %vm628_vm4, %v5879_v26, 0.0  ;;  %5405 = vmatprep.mubr.msk.bf16.mxu0 %vm5972_vm2, %v5971_v27  ;;  %v1956_v46 = vpack.c.bf16 %v5879_v26, %v5879_v26 }
 0x945   :  { %1950 = vadd.xlane.f32.xlu1 %v1949_v30  ;;  %1941 = vadd.xlane.f32.xlu0 %v1940_v31  ;;  %v1958_v33 = vpack.c.bf16 %v5881_v63, %v5881_v63  ;;  %v1946_v36 = vsel %vm449_vm3, %v5881_v63, 0.0 }
 0x946   :  { %5417 = vmatprep.subr.bf16.mxu0 %v5971_v27 }
 0x947   :  { %5388 = vmatmul.mubr.msk.bf16.vlgmr.msra.gmra.mrb[56].mxu1 %vm449_vm3, %v1958_v33 }
 0x948   :  { %5398 = vmatpush3.bf16.msra.mxu1 %v2057_v19  ;;  %5399 = vmatprep.mubr.msk.bf16.mxu1 %vm5972_vm2, %v5971_v27 }
 0x949   :  { %659 = vadd.xlane.f32.xlu1 %v658_v35  ;;  %1947 = vadd.xlane.f32.xlu0 %v1946_v36 }
 0x94a   :  { %5409 = vmatprep.subr.bf16.mxu1 %v5971_v27 }
 0x94d   :  { %665 = vadd.xlane.f32.xlu1 %v664_v38  ;;  %656 = vadd.xlane.f32.xlu0 %v655_v43 }
 0x94f   :  { %5406 = vmatmul.mubr.msk.bf16.vlgmr.msra.gmra.mrb[48].mxu0 %vm628_vm4, %v1957_v44 }
 0x950   :  { %5421 = vmatprep.mubr.msk.bf16.mxu0 %vm5972_vm2, %v5971_v27 }
 0x951   :  { %662 = vadd.xlane.f32.xlu0 %v661_v56 }
 0x953   :  { %5400 = vmatmul.mubr.msk.bf16.vlgmr.msra.gmra.mrb[56].mxu1 %vm628_vm4, %v1956_v46 }
 0x954   :  { %5413 = vmatprep.mubr.msk.bf16.mxu1 %vm5972_vm2, %v5971_v27 }
 0x963   :  { %v1093_v48 = vpop.xlane.xlu1 %1092 }
 0x967   :  { %v1090_v58 = vpop.xlane.xlu0 %1089  ;;  %v1519_v45 = vpop.xlane.xlu1 %1518 }
 0x96b   :  { %v1096_v49 = vpop.xlane.xlu0 %1095  ;;  %v1525_v0 = vpop.xlane.xlu1 %1524 }
 0x96c   :  { %v1100_v52 = vadd.f32 %v1096_v49, %v1090_v58  ;;  %v1527_v1 = vadd.f32 %v1525_v0, %v1519_v45 }
 0x96e   :  { %5882 = vrcp.f32 %v1100_v52 }
 0x96f   :  { %v1099_v54 = vpop.xlane.xlu0 %1098 }
 0x970   :  { %v1101_v59 = vadd.f32 %v1099_v54, %v1093_v48 }
 0x972   :  { %5884 = vrcp.f32 %v1101_v59 }
 0x973   :  { %v1516_v50 = vpop.xlane.xlu0 %1515  ;;  %5886 = vrcp.f32 %v1527_v1 }
 0x977   :  { %v1522_v55 = vpop.xlane.xlu0 %1521 }
 0x978   :  { %v1526_v53 = vadd.f32 %v1522_v55, %v1516_v50  ;;  %v5883_v60 = vpop.eup %5882 }
 0x979   :  { %v1296_v17 = vmul.f32 %v5883_v60, %v6379_v40  ;;  %v5812_v40 = vld [vmem:[%s7122_s10] sm:$0xff]  }
 0x97a   :  { %5888 = vrcp.f32 %v1526_v53  ;;  %5410 = vmatpush3.bf16.msra.mxu1 %v5812_v40 }
 0x97b   :  { %5411 = vmatprep.subr.bf16.mxu1 %v5971_v27 }
 0x97c   :  { %v5885_v61 = vpop.eup %5884 }
 0x97d   :  { %v1297_v20 = vmul.f32 %v5885_v61, %v6377_v34  ;;  %v5887_v42 = vpop.eup %5886 }
 0x97e   :  { %v1723_v3 = vmul.f32 %v5887_v42, %v6459_v10  ;;  %v5813_v10 = vld [vmem:[%s7122_s10 + $0x8] sm:$0xff]  }
 0x97f   :  { %v5773_v51 = vpack.i.bf16 %v1297_v20, %v1296_v17  ;;  %5412 = vmatpush3.bf16.msra.mxu1 %v5813_v10 }
 0x980   :  { %5425 = vmatprep.subr.bf16.mxu1 %v5971_v27 }
 0x981   :  { %5774 = vrot.lane.b32.xlu0 %v5773_v51, %s5980_s20 }
 0x984   :  { %v5889_v2 = vpop.eup %5888 }
 0x985   :  { %v1722_v14 = vmul.f32 %v5889_v2, %v6461_v16 }
 0x987   :  { %v5778_v8 = vpack.i.bf16 %v1723_v3, %v1722_v14 }
 0x989   :  { %5779 = vrot.lane.b32.xlu1 %v5778_v8, %s5981_s21 }
 0x9ce   :  { %v1945_v34 = vpop.xlane.xlu1 %1944 }
 0x9d2   :  { %v1942_v4 = vpop.xlane.xlu0 %1941  ;;  %v1951_v5 = vpop.xlane.xlu1 %1950 }
 0x9d3   :  { %v1953_v57 = vadd.f32 %v1951_v5, %v1945_v34 }
 0x9d5   :  { %5890 = vrcp.f32 %v1953_v57 }
 0x9d6   :  { %v1948_v6 = vpop.xlane.xlu0 %1947  ;;  %v660_v29 = vpop.xlane.xlu1 %659 }
 0x9d7   :  { %v1952_v7 = vadd.f32 %v1948_v6, %v1942_v4 }
 0x9d9   :  { %5892 = vrcp.f32 %v1952_v7 }
 0x9da   :  { %v657_v63 = vpop.xlane.xlu0 %656  ;;  %v666_v30 = vpop.xlane.xlu1 %665 }
 0x9db   :  { %v668_v33 = vadd.f32 %v666_v30, %v660_v29  ;;  %v4881_v30 = vld [vmem:[%s7125_s12] ss:$0 sm:$0xff] }
 0x9dd   :  { %5894 = vrcp.f32 %v668_v33 }
 0x9de   :  { %v663_v31 = vpop.xlane.xlu0 %662 }
 0x9df   :  { %v5891_v13 = vpop.eup %5890  ;;  %v667_v35 = vadd.f32 %v663_v31, %v657_v63 }
 0x9e1   :  { %5896 = vrcp.f32 %v667_v35 }
 0x9e3   :  { %v5893_v18 = vpop.eup %5892 }
 0x9e7   :  { %v5895_v38 = vpop.eup %5894 }
 0x9e8   :  { %v869_v49 = vmul.f32 %v5895_v38, %v6295_v9  ;;  %v5816_v38 = vld [vmem:[%s7126_s14] sm:$0xff]  }
 0x9eb   :  { %v5897_v44 = vpop.eup %5896 }
 0x9ec   :  { %v868_v45 = vmul.f32 %v5897_v44, %v6297_v11  ;;  %v5970_v11 = vld [vmem:[%s7114_s3] sm:$0xff]  ;;  %v5818_v44 = vld [vmem:[%s7126_s14 + $0x10] sm:$0xff]  }
 0x9f3   :  { %v5775_v36 = vpop.permute.xlu0 %5774 }
 0x9f4   :  { %v5777_v56 = vunpack.i.h.bf16 %v5775_v36  ;;  %v5776_v46 = vunpack.i.l.bf16 %v5775_v36 }
 0x9f6   :  { %v2175_v54 = vsel %vm449_vm3, %v869_v49, %v5777_v56  ;;  %v2174_v59 = vsel %vm449_vm3, %v868_v45, %v5776_v46  ;;  %v5819_v56 = vld [vmem:[%s7126_s14 + $0x18] sm:$0xff]   ;;  %v5820_v46 = vld [vmem:[%s7126_s14 + $0x20] sm:$0xff]  }
 0x9f7   :  { %v5823_v45 = vld [vmem:[%s7126_s14 + $0x38] sm:$0xff]  }
 0x9fb   :  { %v5780_v43 = vpop.permute.xlu1 %5779 }
 0x9fc   :  { %v5782_v48 = vunpack.i.h.bf16 %v5780_v43  ;;  %v5781_v58 = vunpack.i.l.bf16 %v5780_v43  ;;  %v5817_v43 = vld [vmem:[%s7126_s14 + $0x8] sm:$0xff]  }
 0x9fe   :  { %v2176_v1 = vsel %vm628_vm4, %v2174_v59, %v5781_v58  ;;  %v2177_v55 = vsel %vm628_vm4, %v2175_v54, %v5782_v48  ;;  %v5821_v48 = vld [vmem:[%s7126_s14 + $0x28] sm:$0xff]   ;;  %v5822_v58 = vld [vmem:[%s7126_s14 + $0x30] sm:$0xff]  }
 0xa22   :  { %v2142_v16 = vpop.f32.mrb[48].mxu0 }
 0xa23   :  { %v5407_v12 = vpop.f32.mrb[49].mxu0  ;;  %v2149_v19 = vmul.f32 %v5891_v13, %v2142_v16 }
 0xa24   :  { %v2145_v47 = vpop.f32.mrb[50].mxu0  ;;  %v5814_v12 = vld [vmem:[%s7123_s13] sm:$0xff]  }
 0xa25   :  { %v5408_v15 = vpop.f32.mrb[51].mxu0  ;;  %5418 = vmatpush3.bf16.msra.mxu0 %v5814_v12  ;;  %v5815_v47 = vld [vmem:[%s7123_s13 + $0x8] sm:$0xff]  }
 0xa26   :  { %v2096_v62 = vpop.f32.mrb[56].mxu1  ;;  %5419 = vmatprep.subr.bf16.mxu0 %v5971_v27 }
 0xa27   :  { %v2148_v22 = vmul.f32 %v5893_v18, %v2096_v62  ;;  %v5401_v23 = vpop.f32.mrb[57].mxu1 }
 0xa28   :  { %v2099_v24 = vpop.f32.mrb[58].mxu1 }
 0xa29   :  { %v5783_v25 = vpack.i.bf16 %v2149_v19, %v2148_v22  ;;  %v5402_v26 = vpop.f32.mrb[59].mxu1  ;;  %5420 = vmatpush3.bf16.msra.mxu0 %v5815_v47 }
 0xa2a   :  { %5445 = vmatprep.subr.bf16.mxu0 %v5971_v27 }
 0xa2b   :  { %5784 = vrot.lane.b32.xlu1 %v5783_v25, %s5982_s26  ;;  %v4880_v25 = vld [vmem:[%s7124_s11] ss:$0 sm:$0xff] }
 0xa9d   :  { %v5785_v52 = vpop.permute.xlu1 %5784 }
 0xa9e   :  { %v5787_v0 = vunpack.i.h.bf16 %v5785_v52  ;;  %v5786_v50 = vunpack.i.l.bf16 %v5785_v52 }
 0xaa0   :  { %v2180_v53 = vsel %vm2178_vm6, %v2177_v55, %v5787_v0  ;;  %v2179_v60 = vsel %vm2178_vm6, %v2176_v1, %v5786_v50 }
 0xaa1   :  { %v2181_v61 = vpack.c.bf16 %v2180_v53, %v2179_v60 }
 0xaa3   :  { %5414 = vmatmul.mubr.msk.bf16.vlgmr.msra.gmra.mrb[60].mxu1 %vm160_vm1, %v2181_v61 }
 0xaa4   :  { %5441 = vmatprep.mubr.msk.bf16.mxu1 %vm5972_vm2, %v5971_v27  ;;  %5426 = vmatpush3.bf16.msra.mxu1 %v5816_v38 }
 0xaa5   :  { %5427 = vmatprep.subr.bf16.mxu1 %v5971_v27 }
 0xaa8   :  { %5428 = vmatpush3.bf16.msra.mxu1 %v5817_v43 }
 0xaa9   :  { %5429 = vmatprep.subr.bf16.mxu1 %v5971_v27 }
 0xaac   :  { %5430 = vmatpush3.bf16.msra.mxu1 %v5818_v44  ;;  %v4900_v44 = vld [vmem:[%s7118_s6 + $0x1] ss:$0 sm:$0xff] }
 0xaad   :  { %5431 = vmatprep.subr.bf16.mxu1 %v5971_v27 }
 0xab0   :  { %5432 = vmatpush3.bf16.msra.mxu1 %v5819_v56 }
 0xab1   :  { %5433 = vmatprep.subr.bf16.mxu1 %v5971_v27 }
 0xab4   :  { %5434 = vmatpush3.bf16.msra.mxu1 %v5820_v46 }
 0xab5   :  { %5435 = vmatprep.subr.bf16.mxu1 %v5971_v27 }
 0xab8   :  { %5436 = vmatpush3.bf16.msra.mxu1 %v5821_v48 }
 0xab9   :  { %5437 = vmatprep.subr.bf16.mxu1 %v5971_v27 }
 0xabc   :  { %5438 = vmatpush3.bf16.msra.mxu1 %v5822_v58 }
 0xabd   :  { %5439 = vmatprep.subr.bf16.mxu1 %v5971_v27 }
 0xac0   :  { %5440 = vmatpush3.bf16.msra.mxu1 %v5823_v45  ;;  %v4901_v45 = vld [vmem:[%s7119_s7 + $0x1] ss:$0 sm:$0xff] }
 0xac1   :  { %5475 = vmatprep.subr.bf16.mxu1 %v5971_v27 }
 0xb76   :  { %v2235_v9 = vpop.f32.mrb[60].mxu1 }
 0xb77   :  { %v6550_v17 = vadd.f32 %v5970_v11, %v2235_v9  ;;  %v5415_v20 = vpop.f32.mrb[61].mxu1 }
 0xb78   :  { %v2238_v51 = vpop.f32.mrb[62].mxu1 }
 0xb79   :  { %v6552_v42 = vadd.f32 %v5970_v11, %v2238_v51  ;;  %v5416_v2 = vpop.f32.mrb[63].mxu1  ;;  %v2246_v14 = vsel %vm160_vm1, %v6550_v17, 0.0 }
 0xb7a   :  { %2247 = vadd.xlane.f32.xlu1 %v2246_v14 }
 0xb7b   :  { %v2249_v3 = vsel %vm160_vm1, %v6552_v42, 0.0 }
 0xb7c   :  { %2250 = vadd.xlane.f32.xlu0 %v2249_v3 }
 0xc07   :  { %v2248_v8 = vpop.xlane.xlu1 %2247 }
 0xc08   :  { %v2252_v40 = vmul.f32 0.03125, %v2248_v8 }
 0xc09   :  { %v2251_v34 = vpop.xlane.xlu0 %2250 }
 0xc0a   :  { %v2254_v4 = vsub.f32 %v6550_v17, %v2252_v40  ;;  %v2253_v5 = vmul.f32 0.03125, %v2251_v34 }
 0xc0c   :  { %v2255_v6 = vsub.f32 %v6552_v42, %v2253_v5  ;;  %v2256_v57 = vmul.f32 %v2254_v4, %v2254_v4 }
 0xc0e   :  { %v2258_v7 = vsel %vm160_vm1, %v2256_v57, 0.0  ;;  %v2257_v10 = vmul.f32 %v2255_v6, %v2255_v6 }
 0xc0f   :  { %2259 = vadd.xlane.f32.xlu0 %v2258_v7 }
 0xc10   :  { %v2261_v16 = vsel %vm160_vm1, %v2257_v10, 0.0 }
 0xc13   :  { %2262 = vadd.xlane.f32.xlu0 %v2261_v16 }
 0xc9c   :  { %v2260_v13 = vpop.xlane.xlu0 %2259 }
 0xc9d   :  { %v2264_v15 = vmul.f32 0.03125, %v2260_v13 }
 0xc9f   :  { %v2266_v18 = vadd.f32 1e-05, %v2264_v15 }
 0xca0   :  { %v2263_v62 = vpop.xlane.xlu0 %2262 }
 0xca1   :  { %5898 = vrsqrt.f32 %v2266_v18  ;;  %v2265_v19 = vmul.f32 0.03125, %v2263_v62 }
 0xca3   :  { %v2267_v22 = vadd.f32 1e-05, %v2265_v19 }
 0xca5   :  { %5900 = vrsqrt.f32 %v2267_v22 }
 0xcab   :  { %v5899_v23 = vpop.eup %5898 }
 0xcac   :  { %v2270_v24 = vmul.f32 %v5899_v23, %v2254_v4 }
 0xcae   :  { %v2278_v29 = vmul.f32 %v4880_v25, %v2270_v24 }
 0xcaf   :  { %v5901_v26 = vpop.eup %5900 }
 0xcb0   :  { %v2271_v63 = vmul.f32 %v5901_v26, %v2255_v6  ;;  %v2286_v33 = vadd.f32 %v4881_v30, %v2278_v29  ;;  %v5824_v26 = vld [vmem:[%s7116_s8 + $0x10] sm:$0xff]   ;;  %v5825_v29 = vld [vmem:[%s7116_s8 + $0x18] sm:$0xff]  }
 0xcb2   :  { %v2279_v31 = vmul.f32 %v4880_v25, %v2271_v63  ;;  %v5826_v63 = vld [vmem:[%s7117_s9 + $0x10] sm:$0xff]  }
 0xcb4   :  { %v2287_v35 = vadd.f32 %v4881_v30, %v2279_v31 }
 0xcb6   :  { %v4997_v36 = vpack.c.bf16 %v2287_v35, %v2286_v33 }
 0xcb8   :  { %5422 = vmatmul.mubr.msk.bf16.vlgmr.msra.gmra.mrb[52].mxu0 %vm160_vm1, %v4997_v36 }
 0xcb9   :  { %5449 = vmatprep.mubr.msk.bf16.mxu0 %vm5972_vm2, %v5971_v27  ;;  %5446 = vmatpush3.bf16.msra.mxu0 %v5824_v26 }
 0xcba   :  { %5447 = vmatprep.subr.bf16.mxu0 %v5971_v27 }
 0xcbd   :  { %5448 = vmatpush3.bf16.msra.mxu0 %v5825_v29 }
 0xcbe   :  { %5453 = vmatprep.subr.bf16.mxu0 %v5826_v63 }
 0xd8b   :  { %v2348_v49 = vpop.f32.mrb[52].mxu0 }
 0xd8c   :  { %v2355_v52 = vmul.f32 %v2348_v49, %v2348_v49  ;;  %v5423_v54 = vpop.f32.mrb[53].mxu0 }
 0xd8d   :  { %v2351_v59 = vpop.f32.mrb[54].mxu0 }
 0xd8e   :  { %v2357_v0 = vmul.f32 %v2355_v52, %v2348_v49  ;;  %v2356_v50 = vmul.f32 %v2351_v59, %v2351_v59  ;;  %v5424_v1 = vpop.f32.mrb[55].mxu0 }
 0xd90   :  { %v2359_v55 = vmul.f32 0.044715, %v2357_v0  ;;  %v2358_v53 = vmul.f32 %v2356_v50, %v2351_v59  ;;  %v5827_v0 = vld [vmem:[%s7117_s9 + $0x18] sm:$0xff]  }
 0xd92   :  { %v2361_v60 = vadd.f32 %v2359_v55, %v2348_v49  ;;  %v2360_v61 = vmul.f32 0.044715, %v2358_v53 }
 0xd94   :  { %v2363_v9 = vmul.f32 0.7978846, %v2361_v60  ;;  %v2362_v11 = vadd.f32 %v2360_v61, %v2351_v59 }
 0xd96   :  { %5902 = vtanh.f32 %v2363_v9  ;;  %v2364_v20 = vmul.f32 0.7978846, %v2362_v11 }
 0xd98   :  { %5904 = vtanh.f32 %v2364_v20 }
 0xda0   :  { %v5903_v51 = vpop.eup %5902 }
 0xda1   :  { %v2367_v2 = vadd.f32 1.0, %v5903_v51 }
 0xda2   :  { %v5905_v14 = vpop.eup %5904 }
 0xda3   :  { %v2369_v3 = vmul.f32 0.5, %v2367_v2  ;;  %v2368_v8 = vadd.f32 1.0, %v5905_v14 }
 0xda5   :  { %v2370_v40 = vmul.f32 0.5, %v2368_v8  ;;  %v2371_v34 = vmul.f32 %v2369_v3, %v2348_v49 }
 0xda7   :  { %v2372_v4 = vmul.f32 %v2370_v40, %v2351_v59 }
 0xda9   :  { %v2373_v5 = vpack.c.bf16 %v2372_v4, %v2371_v34 }
 0xdab   :  { %5442 = vmatmul.mubr.bf16.vlgmr.msra.gmra.mrb[64].mxu1 %v2373_v5 }
 0xdac   :  { %5477 = vmatprep.mubr.msk.bf16.mxu1 %vm5972_vm2, %v5971_v27 }
 0xe7e   :  { %v2472_v6 = vpop.f32.mrb[64].mxu1 }
 0xe7f   :  { %v6614_v57 = vadd.f32 %v2472_v6, %v6550_v17  ;;  %v5443_v7 = vpop.f32.mrb[65].mxu1 }
 0xe80   :  { %v2475_v10 = vpop.f32.mrb[66].mxu1 }
 0xe81   :  { %v6617_v16 = vadd.f32 %v2475_v10, %v6552_v42  ;;  %v5444_v12 = vpop.f32.mrb[67].mxu1  ;;  %v2511_v47 = vsel %vm160_vm1, %v6614_v57, 0.0 }
 0xe82   :  { %2512 = vadd.xlane.f32.xlu1 %v2511_v47 }
 0xe83   :  { %v2514_v13 = vsel %vm160_vm1, %v6617_v16, 0.0 }
 0xe84   :  { %2515 = vadd.xlane.f32.xlu0 %v2514_v13 }
 0xf0f   :  { %v2513_v15 = vpop.xlane.xlu1 %2512 }
 0xf10   :  { %v2517_v18 = vmul.f32 0.03125, %v2513_v15 }
 0xf11   :  { %v2516_v62 = vpop.xlane.xlu0 %2515 }
 0xf12   :  { %v2519_v17 = vsub.f32 %v6614_v57, %v2517_v18  ;;  %v2518_v19 = vmul.f32 0.03125, %v2516_v62 }
 0xf14   :  { %v2520_v22 = vsub.f32 %v6617_v16, %v2518_v19  ;;  %v2521_v23 = vmul.f32 %v2519_v17, %v2519_v17 }
 0xf16   :  { %v2523_v42 = vsel %vm160_vm1, %v2521_v23, 0.0  ;;  %v2522_v24 = vmul.f32 %v2520_v22, %v2520_v22 }
 0xf17   :  { %2524 = vadd.xlane.f32.xlu1 %v2523_v42 }
 0xf18   :  { %v2526_v25 = vsel %vm160_vm1, %v2522_v24, 0.0 }
 0xf19   :  { %2527 = vadd.xlane.f32.xlu0 %v2526_v25 }
 0xfa4   :  { %v2525_v30 = vpop.xlane.xlu1 %2524 }
 0xfa5   :  { %v2529_v31 = vmul.f32 0.03125, %v2525_v30 }
 0xfa6   :  { %v2528_v33 = vpop.xlane.xlu0 %2527 }
 0xfa7   :  { %v2531_v35 = vadd.f32 1e-05, %v2529_v31  ;;  %v2530_v36 = vmul.f32 0.03125, %v2528_v33 }
 0xfa9   :  { %5906 = vrsqrt.f32 %v2531_v35  ;;  %v2532_v38 = vadd.f32 1e-05, %v2530_v36 }
 0xfab   :  { %5908 = vrsqrt.f32 %v2532_v38 }
 0xfb3   :  { %v5907_v43 = vpop.eup %5906 }
 0xfb4   :  { %v2535_v56 = vmul.f32 %v5907_v43, %v2519_v17 }
 0xfb5   :  { %v5909_v46 = vpop.eup %5908 }
 0xfb6   :  { %v2543_v48 = vmul.f32 %v4900_v44, %v2535_v56  ;;  %v2536_v58 = vmul.f32 %v5909_v46, %v2520_v22 }
 0xfb8   :  { %v2544_v49 = vmul.f32 %v4900_v44, %v2536_v58  ;;  %v2551_v52 = vadd.f32 %v4901_v45, %v2543_v48 }
 0xfba   :  { %v2552_v54 = vadd.f32 %v4901_v45, %v2544_v49 }
 0xfbc   :  { %v4998_v59 = vpack.c.bf16 %v2552_v54, %v2551_v52 }
 0xfbe   :  { %5450 = vmatmul.mubr.msk.bf16.vlgmr.msra.gmra.mrb[56].mxu0 %vm160_vm1, %v4998_v59 }
 0xfbf   :  { %5454 = vmatpush3.bf16.msra.mxu0 %v5826_v63  ;;  %5457 = vmatprep.mubr.msk.bf16.mxu0 %vm160_vm1, %v2505_v32 }
 0xfc0   :  { %5455 = vmatprep.subr.bf16.mxu0 %v5827_v0 }
 0xfc3   :  { %5456 = vmatpush3.bf16.msra.mxu0 %v5827_v0 }
 0xfc4   :  { %5461 = vmatprep.subr.bf16.mxu0 %v5971_v27 }
 0xfc6   :  { %5458 = vmatmul.mubr.msk.bf16.vlgmr.msra.gmra.mrb[60].mxu0 %vm160_vm1, %v2506_v41 }
 0xfc7   :  { %5462 = vmatpush3.bf16.msra.mxu0 %v5826_v63  ;;  %5465 = vmatprep.mubr.msk.bf16.mxu0 %vm5972_vm2, %v5971_v27 }
 0xfc8   :  { %5463 = vmatprep.subr.bf16.mxu0 %v5971_v27 }
 0xfcb   :  { %5464 = vmatpush3.bf16.msra.mxu0 %v5827_v0 }
 0xfcc   :  { %5469 = vmatprep.subr.bf16.mxu0 %v5971_v27 }
 0xfce   :  { %5466 = vmatmul.mubr.msk.bf16.vlgmr.msra.gmra.mrb[64].mxu0 %vm160_vm1, %v4998_v59 }
 0xfcf   :  { %5471 = vmatprep.mubr.msk.bf16.mxu0 %vm5972_vm2, %v5971_v27 }
0x1091   :  { %v2614_v21 = vpop.f32.mrb[56].mxu0 }
0x1092   :  { %v5451_v28 = vpop.f32.mrb[57].mxu0  ;;  %v2621_v11 = vmul.f32 0.35355338, %v2614_v21 }
0x1093   :  { %v2617_v32 = vpop.f32.mrb[58].mxu0 }
0x1094   :  { %v5452_v37 = vpop.f32.mrb[59].mxu0  ;;  %v2622_v9 = vmul.f32 0.35355338, %v2617_v32  ;;  %v6681_v34 = vpack.c.bf16 %v2621_v11, %v2621_v11 }
0x1096   :  { %v6675_v3 = vpack.c.bf16 %v2622_v9, %v2622_v9 }
0x1099   :  { %v5459_v39 = vpop.f32.mrb[60].mxu0 }
0x109a   :  { %v2682_v41 = vpop.f32.mrb[61].mxu0 }
0x109b   :  { %v5460_v50 = vpop.f32.mrb[62].mxu0 }
0x109c   :  { %v6663_v1 = vpack.c.bf16 %v5460_v50, %v5459_v39  ;;  %v2685_v55 = vpop.f32.mrb[63].mxu0 }
0x109d   :  { %v6665_v53 = vpack.c.bf16 %v2685_v55, %v2682_v41 }
0x109e   :  { %v2792_v60 = vsel %vm449_vm3, %v6663_v1, 0 }
0x109f   :  { %5476 = vmatpush3.bf16.xpose.msra.mxu1 %v2792_v60  ;;  %v2746_v61 = vsel %vm449_vm3, %v6665_v53, 0 }
0x10a0   :  { %5470 = vmatpush3.bf16.xpose.msra.mxu0 %v2746_v61  ;;  %5487 = vmatprep.subr.bf16.mxu1 %v5971_v27 }
0x10a1   :  { %v2733_v20 = vpop.f32.mrb[64].mxu0  ;;  %5481 = vmatprep.subr.bf16.mxu0 %v5971_v27 }
0x10a2   :  { %v6673_v51 = vpack.c.bf16 %v2733_v20, %v2733_v20  ;;  %v5467_v2 = vpop.f32.mrb[65].mxu0 }
0x10a3   :  { %v2736_v14 = vpop.f32.mrb[66].mxu0 }
0x10a4   :  { %v6677_v8 = vpack.c.bf16 %v2736_v14, %v2736_v14  ;;  %2967 = vrot.lane.b32.xlu1 %v6673_v51, %s5973_s4  ;;  %v5468_v40 = vpop.f32.mrb[67].mxu0  ;;  %v2835_v5 = vsel %vm449_vm3, %v6673_v51, 0 }
0x10a6   :  { %5478 = vmatmul.mubr.msk.bf16.vlgmr.msra.gmra.mrb[68].mxu1 %vm449_vm3, %v6675_v3  ;;  %v2878_v4 = vsel %vm449_vm3, %v6677_v8, 0 }
0x10a7   :  { %5472 = vmatmul.mubr.msk.bf16.vlgmr.msra.gmra.mrb[68].mxu0 %vm449_vm3, %v6681_v34  ;;  %5488 = vmatpush3.bf16.xpose.msra.mxu1 %v2878_v4 }
0x10a8   :  { %5482 = vmatpush3.bf16.xpose.msra.mxu0 %v2835_v5  ;;  %5489 = vmatprep.mubr.msk.bf16.mxu1 %vm5972_vm2, %v5971_v27 }
0x10a9   :  { %5483 = vmatprep.mubr.msk.bf16.mxu0 %vm5972_vm2, %v5971_v27  ;;  %5493 = vmatprep.subr.bf16.mxu0 %v5971_v27 }
0x10aa   :  { %5499 = vmatprep.subr.bf16.mxu1 %v5971_v27 }
0x10ae   :  { %5490 = vmatmul.mubr.msk.bf16.vlgmr.msra.gmra.mrb[72].mxu1 %vm449_vm3, %v6675_v3 }
0x10af   :  { %5484 = vmatmul.mubr.msk.bf16.vlgmr.msra.gmra.mrb[72].mxu0 %vm449_vm3, %v6681_v34  ;;  %5501 = vmatprep.mubr.msk.bf16.mxu1 %vm5972_vm2, %v5971_v27 }
0x10b0   :  { %5495 = vmatprep.mubr.msk.bf16.mxu0 %vm5972_vm2, %v5971_v27 }
0x1116   :  { %v2968_v6 = vpop.permute.xlu1 %2967 }
0x1117   :  { %v2973_v7 = vsel %vm681_vm5, %v2968_v6, 0 }
0x1118   :  { %5494 = vmatpush3.bf16.msra.mxu0 %v2973_v7 }
0x1119   :  { %5505 = vmatprep.subr.bf16.mxu0 %v5971_v27 }
0x1179   :  { %v2828_v10 = vpop.f32.mrb[68].mxu1 }
0x117a   :  { %v2782_v12 = vpop.f32.mrb[68].mxu0  ;;  %v5479_v47 = vpop.f32.mrb[69].mxu1  ;;  %v2923_v13 = vsel %vm628_vm4, %v2828_v10, -inf }
0x117b   :  { %v5473_v15 = vpop.f32.mrb[69].mxu0  ;;  %2924 = vmax.xlane.f32.xlu0 %v2923_v13  ;;  %v2831_v18 = vpop.f32.mrb[70].mxu1  ;;  %v2920_v62 = vsel %vm628_vm4, %v2782_v12, -inf }
0x117c   :  { %2921 = vmax.xlane.f32.xlu1 %v2920_v62  ;;  %v2785_v17 = vpop.f32.mrb[70].mxu0  ;;  %v5480_v19 = vpop.f32.mrb[71].mxu1 }
0x117d   :  { %v5474_v22 = vpop.f32.mrb[71].mxu0 }
0x1181   :  { %v2914_v23 = vpop.f32.mrb[72].mxu1 }
0x1182   :  { %v2871_v42 = vpop.f32.mrb[72].mxu0  ;;  %v5491_v24 = vpop.f32.mrb[73].mxu1  ;;  %v2929_v25 = vsel %vm449_vm3, %v2914_v23, -inf }
0x1183   :  { %v5485_v26 = vpop.f32.mrb[73].mxu0  ;;  %2930 = vmax.xlane.f32.xlu0 %v2929_v25  ;;  %v2917_v29 = vpop.f32.mrb[74].mxu1  ;;  %v2926_v63 = vsel %vm449_vm3, %v2871_v42, -inf }
0x1184   :  { %2927 = vmax.xlane.f32.xlu1 %v2926_v63  ;;  %v2874_v30 = vpop.f32.mrb[74].mxu0  ;;  %v5492_v31 = vpop.f32.mrb[75].mxu1 }
0x1185   :  { %v5486_v33 = vpop.f32.mrb[75].mxu0 }
0x1195   :  { %3065 = vrot.lane.b32.xlu1 %v6665_v53, %s5973_s4 }
0x1199   :  { %3112 = vrot.lane.b32.xlu1 %v6663_v1, %s5973_s4  ;;  %3016 = vrot.lane.b32.xlu0 %v6677_v8, %s5973_s4 }
0x119d   :  { %3163 = vrot.lane.b32.xlu1 %v6665_v53, %s5974_s5  ;;  %3214 = vrot.lane.b32.xlu0 %v6663_v1, %s5974_s5 }
0x11a1   :  { %3161 = vrot.lane.b32.xlu1 %v6681_v34, %s5974_s5  ;;  %3212 = vrot.lane.b32.xlu0 %v6675_v3, %s5974_s5 }
0x11a5   :  { %3262 = vrot.lane.b32.xlu1 %v6673_v51, %s5974_s5  ;;  %3307 = vrot.lane.b32.xlu0 %v6677_v8, %s5974_s5 }
0x11a9   :  { %3398 = vrot.lane.b32.xlu1 %v6673_v51, %s5975_s1 }
0x1208   :  { %v2925_v35 = vpop.xlane.xlu0 %2924 }
0x1209   :  { %v2922_v36 = vpop.xlane.xlu1 %2921 }
0x1210   :  { %v2931_v38 = vpop.xlane.xlu0 %2930 }
0x1211   :  { %v2933_v43 = vmax.f32 %v2925_v35, %v2931_v38  ;;  %v2928_v44 = vpop.xlane.xlu1 %2927 }
0x1212   :  { %v2932_v56 = vmax.f32 %v2922_v36, %v2928_v44 }
0x1213   :  { %v2941_v46 = vsub.f32 %v2914_v23, %v2933_v43  ;;  %v2935_v54 = vsub.f32 %v2828_v10, %v2933_v43 }
0x1214   :  { %v2940_v48 = vsub.f32 %v2871_v42, %v2932_v56  ;;  %v3017_v58 = vpop.permute.xlu0 %3016  ;;  %v2934_v59 = vsub.f32 %v2782_v12, %v2932_v56 }
0x1215   :  { %v2944_v45 = vmul.f32 1.442695, %v2941_v46  ;;  %v3022_v49 = vsel %vm681_vm5, %v3017_v58, 0  ;;  %v2938_v0 = vmul.f32 1.442695, %v2935_v54  ;;  %v3066_v21 = vpop.permute.xlu1 %3065 }
0x1216   :  { %v2942_v52 = vmul.f32 1.442695, %v2940_v48  ;;  %5500 = vmatpush3.bf16.msra.mxu1 %v3022_v49  ;;  %v2936_v28 = vmul.f32 1.442695, %v2934_v59 }
0x1217   :  { %5511 = vmatprep.subr.bf16.mxu1 %v5971_v27  ;;  %5910 = vpow2.f32 %v2944_v45 }
0x1218   :  { %5912 = vpow2.f32 %v2942_v52  ;;  %v3215_v55 = vpop.permute.xlu0 %3214 }
0x1219   :  { %5914 = vpow2.f32 %v2938_v0  ;;  %v3113_v41 = vpop.permute.xlu1 %3112  ;;  %v3220_v2 = vsel %vm449_vm3, %v3215_v55, 0 }
0x121a   :  { %5916 = vpow2.f32 %v2936_v28 }
0x121c   :  { %v3213_v20 = vpop.permute.xlu0 %3212 }
0x121d   :  { %v3164_v61 = vpop.permute.xlu1 %3163 }
0x121e   :  { %v3169_v4 = vsel %vm449_vm3, %v3164_v61, 0 }
0x1220   :  { %v3308_v5 = vpop.permute.xlu0 %3307 }
0x1221   :  { %v6733_v32 = vpop.eup %5910  ;;  %v3162_v40 = vpop.permute.xlu1 %3161  ;;  %v3310_v7 = vsel %vm449_vm3, %v3308_v5, 0 }
0x1222   :  { %v2965_v37 = vpack.c.bf16 %v6733_v32, %v6733_v32  ;;  %v6737_v39 = vpop.eup %5912 }
0x1223   :  { %v2964_v50 = vpack.c.bf16 %v6737_v39, %v6737_v39  ;;  %v6749_v60 = vpop.eup %5914 }
0x1224   :  { %5502 = vmatmul.mubr.msk.bf16.vlgmr.msra.gmra.mrb[76].mxu1 %vm449_vm3, %v2965_v37  ;;  %v6751_v9 = vpop.eup %5916  ;;  %v2963_v11 = vpack.c.bf16 %v6749_v60, %v6749_v60 }
0x1225   :  { %5512 = vmatpush3.bf16.msra.mxu1 %v3113_v41  ;;  %5513 = vmatprep.mubr.msk.bf16.mxu1 %vm5972_vm2, %v5971_v27  ;;  %v2962_v14 = vpack.c.bf16 %v6751_v9, %v6751_v9  ;;  %v3263_v6 = vpop.permute.xlu1 %3262 }
0x1226   :  { %5496 = vmatmul.mubr.msk.bf16.vlgmr.msra.gmra.mrb[76].mxu0 %vm449_vm3, %v2964_v50  ;;  %5523 = vmatprep.subr.bf16.mxu1 %v5971_v27  ;;  %v3265_v10 = vsel %vm449_vm3, %v3263_v6, 0 }
0x1227   :  { %5506 = vmatpush3.bf16.msra.mxu0 %v3066_v21  ;;  %5507 = vmatprep.mubr.msk.bf16.mxu0 %vm5972_vm2, %v5971_v27 }
0x1228   :  { %5517 = vmatprep.subr.bf16.mxu0 %v5971_v27 }
0x1229   :  { %v3399_v12 = vpop.permute.xlu1 %3398 }
0x122a   :  { %v3404_v47 = vsel %vm681_vm5, %v3399_v12, 0 }
0x1230   :  { %5514 = vmatmul.mubr.msk.bf16.vlgmr.msra.gmra.mrb[76].mxu1 %vm628_vm4, %v2963_v11 }
0x1231   :  { %5524 = vmatpush3.bf16.xpose.msra.mxu1 %v3220_v2  ;;  %5525 = vmatprep.mubr.msk.bf16.mxu1 %vm5972_vm2, %v5971_v27 }
0x1232   :  { %5508 = vmatmul.mubr.msk.bf16.vlgmr.msra.gmra.mrb[76].mxu0 %vm628_vm4, %v2962_v14  ;;  %5535 = vmatprep.subr.bf16.mxu1 %v5971_v27 }
0x1233   :  { %5518 = vmatpush3.bf16.xpose.msra.mxu0 %v3169_v4  ;;  %5519 = vmatprep.mubr.msk.bf16.mxu0 %vm5972_vm2, %v5971_v27 }
0x1234   :  { %5529 = vmatprep.subr.bf16.mxu0 %v5971_v27 }
0x1238   :  { %5526 = vmatmul.mubr.msk.bf16.vlgmr.msra.gmra.mrb[80].mxu1 %vm449_vm3, %v3213_v20 }
0x1239   :  { %5536 = vmatpush3.bf16.xpose.msra.mxu1 %v3310_v7  ;;  %5537 = vmatprep.mubr.msk.bf16.mxu1 %vm5972_vm2, %v5971_v27 }
0x123a   :  { %5520 = vmatmul.mubr.msk.bf16.vlgmr.msra.gmra.mrb[80].mxu0 %vm449_vm3, %v3162_v40  ;;  %5547 = vmatprep.subr.bf16.mxu1 %v5971_v27 }
0x123b   :  { %5530 = vmatpush3.bf16.xpose.msra.mxu0 %v3265_v10  ;;  %5531 = vmatprep.mubr.msk.bf16.mxu0 %vm5972_vm2, %v5971_v27 }
0x123c   :  { %5541 = vmatprep.subr.bf16.mxu0 %v5971_v27 }
0x1240   :  { %5538 = vmatmul.mubr.msk.bf16.vlgmr.msra.gmra.mrb[84].mxu1 %vm449_vm3, %v3213_v20 }
0x1241   :  { %5549 = vmatprep.mubr.msk.bf16.mxu1 %vm5972_vm2, %v5971_v27 }
0x1242   :  { %5532 = vmatmul.mubr.msk.bf16.vlgmr.msra.gmra.mrb[84].mxu0 %vm449_vm3, %v3162_v40 }
0x1243   :  { %5542 = vmatpush3.bf16.msra.mxu0 %v3404_v47  ;;  %5543 = vmatprep.mubr.msk.bf16.mxu0 %vm5972_vm2, %v5971_v27 }
0x1244   :  { %5553 = vmatprep.subr.bf16.mxu0 %v5971_v27 }
0x1303   :  { %v6785_v13 = vpop.f32.mrb[76].mxu1 }
0x1304   :  { %v5515_v15 = vpop.f32.mrb[77].mxu1 }
0x1305   :  { %v6787_v18 = vpop.f32.mrb[76].mxu0  ;;  %v3155_v62 = vpop.f32.mrb[78].mxu1 }
0x1306   :  { %v5509_v17 = vpop.f32.mrb[77].mxu0  ;;  %v5516_v19 = vpop.f32.mrb[79].mxu1 }
0x1307   :  { %v3108_v22 = vpop.f32.mrb[78].mxu0 }
0x1308   :  { %v5510_v23 = vpop.f32.mrb[79].mxu0 }
0x130b   :  { %v3256_v42 = vpop.f32.mrb[80].mxu1 }
0x130c   :  { %v5527_v24 = vpop.f32.mrb[81].mxu1  ;;  %v3355_v25 = vsel %vm628_vm4, %v3256_v42, -inf }
0x130d   :  { %v3205_v26 = vpop.f32.mrb[80].mxu0  ;;  %3356 = vmax.xlane.f32.xlu0 %v3355_v25  ;;  %v3259_v29 = vpop.f32.mrb[82].mxu1 }
0x130e   :  { %v5521_v63 = vpop.f32.mrb[81].mxu0  ;;  %v3352_v30 = vsel %vm628_vm4, %v3205_v26, -inf  ;;  %v5528_v31 = vpop.f32.mrb[83].mxu1 }
0x130f   :  { %3353 = vmax.xlane.f32.xlu1 %v3352_v30  ;;  %v3208_v33 = vpop.f32.mrb[82].mxu0 }
0x1310   :  { %v5522_v35 = vpop.f32.mrb[83].mxu0 }
0x1313   :  { %v3346_v36 = vpop.f32.mrb[84].mxu1 }
0x1314   :  { %v5539_v38 = vpop.f32.mrb[85].mxu1  ;;  %v3361_v43 = vsel %vm449_vm3, %v3346_v36, -inf }
0x1315   :  { %v3301_v44 = vpop.f32.mrb[84].mxu0  ;;  %3362 = vmax.xlane.f32.xlu0 %v3361_v43  ;;  %v3349_v56 = vpop.f32.mrb[86].mxu1 }
0x1316   :  { %v5533_v46 = vpop.f32.mrb[85].mxu0  ;;  %v5540_v48 = vpop.f32.mrb[87].mxu1  ;;  %v3358_v49 = vsel %vm449_vm3, %v3301_v44, -inf }
0x1317   :  { %v3304_v58 = vpop.f32.mrb[86].mxu0 }
0x1318   :  { %v5534_v45 = vpop.f32.mrb[87].mxu0 }
0x1319   :  { %3359 = vmax.xlane.f32.xlu0 %v3358_v49 }
0x1320   :  { %3494 = vrot.lane.b32.xlu1 %v6665_v53, %s5975_s1 }
0x1324   :  { %3540 = vrot.lane.b32.xlu1 %v6663_v1, %s5975_s1 }
0x1328   :  { %3590 = vrot.lane.b32.xlu1 %v6665_v53, %s5976_s30 }
0x132c   :  { %3588 = vrot.lane.b32.xlu1 %v6681_v34, %s5976_s30 }
0x132f   :  { %3446 = vrot.lane.b32.xlu0 %v6677_v8, %s5975_s1 }
0x1330   :  { %3688 = vrot.lane.b32.xlu1 %v6673_v51, %s5976_s30 }
0x1333   :  { %3640 = vrot.lane.b32.xlu0 %v6663_v1, %s5976_s30 }
0x1334   :  { %3824 = vrot.lane.b32.xlu1 %v6673_v51, %s5977_s18 }
0x1337   :  { %3638 = vrot.lane.b32.xlu0 %v6675_v3, %s5976_s30 }
0x133b   :  { %3733 = vrot.lane.b32.xlu0 %v6677_v8, %s5976_s30 }
0x139a   :  { %v3357_v52 = vpop.xlane.xlu0 %3356 }
0x139c   :  { %v3354_v21 = vpop.xlane.xlu1 %3353 }
0x13a0   :  { %v3495_v40 = vpop.permute.xlu1 %3494 }
0x13a2   :  { %v3363_v54 = vpop.xlane.xlu0 %3362 }
0x13a3   :  { %v3365_v59 = vmax.f32 %v3357_v52, %v3363_v54 }
0x13a4   :  { %v3541_v7 = vpop.permute.xlu1 %3540 }
0x13a5   :  { %v3373_v0 = vsub.f32 %v3346_v36, %v3365_v59  ;;  %v3367_v20 = vsub.f32 %v3256_v42, %v3365_v59 }
0x13a6   :  { %v3360_v28 = vpop.xlane.xlu0 %3359 }
0x13a7   :  { %v3376_v37 = vmul.f32 1.442695, %v3373_v0  ;;  %v3364_v41 = vmax.f32 %v3354_v21, %v3360_v28  ;;  %v3370_v2 = vmul.f32 1.442695, %v3367_v20 }
0x13a8   :  { %v3591_v62 = vpop.permute.xlu1 %3590 }
0x13a9   :  { %v3372_v50 = vsub.f32 %v3301_v44, %v3364_v41  ;;  %5918 = vpow2.f32 %v3376_v37  ;;  %v3366_v14 = vsub.f32 %v3205_v26, %v3364_v41  ;;  %v3596_v25 = vsel %vm449_vm3, %v3591_v62, 0 }
0x13aa   :  { %v3447_v55 = vpop.permute.xlu0 %3446 }
0x13ab   :  { %v3374_v61 = vmul.f32 1.442695, %v3372_v50  ;;  %v3452_v11 = vsel %vm681_vm5, %v3447_v55, 0  ;;  %v3368_v5 = vmul.f32 1.442695, %v3366_v14 }
0x13ac   :  { %5548 = vmatpush3.bf16.msra.mxu1 %v3452_v11  ;;  %v3589_v24 = vpop.permute.xlu1 %3588 }
0x13ad   :  { %5559 = vmatprep.subr.bf16.mxu1 %v5971_v27  ;;  %5920 = vpow2.f32 %v3374_v61 }
0x13ae   :  { %5922 = vpow2.f32 %v3370_v2  ;;  %v3641_v47 = vpop.permute.xlu0 %3640 }
0x13af   :  { %5924 = vpow2.f32 %v3368_v5  ;;  %v3646_v23 = vsel %vm449_vm3, %v3641_v47, 0 }
0x13b0   :  { %v3689_v63 = vpop.permute.xlu1 %3688 }
0x13b1   :  { %v3691_v30 = vsel %vm449_vm3, %v3689_v63, 0 }
0x13b2   :  { %v3639_v22 = vpop.permute.xlu0 %3638 }
0x13b3   :  { %v6815_v4 = vpop.eup %5918 }
0x13b4   :  { %v3397_v6 = vpack.c.bf16 %v6815_v4, %v6815_v4  ;;  %v3825_v31 = vpop.permute.xlu1 %3824 }
0x13b5   :  { %v3830_v33 = vsel %vm681_vm5, %v3825_v31, 0 }
0x13b6   :  { %5550 = vmatmul.mubr.msk.bf16.vlgmr.msra.gmra.mrb[88].mxu1 %vm449_vm3, %v3397_v6  ;;  %v3734_v26 = vpop.permute.xlu0 %3733 }
0x13b7   :  { %v6820_v10 = vpop.eup %5920  ;;  %5560 = vmatpush3.bf16.msra.mxu1 %v3541_v7  ;;  %5561 = vmatprep.mubr.msk.bf16.mxu1 %vm5972_vm2, %v5971_v27  ;;  %v3736_v29 = vsel %vm449_vm3, %v3734_v26, 0 }
0x13b8   :  { %v3396_v12 = vpack.c.bf16 %v6820_v10, %v6820_v10  ;;  %5571 = vmatprep.subr.bf16.mxu1 %v5971_v27  ;;  %v6831_v15 = vpop.eup %5922 }
0x13b9   :  { %v3395_v17 = vpack.c.bf16 %v6831_v15, %v6831_v15  ;;  %v6835_v19 = vpop.eup %5924 }
0x13ba   :  { %5544 = vmatmul.mubr.msk.bf16.vlgmr.msra.gmra.mrb[88].mxu0 %vm449_vm3, %v3396_v12  ;;  %v3394_v42 = vpack.c.bf16 %v6835_v19, %v6835_v19 }
0x13bb   :  { %5554 = vmatpush3.bf16.msra.mxu0 %v3495_v40  ;;  %5555 = vmatprep.mubr.msk.bf16.mxu0 %vm5972_vm2, %v5971_v27 }
0x13bc   :  { %5565 = vmatprep.subr.bf16.mxu0 %v5971_v27 }
0x13c2   :  { %5562 = vmatmul.mubr.msk.bf16.vlgmr.msra.gmra.mrb[88].mxu1 %vm628_vm4, %v3395_v17 }
0x13c3   :  { %5572 = vmatpush3.bf16.xpose.msra.mxu1 %v3646_v23  ;;  %5573 = vmatprep.mubr.msk.bf16.mxu1 %vm5972_vm2, %v5971_v27 }
0x13c4   :  { %5583 = vmatprep.subr.bf16.mxu1 %v5971_v27 }
0x13c6   :  { %5556 = vmatmul.mubr.msk.bf16.vlgmr.msra.gmra.mrb[88].mxu0 %vm628_vm4, %v3394_v42 }
0x13c7   :  { %5566 = vmatpush3.bf16.xpose.msra.mxu0 %v3596_v25  ;;  %5567 = vmatprep.mubr.msk.bf16.mxu0 %vm5972_vm2, %v5971_v27 }
0x13c8   :  { %5577 = vmatprep.subr.bf16.mxu0 %v5971_v27 }
0x13ca   :  { %5574 = vmatmul.mubr.msk.bf16.vlgmr.msra.gmra.mrb[92].mxu1 %vm449_vm3, %v3639_v22 }
0x13cb   :  { %5584 = vmatpush3.bf16.xpose.msra.mxu1 %v3736_v29  ;;  %5585 = vmatprep.mubr.msk.bf16.mxu1 %vm5972_vm2, %v5971_v27 }
0x13cc   :  { %5595 = vmatprep.subr.bf16.mxu1 %v5971_v27 }
0x13ce   :  { %5568 = vmatmul.mubr.msk.bf16.vlgmr.msra.gmra.mrb[92].mxu0 %vm449_vm3, %v3589_v24 }
0x13cf   :  { %5578 = vmatpush3.bf16.xpose.msra.mxu0 %v3691_v30  ;;  %5579 = vmatprep.mubr.msk.bf16.mxu0 %vm5972_vm2, %v5971_v27 }
0x13d0   :  { %5589 = vmatprep.subr.bf16.mxu0 %v5971_v27 }
0x13d2   :  { %5586 = vmatmul.mubr.msk.bf16.vlgmr.msra.gmra.mrb[96].mxu1 %vm449_vm3, %v3639_v22 }
0x13d3   :  { %5597 = vmatprep.mubr.msk.bf16.mxu1 %vm5972_vm2, %v5971_v27 }
0x13d6   :  { %5580 = vmatmul.mubr.msk.bf16.vlgmr.msra.gmra.mrb[96].mxu0 %vm449_vm3, %v3589_v24 }
0x13d7   :  { %5590 = vmatpush3.bf16.msra.mxu0 %v3830_v33  ;;  %5591 = vmatprep.mubr.msk.bf16.mxu0 %vm5972_vm2, %v5971_v27 }
0x13d8   :  { %5601 = vmatprep.subr.bf16.mxu0 %v5971_v27 }
0x1495   :  { %v6867_v35 = vpop.f32.mrb[88].mxu1 }
0x1496   :  { %v5563_v36 = vpop.f32.mrb[89].mxu1 }
0x1497   :  { %v3583_v38 = vpop.f32.mrb[90].mxu1 }
0x1498   :  { %v5564_v43 = vpop.f32.mrb[91].mxu1 }
0x1499   :  { %v6869_v44 = vpop.f32.mrb[88].mxu0 }
0x149a   :  { %v5557_v56 = vpop.f32.mrb[89].mxu0 }
0x149b   :  { %v3537_v46 = vpop.f32.mrb[90].mxu0 }
0x149c   :  { %v5558_v48 = vpop.f32.mrb[91].mxu0 }
0x149d   :  { %v3682_v58 = vpop.f32.mrb[92].mxu1 }
0x149e   :  { %v5575_v45 = vpop.f32.mrb[93].mxu1  ;;  %v3781_v49 = vsel %vm628_vm4, %v3682_v58, -inf }
0x149f   :  { %3782 = vmax.xlane.f32.xlu0 %v3781_v49  ;;  %v3685_v52 = vpop.f32.mrb[94].mxu1 }
0x14a0   :  { %v5576_v54 = vpop.f32.mrb[95].mxu1 }
0x14a1   :  { %v3632_v59 = vpop.f32.mrb[92].mxu0 }
0x14a2   :  { %v5569_v0 = vpop.f32.mrb[93].mxu0  ;;  %v3778_v21 = vsel %vm628_vm4, %v3632_v59, -inf }
0x14a3   :  { %3779 = vmax.xlane.f32.xlu1 %v3778_v21  ;;  %v3635_v28 = vpop.f32.mrb[94].mxu0 }
0x14a4   :  { %v5570_v37 = vpop.f32.mrb[95].mxu0 }
0x14a5   :  { %v3772_v41 = vpop.f32.mrb[96].mxu1 }
0x14a6   :  { %v5587_v50 = vpop.f32.mrb[97].mxu1  ;;  %v3787_v55 = vsel %vm449_vm3, %v3772_v41, -inf }
0x14a7   :  { %3788 = vmax.xlane.f32.xlu0 %v3787_v55  ;;  %v3775_v61 = vpop.f32.mrb[98].mxu1 }
0x14a8   :  { %v5588_v11 = vpop.f32.mrb[99].mxu1 }
0x14a9   :  { %v3727_v20 = vpop.f32.mrb[96].mxu0 }
0x14aa   :  { %v5581_v2 = vpop.f32.mrb[97].mxu0  ;;  %v3784_v14 = vsel %vm449_vm3, %v3727_v20, -inf }
0x14ab   :  { %v3730_v40 = vpop.f32.mrb[98].mxu0  ;;  %3785 = vmax.xlane.f32.xlu0 %v3784_v14 }
0x14ac   :  { %v5582_v5 = vpop.f32.mrb[99].mxu0 }
0x14b4   :  { %3920 = vrot.lane.b32.xlu1 %v6665_v53, %s5977_s18 }
0x14b8   :  { %3966 = vrot.lane.b32.xlu1 %v6663_v1, %s5977_s18 }
0x14bc   :  { %4016 = vrot.lane.b32.xlu1 %v6665_v53, %s5978_s19 }
0x14c0   :  { %4014 = vrot.lane.b32.xlu1 %v6681_v34, %s5978_s19 }
0x14c1   :  { %3872 = vrot.lane.b32.xlu0 %v6677_v8, %s5977_s18 }
0x14c4   :  { %4114 = vrot.lane.b32.xlu1 %v6673_v51, %s5978_s19 }
0x14c5   :  { %4066 = vrot.lane.b32.xlu0 %v6663_v1, %s5978_s19 }
0x14c9   :  { %4064 = vrot.lane.b32.xlu0 %v6675_v3, %s5978_s19 }
0x14cd   :  { %4159 = vrot.lane.b32.xlu0 %v6677_v8, %s5978_s19 }
0x152c   :  { %v3783_v6 = vpop.xlane.xlu0 %3782 }
0x1530   :  { %v3780_v34 = vpop.xlane.xlu1 %3779 }
0x1534   :  { %v3789_v7 = vpop.xlane.xlu0 %3788  ;;  %v3921_v63 = vpop.permute.xlu1 %3920 }
0x1535   :  { %v3791_v12 = vmax.f32 %v3783_v6, %v3789_v7 }
0x1537   :  { %v3799_v47 = vsub.f32 %v3772_v41, %v3791_v12  ;;  %v3793_v26 = vsub.f32 %v3682_v58, %v3791_v12 }
0x1538   :  { %v3786_v62 = vpop.xlane.xlu0 %3785  ;;  %v3967_v36 = vpop.permute.xlu1 %3966 }
0x1539   :  { %v3802_v17 = vmul.f32 1.442695, %v3799_v47  ;;  %v3790_v22 = vmax.f32 %v3780_v34, %v3786_v62  ;;  %v3796_v3 = vmul.f32 1.442695, %v3793_v26 }
0x153b   :  { %v3798_v23 = vsub.f32 %v3727_v20, %v3790_v22  ;;  %5926 = vpow2.f32 %v3802_v17  ;;  %v3792_v29 = vsub.f32 %v3632_v59, %v3790_v22 }
0x153c   :  { %v3873_v42 = vpop.permute.xlu0 %3872  ;;  %v4017_v48 = vpop.permute.xlu1 %4016 }
0x153d   :  { %v3800_v24 = vmul.f32 1.442695, %v3798_v23  ;;  %v3878_v25 = vsel %vm681_vm5, %v3873_v42, 0  ;;  %v3794_v31 = vmul.f32 1.442695, %v3792_v29  ;;  %v4022_v0 = vsel %vm449_vm3, %v4017_v48, 0 }
0x153e   :  { %5596 = vmatpush3.bf16.msra.mxu1 %v3878_v25 }
0x153f   :  { %5607 = vmatprep.subr.bf16.mxu1 %v5971_v27  ;;  %5928 = vpow2.f32 %v3800_v24 }
0x1540   :  { %5930 = vpow2.f32 %v3796_v3  ;;  %v4067_v56 = vpop.permute.xlu0 %4066  ;;  %v4015_v59 = vpop.permute.xlu1 %4014 }
0x1541   :  { %5932 = vpow2.f32 %v3794_v31  ;;  %v4072_v52 = vsel %vm449_vm3, %v4067_v56, 0  ;;  %v3381_v56 = vsel %vm628_vm4, %v6831_v15, 0.0 }
0x1544   :  { %v4065_v49 = vpop.permute.xlu0 %4064  ;;  %v4115_v37 = vpop.permute.xlu1 %4114 }
0x1545   :  { %v6895_v30 = vpop.eup %5926  ;;  %v4117_v41 = vsel %vm449_vm3, %v4115_v37, 0 }
0x1546   :  { %v3823_v33 = vpack.c.bf16 %v6895_v30, %v6895_v30 }
0x1548   :  { %5598 = vmatmul.mubr.msk.bf16.vlgmr.msra.gmra.mrb[100].mxu1 %vm449_vm3, %v3823_v33  ;;  %v4160_v21 = vpop.permute.xlu0 %4159 }
0x1549   :  { %v6900_v38 = vpop.eup %5928  ;;  %5608 = vmatpush3.bf16.msra.mxu1 %v3967_v36  ;;  %5609 = vmatprep.mubr.msk.bf16.mxu1 %vm5972_vm2, %v5971_v27  ;;  %v4162_v28 = vsel %vm449_vm3, %v4160_v21, 0 }
0x154a   :  { %v3822_v43 = vpack.c.bf16 %v6900_v38, %v6900_v38  ;;  %5619 = vmatprep.subr.bf16.mxu1 %v5971_v27  ;;  %v6911_v46 = vpop.eup %5930 }
0x154b   :  { %v3821_v58 = vpack.c.bf16 %v6911_v46, %v6911_v46  ;;  %v6915_v45 = vpop.eup %5932  ;;  %v3807_v15 = vsel %vm628_vm4, %v6911_v46, 0.0 }
0x154c   :  { %5592 = vmatmul.mubr.msk.bf16.vlgmr.msra.gmra.mrb[100].mxu0 %vm449_vm3, %v3822_v43  ;;  %v3820_v54 = vpack.c.bf16 %v6915_v45, %v6915_v45  ;;  %v3378_v43 = vsel %vm628_vm4, %v6835_v19, 0.0  ;;  %v3813_v19 = vsel %vm449_vm3, %v6895_v30, 0.0 }
0x154d   :  { %5602 = vmatpush3.bf16.msra.mxu0 %v3921_v63  ;;  %5603 = vmatprep.mubr.msk.bf16.mxu0 %vm5972_vm2, %v5971_v27 }
0x154e   :  { %5613 = vmatprep.subr.bf16.mxu0 %v5971_v27 }
0x1554   :  { %5610 = vmatmul.mubr.msk.bf16.vlgmr.msra.gmra.mrb[100].mxu1 %vm628_vm4, %v3821_v58 }
0x1555   :  { %5620 = vmatpush3.bf16.xpose.msra.mxu1 %v4072_v52  ;;  %5621 = vmatprep.mubr.msk.bf16.mxu1 %vm5972_vm2, %v5971_v27 }
0x1556   :  { %5631 = vmatprep.subr.bf16.mxu1 %v5971_v27 }
0x1558   :  { %5604 = vmatmul.mubr.msk.bf16.vlgmr.msra.gmra.mrb[100].mxu0 %vm628_vm4, %v3820_v54 }
0x1559   :  { %5614 = vmatpush3.bf16.xpose.msra.mxu0 %v4022_v0  ;;  %5615 = vmatprep.mubr.msk.bf16.mxu0 %vm5972_vm2, %v5971_v27 }
0x155a   :  { %5625 = vmatprep.subr.bf16.mxu0 %v5971_v27 }
0x155c   :  { %5622 = vmatmul.mubr.msk.bf16.vlgmr.msra.gmra.mrb[104].mxu1 %vm449_vm3, %v4065_v49 }
0x155d   :  { %5632 = vmatpush3.bf16.xpose.msra.mxu1 %v4162_v28  ;;  %5633 = vmatprep.mubr.msk.bf16.mxu1 %vm5972_vm2, %v5971_v27 }
0x155e   :  { %5643 = vmatprep.subr.bf16.mxu1 %v5971_v27 }
0x1560   :  { %5616 = vmatmul.mubr.msk.bf16.vlgmr.msra.gmra.mrb[104].mxu0 %vm449_vm3, %v4015_v59 }
0x1561   :  { %5626 = vmatpush3.bf16.xpose.msra.mxu0 %v4117_v41  ;;  %5627 = vmatprep.mubr.msk.bf16.mxu0 %vm5972_vm2, %v5971_v27 }
0x1562   :  { %5637 = vmatprep.subr.bf16.mxu0 %v5971_v27 }
0x1564   :  { %5634 = vmatmul.mubr.msk.bf16.vlgmr.msra.gmra.mrb[108].mxu1 %vm449_vm3, %v4065_v49 }
0x1565   :  { %5645 = vmatprep.mubr.msk.bf16.mxu1 %vm5972_vm2, %v5971_v27 }
0x1568   :  { %5628 = vmatmul.mubr.msk.bf16.vlgmr.msra.gmra.mrb[108].mxu0 %vm449_vm3, %v4015_v59 }
0x1569   :  { %5639 = vmatprep.mubr.msk.bf16.mxu0 %vm5972_vm2, %v5971_v27 }
0x1627   :  { %v6945_v50 = vpop.f32.mrb[100].mxu1 }
0x1628   :  { %v5611_v55 = vpop.f32.mrb[101].mxu1 }
0x1629   :  { %v4009_v61 = vpop.f32.mrb[102].mxu1 }
0x162a   :  { %v5612_v11 = vpop.f32.mrb[103].mxu1 }
0x162b   :  { %v6947_v20 = vpop.f32.mrb[100].mxu0 }
0x162c   :  { %v5605_v2 = vpop.f32.mrb[101].mxu0 }
0x162d   :  { %v3963_v14 = vpop.f32.mrb[102].mxu0 }
0x162e   :  { %v5606_v40 = vpop.f32.mrb[103].mxu0 }
0x162f   :  { %v4108_v5 = vpop.f32.mrb[104].mxu1 }
0x1630   :  { %v5623_v6 = vpop.f32.mrb[105].mxu1  ;;  %v4207_v7 = vsel %vm628_vm4, %v4108_v5, -inf }
0x1631   :  { %4208 = vmax.xlane.f32.xlu0 %v4207_v7  ;;  %v4111_v12 = vpop.f32.mrb[106].mxu1 }
0x1632   :  { %v5624_v47 = vpop.f32.mrb[107].mxu1 }
0x1633   :  { %v4058_v34 = vpop.f32.mrb[104].mxu0 }
0x1634   :  { %v5617_v62 = vpop.f32.mrb[105].mxu0  ;;  %v4204_v17 = vsel %vm628_vm4, %v4058_v34, -inf }
0x1635   :  { %4205 = vmax.xlane.f32.xlu1 %v4204_v17  ;;  %v4061_v22 = vpop.f32.mrb[106].mxu0  ;;  %v2949_v62 = vsel %vm628_vm4, %v6749_v60, 0.0  ;;  %v2952_v60 = vsel %vm449_vm3, %v6737_v39, 0.0 }
0x1636   :  { %v5618_v23 = vpop.f32.mrb[107].mxu0  ;;  %v2955_v22 = vsel %vm449_vm3, %v6733_v32, 0.0 }
0x1637   :  { %v4198_v42 = vpop.f32.mrb[108].mxu1  ;;  %v2946_v23 = vsel %vm628_vm4, %v6751_v9, 0.0 }
0x1638   :  { %v5635_v24 = vpop.f32.mrb[109].mxu1  ;;  %v4213_v25 = vsel %vm449_vm3, %v4198_v42, -inf }
0x1639   :  { %4214 = vmax.xlane.f32.xlu0 %v4213_v25  ;;  %v4201_v26 = vpop.f32.mrb[110].mxu1 }
0x163a   :  { %v5636_v3 = vpop.f32.mrb[111].mxu1 }
0x163b   :  { %v4153_v29 = vpop.f32.mrb[108].mxu0 }
0x163c   :  { %v5629_v63 = vpop.f32.mrb[109].mxu0  ;;  %v4210_v31 = vsel %vm449_vm3, %v4153_v29, -inf }
0x163d   :  { %v4156_v33 = vpop.f32.mrb[110].mxu0  ;;  %4211 = vmax.xlane.f32.xlu0 %v4210_v31 }
0x163e   :  { %v5630_v36 = vpop.f32.mrb[111].mxu0 }
0x1646   :  { %4250 = vrot.lane.b32.xlu1 %v6673_v51, %s5979_s0  ;;  %v3804_v51 = vsel %vm628_vm4, %v6915_v45, 0.0 }
0x164a   :  { %4346 = vrot.lane.b32.xlu1 %v6665_v53, %s5979_s0  ;;  %v3384_v53 = vsel %vm449_vm3, %v6820_v10, 0.0 }
0x164e   :  { %4392 = vrot.lane.b32.xlu1 %v6663_v1, %s5979_s0  ;;  %v3810_v1 = vsel %vm449_vm3, %v6900_v38, 0.0 }
0x1653   :  { %4298 = vrot.lane.b32.xlu0 %v6677_v8, %s5979_s0  ;;  %v3387_v8 = vsel %vm449_vm3, %v6815_v4, 0.0 }
0x1672   :  { %3379 = vadd.xlane.f32.xlu1 %v3378_v43  ;;  %3382 = vadd.xlane.f32.xlu0 %v3381_v56 }
0x1676   :  { %3805 = vadd.xlane.f32.xlu1 %v3804_v51  ;;  %3385 = vadd.xlane.f32.xlu0 %v3384_v53 }
0x167a   :  { %3811 = vadd.xlane.f32.xlu1 %v3810_v1  ;;  %3388 = vadd.xlane.f32.xlu0 %v3387_v8 }
0x167e   :  { %3808 = vadd.xlane.f32.xlu0 %v3807_v15 }
0x1682   :  { %3814 = vadd.xlane.f32.xlu0 %v3813_v19 }
0x16be   :  { %v4209_v48 = vpop.xlane.xlu0 %4208 }
0x16c2   :  { %v4206_v10 = vpop.xlane.xlu1 %4205 }
0x16c6   :  { %v4251_v58 = vpop.permute.xlu1 %4250  ;;  %v4215_v45 = vpop.xlane.xlu0 %4214 }
0x16c7   :  { %v4256_v49 = vsel %vm681_vm5, %v4251_v58, 0  ;;  %v4217_v38 = vmax.f32 %v4209_v48, %v4215_v45  ;;  %v5828_v45 = vld [vmem:[%s7122_s10 + $0x10] sm:$0xff]  }
0x16c8   :  { %5638 = vmatpush3.bf16.msra.mxu0 %v4256_v49 }
0x16c9   :  { %v4219_v52 = vsub.f32 %v4108_v5, %v4217_v38  ;;  %v4225_v4 = vsub.f32 %v4198_v42, %v4217_v38  ;;  %5649 = vmatprep.subr.bf16.mxu0 %v5971_v27 }
0x16ca   :  { %v4212_v54 = vpop.xlane.xlu0 %4211  ;;  %v4347_v61 = vpop.permute.xlu1 %4346 }
0x16cb   :  { %v4222_v59 = vmul.f32 1.442695, %v4219_v52  ;;  %v4228_v46 = vmul.f32 1.442695, %v4225_v4  ;;  %v4216_v0 = vmax.f32 %v4206_v10, %v4212_v54 }
0x16cd   :  { %5934 = vpow2.f32 %v4222_v59  ;;  %v4218_v21 = vsub.f32 %v4058_v34, %v4216_v0  ;;  %v4224_v30 = vsub.f32 %v4153_v29, %v4216_v0 }
0x16ce   :  { %5936 = vpow2.f32 %v4228_v46  ;;  %v4299_v28 = vpop.permute.xlu0 %4298  ;;  %v4393_v6 = vpop.permute.xlu1 %4392 }
0x16cf   :  { %v4220_v37 = vmul.f32 1.442695, %v4218_v21  ;;  %v4226_v41 = vmul.f32 1.442695, %v4224_v30  ;;  %v4304_v55 = vsel %vm681_vm5, %v4299_v28, 0 }
0x16d0   :  { %5644 = vmatpush3.bf16.msra.mxu1 %v4304_v55 }
0x16d1   :  { %5938 = vpow2.f32 %v4220_v37  ;;  %5655 = vmatprep.subr.bf16.mxu1 %v5971_v27 }
0x16d2   :  { %5940 = vpow2.f32 %v4226_v41 }
0x16d7   :  { %v5935_v11 = vpop.eup %5934 }
0x16d8   :  { %v5937_v2 = vpop.eup %5936  ;;  %v4233_v14 = vsel %vm628_vm4, %v5935_v11, 0.0  ;;  %v4247_v42 = vpack.c.bf16 %v5935_v11, %v5935_v11 }
0x16d9   :  { %4234 = vadd.xlane.f32.xlu0 %v4233_v14  ;;  %v4249_v40 = vpack.c.bf16 %v5937_v2, %v5937_v2  ;;  %v4239_v12 = vsel %vm449_vm3, %v5937_v2, 0.0 }
0x16db   :  { %v5939_v5 = vpop.eup %5938  ;;  %5646 = vmatmul.mubr.msk.bf16.vlgmr.msra.gmra.mrb[112].mxu1 %vm449_vm3, %v4249_v40 }
0x16dc   :  { %v5941_v7 = vpop.eup %5940  ;;  %5656 = vmatpush3.bf16.msra.mxu1 %v4393_v6  ;;  %v4230_v47 = vsel %vm628_vm4, %v5939_v5, 0.0  ;;  %5657 = vmatprep.mubr.msk.bf16.mxu1 %vm5972_vm2, %v5971_v27  ;;  %v4246_v24 = vpack.c.bf16 %v5939_v5, %v5939_v5 }
0x16dd   :  { %4240 = vadd.xlane.f32.xlu0 %v4239_v12  ;;  %4231 = vadd.xlane.f32.xlu1 %v4230_v47  ;;  %v4248_v34 = vpack.c.bf16 %v5941_v7, %v5941_v7  ;;  %v4236_v17 = vsel %vm449_vm3, %v5941_v7, 0.0 }
0x16de   :  { %5669 = vmatprep.subr.bf16.mxu1 %v5971_v27 }
0x16df   :  { %5640 = vmatmul.mubr.msk.bf16.vlgmr.msra.gmra.mrb[112].mxu0 %vm449_vm3, %v4248_v34 }
0x16e0   :  { %5650 = vmatpush3.bf16.msra.mxu0 %v4347_v61  ;;  %5651 = vmatprep.mubr.msk.bf16.mxu0 %vm5972_vm2, %v5971_v27 }
0x16e1   :  { %2950 = vadd.xlane.f32.xlu0 %v2949_v62  ;;  %4237 = vadd.xlane.f32.xlu1 %v4236_v17 }
0x16e2   :  { %5661 = vmatprep.subr.bf16.mxu0 %v5971_v27 }
0x16e5   :  { %2956 = vadd.xlane.f32.xlu0 %v2955_v22  ;;  %2947 = vadd.xlane.f32.xlu1 %v2946_v23 }
0x16e7   :  { %5658 = vmatmul.mubr.msk.bf16.vlgmr.msra.gmra.mrb[112].mxu1 %vm628_vm4, %v4247_v42 }
0x16e8   :  { %5673 = vmatprep.mubr.msk.bf16.mxu1 %vm5972_vm2, %v5971_v27 }
0x16e9   :  { %2953 = vadd.xlane.f32.xlu1 %v2952_v60 }
0x16eb   :  { %5652 = vmatmul.mubr.msk.bf16.vlgmr.msra.gmra.mrb[112].mxu0 %vm628_vm4, %v4246_v24 }
0x16ec   :  { %5665 = vmatprep.mubr.msk.bf16.mxu0 %vm5972_vm2, %v5971_v27  ;;  %5662 = vmatpush3.bf16.msra.mxu0 %v5828_v45 }
0x16ed   :  { %5663 = vmatprep.subr.bf16.mxu0 %v5971_v27 }
0x16ff   :  { %v3380_v32 = vpop.xlane.xlu1 %3379  ;;  %v3383_v9 = vpop.xlane.xlu0 %3382 }
0x1703   :  { %v3806_v25 = vpop.xlane.xlu1 %3805  ;;  %v3386_v26 = vpop.xlane.xlu0 %3385 }
0x1704   :  { %v3390_v3 = vadd.f32 %v3386_v26, %v3380_v32 }
0x1706   :  { %5942 = vrcp.f32 %v3390_v3 }
0x1707   :  { %v3389_v29 = vpop.xlane.xlu0 %3388  ;;  %v3812_v31 = vpop.xlane.xlu1 %3811 }
0x1708   :  { %v3391_v63 = vadd.f32 %v3389_v29, %v3383_v9  ;;  %v3816_v33 = vadd.f32 %v3812_v31, %v3806_v25 }
0x170a   :  { %5944 = vrcp.f32 %v3391_v63 }
0x170b   :  { %v3809_v39 = vpop.xlane.xlu0 %3808  ;;  %5946 = vrcp.f32 %v3816_v33 }
0x170f   :  { %v3815_v36 = vpop.xlane.xlu0 %3814 }
0x1710   :  { %v3817_v43 = vadd.f32 %v3815_v36, %v3809_v39  ;;  %v5943_v56 = vpop.eup %5942 }
0x1711   :  { %v3586_v53 = vmul.f32 %v5943_v56, %v6869_v44 }
0x1712   :  { %5948 = vrcp.f32 %v3817_v43 }
0x1714   :  { %v5945_v51 = vpop.eup %5944 }
0x1715   :  { %v3587_v1 = vmul.f32 %v5945_v51, %v6867_v35  ;;  %v5947_v15 = vpop.eup %5946 }
0x1716   :  { %v4012_v48 = vmul.f32 %v5947_v15, %v6947_v20 }
0x1717   :  { %v5788_v8 = vpack.i.bf16 %v3587_v1, %v3586_v53 }
0x1719   :  { %5789 = vrot.lane.b32.xlu1 %v5788_v8, %s5980_s20 }
0x171c   :  { %v5949_v19 = vpop.eup %5948 }
0x171d   :  { %v4013_v10 = vmul.f32 %v5949_v19, %v6945_v50  ;;  %v5829_v50 = vld [vmem:[%s7122_s10 + $0x18] sm:$0xff]  }
0x171e   :  { %5664 = vmatpush3.bf16.msra.mxu0 %v5829_v50 }
0x171f   :  { %v5793_v58 = vpack.i.bf16 %v4013_v10, %v4012_v48  ;;  %5677 = vmatprep.subr.bf16.mxu0 %v5971_v27 }
0x1721   :  { %5794 = vrot.lane.b32.xlu0 %v5793_v58, %s5981_s21 }
0x1766   :  { %v4235_v35 = vpop.xlane.xlu0 %4234 }
0x176a   :  { %v4232_v44 = vpop.xlane.xlu1 %4231  ;;  %v4241_v49 = vpop.xlane.xlu0 %4240 }
0x176b   :  { %v4243_v52 = vadd.f32 %v4241_v49, %v4235_v35  ;;  %v5831_v49 = vld [vmem:[%s7123_s13 + $0x18] sm:$0xff]  }
0x176d   :  { %5950 = vrcp.f32 %v4243_v52 }
0x176e   :  { %v4238_v38 = vpop.xlane.xlu1 %4237  ;;  %v2951_v2 = vpop.xlane.xlu0 %2950 }
0x176f   :  { %v4242_v4 = vadd.f32 %v4238_v38, %v4232_v44  ;;  %v5830_v44 = vld [vmem:[%s7123_s13 + $0x10] sm:$0xff]  }
0x1770   :  { %5670 = vmatpush3.bf16.msra.mxu1 %v5830_v44 }
0x1771   :  { %5952 = vrcp.f32 %v4242_v4  ;;  %5671 = vmatprep.subr.bf16.mxu1 %v5971_v27 }
0x1772   :  { %v2948_v14 = vpop.xlane.xlu1 %2947  ;;  %v2957_v40 = vpop.xlane.xlu0 %2956 }
0x1773   :  { %v2959_v6 = vadd.f32 %v2957_v40, %v2951_v2  ;;  %v5832_v2 = vld [vmem:[%s7126_s14 + $0x40] sm:$0xff]   ;;  %v5834_v40 = vld [vmem:[%s7126_s14 + $0x50] sm:$0xff]  }
0x1774   :  { %5672 = vmatpush3.bf16.msra.mxu1 %v5831_v49 }
0x1775   :  { %5954 = vrcp.f32 %v2959_v6  ;;  %v5836_v6 = vld [vmem:[%s7126_s14 + $0x60] sm:$0xff]  }
0x1776   :  { %v2954_v5 = vpop.xlane.xlu1 %2953 }
0x1777   :  { %v5951_v46 = vpop.eup %5950  ;;  %v2958_v7 = vadd.f32 %v2954_v5, %v2948_v14  ;;  %v5833_v14 = vld [vmem:[%s7126_s14 + $0x48] sm:$0xff]   ;;  %v5835_v5 = vld [vmem:[%s7126_s14 + $0x58] sm:$0xff]  }
0x1779   :  { %5956 = vrcp.f32 %v2958_v7  ;;  %v5837_v7 = vld [vmem:[%s7126_s14 + $0x68] sm:$0xff]  }
0x177b   :  { %v5953_v21 = vpop.eup %5952 }
0x177f   :  { %v5955_v47 = vpop.eup %5954 }
0x1780   :  { %v3159_v24 = vmul.f32 %v5955_v47, %v6785_v13  ;;  %v5839_v47 = vld [vmem:[%s7126_s14 + $0x78] sm:$0xff]  }
0x1783   :  { %v5957_v62 = vpop.eup %5956 }
0x1784   :  { %v3158_v60 = vmul.f32 %v5957_v62, %v6787_v18 }
0x178b   :  { %v5790_v12 = vpop.permute.xlu1 %5789 }
0x178c   :  { %v5792_v17 = vunpack.i.h.bf16 %v5790_v12  ;;  %v5791_v22 = vunpack.i.l.bf16 %v5790_v12  ;;  %v5838_v12 = vld [vmem:[%s7126_s14 + $0x70] sm:$0xff]  }
0x178e   :  { %v4464_v9 = vsel %vm449_vm3, %v3158_v60, %v5791_v22  ;;  %v4465_v25 = vsel %vm449_vm3, %v3159_v24, %v5792_v17 }
0x1793   :  { %v5795_v34 = vpop.permute.xlu0 %5794 }
0x1794   :  { %v5797_v23 = vunpack.i.h.bf16 %v5795_v34  ;;  %v5796_v42 = vunpack.i.l.bf16 %v5795_v34 }
0x1796   :  { %v4467_v29 = vsel %vm628_vm4, %v4465_v25, %v5797_v23  ;;  %v4466_v63 = vsel %vm628_vm4, %v4464_v9, %v5796_v42 }
0x17ba   :  { %v4432_v20 = vpop.f32.mrb[112].mxu1 }
0x17bb   :  { %v5659_v54 = vpop.f32.mrb[113].mxu1  ;;  %v4439_v28 = vmul.f32 %v5951_v46, %v4432_v20  ;;  %v4960_v46 = vld [vmem:[%s7124_s11 + $0x1] ss:$0 sm:$0xff] }
0x17bc   :  { %v4435_v59 = vpop.f32.mrb[114].mxu1 }
0x17bd   :  { %v5660_v0 = vpop.f32.mrb[115].mxu1 }
0x17be   :  { %v4386_v30 = vpop.f32.mrb[112].mxu0 }
0x17bf   :  { %v4438_v37 = vmul.f32 %v5953_v21, %v4386_v30  ;;  %v5653_v41 = vpop.f32.mrb[113].mxu0 }
0x17c0   :  { %v4389_v55 = vpop.f32.mrb[114].mxu0 }
0x17c1   :  { %v5798_v61 = vpack.i.bf16 %v4439_v28, %v4438_v37  ;;  %v5654_v11 = vpop.f32.mrb[115].mxu0  ;;  %v4961_v37 = vld [vmem:[%s7125_s12 + $0x1] ss:$0 sm:$0xff] }
0x17c3   :  { %5799 = vrot.lane.b32.xlu1 %v5798_v61, %s5982_s26 }
0x1835   :  { %v5800_v32 = vpop.permute.xlu1 %5799 }
0x1836   :  { %v5802_v26 = vunpack.i.h.bf16 %v5800_v32  ;;  %v5801_v3 = vunpack.i.l.bf16 %v5800_v32 }
0x1838   :  { %v4469_v31 = vsel %vm2178_vm6, %v4467_v29, %v5802_v26  ;;  %v4468_v39 = vsel %vm2178_vm6, %v4466_v63, %v5801_v3 }
0x1839   :  { %v4470_v33 = vpack.c.bf16 %v4469_v31, %v4468_v39 }
0x183b   :  { %5666 = vmatmul.mubr.msk.bf16.vlgmr.msra.gmra.mrb[116].mxu0 %vm160_vm1, %v4470_v33 }
0x183c   :  { %5693 = vmatprep.mubr.msk.bf16.mxu0 %vm5972_vm2, %v5971_v27  ;;  %5678 = vmatpush3.bf16.msra.mxu0 %v5832_v2 }
0x183d   :  { %5679 = vmatprep.subr.bf16.mxu0 %v5971_v27 }
0x1840   :  { %5680 = vmatpush3.bf16.msra.mxu0 %v5833_v14 }
0x1841   :  { %5681 = vmatprep.subr.bf16.mxu0 %v5971_v27 }
0x1844   :  { %5682 = vmatpush3.bf16.msra.mxu0 %v5834_v40 }
0x1845   :  { %5683 = vmatprep.subr.bf16.mxu0 %v5971_v27 }
0x1848   :  { %5684 = vmatpush3.bf16.msra.mxu0 %v5835_v5 }
0x1849   :  { %5685 = vmatprep.subr.bf16.mxu0 %v5971_v27 }
0x184c   :  { %5686 = vmatpush3.bf16.msra.mxu0 %v5836_v6 }
0x184d   :  { %5687 = vmatprep.subr.bf16.mxu0 %v5971_v27 }
0x1850   :  { %5688 = vmatpush3.bf16.msra.mxu0 %v5837_v7 }
0x1851   :  { %5689 = vmatprep.subr.bf16.mxu0 %v5971_v27 }
0x1854   :  { %5690 = vmatpush3.bf16.msra.mxu0 %v5838_v12 }
0x1855   :  { %5691 = vmatprep.subr.bf16.mxu0 %v5971_v27 }
0x1858   :  { %5692 = vmatpush3.bf16.msra.mxu0 %v5839_v47 }
0x190e   :  { %v4525_v13 = vpop.f32.mrb[116].mxu0 }
0x190f   :  { %v7034_v18 = vadd.f32 %v4525_v13, %v6614_v57  ;;  %v5667_v36 = vpop.f32.mrb[117].mxu0 }
0x1910   :  { %v4528_v43 = vpop.f32.mrb[118].mxu0 }
0x1911   :  { %v7037_v56 = vadd.f32 %v4528_v43, %v6617_v16  ;;  %v5668_v51 = vpop.f32.mrb[119].mxu0  ;;  %v4538_v53 = vsel %vm160_vm1, %v7034_v18, 0.0 }
0x1912   :  { %4539 = vadd.xlane.f32.xlu1 %v4538_v53 }
0x1913   :  { %v4541_v1 = vsel %vm160_vm1, %v7037_v56, 0.0 }
0x1914   :  { %4542 = vadd.xlane.f32.xlu0 %v4541_v1 }
0x199f   :  { %v4540_v8 = vpop.xlane.xlu1 %4539 }
0x19a0   :  { %v4544_v15 = vmul.f32 0.03125, %v4540_v8 }
0x19a1   :  { %v4543_v19 = vpop.xlane.xlu0 %4542 }
0x19a2   :  { %v4546_v57 = vsub.f32 %v7034_v18, %v4544_v15  ;;  %v4545_v48 = vmul.f32 0.03125, %v4543_v19 }
0x19a4   :  { %v4547_v10 = vsub.f32 %v7037_v56, %v4545_v48  ;;  %v4548_v58 = vmul.f32 %v4546_v57, %v4546_v57 }
0x19a6   :  { %v4550_v16 = vsel %vm160_vm1, %v4548_v58, 0.0  ;;  %v4549_v45 = vmul.f32 %v4547_v10, %v4547_v10 }
0x19a7   :  { %4551 = vadd.xlane.f32.xlu0 %v4550_v16 }
0x19a8   :  { %v4553_v35 = vsel %vm160_vm1, %v4549_v45, 0.0 }
0x19a9   :  { %4554 = vadd.xlane.f32.xlu1 %v4553_v35 }
0x1a34   :  { %v4552_v38 = vpop.xlane.xlu0 %4551 }
0x1a35   :  { %v4556_v52 = vmul.f32 0.03125, %v4552_v38 }
0x1a36   :  { %v4555_v4 = vpop.xlane.xlu1 %4554 }
0x1a37   :  { %v4558_v50 = vadd.f32 1e-05, %v4556_v52  ;;  %v4557_v20 = vmul.f32 0.03125, %v4555_v4 }
0x1a39   :  { %5958 = vrsqrt.f32 %v4558_v50  ;;  %v4559_v54 = vadd.f32 1e-05, %v4557_v20 }
0x1a3b   :  { %5960 = vrsqrt.f32 %v4559_v54 }
0x1a43   :  { %v5959_v59 = vpop.eup %5958 }
0x1a44   :  { %v4562_v0 = vmul.f32 %v5959_v59, %v4546_v57 }
0x1a45   :  { %v5961_v21 = vpop.eup %5960 }
0x1a46   :  { %v4570_v30 = vmul.f32 %v4960_v46, %v4562_v0  ;;  %v4563_v28 = vmul.f32 %v5961_v21, %v4547_v10  ;;  %v4994_v21 = vld [vmem:[%s7127_s15] ss:$0 sm:$0xff] }
0x1a48   :  { %v4571_v41 = vmul.f32 %v4960_v46, %v4563_v28  ;;  %v4578_v55 = vadd.f32 %v4961_v37, %v4570_v30 }
0x1a4a   :  { %v4579_v61 = vadd.f32 %v4961_v37, %v4571_v41  ;;  %v4995_v37 = vld [vmem:[%s7128_s16] ss:$0 sm:$0xff] }
0x1a4c   :  { %v4999_v11 = vpack.c.bf16 %v4579_v61, %v4578_v55 }
0x1a4e   :  { %5674 = vmatmul.mubr.msk.bf16.vlgmr.msra.gmra.mrb[116].mxu1 %vm160_vm1, %v4999_v11 }
0x1b21   :  { %v4641_v34 = vpop.f32.mrb[116].mxu1 }
0x1b22   :  { %v4648_v62 = vmul.f32 %v4641_v34, %v4641_v34  ;;  %v5675_v17 = vpop.f32.mrb[117].mxu1 }
0x1b23   :  { %v4644_v22 = vpop.f32.mrb[118].mxu1 }
0x1b24   :  { %v4650_v23 = vmul.f32 %v4648_v62, %v4641_v34  ;;  %v4649_v42 = vmul.f32 %v4644_v22, %v4644_v22  ;;  %v5676_v60 = vpop.f32.mrb[119].mxu1 }
0x1b26   :  { %v4652_v24 = vmul.f32 0.044715, %v4650_v23  ;;  %v4651_v32 = vmul.f32 %v4649_v42, %v4644_v22 }
0x1b28   :  { %v4654_v9 = vadd.f32 %v4652_v24, %v4641_v34  ;;  %v4653_v25 = vmul.f32 0.044715, %v4651_v32 }
0x1b2a   :  { %v4656_v26 = vmul.f32 0.7978846, %v4654_v9  ;;  %v4655_v3 = vadd.f32 %v4653_v25, %v4644_v22 }
0x1b2c   :  { %5962 = vtanh.f32 %v4656_v26  ;;  %v4657_v27 = vmul.f32 0.7978846, %v4655_v3 }
0x1b2e   :  { %5964 = vtanh.f32 %v4657_v27 }
0x1b36   :  { %v5963_v29 = vpop.eup %5962 }
0x1b37   :  { %v4660_v63 = vadd.f32 1.0, %v5963_v29 }
0x1b38   :  { %v5965_v31 = vpop.eup %5964 }
0x1b39   :  { %v4662_v39 = vmul.f32 0.5, %v4660_v63  ;;  %v4661_v33 = vadd.f32 1.0, %v5965_v31 }
0x1b3b   :  { %v4663_v13 = vmul.f32 0.5, %v4661_v33  ;;  %v4664_v36 = vmul.f32 %v4662_v39, %v4641_v34 }
0x1b3d   :  { %v4665_v43 = vmul.f32 %v4663_v13, %v4644_v22 }
0x1b3f   :  { %v4666_v51 = vpack.c.bf16 %v4665_v43, %v4664_v36 }
0x1b41   :  { %5694 = vmatmul.mubr.bf16.vlgmr.msra.gmra.mrb[120].mxu0 %v4666_v51 }
0x1c14   :  { %v4766_v53 = vpop.f32.mrb[120].mxu0 }
0x1c15   :  { %v4773_v1 = vadd.f32 %v4766_v53, %v7034_v18  ;;  %v5695_v8 = vpop.f32.mrb[121].mxu0 }
0x1c16   :  { %v4769_v15 = vpop.f32.mrb[122].mxu0 }
0x1c17   :  { %v4774_v19 = vadd.f32 %v4769_v15, %v7037_v56  ;;  %v5696_v57 = vpop.f32.mrb[123].mxu0  ;;  %v4777_v48 = vsel %vm160_vm1, %v4773_v1, 0.0 }
0x1c18   :  { %4778 = vadd.xlane.f32.xlu0 %v4777_v48 }
0x1c19   :  { %v4780_v10 = vsel %vm160_vm1, %v4774_v19, 0.0 }
0x1c1a   :  { %4781 = vadd.xlane.f32.xlu1 %v4780_v10 }
0x1ca5   :  { %v4779_v58 = vpop.xlane.xlu0 %4778 }
0x1ca6   :  { %v4783_v16 = vmul.f32 0.03125, %v4779_v58 }
0x1ca7   :  { %v4782_v45 = vpop.xlane.xlu1 %4781 }
0x1ca8   :  { %v4785_v35 = vsub.f32 %v4773_v1, %v4783_v16  ;;  %v4784_v44 = vmul.f32 0.03125, %v4782_v45 }
0x1caa   :  { %v4786_v49 = vsub.f32 %v4774_v19, %v4784_v44  ;;  %v4787_v38 = vmul.f32 %v4785_v35, %v4785_v35 }
0x1cac   :  { %v4789_v18 = vsel %vm160_vm1, %v4787_v38, 0.0  ;;  %v4788_v52 = vmul.f32 %v4786_v49, %v4786_v49 }
0x1cad   :  { %4790 = vadd.xlane.f32.xlu0 %v4789_v18 }
0x1cae   :  { %v4792_v56 = vsel %vm160_vm1, %v4788_v52, 0.0 }
0x1caf   :  { %4793 = vadd.xlane.f32.xlu1 %v4792_v56 }
0x1d3a   :  { %v4791_v4 = vpop.xlane.xlu0 %4790 }
0x1d3b   :  { %v4795_v50 = vmul.f32 0.03125, %v4791_v4 }
0x1d3c   :  { %v4794_v20 = vpop.xlane.xlu1 %4793 }
0x1d3d   :  { %v4797_v54 = vadd.f32 1e-05, %v4795_v50  ;;  %v4796_v59 = vmul.f32 0.03125, %v4794_v20 }
0x1d3f   :  { %5966 = vrsqrt.f32 %v4797_v54  ;;  %v4798_v46 = vadd.f32 1e-05, %v4796_v59 }
0x1d41   :  { %5968 = vrsqrt.f32 %v4798_v46 }
0x1d49   :  { %v5967_v0 = vpop.eup %5966 }
0x1d4a   :  { %v4801_v30 = vmul.f32 %v5967_v0, %v4785_v35 }
0x1d4b   :  { %v5969_v28 = vpop.eup %5968 }
0x1d4c   :  { %v4809_v41 = vmul.f32 %v4994_v21, %v4801_v30  ;;  %v4802_v55 = vmul.f32 %v5969_v28, %v4786_v49 }
0x1d4e   :  { %v4817_v61 = vadd.f32 %v4995_v37, %v4809_v41  ;;  %v4810_v11 = vmul.f32 %v4994_v21, %v4802_v55 }
0x1d50   :  { %4819 = vst.msk [vmem:[%s7129_s17] sm:$0xff] %vm160_vm1, %v4817_v61  ;;  %v4818_v2 = vadd.f32 %v4995_v37, %v4810_v11 }
0x1d52   :  { %4820 = vst.msk [vmem:[%s7129_s17 + $0x8] sm:$0xff] %vm160_vm1, %v4818_v2 }

// kernel: flamingo_forward.3
= control target key start
LH: loop header
LB: loop body
LE: loop exit
PB: predicated region body
PF: predicated region fallthrough
CT: control target
= control target key end

     0   :  { %vm93_vm0 = vcmask 261120   ;;  %v6961_v14 = vmov 0.0   ;;  %vm6962_vm1 = vmmov 0   ;;  %vm269_vm2 = vcmask 64512   ;;  %s8515_s28 = smov 120   ;;  %s8467_s0 = inlined_call_operand.vmem [shape: f32[16,32], index: 0, kind: input, shape index: {}]   ;;  %s8468_s7 = inlined_call_operand.vmem [shape: bf16[2,32,32], index: 7, kind: input, shape index: {}]   ;;  %s8469_s8 = inlined_call_operand.vmem [shape: bf16[2,32,64], index: 8, kind: input, shape index: {}]   ;;  %s8470_s4 = inlined_call_operand.vmem [shape: bf16[2,8,32], index: 4, kind: input, shape index: {}]   ;;  %s8471_s5 = inlined_call_operand.vmem [shape: f32[2,1,32], index: 5, kind: input, shape index: {}]   ;;  %s8472_s6 = inlined_call_operand.vmem [shape: f32[2,1,32], index: 6, kind: input, shape index: {}]   ;;  %s8473_s2 = inlined_call_operand.vmem [shape: f32[2,8,8], index: 2, kind: input, shape index: {}]   ;;  %s8474_s9 = inlined_call_operand.vmem [shape: bf16[2,32,32], index: 9, kind: input, shape index: {}]   ;;  %s8475_s3 = inlined_call_operand.vmem [shape: f32[16,1], index: 3, kind: input, shape index: {}]   ;;  %s8476_s12 = inlined_call_operand.vmem [shape: bf16[2,32,128], index: 12, kind: input, shape index: {}]   ;;  %s8477_s10 = inlined_call_operand.vmem [shape: f32[2,1,32], index: 10, kind: input, shape index: {}]   ;;  %s8478_s11 = inlined_call_operand.vmem [shape: f32[2,1,32], index: 11, kind: input, shape index: {}]   ;;  %s8479_s13 = inlined_call_operand.vmem [shape: bf16[2,128,32], index: 13, kind: input, shape index: {}]   ;;  %s8480_s16 = inlined_call_operand.vmem [shape: bf16[2,32,96], index: 16, kind: input, shape index: {}]   ;;  %s8481_s14 = inlined_call_operand.vmem [shape: f32[2,1,32], index: 14, kind: input, shape index: {}]   ;;  %s8482_s15 = inlined_call_operand.vmem [shape: f32[2,1,32], index: 15, kind: input, shape index: {}]   ;;  %s8483_s1 = inlined_call_operand.vmem [shape: f32[2,8,8], index: 1, kind: input, shape index: {}]   ;;  %s8484_s17 = inlined_call_operand.vmem [shape: bf16[2,32,32], index: 17, kind: input, shape index: {}]   ;;  %s8485_s20 = inlined_call_operand.vmem [shape: bf16[2,32,128], index: 20, kind: input, shape index: {}]   ;;  %s8486_s18 = inlined_call_operand.vmem [shape: f32[2,1,32], index: 18, kind: input, shape index: {}]   ;;  %s8487_s19 = inlined_call_operand.vmem [shape: f32[2,1,32], index: 19, kind: input, shape index: {}]   ;;  %s8488_s21 = inlined_call_operand.vmem [shape: bf16[2,128,32], index: 21, kind: input, shape index: {}]   ;;  %s8489_s24 = inlined_call_operand.vmem [shape: bf16[32,128], index: 24, kind: input, shape index: {}]   ;;  %s8490_s22 = inlined_call_operand.vmem [shape: f32[1,32], index: 22, kind: input, shape index: {}]   ;;  %s8491_s23 = inlined_call_operand.vmem [shape: f32[1,32], index: 23, kind: input, shape index: {}]   ;;  %s8492_s25 = inlined_call_operand.vmem [shape: f32[16,128], index: 25, kind: output, shape index: {}]  }
   0x1   :  { %8542 = sst [smem:[#allocation2_spill]] %s8467_s0  ;;  %6050 = vmatprep.subr.bf16.mxu1 %v6961_v14  ;;  %6054 = vmatprep.mubr.msk.bf16.mxu1 %vm6962_vm1, %v6961_v14  ;;  %vm390_vm3 = vcmask 1043456   ;;  %s8505_s0 = smov 72   ;;  %vm1173_vm4 = vcmask 130048   ;;  %vm1176_vm5 = vcmask 195584  }
   0x2   :  { %8543 = sst [smem:[#allocation3_spill]] %s8468_s7  ;;  %6066 = vmatprep.subr.bf16.mxu0 %v6961_v14  ;;  %6068 = vmatprep.mubr.msk.bf16.mxu0 %vm6962_vm1, %v6961_v14  ;;  %s8521_s7 = smov 96  }
   0x3   :  { %8544 = sst [smem:[#allocation4_spill]] %s8469_s8  ;;  %s8562_s8 = sld [smem:[#allocation2_spill]] }
   0x4   :  { %8545 = sst [smem:[#allocation5_spill]] %s8470_s4  ;;  %s8563_s26 = sld [smem:[#allocation3_spill]] }
   0x5   :  { %8546 = sst [smem:[#allocation6_spill]] %s8471_s5  ;;  %s8566_s30 = sld [smem:[#allocation4_spill]] }
   0x6   :  { %8547 = sst [smem:[#allocation7_spill]] %s8472_s6  ;;  %s8567_s27 = sld [smem:[#allocation5_spill]] }
   0x7   :  { %8548 = sst [smem:[#allocation8_spill]] %s8473_s2  ;;  %s8565_s2 = sld [smem:[#allocation7_spill]] }
   0x8   :  { %8549 = sst [smem:[#allocation9_spill]] %s8474_s9  ;;  %s8568_s29 = sld [smem:[#allocation8_spill]] }
   0x9   :  { %8550 = sst [smem:[#allocation10_spill]] %s8475_s3  ;;  %v7111_v0 = vld [vmem:[%s8562_s8] sm:$0xff]  ;;  %v7116_v1 = vld [vmem:[%s8562_s8 + $0x8] sm:$0xff]  ;;  %s8519_s4 = smov 88  }
   0xa   :  { %8551 = sst [smem:[#allocation11_spill]] %s8476_s12  ;;  %v94_v2 = vsel %vm93_vm0, %v7111_v0, 0.0  ;;  %v97_v3 = vsel %vm93_vm0, %v7116_v1, 0.0  ;;  %v6713_v15 = vld [vmem:[%s8563_s26] sm:$0xff]   ;;  %v6714_v16 = vld [vmem:[%s8563_s26 + $0x8] sm:$0xff]   ;;  %s8564_s12 = sld [smem:[#allocation6_spill]] }
   0xb   :  { %8552 = sst [smem:[#allocation12_spill]] %s8481_s14  ;;  %95 = vadd.xlane.f32.xlu0 %v94_v2  ;;  %6051 = vmatpush3.bf16.msra.mxu1 %v6713_v15  ;;  %v6715_v33 = vld [vmem:[%s8566_s30] sm:$0xff]   ;;  %v6716_v35 = vld [vmem:[%s8566_s30 + $0x8] sm:$0xff]   ;;  %s8507_s3 = smov 112  }
   0xc   :  { %8553 = sst [smem:[#allocation13_spill]] %s8482_s15  ;;  %6052 = vmatprep.subr.bf16.mxu1 %v6961_v14  ;;  %v6717_v36 = vld [vmem:[%s8567_s27] sm:$0xff]   ;;  %s8511_s5 = smov 80  }
   0xd   :  { %8554 = sst [smem:[#allocation14_spill]] %s8483_s1  ;;  %v5614_v29 = vld [vmem:[%s8565_s2] ss:$0 sm:$0xff]  ;;  %s8503_s6 = smov 104  }
   0xe   :  { %8555 = sst [smem:[#allocation15_spill]] %s8484_s17  ;;  %v7194_v55 = vld [vmem:[%s8568_s29] sm:$0xff]  ;;  %v7199_v57 = vld [vmem:[%s8568_s29 + $0x8] sm:$0xff]  ;;  %s8509_s8 = smov 8  }
   0xf   :  { %8556 = sst [smem:[#allocation16_spill]] %s8485_s20  ;;  %98 = vadd.xlane.f32.xlu0 %v97_v3  ;;  %6053 = vmatpush3.bf16.msra.mxu1 %v6714_v16  ;;  %s8513_s9 = smov 16  }
  0x10   :  { %8557 = sst [smem:[#allocation17_spill]] %s8487_s19  ;;  %6058 = vmatprep.subr.bf16.mxu1 %v6961_v14  ;;  %v5613_v25 = vld [vmem:[%s8564_s12] ss:$0 sm:$0xff] }
  0x11   :  { %8558 = sst [smem:[#allocation18_spill]] %s8489_s24 }
  0x12   :  { %8559 = sst [smem:[#allocation19_spill]] %s8490_s22  ;;  %s8581_s22 = smov 24  }
  0x13   :  { %8560 = sst [smem:[#allocation20_spill]] %s8491_s23  ;;  %s8580_s23 = smov 16  }
  0x14   :  { %8561 = sst [smem:[#allocation21_spill]] %s8492_s25  ;;  %s8530_s25 = smov 40  }
  0x98   :  { %v96_v4 = vpop.xlane.xlu0 %95 }
  0x99   :  { %v101_v5 = vmul.f32 0.03125, %v96_v4 }
  0x9b   :  { %v103_v6 = vsub.f32 %v7111_v0, %v101_v5 }
  0x9c   :  { %v99_v7 = vpop.xlane.xlu0 %98 }
  0x9d   :  { %v102_v8 = vmul.f32 0.03125, %v99_v7  ;;  %v105_v9 = vmul.f32 %v103_v6, %v103_v6 }
  0x9f   :  { %v104_v10 = vsub.f32 %v7116_v1, %v102_v8  ;;  %v107_v11 = vsel %vm93_vm0, %v105_v9, 0.0 }
  0xa0   :  { %108 = vadd.xlane.f32.xlu1 %v107_v11 }
  0xa1   :  { %v106_v12 = vmul.f32 %v104_v10, %v104_v10 }
  0xa3   :  { %v110_v13 = vsel %vm93_vm0, %v106_v12, 0.0 }
  0xa4   :  { %111 = vadd.xlane.f32.xlu1 %v110_v13 }
 0x12d   :  { %v109_v17 = vpop.xlane.xlu1 %108 }
 0x12e   :  { %v113_v18 = vmul.f32 0.03125, %v109_v17 }
 0x130   :  { %v115_v19 = vadd.f32 1e-05, %v113_v18 }
 0x131   :  { %v112_v20 = vpop.xlane.xlu1 %111 }
 0x132   :  { %6776 = vrsqrt.f32 %v115_v19  ;;  %v114_v21 = vmul.f32 0.03125, %v112_v20 }
 0x134   :  { %v116_v22 = vadd.f32 1e-05, %v114_v21 }
 0x136   :  { %6778 = vrsqrt.f32 %v116_v22 }
 0x13c   :  { %v6777_v23 = vpop.eup %6776 }
 0x13d   :  { %v119_v24 = vmul.f32 %v6777_v23, %v103_v6 }
 0x13f   :  { %v127_v28 = vmul.f32 %v5613_v25, %v119_v24 }
 0x140   :  { %v6779_v26 = vpop.eup %6778 }
 0x141   :  { %v120_v27 = vmul.f32 %v6779_v26, %v104_v10  ;;  %v135_v31 = vadd.f32 %v5614_v29, %v127_v28 }
 0x143   :  { %v128_v30 = vmul.f32 %v5613_v25, %v120_v27 }
 0x145   :  { %v136_v32 = vadd.f32 %v5614_v29, %v128_v30 }
 0x147   :  { %v137_v34 = vpack.c.bf16 %v136_v32, %v135_v31 }
 0x149   :  { %6055 = vmatmul.mubr.msk.bf16.vlgmr.msra.gmra.mrb[0].mxu1 %vm93_vm0, %v137_v34 }
 0x14a   :  { %6059 = vmatpush3.bf16.msra.mxu1 %v6715_v33  ;;  %6062 = vmatprep.mubr.msk.bf16.mxu1 %vm6962_vm1, %v6961_v14 }
 0x14b   :  { %6060 = vmatprep.subr.bf16.mxu1 %v6961_v14 }
 0x14e   :  { %6061 = vmatpush3.bf16.msra.mxu1 %v6716_v35 }
 0x14f   :  { %6072 = vmatprep.subr.bf16.mxu1 %v6961_v14 }
 0x151   :  { %6063 = vmatmul.mubr.msk.bf16.vlgmr.msra.gmra.mrb[4].mxu1 %vm93_vm0, %v6717_v36 }
 0x152   :  { %6074 = vmatprep.mubr.msk.bf16.mxu1 %vm6962_vm1, %v6961_v14 }
 0x21c   :  { %v191_v37 = vpop.f32.mrb[0].mxu1 }
 0x21d   :  { %v6056_v38 = vpop.f32.mrb[1].mxu1  ;;  %v198_v48 = vmul.f32 0.35355338, %v191_v37 }
 0x21e   :  { %v194_v39 = vpop.f32.mrb[2].mxu1 }
 0x21f   :  { %v6057_v40 = vpop.f32.mrb[3].mxu1  ;;  %v199_v50 = vmul.f32 0.35355338, %v194_v39  ;;  %v7175_v51 = vpack.c.bf16 %v198_v48, %v198_v48 }
 0x221   :  { %v7179_v52 = vpack.c.bf16 %v199_v50, %v199_v50 }
 0x224   :  { %v260_v41 = vpop.f32.mrb[4].mxu1 }
 0x225   :  { %v7163_v42 = vpack.c.bf16 %v260_v41, %v260_v41  ;;  %v6064_v43 = vpop.f32.mrb[5].mxu1 }
 0x226   :  { %v263_v44 = vpop.f32.mrb[6].mxu1 }
 0x227   :  { %v7165_v45 = vpack.c.bf16 %v263_v44, %v263_v44  ;;  %v6065_v46 = vpop.f32.mrb[7].mxu1  ;;  %v274_v47 = vsel %vm269_vm2, %v7163_v42, 0 }
 0x228   :  { %6067 = vmatpush3.bf16.xpose.msra.mxu0 %v274_v47 }
 0x229   :  { %435 = vrot.lane.b32.xlu1 %v7165_v45, %s8521_s7  ;;  %v320_v49 = vsel %vm269_vm2, %v7165_v45, 0  ;;  %6078 = vmatprep.subr.bf16.mxu0 %v6961_v14 }
 0x22a   :  { %6073 = vmatpush3.bf16.xpose.msra.mxu1 %v320_v49 }
 0x22b   :  { %6084 = vmatprep.subr.bf16.mxu1 %v6961_v14 }
 0x22d   :  { %488 = vrot.lane.b32.xlu1 %v7163_v42, %s8515_s28 }
 0x22f   :  { %6069 = vmatmul.mubr.msk.bf16.vlgmr.msra.gmra.mrb[0].mxu0 %vm269_vm2, %v7175_v51 }
 0x230   :  { %6080 = vmatprep.mubr.msk.bf16.mxu0 %vm6962_vm1, %v6961_v14 }
 0x231   :  { %6075 = vmatmul.mubr.msk.bf16.vlgmr.msra.gmra.mrb[8].mxu1 %vm269_vm2, %v7179_v52 }
 0x232   :  { %6086 = vmatprep.mubr.msk.bf16.mxu1 %vm6962_vm1, %v6961_v14 }
 0x29b   :  { %v436_v53 = vpop.permute.xlu1 %435 }
 0x29c   :  { %v441_v54 = vsel %vm390_vm3, %v436_v53, 0 }
 0x29d   :  { %6085 = vmatpush3.bf16.msra.mxu1 %v441_v54 }
 0x29e   :  { %6096 = vmatprep.subr.bf16.mxu1 %v6961_v14 }
 0x29f   :  { %v489_v7 = vpop.permute.xlu1 %488 }
 0x2a0   :  { %v494_v22 = vsel %vm269_vm2, %v489_v7, 0 }
 0x302   :  { %v310_v56 = vpop.f32.mrb[0].mxu0 }
 0x303   :  { %v311_v58 = vadd.f32 %v310_v56, %v7194_v55  ;;  %v6070_v59 = vpop.f32.mrb[1].mxu0 }
 0x304   :  { %v313_v60 = vpop.f32.mrb[2].mxu0  ;;  %v356_v61 = vpop.f32.mrb[8].mxu1 }
 0x305   :  { %v357_v62 = vadd.f32 %v356_v61, %v7199_v57  ;;  %v6071_v63 = vpop.f32.mrb[3].mxu0  ;;  %v6076_v2 = vpop.f32.mrb[9].mxu1  ;;  %v362_v3 = vsel %vm269_vm2, %v311_v58, -inf }
 0x306   :  { %363 = vmax.xlane.f32.xlu0 %v362_v3  ;;  %v359_v4 = vpop.f32.mrb[10].mxu1 }
 0x307   :  { %v6077_v5 = vpop.f32.mrb[11].mxu1  ;;  %v365_v6 = vsel %vm269_vm2, %v357_v62, -inf }
 0x308   :  { %366 = vmax.xlane.f32.xlu1 %v365_v6 }
 0x319   :  { %539 = vrot.lane.b32.xlu1 %v7165_v45, %s8515_s28 }
 0x31c   :  { %385 = vrot.lane.b32.xlu0 %v7163_v42, %s8521_s7  ;;  %s8575_s7 = smov 80  }
 0x31d   :  { %537 = vrot.lane.b32.xlu1 %v7179_v52, %s8515_s28 }
 0x320   :  { %486 = vrot.lane.b32.xlu0 %v7175_v51, %s8515_s28  ;;  %s8527_s28 = smov 64  }
 0x321   :  { %657 = vrot.lane.b32.xlu1 %v7165_v45, %s8519_s4 }
 0x324   :  { %609 = vrot.lane.b32.xlu0 %v7163_v42, %s8519_s4  ;;  %s8573_s4 = smov 88  }
 0x393   :  { %v364_v8 = vpop.xlane.xlu0 %363 }
 0x394   :  { %v368_v9 = vsub.f32 %v311_v58, %v364_v8 }
 0x395   :  { %v367_v10 = vpop.xlane.xlu1 %366 }
 0x396   :  { %v370_v11 = vmul.f32 1.442695, %v368_v9  ;;  %v369_v12 = vsub.f32 %v357_v62, %v367_v10 }
 0x397   :  { %v386_v13 = vpop.permute.xlu0 %385 }
 0x398   :  { %6780 = vpow2.f32 %v370_v11  ;;  %v372_v15 = vmul.f32 1.442695, %v369_v12  ;;  %v392_v16 = vsel %vm390_vm3, %v386_v13, 0 }
 0x399   :  { %6079 = vmatpush3.bf16.msra.mxu0 %v392_v16  ;;  %v540_v17 = vpop.permute.xlu1 %539 }
 0x39a   :  { %6782 = vpow2.f32 %v372_v15  ;;  %6090 = vmatprep.subr.bf16.mxu0 %v6961_v14  ;;  %v545_v25 = vsel %vm269_vm2, %v540_v17, 0 }
 0x39b   :  { %v487_v21 = vpop.permute.xlu0 %486 }
 0x39d   :  { %v538_v24 = vpop.permute.xlu1 %537 }
 0x39f   :  { %v610_v26 = vpop.permute.xlu0 %609 }
 0x3a0   :  { %v615_v28 = vsel %vm390_vm3, %v610_v26, 0 }
 0x3a1   :  { %v658_v27 = vpop.permute.xlu1 %657 }
 0x3a2   :  { %v7219_v18 = vpop.eup %6780  ;;  %v663_v29 = vsel %vm390_vm3, %v658_v27, 0 }
 0x3a3   :  { %v382_v19 = vpack.c.bf16 %v7219_v18, %v7219_v18 }
 0x3a4   :  { %v7223_v20 = vpop.eup %6782 }
 0x3a5   :  { %6081 = vmatmul.mubr.msk.bf16.vlgmr.msra.gmra.mrb[4].mxu0 %vm269_vm2, %v382_v19  ;;  %v383_v23 = vpack.c.bf16 %v7223_v20, %v7223_v20 }
 0x3a6   :  { %6091 = vmatpush3.bf16.xpose.msra.mxu0 %v494_v22  ;;  %6092 = vmatprep.mubr.msk.bf16.mxu0 %vm6962_vm1, %v6961_v14 }
 0x3a7   :  { %6087 = vmatmul.mubr.msk.bf16.vlgmr.msra.gmra.mrb[12].mxu1 %vm269_vm2, %v383_v23  ;;  %6102 = vmatprep.subr.bf16.mxu0 %v6961_v14 }
 0x3a8   :  { %6097 = vmatpush3.bf16.xpose.msra.mxu1 %v545_v25  ;;  %6098 = vmatprep.mubr.msk.bf16.mxu1 %vm6962_vm1, %v6961_v14 }
 0x3a9   :  { %6108 = vmatprep.subr.bf16.mxu1 %v6961_v14 }
 0x3ad   :  { %6093 = vmatmul.mubr.msk.bf16.vlgmr.msra.gmra.mrb[8].mxu0 %vm269_vm2, %v487_v21 }
 0x3ae   :  { %6103 = vmatpush3.bf16.msra.mxu0 %v615_v28  ;;  %6104 = vmatprep.mubr.msk.bf16.mxu0 %vm6962_vm1, %v6961_v14 }
 0x3af   :  { %6099 = vmatmul.mubr.msk.bf16.vlgmr.msra.gmra.mrb[16].mxu1 %vm269_vm2, %v538_v24  ;;  %6114 = vmatprep.subr.bf16.mxu0 %v6961_v14 }
 0x3b0   :  { %6109 = vmatpush3.bf16.msra.mxu1 %v663_v29  ;;  %6110 = vmatprep.mubr.msk.bf16.mxu1 %vm6962_vm1, %v6961_v14 }
 0x3b1   :  { %6120 = vmatprep.subr.bf16.mxu1 %v6961_v14 }
 0x478   :  { %v7247_v30 = vpop.f32.mrb[4].mxu0 }
 0x479   :  { %v6082_v31 = vpop.f32.mrb[5].mxu0 }
 0x47a   :  { %v431_v32 = vpop.f32.mrb[6].mxu0  ;;  %v7249_v33 = vpop.f32.mrb[12].mxu1 }
 0x47b   :  { %v6083_v34 = vpop.f32.mrb[7].mxu0  ;;  %v6088_v35 = vpop.f32.mrb[13].mxu1 }
 0x47c   :  { %v480_v36 = vpop.f32.mrb[14].mxu1 }
 0x47d   :  { %v6089_v37 = vpop.f32.mrb[15].mxu1 }
 0x480   :  { %v530_v38 = vpop.f32.mrb[8].mxu0 }
 0x481   :  { %v531_v39 = vadd.f32 %v530_v38, %v7194_v55  ;;  %v6094_v40 = vpop.f32.mrb[9].mxu0 }
 0x482   :  { %v533_v41 = vpop.f32.mrb[10].mxu0  ;;  %v581_v43 = vpop.f32.mrb[16].mxu1 }
 0x483   :  { %v582_v44 = vadd.f32 %v581_v43, %v7199_v57  ;;  %v6095_v46 = vpop.f32.mrb[11].mxu0  ;;  %v6100_v47 = vpop.f32.mrb[17].mxu1  ;;  %v587_v48 = vsel %vm269_vm2, %v531_v39, -inf }
 0x484   :  { %588 = vmax.xlane.f32.xlu0 %v587_v48  ;;  %v584_v49 = vpop.f32.mrb[18].mxu1 }
 0x485   :  { %v6101_v50 = vpop.f32.mrb[19].mxu1  ;;  %v590_v53 = vsel %vm269_vm2, %v582_v44, -inf }
 0x486   :  { %591 = vmax.xlane.f32.xlu1 %v590_v53 }
 0x497   :  { %759 = vrot.lane.b32.xlu1 %v7165_v45, %s8507_s3 }
 0x49a   :  { %709 = vrot.lane.b32.xlu0 %v7163_v42, %s8507_s3 }
 0x49b   :  { %757 = vrot.lane.b32.xlu1 %v7179_v52, %s8507_s3 }
 0x49e   :  { %707 = vrot.lane.b32.xlu0 %v7175_v51, %s8507_s3  ;;  %s8569_s3 = sld [smem:[#allocation9_spill]] }
 0x49f   :  { %877 = vrot.lane.b32.xlu1 %v7165_v45, %s8511_s5 }
 0x4a2   :  { %829 = vrot.lane.b32.xlu0 %v7163_v42, %s8511_s5  ;;  %s8517_s5 = smov 24  }
 0x511   :  { %v589_v54 = vpop.xlane.xlu0 %588 }
 0x512   :  { %v593_v56 = vsub.f32 %v531_v39, %v589_v54 }
 0x513   :  { %v592_v58 = vpop.xlane.xlu1 %591 }
 0x514   :  { %v595_v59 = vmul.f32 1.442695, %v593_v56  ;;  %v594_v60 = vsub.f32 %v582_v44, %v592_v58 }
 0x515   :  { %v710_v62 = vpop.permute.xlu0 %709 }
 0x516   :  { %6784 = vpow2.f32 %v595_v59  ;;  %v597_v61 = vmul.f32 1.442695, %v594_v60  ;;  %v715_v6 = vsel %vm269_vm2, %v710_v62, 0 }
 0x517   :  { %v760_v63 = vpop.permute.xlu1 %759 }
 0x518   :  { %6786 = vpow2.f32 %v597_v61  ;;  %v765_v9 = vsel %vm269_vm2, %v760_v63, 0 }
 0x519   :  { %v708_v5 = vpop.permute.xlu0 %707 }
 0x51b   :  { %v758_v8 = vpop.permute.xlu1 %757 }
 0x51d   :  { %v830_v10 = vpop.permute.xlu0 %829 }
 0x51e   :  { %v835_v12 = vsel %vm390_vm3, %v830_v10, 0 }
 0x51f   :  { %v878_v11 = vpop.permute.xlu1 %877 }
 0x520   :  { %v7267_v2 = vpop.eup %6784  ;;  %v883_v13 = vsel %vm390_vm3, %v878_v11, 0 }
 0x521   :  { %v607_v3 = vpack.c.bf16 %v7267_v2, %v7267_v2 }
 0x522   :  { %v7271_v4 = vpop.eup %6786 }
 0x523   :  { %6105 = vmatmul.mubr.msk.bf16.vlgmr.msra.gmra.mrb[12].mxu0 %vm269_vm2, %v607_v3  ;;  %v608_v7 = vpack.c.bf16 %v7271_v4, %v7271_v4 }
 0x524   :  { %6115 = vmatpush3.bf16.xpose.msra.mxu0 %v715_v6  ;;  %6116 = vmatprep.mubr.msk.bf16.mxu0 %vm6962_vm1, %v6961_v14 }
 0x525   :  { %6111 = vmatmul.mubr.msk.bf16.vlgmr.msra.gmra.mrb[20].mxu1 %vm269_vm2, %v608_v7  ;;  %6126 = vmatprep.subr.bf16.mxu0 %v6961_v14 }
 0x526   :  { %6121 = vmatpush3.bf16.xpose.msra.mxu1 %v765_v9  ;;  %6122 = vmatprep.mubr.msk.bf16.mxu1 %vm6962_vm1, %v6961_v14 }
 0x527   :  { %6132 = vmatprep.subr.bf16.mxu1 %v6961_v14 }
 0x52b   :  { %6117 = vmatmul.mubr.msk.bf16.vlgmr.msra.gmra.mrb[16].mxu0 %vm269_vm2, %v708_v5 }
 0x52c   :  { %6127 = vmatpush3.bf16.msra.mxu0 %v835_v12  ;;  %6128 = vmatprep.mubr.msk.bf16.mxu0 %vm6962_vm1, %v6961_v14 }
 0x52d   :  { %6123 = vmatmul.mubr.msk.bf16.vlgmr.msra.gmra.mrb[24].mxu1 %vm269_vm2, %v758_v8  ;;  %6138 = vmatprep.subr.bf16.mxu0 %v6961_v14 }
 0x52e   :  { %6133 = vmatpush3.bf16.msra.mxu1 %v883_v13  ;;  %6134 = vmatprep.mubr.msk.bf16.mxu1 %vm6962_vm1, %v6961_v14 }
 0x52f   :  { %6144 = vmatprep.subr.bf16.mxu1 %v6961_v14 }
 0x5f6   :  { %v7295_v15 = vpop.f32.mrb[12].mxu0 }
 0x5f7   :  { %v6106_v16 = vpop.f32.mrb[13].mxu0 }
 0x5f8   :  { %v654_v17 = vpop.f32.mrb[14].mxu0  ;;  %v7297_v19 = vpop.f32.mrb[20].mxu1 }
 0x5f9   :  { %v6107_v21 = vpop.f32.mrb[15].mxu0  ;;  %v6112_v22 = vpop.f32.mrb[21].mxu1 }
 0x5fa   :  { %v702_v23 = vpop.f32.mrb[22].mxu1 }
 0x5fb   :  { %v6113_v24 = vpop.f32.mrb[23].mxu1 }
 0x5fe   :  { %v751_v25 = vpop.f32.mrb[16].mxu0 }
 0x5ff   :  { %v752_v26 = vadd.f32 %v751_v25, %v7194_v55  ;;  %v6118_v27 = vpop.f32.mrb[17].mxu0 }
 0x600   :  { %v754_v28 = vpop.f32.mrb[18].mxu0  ;;  %v801_v29 = vpop.f32.mrb[24].mxu1 }
 0x601   :  { %v802_v31 = vadd.f32 %v801_v29, %v7199_v57  ;;  %v6119_v32 = vpop.f32.mrb[19].mxu0  ;;  %v6124_v34 = vpop.f32.mrb[25].mxu1  ;;  %v807_v35 = vsel %vm269_vm2, %v752_v26, -inf }
 0x602   :  { %808 = vmax.xlane.f32.xlu0 %v807_v35  ;;  %v804_v36 = vpop.f32.mrb[26].mxu1 }
 0x603   :  { %v6125_v37 = vpop.f32.mrb[27].mxu1  ;;  %v810_v38 = vsel %vm269_vm2, %v802_v31, -inf }
 0x604   :  { %811 = vmax.xlane.f32.xlu1 %v810_v38 }
 0x615   :  { %979 = vrot.lane.b32.xlu1 %v7165_v45, %s8503_s6 }
 0x618   :  { %929 = vrot.lane.b32.xlu0 %v7163_v42, %s8503_s6 }
 0x619   :  { %977 = vrot.lane.b32.xlu1 %v7179_v52, %s8503_s6 }
 0x61c   :  { %927 = vrot.lane.b32.xlu0 %v7175_v51, %s8503_s6  ;;  %s8571_s6 = sld [smem:[#allocation11_spill]] }
 0x68f   :  { %v809_v39 = vpop.xlane.xlu0 %808 }
 0x690   :  { %v813_v40 = vsub.f32 %v752_v26, %v809_v39 }
 0x691   :  { %v812_v41 = vpop.xlane.xlu1 %811 }
 0x692   :  { %v815_v43 = vmul.f32 1.442695, %v813_v40  ;;  %v814_v44 = vsub.f32 %v802_v31, %v812_v41  ;;  %v374_v40 = vsel %vm269_vm2, %v7219_v18, 0.0  ;;  %v377_v41 = vsel %vm269_vm2, %v7223_v20, 0.0 }
 0x693   :  { %v930_v48 = vpop.permute.xlu0 %929 }
 0x694   :  { %6788 = vpow2.f32 %v815_v43  ;;  %v817_v46 = vmul.f32 1.442695, %v814_v44  ;;  %v935_v54 = vsel %vm269_vm2, %v930_v48, 0 }
 0x695   :  { %v980_v53 = vpop.permute.xlu1 %979 }
 0x696   :  { %6790 = vpow2.f32 %v817_v46  ;;  %v985_v51 = vsel %vm269_vm2, %v980_v53, 0 }
 0x697   :  { %v928_v56 = vpop.permute.xlu0 %927 }
 0x699   :  { %v978_v58 = vpop.permute.xlu1 %977 }
 0x69e   :  { %v6789_v47 = vpop.eup %6788 }
 0x69f   :  { %v827_v49 = vpack.c.bf16 %v6789_v47, %v6789_v47  ;;  %v819_v24 = vsel %vm269_vm2, %v6789_v47, 0.0 }
 0x6a0   :  { %v6791_v50 = vpop.eup %6790 }
 0x6a1   :  { %6129 = vmatmul.mubr.msk.bf16.vlgmr.msra.gmra.mrb[20].mxu0 %vm269_vm2, %v827_v49  ;;  %v828_v52 = vpack.c.bf16 %v6791_v50, %v6791_v50  ;;  %v822_v25 = vsel %vm269_vm2, %v6791_v50, 0.0 }
 0x6a2   :  { %6139 = vmatpush3.bf16.xpose.msra.mxu0 %v935_v54  ;;  %6140 = vmatprep.mubr.msk.bf16.mxu0 %vm6962_vm1, %v6961_v14 }
 0x6a3   :  { %6135 = vmatmul.mubr.msk.bf16.vlgmr.msra.gmra.mrb[28].mxu1 %vm269_vm2, %v828_v52  ;;  %6150 = vmatprep.subr.bf16.mxu0 %v6961_v14 }
 0x6a4   :  { %6145 = vmatpush3.bf16.xpose.msra.mxu1 %v985_v51  ;;  %6146 = vmatprep.mubr.msk.bf16.mxu1 %vm6962_vm1, %v6961_v14 }
 0x6a5   :  { %6156 = vmatprep.subr.bf16.mxu1 %v6961_v14 }
 0x6a9   :  { %6141 = vmatmul.mubr.msk.bf16.vlgmr.msra.gmra.mrb[24].mxu0 %vm269_vm2, %v928_v56 }
 0x6aa   :  { %6152 = vmatprep.mubr.msk.bf16.mxu0 %vm6962_vm1, %v6961_v14 }
 0x6ab   :  { %6147 = vmatmul.mubr.msk.bf16.vlgmr.msra.gmra.mrb[32].mxu1 %vm269_vm2, %v978_v58 }
 0x6ac   :  { %6158 = vmatprep.mubr.msk.bf16.mxu1 %vm6962_vm1, %v6961_v14 }
 0x774   :  { %v7327_v59 = vpop.f32.mrb[20].mxu0 }
 0x775   :  { %v6130_v60 = vpop.f32.mrb[21].mxu0 }
 0x776   :  { %v874_v61 = vpop.f32.mrb[22].mxu0  ;;  %v7329_v62 = vpop.f32.mrb[28].mxu1 }
 0x777   :  { %v6131_v63 = vpop.f32.mrb[23].mxu0  ;;  %v6136_v3 = vpop.f32.mrb[29].mxu1  ;;  %v6972_v61 = vmov 0  }
 0x778   :  { %v922_v5 = vpop.f32.mrb[30].mxu1  ;;  %6666 = vset.pattern.permute.xlu1 %v6972_v61  ;;  %6667 = vset.pattern.permute.xlu0 %v6972_v61 }
 0x779   :  { %v6137_v6 = vpop.f32.mrb[31].mxu1 }
 0x77c   :  { %v971_v7 = vpop.f32.mrb[24].mxu0 }
 0x77d   :  { %v972_v8 = vadd.f32 %v971_v7, %v7194_v55  ;;  %v6142_v9 = vpop.f32.mrb[25].mxu0  ;;  %v599_v55 = vsel %vm269_vm2, %v7267_v2, 0.0 }
 0x77e   :  { %v974_v10 = vpop.f32.mrb[26].mxu0  ;;  %v1021_v11 = vpop.f32.mrb[32].mxu1 }
 0x77f   :  { %v1022_v12 = vadd.f32 %v1021_v11, %v7199_v57  ;;  %v6143_v13 = vpop.f32.mrb[27].mxu0  ;;  %v6148_v16 = vpop.f32.mrb[33].mxu1  ;;  %v1027_v17 = vsel %vm269_vm2, %v972_v8, -inf  ;;  %v602_v57 = vsel %vm269_vm2, %v7271_v4, 0.0 }
 0x780   :  { %1028 = vmax.xlane.f32.xlu0 %v1027_v17  ;;  %v1024_v21 = vpop.f32.mrb[34].mxu1 }
 0x781   :  { %v6149_v22 = vpop.f32.mrb[35].mxu1  ;;  %v1030_v23 = vsel %vm269_vm2, %v1022_v12, -inf }
 0x782   :  { %1031 = vmax.xlane.f32.xlu1 %v1030_v23 }
 0x793   :  { %1097 = vrot.lane.b32.xlu1 %v7165_v45, %s8505_s0 }
 0x796   :  { %1049 = vrot.lane.b32.xlu0 %v7163_v42, %s8505_s0  ;;  %s8574_s0 = smov 120  }
 0x7b5   :  { %600 = vadd.xlane.f32.xlu0 %v599_v55 }
 0x7b7   :  { %603 = vadd.xlane.f32.xlu1 %v602_v57 }
 0x7b9   :  { %820 = vadd.xlane.f32.xlu0 %v819_v24 }
 0x7bd   :  { %823 = vadd.xlane.f32.xlu0 %v822_v25 }
 0x80d   :  { %v1029_v26 = vpop.xlane.xlu0 %1028 }
 0x80e   :  { %v1033_v27 = vsub.f32 %v972_v8, %v1029_v26 }
 0x80f   :  { %v1032_v45 = vpop.xlane.xlu1 %1031 }
 0x810   :  { %v1035_v28 = vmul.f32 1.442695, %v1033_v27  ;;  %v1034_v29 = vsub.f32 %v1022_v12, %v1032_v45 }
 0x811   :  { %v1050_v42 = vpop.permute.xlu0 %1049 }
 0x812   :  { %6792 = vpow2.f32 %v1035_v28  ;;  %v1037_v31 = vmul.f32 1.442695, %v1034_v29  ;;  %v1055_v2 = vsel %vm390_vm3, %v1050_v42, 0 }
 0x813   :  { %6151 = vmatpush3.bf16.msra.mxu0 %v1055_v2  ;;  %v1098_v32 = vpop.permute.xlu1 %1097 }
 0x814   :  { %6794 = vpow2.f32 %v1037_v31  ;;  %v1103_v4 = vsel %vm390_vm3, %v1098_v32, 0  ;;  %6162 = vmatprep.subr.bf16.mxu0 %v6961_v14 }
 0x815   :  { %6157 = vmatpush3.bf16.msra.mxu1 %v1103_v4 }
 0x816   :  { %6170 = vmatprep.subr.bf16.mxu1 %v6961_v14 }
 0x81c   :  { %v6793_v34 = vpop.eup %6792 }
 0x81d   :  { %v1039_v35 = vsel %vm269_vm2, %v6793_v34, 0.0  ;;  %v1047_v36 = vpack.c.bf16 %v6793_v34, %v6793_v34 }
 0x81e   :  { %v6795_v37 = vpop.eup %6794  ;;  %1040 = vadd.xlane.f32.xlu0 %v1039_v35 }
 0x81f   :  { %6153 = vmatmul.mubr.msk.bf16.vlgmr.msra.gmra.mrb[28].mxu0 %vm269_vm2, %v1047_v36  ;;  %v1042_v38 = vsel %vm269_vm2, %v6795_v37, 0.0  ;;  %v1048_v39 = vpack.c.bf16 %v6795_v37, %v6795_v37 }
 0x820   :  { %1043 = vadd.xlane.f32.xlu1 %v1042_v38  ;;  %6166 = vmatprep.mubr.msk.bf16.mxu0 %vm6962_vm1, %v6961_v14 }
 0x821   :  { %6159 = vmatmul.mubr.msk.bf16.vlgmr.msra.gmra.mrb[36].mxu1 %vm269_vm2, %v1048_v39 }
 0x822   :  { %375 = vadd.xlane.f32.xlu0 %v374_v40  ;;  %6174 = vmatprep.mubr.msk.bf16.mxu1 %vm6962_vm1, %v6961_v14 }
 0x824   :  { %378 = vadd.xlane.f32.xlu1 %v377_v41 }
 0x842   :  { %v601_v43 = vpop.xlane.xlu0 %600 }
 0x843   :  { %6796 = vrcp.f32 %v601_v43 }
 0x844   :  { %v604_v44 = vpop.xlane.xlu1 %603 }
 0x845   :  { %6798 = vrcp.f32 %v604_v44 }
 0x846   :  { %v821_v46 = vpop.xlane.xlu0 %820 }
 0x847   :  { %6800 = vrcp.f32 %v821_v46 }
 0x84a   :  { %v824_v47 = vpop.xlane.xlu0 %823 }
 0x84b   :  { %6802 = vrcp.f32 %v824_v47 }
 0x84d   :  { %v6797_v48 = vpop.eup %6796 }
 0x84e   :  { %v705_v18 = vmul.f32 %v6797_v48, %v7295_v15  ;;  %v6718_v15 = vld [vmem:[%s8569_s3] sm:$0xff]  }
 0x84f   :  { %v6799_v49 = vpop.eup %6798  ;;  %6163 = vmatpush3.bf16.msra.mxu0 %v6718_v15 }
 0x850   :  { %v706_v50 = vmul.f32 %v6799_v49, %v7297_v19  ;;  %6164 = vmatprep.subr.bf16.mxu0 %v6961_v14 }
 0x851   :  { %v6801_v54 = vpop.eup %6800 }
 0x852   :  { %v6651_v53 = vpack.i.bf16 %v706_v50, %v705_v18  ;;  %v925_v52 = vmul.f32 %v6801_v54, %v7327_v59  ;;  %v6719_v59 = vld [vmem:[%s8569_s3 + $0x8] sm:$0xff]  }
 0x853   :  { %6165 = vmatpush3.bf16.msra.mxu0 %v6719_v59 }
 0x854   :  { %6652 = vrot.lane.b32.xlu0 %v6651_v53, %s8509_s8  ;;  %6178 = vmatprep.subr.bf16.mxu0 %v6961_v14  ;;  %s8523_s8 = smov 56  }
 0x855   :  { %v6803_v20 = vpop.eup %6802 }
 0x856   :  { %v926_v51 = vmul.f32 %v6803_v20, %v7329_v62 }
 0x858   :  { %v6656_v56 = vpack.i.bf16 %v926_v51, %v925_v52 }
 0x85a   :  { %6657 = vrot.lane.b32.xlu1 %v6656_v56, %s8513_s9  ;;  %s8570_s9 = sld [smem:[#allocation10_spill]] }
 0x860   :  { %v90_v62 = vld [vmem:[%s8570_s9 + $0x8] sm:$0xff]  ;;  %v89_v17 = vld [vmem:[%s8570_s9] sm:$0xff]  ;;  %s8572_s9 = smov 96  }
 0x861   :  { %1247 = vperm.xlu0 %6667, %v90_v62  }
 0x8ab   :  { %v1041_v19 = vpop.xlane.xlu0 %1040 }
 0x8ac   :  { %6804 = vrcp.f32 %v1041_v19  ;;  %v6720_v19 = vld [vmem:[%s8571_s6] sm:$0xff]  }
 0x8ad   :  { %v1044_v58 = vpop.xlane.xlu1 %1043  ;;  %6171 = vmatpush3.bf16.msra.mxu1 %v6720_v19 }
 0x8ae   :  { %6806 = vrcp.f32 %v1044_v58  ;;  %v6721_v58 = vld [vmem:[%s8571_s6 + $0x8] sm:$0xff]   ;;  %6172 = vmatprep.subr.bf16.mxu1 %v6961_v14 }
 0x8af   :  { %v376_v21 = vpop.xlane.xlu0 %375 }
 0x8b0   :  { %6808 = vrcp.f32 %v376_v21  ;;  %v6722_v21 = vld [vmem:[%s8479_s13] sm:$0xff]  }
 0x8b1   :  { %v379_v22 = vpop.xlane.xlu1 %378  ;;  %6173 = vmatpush3.bf16.msra.mxu1 %v6721_v58 }
 0x8b2   :  { %6810 = vrcp.f32 %v379_v22  ;;  %6198 = vmatprep.subr.bf16.mxu1 %v6961_v14  ;;  %v6723_v22 = vld [vmem:[%s8479_s13 + $0x8] sm:$0xff]  }
 0x8b6   :  { %v6805_v63 = vpop.eup %6804 }
 0x8b8   :  { %v6807_v5 = vpop.eup %6806 }
 0x8ba   :  { %v6809_v55 = vpop.eup %6808 }
 0x8bb   :  { %v483_v28 = vmul.f32 %v6809_v55, %v7247_v30  ;;  %v6725_v55 = vld [vmem:[%s8479_s13 + $0x18] sm:$0xff]  }
 0x8bc   :  { %v6811_v24 = vpop.eup %6810 }
 0x8bd   :  { %v484_v29 = vmul.f32 %v6811_v24, %v7249_v33  ;;  %v6727_v24 = vld [vmem:[%s8479_s13 + $0x28] sm:$0xff]  }
 0x8c6   :  { %v6653_v23 = vpop.permute.xlu0 %6652 }
 0x8c7   :  { %v6655_v25 = vunpack.i.h.bf16 %v6653_v23  ;;  %v6654_v26 = vunpack.i.l.bf16 %v6653_v23  ;;  %v6724_v23 = vld [vmem:[%s8479_s13 + $0x10] sm:$0xff]  }
 0x8c9   :  { %v1171_v31 = vsel %vm269_vm2, %v483_v28, %v6654_v26  ;;  %v1172_v2 = vsel %vm269_vm2, %v484_v29, %v6655_v25  ;;  %v6728_v25 = vld [vmem:[%s8479_s13 + $0x30] sm:$0xff]   ;;  %v6729_v26 = vld [vmem:[%s8479_s13 + $0x38] sm:$0xff]  }
 0x8cc   :  { %v6658_v57 = vpop.permute.xlu1 %6657 }
 0x8cd   :  { %v6660_v27 = vunpack.i.h.bf16 %v6658_v57  ;;  %v6659_v45 = vunpack.i.l.bf16 %v6658_v57  ;;  %v6726_v57 = vld [vmem:[%s8479_s13 + $0x20] sm:$0xff]  }
 0x8cf   :  { %v1175_v34 = vsel %vm1173_vm4, %v1172_v2, %v6660_v27  ;;  %v1174_v35 = vsel %vm1173_vm4, %v1171_v31, %v6659_v45 }
 0x8e0   :  { %v7395_v39 = vpop.permute.xlu0 %1247 }
 0x8f2   :  { %v1091_v60 = vpop.f32.mrb[28].mxu0 }
 0x8f3   :  { %v6154_v3 = vpop.f32.mrb[29].mxu0  ;;  %v1145_v8 = vmul.f32 %v6805_v63, %v1091_v60 }
 0x8f4   :  { %v1094_v6 = vpop.f32.mrb[30].mxu0  ;;  %v1139_v7 = vpop.f32.mrb[36].mxu1 }
 0x8f5   :  { %v1146_v9 = vmul.f32 %v6807_v5, %v1139_v7  ;;  %v6155_v10 = vpop.f32.mrb[31].mxu0  ;;  %v6160_v11 = vpop.f32.mrb[37].mxu1  ;;  %v5641_v6 = vld [vmem:[%s8477_s10] ss:$0 sm:$0xff] }
 0x8f6   :  { %v1142_v12 = vpop.f32.mrb[38].mxu1  ;;  %v5642_v11 = vld [vmem:[%s8478_s11] ss:$0 sm:$0xff] }
 0x8f7   :  { %v6661_v13 = vpack.i.bf16 %v1146_v9, %v1145_v8  ;;  %v6161_v16 = vpop.f32.mrb[39].mxu1 }
 0x8f9   :  { %6662 = vrot.lane.b32.xlu1 %v6661_v13, %s8517_s5  ;;  %s8576_s5 = smov 112  }
 0x8fd   :  { %1242 = vperm.xlu1 %6666, %v89_v17  }
 0x96b   :  { %v6663_v42 = vpop.permute.xlu1 %6662 }
 0x96c   :  { %v6665_v32 = vunpack.i.h.bf16 %v6663_v42  ;;  %v6664_v4 = vunpack.i.l.bf16 %v6663_v42 }
 0x96e   :  { %v1178_v36 = vsel %vm1176_vm5, %v1175_v34, %v6665_v32  ;;  %v1177_v37 = vsel %vm1176_vm5, %v1174_v35, %v6664_v4 }
 0x96f   :  { %v1179_v30 = vpack.c.bf16 %v1178_v36, %v1177_v37 }
 0x971   :  { %6167 = vmatmul.mubr.msk.bf16.vlgmr.msra.gmra.mrb[32].mxu0 %vm93_vm0, %v1179_v30 }
 0x972   :  { %6194 = vmatprep.mubr.msk.bf16.mxu0 %vm6962_vm1, %v6961_v14  ;;  %6179 = vmatpush3.bf16.msra.mxu0 %v6722_v21 }
 0x973   :  { %6180 = vmatprep.subr.bf16.mxu0 %v6961_v14 }
 0x976   :  { %6181 = vmatpush3.bf16.msra.mxu0 %v6723_v22 }
 0x977   :  { %6182 = vmatprep.subr.bf16.mxu0 %v6961_v14 }
 0x97a   :  { %6183 = vmatpush3.bf16.msra.mxu0 %v6724_v23  ;;  %v5655_v23 = vld [vmem:[%s8482_s15] ss:$0 sm:$0xff] }
 0x97b   :  { %6184 = vmatprep.subr.bf16.mxu0 %v6961_v14 }
 0x97c   :  { %v7393_v33 = vpop.permute.xlu1 %1242 }
 0x97e   :  { %6185 = vmatpush3.bf16.msra.mxu0 %v6725_v55 }
 0x97f   :  { %6186 = vmatprep.subr.bf16.mxu0 %v6961_v14 }
 0x982   :  { %6187 = vmatpush3.bf16.msra.mxu0 %v6726_v57 }
 0x983   :  { %6188 = vmatprep.subr.bf16.mxu0 %v6961_v14 }
 0x986   :  { %6189 = vmatpush3.bf16.msra.mxu0 %v6727_v24 }
 0x987   :  { %6190 = vmatprep.subr.bf16.mxu0 %v6961_v14 }
 0x98a   :  { %6191 = vmatpush3.bf16.msra.mxu0 %v6728_v25 }
 0x98b   :  { %6192 = vmatprep.subr.bf16.mxu0 %v6961_v14 }
 0x98e   :  { %6193 = vmatpush3.bf16.msra.mxu0 %v6729_v26 }
 0x98f   :  { %6224 = vmatprep.subr.bf16.mxu0 %v6961_v14 }
 0xa44   :  { %v1233_v38 = vpop.f32.mrb[32].mxu0 }
 0xa45   :  { %v1250_v40 = vmul.f32 %v7393_v33, %v1233_v38  ;;  %v6168_v41 = vpop.f32.mrb[33].mxu0 }
 0xa46   :  { %v1236_v43 = vpop.f32.mrb[34].mxu0 }
 0xa47   :  { %v7399_v44 = vadd.f32 %v1250_v40, %v7111_v0  ;;  %v1251_v46 = vmul.f32 %v7395_v39, %v1236_v43  ;;  %v6169_v47 = vpop.f32.mrb[35].mxu0 }
 0xa49   :  { %v7403_v48 = vadd.f32 %v1251_v46, %v7116_v1  ;;  %v1256_v49 = vsel %vm93_vm0, %v7399_v44, 0.0 }
 0xa4a   :  { %1257 = vadd.xlane.f32.xlu1 %v1256_v49 }
 0xa4b   :  { %v1259_v18 = vsel %vm93_vm0, %v7403_v48, 0.0 }
 0xa4c   :  { %1260 = vadd.xlane.f32.xlu0 %v1259_v18 }
 0xad7   :  { %v1258_v50 = vpop.xlane.xlu1 %1257 }
 0xad8   :  { %v1262_v53 = vmul.f32 0.03125, %v1258_v50 }
 0xad9   :  { %v1261_v54 = vpop.xlane.xlu0 %1260 }
 0xada   :  { %v1264_v0 = vsub.f32 %v7399_v44, %v1262_v53  ;;  %v1263_v20 = vmul.f32 0.03125, %v1261_v54 }
 0xadc   :  { %v1265_v52 = vsub.f32 %v7403_v48, %v1263_v20  ;;  %v1266_v51 = vmul.f32 %v1264_v0, %v1264_v0 }
 0xade   :  { %v1268_v1 = vsel %vm93_vm0, %v1266_v51, 0.0  ;;  %v1267_v56 = vmul.f32 %v1265_v52, %v1265_v52 }
 0xadf   :  { %1269 = vadd.xlane.f32.xlu0 %v1268_v1 }
 0xae0   :  { %v1271_v15 = vsel %vm93_vm0, %v1267_v56, 0.0 }
 0xae1   :  { %1272 = vadd.xlane.f32.xlu1 %v1271_v15 }
 0xb6c   :  { %v1270_v59 = vpop.xlane.xlu0 %1269 }
 0xb6d   :  { %v1274_v60 = vmul.f32 0.03125, %v1270_v59 }
 0xb6e   :  { %v1273_v61 = vpop.xlane.xlu1 %1272 }
 0xb6f   :  { %v1276_v62 = vadd.f32 1e-05, %v1274_v60  ;;  %v1275_v63 = vmul.f32 0.03125, %v1273_v61 }
 0xb71   :  { %6812 = vrsqrt.f32 %v1276_v62  ;;  %v1277_v3 = vadd.f32 1e-05, %v1275_v63 }
 0xb73   :  { %6814 = vrsqrt.f32 %v1277_v3  ;;  %v6730_v3 = vld [vmem:[%s8480_s16] sm:$0xff]  }
 0xb7b   :  { %v6813_v5 = vpop.eup %6812 }
 0xb7c   :  { %v1280_v7 = vmul.f32 %v6813_v5, %v1264_v0  ;;  %v6731_v5 = vld [vmem:[%s8480_s16 + $0x8] sm:$0xff]  }
 0xb7d   :  { %v6815_v8 = vpop.eup %6814 }
 0xb7e   :  { %v1288_v9 = vmul.f32 %v5641_v6, %v1280_v7  ;;  %v1281_v10 = vmul.f32 %v6815_v8, %v1265_v52 }
 0xb80   :  { %v1289_v12 = vmul.f32 %v5641_v6, %v1281_v10  ;;  %v1296_v13 = vadd.f32 %v5642_v11, %v1288_v9 }
 0xb82   :  { %v1297_v16 = vadd.f32 %v5642_v11, %v1289_v12 }
 0xb84   :  { %v1298_v17 = vpack.c.bf16 %v1297_v16, %v1296_v13  ;;  %v5654_v13 = vld [vmem:[%s8481_s14] ss:$0 sm:$0xff] }
 0xb86   :  { %6175 = vmatmul.mubr.msk.bf16.vlgmr.msra.gmra.mrb[40].mxu1 %vm93_vm0, %v1298_v17 }
 0xb87   :  { %6202 = vmatprep.mubr.msk.bf16.mxu1 %vm6962_vm1, %v6961_v14  ;;  %6199 = vmatpush3.bf16.msra.mxu1 %v6730_v3 }
 0xb88   :  { %6200 = vmatprep.subr.bf16.mxu1 %v6961_v14 }
 0xb8b   :  { %6201 = vmatpush3.bf16.msra.mxu1 %v6731_v5 }
 0xb8c   :  { %6206 = vmatprep.subr.bf16.mxu1 %v6961_v14 }
 0xc59   :  { %v1352_v27 = vpop.f32.mrb[40].mxu1 }
 0xc5a   :  { %v1359_v45 = vmul.f32 %v1352_v27, %v1352_v27  ;;  %v6176_v28 = vpop.f32.mrb[41].mxu1 }
 0xc5b   :  { %v1355_v29 = vpop.f32.mrb[42].mxu1 }
 0xc5c   :  { %v1361_v42 = vmul.f32 %v1359_v45, %v1352_v27  ;;  %v1360_v31 = vmul.f32 %v1355_v29, %v1355_v29  ;;  %v6177_v2 = vpop.f32.mrb[43].mxu1 }
 0xc5e   :  { %v1363_v32 = vmul.f32 0.044715, %v1361_v42  ;;  %v1362_v4 = vmul.f32 %v1360_v31, %v1355_v29 }
 0xc60   :  { %v1365_v34 = vadd.f32 %v1363_v32, %v1352_v27  ;;  %v1364_v35 = vmul.f32 0.044715, %v1362_v4 }
 0xc62   :  { %v1367_v36 = vmul.f32 0.7978846, %v1365_v34  ;;  %v1366_v37 = vadd.f32 %v1364_v35, %v1355_v29 }
 0xc64   :  { %6816 = vtanh.f32 %v1367_v36  ;;  %v1368_v30 = vmul.f32 0.7978846, %v1366_v37 }
 0xc66   :  { %6818 = vtanh.f32 %v1368_v30  ;;  %v7522_v30 = vld [vmem:[%s8483_s1] sm:$0xff] }
 0xc6e   :  { %v6817_v38 = vpop.eup %6816 }
 0xc6f   :  { %v1371_v40 = vadd.f32 1.0, %v6817_v38 }
 0xc70   :  { %v6819_v41 = vpop.eup %6818 }
 0xc71   :  { %v1373_v43 = vmul.f32 0.5, %v1371_v40  ;;  %v1372_v46 = vadd.f32 1.0, %v6819_v41 }
 0xc73   :  { %v1374_v47 = vmul.f32 0.5, %v1372_v46  ;;  %v1375_v49 = vmul.f32 %v1373_v43, %v1352_v27 }
 0xc75   :  { %v1376_v18 = vmul.f32 %v1374_v47, %v1355_v29 }
 0xc77   :  { %v1377_v50 = vpack.c.bf16 %v1376_v18, %v1375_v49  ;;  %v7529_v49 = vld [vmem:[%s8483_s1 + $0x8] sm:$0xff]  ;;  %s8584_s1 = sld [smem:[#allocation14_spill]] }
 0xc79   :  { %6195 = vmatmul.mubr.bf16.vlgmr.msra.gmra.mrb[36].mxu0 %v1377_v50 }
 0xc7a   :  { %6226 = vmatprep.mubr.msk.bf16.mxu0 %vm6962_vm1, %v6961_v14 }
 0xd4c   :  { %v1476_v53 = vpop.f32.mrb[36].mxu0 }
 0xd4d   :  { %v7465_v54 = vadd.f32 %v1476_v53, %v7399_v44  ;;  %v6196_v0 = vpop.f32.mrb[37].mxu0 }
 0xd4e   :  { %v1479_v20 = vpop.f32.mrb[38].mxu0 }
 0xd4f   :  { %v7468_v52 = vadd.f32 %v1479_v20, %v7403_v48  ;;  %v6197_v51 = vpop.f32.mrb[39].mxu0  ;;  %v1487_v1 = vsel %vm93_vm0, %v7465_v54, 0.0 }
 0xd50   :  { %1488 = vadd.xlane.f32.xlu0 %v1487_v1 }
 0xd51   :  { %v1490_v56 = vsel %vm93_vm0, %v7468_v52, 0.0 }
 0xd52   :  { %1491 = vadd.xlane.f32.xlu1 %v1490_v56 }
 0xddd   :  { %v1489_v15 = vpop.xlane.xlu0 %1488 }
 0xdde   :  { %v1493_v19 = vmul.f32 0.03125, %v1489_v15 }
 0xddf   :  { %v1492_v58 = vpop.xlane.xlu1 %1491 }
 0xde0   :  { %v1495_v44 = vsub.f32 %v7465_v54, %v1493_v19  ;;  %v1494_v59 = vmul.f32 0.03125, %v1492_v58 }
 0xde2   :  { %v1496_v60 = vsub.f32 %v7468_v52, %v1494_v59  ;;  %v1497_v61 = vmul.f32 %v1495_v44, %v1495_v44 }
 0xde4   :  { %v1499_v48 = vsel %vm93_vm0, %v1497_v61, 0.0  ;;  %v1498_v62 = vmul.f32 %v1496_v60, %v1496_v60 }
 0xde5   :  { %1500 = vadd.xlane.f32.xlu0 %v1499_v48 }
 0xde6   :  { %v1502_v63 = vsel %vm93_vm0, %v1498_v62, 0.0 }
 0xde7   :  { %1503 = vadd.xlane.f32.xlu1 %v1502_v63 }
 0xe72   :  { %v1501_v6 = vpop.xlane.xlu0 %1500 }
 0xe73   :  { %v1505_v7 = vmul.f32 0.03125, %v1501_v6 }
 0xe74   :  { %v1504_v8 = vpop.xlane.xlu1 %1503 }
 0xe75   :  { %v1507_v9 = vadd.f32 1e-05, %v1505_v7  ;;  %v1506_v10 = vmul.f32 0.03125, %v1504_v8 }
 0xe77   :  { %6820 = vrsqrt.f32 %v1507_v9  ;;  %v1508_v11 = vadd.f32 1e-05, %v1506_v10 }
 0xe79   :  { %6822 = vrsqrt.f32 %v1508_v11 }
 0xe81   :  { %v6821_v12 = vpop.eup %6820 }
 0xe82   :  { %v1511_v16 = vmul.f32 %v6821_v12, %v1495_v44 }
 0xe83   :  { %v6823_v17 = vpop.eup %6822 }
 0xe84   :  { %v1519_v21 = vmul.f32 %v5654_v13, %v1511_v16  ;;  %v1512_v22 = vmul.f32 %v6823_v17, %v1496_v60 }
 0xe86   :  { %v1520_v55 = vmul.f32 %v5654_v13, %v1512_v22  ;;  %v1527_v57 = vadd.f32 %v5655_v23, %v1519_v21 }
 0xe88   :  { %v1528_v24 = vadd.f32 %v5655_v23, %v1520_v55 }
 0xe8a   :  { %v1529_v25 = vpack.c.bf16 %v1528_v24, %v1527_v57 }
 0xe8c   :  { %6203 = vmatmul.mubr.msk.bf16.vlgmr.msra.gmra.mrb[44].mxu1 %vm93_vm0, %v1529_v25 }
 0xe8d   :  { %6208 = vmatprep.mubr.msk.bf16.mxu1 %vm6962_vm1, %v6961_v14 }
 0xf5f   :  { %v1583_v26 = vpop.f32.mrb[44].mxu1 }
 0xf60   :  { %v7495_v27 = vpack.c.bf16 %v1583_v26, %v1583_v26  ;;  %v6204_v45 = vpop.f32.mrb[45].mxu1  ;;  %v1590_v32 = vmul.f32 0.35355338, %v1583_v26 }
 0xf61   :  { %v1586_v28 = vpop.f32.mrb[46].mxu1 }
 0xf62   :  { %v7497_v29 = vpack.c.bf16 %v1586_v28, %v1586_v28  ;;  %1597 = vrot.lane.b32.xlu0 %v7495_v27, %s8572_s9  ;;  %v6205_v42 = vpop.f32.mrb[47].mxu1  ;;  %v7505_v34 = vpack.c.bf16 %v1590_v32, %v1590_v32  ;;  %v1591_v36 = vmul.f32 0.35355338, %v1586_v28 }
 0xf64   :  { %1646 = vrot.lane.b32.xlu1 %v7497_v29, %s8572_s9  ;;  %v7513_v37 = vpack.c.bf16 %v1591_v36, %v1591_v36 }
 0xfd4   :  { %v1598_v31 = vpop.permute.xlu0 %1597 }
 0xfd5   :  { %v1603_v2 = vsel %vm269_vm2, %v1598_v31, 0 }
 0xfd6   :  { %6207 = vmatpush3.bf16.xpose.msra.mxu1 %v1603_v2  ;;  %v1647_v4 = vpop.permute.xlu1 %1646 }
 0xfd7   :  { %6212 = vmatprep.subr.bf16.mxu1 %v6961_v14  ;;  %v1652_v35 = vsel %vm269_vm2, %v1647_v4, 0 }
 0xfdd   :  { %6209 = vmatmul.mubr.msk.bf16.vlgmr.msra.gmra.mrb[48].mxu1 %vm269_vm2, %v7505_v34 }
 0xfde   :  { %6213 = vmatpush3.bf16.xpose.msra.mxu1 %v1652_v35  ;;  %6214 = vmatprep.mubr.msk.bf16.mxu1 %vm6962_vm1, %v6961_v14 }
 0xfdf   :  { %6218 = vmatprep.subr.bf16.mxu1 %v6961_v14 }
 0xfe5   :  { %6215 = vmatmul.mubr.msk.bf16.vlgmr.msra.gmra.mrb[52].mxu1 %vm269_vm2, %v7513_v37 }
 0xfe6   :  { %6220 = vmatprep.mubr.msk.bf16.mxu1 %vm6962_vm1, %v6961_v14 }
0x10b0   :  { %v1639_v38 = vpop.f32.mrb[48].mxu1 }
0x10b1   :  { %v1640_v40 = vadd.f32 %v1639_v38, %v7522_v30  ;;  %v6210_v41 = vpop.f32.mrb[49].mxu1 }
0x10b2   :  { %v1642_v43 = vpop.f32.mrb[50].mxu1 }
0x10b3   :  { %v6211_v46 = vpop.f32.mrb[51].mxu1  ;;  %v1694_v47 = vsel %vm269_vm2, %v1640_v40, -inf }
0x10b4   :  { %1695 = vmax.xlane.f32.xlu1 %v1694_v47 }
0x10b8   :  { %v1688_v18 = vpop.f32.mrb[52].mxu1 }
0x10b9   :  { %v1689_v50 = vadd.f32 %v1688_v18, %v7529_v49  ;;  %v6216_v53 = vpop.f32.mrb[53].mxu1 }
0x10ba   :  { %v1691_v0 = vpop.f32.mrb[54].mxu1 }
0x10bb   :  { %v6217_v20 = vpop.f32.mrb[55].mxu1  ;;  %v1697_v51 = vsel %vm269_vm2, %v1689_v50, -inf }
0x10bc   :  { %1698 = vmax.xlane.f32.xlu0 %v1697_v51 }
0x10c5   :  { %1764 = vrot.lane.b32.xlu1 %v7497_v29, %s8527_s28 }
0x10c9   :  { %1817 = vrot.lane.b32.xlu1 %v7495_v27, %s8573_s4 }
0x10cd   :  { %1868 = vrot.lane.b32.xlu1 %v7497_v29, %s8573_s4 }
0x10d1   :  { %1866 = vrot.lane.b32.xlu1 %v7513_v37, %s8574_s0 }
0x10d2   :  { %1716 = vrot.lane.b32.xlu0 %v7495_v27, %s8527_s28  ;;  %s8578_s28 = smov 104  }
0x10d5   :  { %1986 = vrot.lane.b32.xlu1 %v7497_v29, %s8523_s8 }
0x10d6   :  { %1815 = vrot.lane.b32.xlu0 %v7505_v34, %s8574_s0 }
0x10da   :  { %1938 = vrot.lane.b32.xlu0 %v7495_v27, %s8523_s8  ;;  %s8525_s8 = smov 48  }
0x1141   :  { %v1696_v1 = vpop.xlane.xlu1 %1695 }
0x1142   :  { %v1700_v56 = vsub.f32 %v1640_v40, %v1696_v1 }
0x1144   :  { %v1702_v15 = vmul.f32 1.442695, %v1700_v56 }
0x1145   :  { %v1765_v19 = vpop.permute.xlu1 %1764 }
0x1146   :  { %6824 = vpow2.f32 %v1702_v15  ;;  %v1770_v58 = vsel %vm390_vm3, %v1765_v19, 0 }
0x1147   :  { %6225 = vmatpush3.bf16.msra.mxu0 %v1770_v58 }
0x1148   :  { %6236 = vmatprep.subr.bf16.mxu0 %v6961_v14 }
0x1149   :  { %v1699_v44 = vpop.xlane.xlu0 %1698  ;;  %v1818_v48 = vpop.permute.xlu1 %1817 }
0x114a   :  { %v1701_v59 = vsub.f32 %v1689_v50, %v1699_v44  ;;  %v1823_v7 = vsel %vm269_vm2, %v1818_v48, 0 }
0x114c   :  { %v1704_v60 = vmul.f32 1.442695, %v1701_v59 }
0x114d   :  { %v1717_v61 = vpop.permute.xlu0 %1716  ;;  %v1869_v5 = vpop.permute.xlu1 %1868 }
0x114e   :  { %6826 = vpow2.f32 %v1704_v60  ;;  %v1722_v62 = vsel %vm390_vm3, %v1717_v61, 0  ;;  %v1874_v11 = vsel %vm269_vm2, %v1869_v5, 0 }
0x114f   :  { %6219 = vmatpush3.bf16.msra.mxu1 %v1722_v62 }
0x1150   :  { %v7552_v63 = vpop.eup %6824  ;;  %6230 = vmatprep.subr.bf16.mxu1 %v6961_v14 }
0x1151   :  { %v1714_v3 = vpack.c.bf16 %v7552_v63, %v7552_v63  ;;  %v1816_v6 = vpop.permute.xlu0 %1815  ;;  %v1867_v10 = vpop.permute.xlu1 %1866 }
0x1153   :  { %6221 = vmatmul.mubr.msk.bf16.vlgmr.msra.gmra.mrb[56].mxu1 %vm269_vm2, %v1714_v3 }
0x1154   :  { %6232 = vmatprep.mubr.msk.bf16.mxu1 %vm6962_vm1, %v6961_v14 }
0x1155   :  { %v1939_v12 = vpop.permute.xlu0 %1938  ;;  %v1987_v16 = vpop.permute.xlu1 %1986 }
0x1156   :  { %v1944_v13 = vsel %vm390_vm3, %v1939_v12, 0  ;;  %v1992_v17 = vsel %vm390_vm3, %v1987_v16, 0 }
0x1158   :  { %v7561_v8 = vpop.eup %6826  ;;  %6231 = vmatpush3.bf16.xpose.msra.mxu1 %v1823_v7 }
0x1159   :  { %v1715_v9 = vpack.c.bf16 %v7561_v8, %v7561_v8  ;;  %6242 = vmatprep.subr.bf16.mxu1 %v6961_v14 }
0x115b   :  { %6227 = vmatmul.mubr.msk.bf16.vlgmr.msra.gmra.mrb[40].mxu0 %vm269_vm2, %v1715_v9 }
0x115c   :  { %6237 = vmatpush3.bf16.xpose.msra.mxu0 %v1874_v11  ;;  %6238 = vmatprep.mubr.msk.bf16.mxu0 %vm6962_vm1, %v6961_v14 }
0x115d   :  { %6248 = vmatprep.subr.bf16.mxu0 %v6961_v14 }
0x115f   :  { %6233 = vmatmul.mubr.msk.bf16.vlgmr.msra.gmra.mrb[60].mxu1 %vm269_vm2, %v1816_v6 }
0x1160   :  { %6243 = vmatpush3.bf16.msra.mxu1 %v1944_v13  ;;  %6244 = vmatprep.mubr.msk.bf16.mxu1 %vm6962_vm1, %v6961_v14 }
0x1161   :  { %6254 = vmatprep.subr.bf16.mxu1 %v6961_v14 }
0x1163   :  { %6239 = vmatmul.mubr.msk.bf16.vlgmr.msra.gmra.mrb[44].mxu0 %vm269_vm2, %v1867_v10 }
0x1164   :  { %6249 = vmatpush3.bf16.msra.mxu0 %v1992_v17  ;;  %6250 = vmatprep.mubr.msk.bf16.mxu0 %vm6962_vm1, %v6961_v14 }
0x1165   :  { %6260 = vmatprep.subr.bf16.mxu0 %v6961_v14 }
0x1226   :  { %v7581_v21 = vpop.f32.mrb[56].mxu1 }
0x1227   :  { %v6222_v22 = vpop.f32.mrb[57].mxu1 }
0x1228   :  { %v1761_v23 = vpop.f32.mrb[58].mxu1 }
0x1229   :  { %v6223_v55 = vpop.f32.mrb[59].mxu1 }
0x122e   :  { %v7583_v57 = vpop.f32.mrb[40].mxu0 }
0x122f   :  { %v6228_v24 = vpop.f32.mrb[41].mxu0 }
0x1230   :  { %v1809_v25 = vpop.f32.mrb[42].mxu0 }
0x1231   :  { %v6229_v26 = vpop.f32.mrb[43].mxu0 }
0x1232   :  { %v1859_v45 = vpop.f32.mrb[60].mxu1 }
0x1233   :  { %v1860_v28 = vadd.f32 %v1859_v45, %v7522_v30  ;;  %v6234_v42 = vpop.f32.mrb[61].mxu1 }
0x1234   :  { %v1862_v31 = vpop.f32.mrb[62].mxu1 }
0x1235   :  { %v6235_v2 = vpop.f32.mrb[63].mxu1  ;;  %v1916_v32 = vsel %vm269_vm2, %v1860_v28, -inf }
0x1236   :  { %v1910_v4 = vpop.f32.mrb[44].mxu0  ;;  %1917 = vmax.xlane.f32.xlu0 %v1916_v32 }
0x1237   :  { %v1911_v35 = vadd.f32 %v1910_v4, %v7529_v49  ;;  %v6240_v36 = vpop.f32.mrb[45].mxu0 }
0x1238   :  { %v1913_v38 = vpop.f32.mrb[46].mxu0 }
0x1239   :  { %v6241_v40 = vpop.f32.mrb[47].mxu0  ;;  %v1919_v41 = vsel %vm269_vm2, %v1911_v35, -inf }
0x123a   :  { %1920 = vmax.xlane.f32.xlu1 %v1919_v41 }
0x124b   :  { %2088 = vrot.lane.b32.xlu1 %v7497_v29, %s8575_s7 }
0x124c   :  { %2038 = vrot.lane.b32.xlu0 %v7495_v27, %s8575_s7 }
0x124f   :  { %2086 = vrot.lane.b32.xlu1 %v7513_v37, %s8576_s5 }
0x1250   :  { %2036 = vrot.lane.b32.xlu0 %v7505_v34, %s8576_s5 }
0x1253   :  { %2206 = vrot.lane.b32.xlu1 %v7497_v29, %s8525_s8 }
0x1254   :  { %2158 = vrot.lane.b32.xlu0 %v7495_v27, %s8525_s8  ;;  %s8577_s8 = smov 72  }
0x12c3   :  { %v1918_v43 = vpop.xlane.xlu0 %1917 }
0x12c4   :  { %v1922_v46 = vsub.f32 %v1860_v28, %v1918_v43 }
0x12c6   :  { %v1924_v47 = vmul.f32 1.442695, %v1922_v46 }
0x12c7   :  { %v1921_v18 = vpop.xlane.xlu1 %1920  ;;  %v2039_v0 = vpop.permute.xlu0 %2038 }
0x12c8   :  { %6828 = vpow2.f32 %v1924_v47  ;;  %v1923_v50 = vsub.f32 %v1911_v35, %v1921_v18  ;;  %v2044_v15 = vsel %vm269_vm2, %v2039_v0, 0 }
0x12ca   :  { %v1926_v53 = vmul.f32 1.442695, %v1923_v50 }
0x12cb   :  { %v2089_v51 = vpop.permute.xlu1 %2088  ;;  %v2037_v56 = vpop.permute.xlu0 %2036 }
0x12cc   :  { %6830 = vpow2.f32 %v1926_v53  ;;  %v2094_v59 = vsel %vm269_vm2, %v2089_v51, 0 }
0x12cf   :  { %v2087_v44 = vpop.permute.xlu1 %2086  ;;  %v2159_v60 = vpop.permute.xlu0 %2158 }
0x12d0   :  { %v2164_v61 = vsel %vm390_vm3, %v2159_v60, 0 }
0x12d2   :  { %v7601_v20 = vpop.eup %6828 }
0x12d3   :  { %v1936_v1 = vpack.c.bf16 %v7601_v20, %v7601_v20  ;;  %v2207_v48 = vpop.permute.xlu1 %2206 }
0x12d4   :  { %v2212_v62 = vsel %vm390_vm3, %v2207_v48, 0 }
0x12d5   :  { %6245 = vmatmul.mubr.msk.bf16.vlgmr.msra.gmra.mrb[64].mxu1 %vm269_vm2, %v1936_v1 }
0x12d6   :  { %v7607_v19 = vpop.eup %6830  ;;  %6255 = vmatpush3.bf16.xpose.msra.mxu1 %v2044_v15  ;;  %6256 = vmatprep.mubr.msk.bf16.mxu1 %vm6962_vm1, %v6961_v14 }
0x12d7   :  { %v1937_v58 = vpack.c.bf16 %v7607_v19, %v7607_v19  ;;  %6266 = vmatprep.subr.bf16.mxu1 %v6961_v14 }
0x12d9   :  { %6251 = vmatmul.mubr.msk.bf16.vlgmr.msra.gmra.mrb[48].mxu0 %vm269_vm2, %v1937_v58 }
0x12da   :  { %6261 = vmatpush3.bf16.xpose.msra.mxu0 %v2094_v59  ;;  %6262 = vmatprep.mubr.msk.bf16.mxu0 %vm6962_vm1, %v6961_v14 }
0x12db   :  { %6272 = vmatprep.subr.bf16.mxu0 %v6961_v14 }
0x12dd   :  { %6257 = vmatmul.mubr.msk.bf16.vlgmr.msra.gmra.mrb[68].mxu1 %vm269_vm2, %v2037_v56 }
0x12de   :  { %6267 = vmatpush3.bf16.msra.mxu1 %v2164_v61  ;;  %6268 = vmatprep.mubr.msk.bf16.mxu1 %vm6962_vm1, %v6961_v14 }
0x12df   :  { %6278 = vmatprep.subr.bf16.mxu1 %v6961_v14 }
0x12e1   :  { %6263 = vmatmul.mubr.msk.bf16.vlgmr.msra.gmra.mrb[52].mxu0 %vm269_vm2, %v2087_v44 }
0x12e2   :  { %6273 = vmatpush3.bf16.msra.mxu0 %v2212_v62  ;;  %6274 = vmatprep.mubr.msk.bf16.mxu0 %vm6962_vm1, %v6961_v14 }
0x12e3   :  { %6284 = vmatprep.subr.bf16.mxu0 %v6961_v14 }
0x13a8   :  { %v7629_v3 = vpop.f32.mrb[64].mxu1 }
0x13a9   :  { %v6246_v5 = vpop.f32.mrb[65].mxu1 }
0x13aa   :  { %v1983_v6 = vpop.f32.mrb[66].mxu1 }
0x13ab   :  { %v6247_v7 = vpop.f32.mrb[67].mxu1 }
0x13ac   :  { %v7631_v9 = vpop.f32.mrb[48].mxu0 }
0x13ad   :  { %v6252_v10 = vpop.f32.mrb[49].mxu0 }
0x13ae   :  { %v2031_v11 = vpop.f32.mrb[50].mxu0 }
0x13af   :  { %v6253_v12 = vpop.f32.mrb[51].mxu0 }
0x13b0   :  { %v2080_v13 = vpop.f32.mrb[68].mxu1 }
0x13b1   :  { %v2081_v16 = vadd.f32 %v2080_v13, %v7522_v30  ;;  %v6258_v17 = vpop.f32.mrb[69].mxu1 }
0x13b2   :  { %v2083_v22 = vpop.f32.mrb[70].mxu1 }
0x13b3   :  { %v6259_v23 = vpop.f32.mrb[71].mxu1  ;;  %v2136_v55 = vsel %vm269_vm2, %v2081_v16, -inf }
0x13b4   :  { %v2130_v24 = vpop.f32.mrb[52].mxu0  ;;  %2137 = vmax.xlane.f32.xlu0 %v2136_v55 }
0x13b5   :  { %v2131_v25 = vadd.f32 %v2130_v24, %v7529_v49  ;;  %v6264_v26 = vpop.f32.mrb[53].mxu0 }
0x13b6   :  { %v2133_v45 = vpop.f32.mrb[54].mxu0 }
0x13b7   :  { %v6265_v28 = vpop.f32.mrb[55].mxu0  ;;  %v2139_v42 = vsel %vm269_vm2, %v2131_v25, -inf }
0x13b8   :  { %2140 = vmax.xlane.f32.xlu1 %v2139_v42 }
0x13c9   :  { %2308 = vrot.lane.b32.xlu1 %v7497_v29, %s8577_s8 }
0x13ca   :  { %2258 = vrot.lane.b32.xlu0 %v7495_v27, %s8577_s8 }
0x13cd   :  { %2306 = vrot.lane.b32.xlu1 %v7513_v37, %s8578_s28 }
0x13ce   :  { %2256 = vrot.lane.b32.xlu0 %v7505_v34, %s8578_s28 }
0x1441   :  { %v2138_v31 = vpop.xlane.xlu0 %2137 }
0x1442   :  { %v2142_v2 = vsub.f32 %v2081_v16, %v2138_v31 }
0x1444   :  { %v2144_v32 = vmul.f32 1.442695, %v2142_v2 }
0x1445   :  { %v2141_v4 = vpop.xlane.xlu1 %2140  ;;  %v2259_v40 = vpop.permute.xlu0 %2258 }
0x1446   :  { %6832 = vpow2.f32 %v2144_v32  ;;  %v2143_v35 = vsub.f32 %v2131_v25, %v2141_v4  ;;  %v2264_v43 = vsel %vm269_vm2, %v2259_v40, 0  ;;  %v1706_v32 = vsel %vm269_vm2, %v7552_v63, 0.0 }
0x1448   :  { %v2146_v36 = vmul.f32 1.442695, %v2143_v35  ;;  %v1709_v35 = vsel %vm269_vm2, %v7561_v8, 0.0 }
0x1449   :  { %v2309_v37 = vpop.permute.xlu1 %2308  ;;  %v2257_v18 = vpop.permute.xlu0 %2256 }
0x144a   :  { %6834 = vpow2.f32 %v2146_v36  ;;  %v2314_v47 = vsel %vm269_vm2, %v2309_v37, 0 }
0x144d   :  { %v2307_v50 = vpop.permute.xlu1 %2306 }
0x1450   :  { %v6833_v38 = vpop.eup %6832 }
0x1451   :  { %v2156_v41 = vpack.c.bf16 %v6833_v38, %v6833_v38  ;;  %v2148_v16 = vsel %vm269_vm2, %v6833_v38, 0.0 }
0x1453   :  { %6269 = vmatmul.mubr.msk.bf16.vlgmr.msra.gmra.mrb[72].mxu1 %vm269_vm2, %v2156_v41 }
0x1454   :  { %v6835_v46 = vpop.eup %6834  ;;  %6279 = vmatpush3.bf16.xpose.msra.mxu1 %v2264_v43  ;;  %6280 = vmatprep.mubr.msk.bf16.mxu1 %vm6962_vm1, %v6961_v14 }
0x1455   :  { %v2157_v34 = vpack.c.bf16 %v6835_v46, %v6835_v46  ;;  %6290 = vmatprep.subr.bf16.mxu1 %v6961_v14  ;;  %v2151_v17 = vsel %vm269_vm2, %v6835_v46, 0.0 }
0x1457   :  { %6275 = vmatmul.mubr.msk.bf16.vlgmr.msra.gmra.mrb[56].mxu0 %vm269_vm2, %v2157_v34 }
0x1458   :  { %6285 = vmatpush3.bf16.xpose.msra.mxu0 %v2314_v47  ;;  %6286 = vmatprep.mubr.msk.bf16.mxu0 %vm6962_vm1, %v6961_v14 }
0x1459   :  { %6296 = vmatprep.subr.bf16.mxu0 %v6961_v14 }
0x145b   :  { %6281 = vmatmul.mubr.msk.bf16.vlgmr.msra.gmra.mrb[76].mxu1 %vm269_vm2, %v2257_v18 }
0x145c   :  { %6292 = vmatprep.mubr.msk.bf16.mxu1 %vm6962_vm1, %v6961_v14 }
0x145f   :  { %6287 = vmatmul.mubr.msk.bf16.vlgmr.msra.gmra.mrb[60].mxu0 %vm269_vm2, %v2307_v50 }
0x1460   :  { %6298 = vmatprep.mubr.msk.bf16.mxu0 %vm6962_vm1, %v6961_v14 }
0x1526   :  { %v7661_v53 = vpop.f32.mrb[72].mxu1 }
0x1527   :  { %v6270_v0 = vpop.f32.mrb[73].mxu1 }
0x1528   :  { %v2203_v51 = vpop.f32.mrb[74].mxu1 }
0x1529   :  { %v6271_v1 = vpop.f32.mrb[75].mxu1  ;;  %v6732_v51 = vld [vmem:[%s8484_s17] sm:$0xff]  }
0x152a   :  { %v7663_v56 = vpop.f32.mrb[56].mxu0 }
0x152b   :  { %v6276_v15 = vpop.f32.mrb[57].mxu0 }
0x152c   :  { %v2251_v58 = vpop.f32.mrb[58].mxu0 }
0x152d   :  { %v6277_v44 = vpop.f32.mrb[59].mxu0 }
0x152e   :  { %v2300_v59 = vpop.f32.mrb[76].mxu1 }
0x152f   :  { %v2301_v60 = vadd.f32 %v2300_v59, %v7522_v30  ;;  %v6282_v61 = vpop.f32.mrb[77].mxu1  ;;  %v1928_v30 = vsel %vm269_vm2, %v7601_v20, 0.0 }
0x1530   :  { %v2303_v48 = vpop.f32.mrb[78].mxu1 }
0x1531   :  { %v6283_v62 = vpop.f32.mrb[79].mxu1  ;;  %v2356_v5 = vsel %vm269_vm2, %v2301_v60, -inf }
0x1532   :  { %v2350_v6 = vpop.f32.mrb[60].mxu0  ;;  %2357 = vmax.xlane.f32.xlu0 %v2356_v5 }
0x1533   :  { %v2351_v7 = vadd.f32 %v2350_v6, %v7529_v49  ;;  %v6288_v10 = vpop.f32.mrb[61].mxu0  ;;  %v1931_v49 = vsel %vm269_vm2, %v7607_v19, 0.0 }
0x1534   :  { %v2353_v11 = vpop.f32.mrb[62].mxu0 }
0x1535   :  { %v6289_v12 = vpop.f32.mrb[63].mxu0  ;;  %v2359_v13 = vsel %vm269_vm2, %v2351_v7, -inf }
0x1536   :  { %2360 = vmax.xlane.f32.xlu1 %v2359_v13 }
0x1547   :  { %2426 = vrot.lane.b32.xlu1 %v7497_v29, %s8530_s25 }
0x1548   :  { %2378 = vrot.lane.b32.xlu0 %v7495_v27, %s8530_s25  ;;  %s8579_s25 = smov 8  }
0x1567   :  { %1929 = vadd.xlane.f32.xlu0 %v1928_v30 }
0x156b   :  { %1932 = vadd.xlane.f32.xlu1 %v1931_v49  ;;  %2149 = vadd.xlane.f32.xlu0 %v2148_v16 }
0x156f   :  { %2152 = vadd.xlane.f32.xlu0 %v2151_v17 }
0x15bf   :  { %v2358_v22 = vpop.xlane.xlu0 %2357 }
0x15c0   :  { %v2362_v23 = vsub.f32 %v2301_v60, %v2358_v22 }
0x15c2   :  { %v2364_v29 = vmul.f32 1.442695, %v2362_v23 }
0x15c3   :  { %v2361_v55 = vpop.xlane.xlu1 %2360  ;;  %v2379_v24 = vpop.permute.xlu0 %2378 }
0x15c4   :  { %6836 = vpow2.f32 %v2364_v29  ;;  %v2363_v27 = vsub.f32 %v2351_v7, %v2361_v55  ;;  %v2384_v20 = vsel %vm390_vm3, %v2379_v24, 0 }
0x15c5   :  { %6291 = vmatpush3.bf16.msra.mxu1 %v2384_v20 }
0x15c6   :  { %v2366_v25 = vmul.f32 1.442695, %v2363_v27  ;;  %6302 = vmatprep.subr.bf16.mxu1 %v6961_v14 }
0x15c7   :  { %v2427_v19 = vpop.permute.xlu1 %2426 }
0x15c8   :  { %6838 = vpow2.f32 %v2366_v25  ;;  %v2432_v26 = vsel %vm390_vm3, %v2427_v19, 0 }
0x15c9   :  { %6297 = vmatpush3.bf16.msra.mxu0 %v2432_v26 }
0x15ca   :  { %6310 = vmatprep.subr.bf16.mxu0 %v6961_v14 }
0x15ce   :  { %v6837_v45 = vpop.eup %6836 }
0x15cf   :  { %v2368_v28 = vsel %vm269_vm2, %v6837_v45, 0.0  ;;  %v2376_v42 = vpack.c.bf16 %v6837_v45, %v6837_v45 }
0x15d0   :  { %2369 = vadd.xlane.f32.xlu0 %v2368_v28 }
0x15d1   :  { %6293 = vmatmul.mubr.msk.bf16.vlgmr.msra.gmra.mrb[80].mxu1 %vm269_vm2, %v2376_v42 }
0x15d2   :  { %v6839_v31 = vpop.eup %6838  ;;  %6306 = vmatprep.mubr.msk.bf16.mxu1 %vm6962_vm1, %v6961_v14  ;;  %6303 = vmatpush3.bf16.msra.mxu1 %v6732_v51 }
0x15d3   :  { %v2371_v2 = vsel %vm269_vm2, %v6839_v31, 0.0  ;;  %v2377_v4 = vpack.c.bf16 %v6839_v31, %v6839_v31  ;;  %6304 = vmatprep.subr.bf16.mxu1 %v6961_v14 }
0x15d4   :  { %2372 = vadd.xlane.f32.xlu1 %v2371_v2  ;;  %1707 = vadd.xlane.f32.xlu0 %v1706_v32 }
0x15d5   :  { %6299 = vmatmul.mubr.msk.bf16.vlgmr.msra.gmra.mrb[64].mxu0 %vm269_vm2, %v2377_v4 }
0x15d6   :  { %6314 = vmatprep.mubr.msk.bf16.mxu0 %vm6962_vm1, %v6961_v14 }
0x15d8   :  { %1710 = vadd.xlane.f32.xlu1 %v1709_v35 }
0x15f4   :  { %v1930_v36 = vpop.xlane.xlu0 %1929 }
0x15f5   :  { %6840 = vrcp.f32 %v1930_v36 }
0x15f8   :  { %v1933_v38 = vpop.xlane.xlu1 %1932  ;;  %v2150_v40 = vpop.xlane.xlu0 %2149 }
0x15f9   :  { %6842 = vrcp.f32 %v1933_v38 }
0x15fa   :  { %6844 = vrcp.f32 %v2150_v40 }
0x15fc   :  { %v2153_v41 = vpop.xlane.xlu0 %2152 }
0x15fd   :  { %6846 = vrcp.f32 %v2153_v41 }
0x15ff   :  { %v6841_v63 = vpop.eup %6840 }
0x1600   :  { %v2034_v46 = vmul.f32 %v6841_v63, %v7629_v3 }
0x1603   :  { %v6843_v43 = vpop.eup %6842 }
0x1604   :  { %v2035_v37 = vmul.f32 %v6843_v43, %v7631_v9  ;;  %v6845_v34 = vpop.eup %6844 }
0x1605   :  { %v2254_v8 = vmul.f32 %v6845_v34, %v7661_v53  ;;  %v6733_v53 = vld [vmem:[%s8484_s17 + $0x8] sm:$0xff]   ;;  %s8586_s17 = smov 56  }
0x1606   :  { %v6668_v47 = vpack.i.bf16 %v2035_v37, %v2034_v46  ;;  %6305 = vmatpush3.bf16.msra.mxu1 %v6733_v53 }
0x1607   :  { %v6847_v18 = vpop.eup %6846  ;;  %6318 = vmatprep.subr.bf16.mxu1 %v6961_v14 }
0x1608   :  { %6669 = vrot.lane.b32.xlu0 %v6668_v47, %s8579_s25  ;;  %v2255_v50 = vmul.f32 %v6847_v18, %v7663_v56  ;;  %v6734_v18 = vld [vmem:[%s8485_s20] sm:$0xff]  }
0x1609   :  { %6311 = vmatpush3.bf16.msra.mxu0 %v6734_v18 }
0x160a   :  { %v6673_v0 = vpack.i.bf16 %v2255_v50, %v2254_v8  ;;  %v6735_v8 = vld [vmem:[%s8485_s20 + $0x8] sm:$0xff]   ;;  %6312 = vmatprep.subr.bf16.mxu0 %v6961_v14 }
0x160c   :  { %6674 = vrot.lane.b32.xlu1 %v6673_v0, %s8580_s23 }
0x160d   :  { %6313 = vmatpush3.bf16.msra.mxu0 %v6735_v8 }
0x160e   :  { %6338 = vmatprep.subr.bf16.mxu0 %v6961_v14 }
0x165d   :  { %v2370_v3 = vpop.xlane.xlu0 %2369 }
0x165e   :  { %6848 = vrcp.f32 %v2370_v3 }
0x1661   :  { %v2373_v9 = vpop.xlane.xlu1 %2372  ;;  %v1708_v10 = vpop.xlane.xlu0 %1707 }
0x1662   :  { %6850 = vrcp.f32 %v2373_v9 }
0x1663   :  { %6852 = vrcp.f32 %v1708_v10  ;;  %v6738_v10 = vld [vmem:[%s8488_s21 + $0x10] sm:$0xff]  }
0x1665   :  { %v1711_v11 = vpop.xlane.xlu1 %1710 }
0x1666   :  { %6854 = vrcp.f32 %v1711_v11  ;;  %v6739_v11 = vld [vmem:[%s8488_s21 + $0x18] sm:$0xff]  }
0x1668   :  { %v6849_v58 = vpop.eup %6848 }
0x166c   :  { %v6851_v59 = vpop.eup %6850 }
0x166d   :  { %v6853_v13 = vpop.eup %6852 }
0x166e   :  { %v1812_v29 = vmul.f32 %v6853_v13, %v7581_v21  ;;  %v6741_v13 = vld [vmem:[%s8488_s21 + $0x28] sm:$0xff]  }
0x1670   :  { %v6855_v49 = vpop.eup %6854 }
0x1671   :  { %v1813_v55 = vmul.f32 %v6855_v49, %v7583_v57  ;;  %v6743_v49 = vld [vmem:[%s8488_s21 + $0x38] sm:$0xff]  }
0x167a   :  { %v6670_v12 = vpop.permute.xlu0 %6669 }
0x167b   :  { %v6672_v16 = vunpack.i.h.bf16 %v6670_v12  ;;  %v6671_v17 = vunpack.i.l.bf16 %v6670_v12  ;;  %v6740_v12 = vld [vmem:[%s8488_s21 + $0x20] sm:$0xff]  }
0x167d   :  { %v2501_v27 = vsel %vm269_vm2, %v1813_v55, %v6672_v16  ;;  %v2500_v20 = vsel %vm269_vm2, %v1812_v29, %v6671_v17 }
0x167e   :  { %v6675_v30 = vpop.permute.xlu1 %6674 }
0x167f   :  { %v6677_v22 = vunpack.i.h.bf16 %v6675_v30  ;;  %v6676_v23 = vunpack.i.l.bf16 %v6675_v30  ;;  %v6742_v30 = vld [vmem:[%s8488_s21 + $0x30] sm:$0xff]  }
0x1681   :  { %v2502_v26 = vsel %vm1173_vm4, %v2500_v20, %v6676_v23  ;;  %v2503_v45 = vsel %vm1173_vm4, %v2501_v27, %v6677_v22 }
0x16a4   :  { %v2420_v1 = vpop.f32.mrb[80].mxu1 }
0x16a5   :  { %v6294_v56 = vpop.f32.mrb[81].mxu1  ;;  %v2474_v61 = vmul.f32 %v6849_v58, %v2420_v1 }
0x16a6   :  { %v2423_v15 = vpop.f32.mrb[82].mxu1 }
0x16a7   :  { %v6295_v44 = vpop.f32.mrb[83].mxu1  ;;  %v5678_v15 = vld [vmem:[%s8486_s18] ss:$0 sm:$0xff] }
0x16a8   :  { %v2468_v60 = vpop.f32.mrb[64].mxu0 }
0x16a9   :  { %v2475_v48 = vmul.f32 %v6851_v59, %v2468_v60  ;;  %v6300_v62 = vpop.f32.mrb[65].mxu0  ;;  %v5679_v60 = vld [vmem:[%s8487_s19] ss:$0 sm:$0xff]  ;;  %s8595_s19 = sld [smem:[#allocation21_spill]] }
0x16aa   :  { %v2471_v5 = vpop.f32.mrb[66].mxu0 }
0x16ab   :  { %v6678_v6 = vpack.i.bf16 %v2475_v48, %v2474_v61  ;;  %v6301_v7 = vpop.f32.mrb[67].mxu0 }
0x16ac   :  { %v6737_v7 = vld [vmem:[%s8488_s21 + $0x8] sm:$0xff]  }
0x16ad   :  { %6679 = vrot.lane.b32.xlu1 %v6678_v6, %s8581_s22  ;;  %v6736_v6 = vld [vmem:[%s8488_s21] sm:$0xff]  }
0x171f   :  { %v6680_v24 = vpop.permute.xlu1 %6679 }
0x1720   :  { %v6682_v25 = vunpack.i.h.bf16 %v6680_v24  ;;  %v6681_v19 = vunpack.i.l.bf16 %v6680_v24 }
0x1722   :  { %v2505_v28 = vsel %vm1176_vm5, %v2503_v45, %v6682_v25  ;;  %v2504_v42 = vsel %vm1176_vm5, %v2502_v26, %v6681_v19 }
0x1723   :  { %v2506_v31 = vpack.c.bf16 %v2505_v28, %v2504_v42 }
0x1725   :  { %6307 = vmatmul.mubr.msk.bf16.vlgmr.msra.gmra.mrb[84].mxu1 %vm93_vm0, %v2506_v31 }
0x1726   :  { %6334 = vmatprep.mubr.msk.bf16.mxu1 %vm6962_vm1, %v6961_v14  ;;  %6319 = vmatpush3.bf16.msra.mxu1 %v6736_v6  ;;  %v5694_v6 = vld [vmem:[%s8565_s2 + $0x1] ss:$0 sm:$0xff] }
0x1727   :  { %6320 = vmatprep.subr.bf16.mxu1 %v6961_v14 }
0x172a   :  { %6321 = vmatpush3.bf16.msra.mxu1 %v6737_v7 }
0x172b   :  { %6322 = vmatprep.subr.bf16.mxu1 %v6961_v14 }
0x172e   :  { %6323 = vmatpush3.bf16.msra.mxu1 %v6738_v10 }
0x172f   :  { %6324 = vmatprep.subr.bf16.mxu1 %v6961_v14 }
0x1732   :  { %6325 = vmatpush3.bf16.msra.mxu1 %v6739_v11 }
0x1733   :  { %6326 = vmatprep.subr.bf16.mxu1 %v6961_v14 }
0x1736   :  { %6327 = vmatpush3.bf16.msra.mxu1 %v6740_v12 }
0x1737   :  { %6328 = vmatprep.subr.bf16.mxu1 %v6961_v14 }
0x173a   :  { %6329 = vmatpush3.bf16.msra.mxu1 %v6741_v13 }
0x173b   :  { %6330 = vmatprep.subr.bf16.mxu1 %v6961_v14 }
0x173e   :  { %6331 = vmatpush3.bf16.msra.mxu1 %v6742_v30  ;;  %v6746_v30 = vld [vmem:[%s8566_s30 + $0x10] sm:$0xff]  }
0x173f   :  { %6332 = vmatprep.subr.bf16.mxu1 %v6961_v14 }
0x1742   :  { %6333 = vmatpush3.bf16.msra.mxu1 %v6743_v49 }
0x1743   :  { %6366 = vmatprep.subr.bf16.mxu1 %v6961_v14 }
0x17f8   :  { %v2560_v21 = vpop.f32.mrb[84].mxu1 }
0x17f9   :  { %v7722_v57 = vadd.f32 %v2560_v21, %v7465_v54  ;;  %v6308_v2 = vpop.f32.mrb[85].mxu1 }
0x17fa   :  { %v2563_v32 = vpop.f32.mrb[86].mxu1 }
0x17fb   :  { %v7725_v4 = vadd.f32 %v2563_v32, %v7468_v52  ;;  %v6309_v35 = vpop.f32.mrb[87].mxu1  ;;  %v2571_v36 = vsel %vm93_vm0, %v7722_v57, 0.0 }
0x17fc   :  { %2572 = vadd.xlane.f32.xlu1 %v2571_v36 }
0x17fd   :  { %v2574_v38 = vsel %vm93_vm0, %v7725_v4, 0.0 }
0x17fe   :  { %2575 = vadd.xlane.f32.xlu0 %v2574_v38 }
0x1889   :  { %v2573_v40 = vpop.xlane.xlu1 %2572 }
0x188a   :  { %v2577_v41 = vmul.f32 0.03125, %v2573_v40 }
0x188b   :  { %v2576_v63 = vpop.xlane.xlu0 %2575 }
0x188c   :  { %v2579_v54 = vsub.f32 %v7722_v57, %v2577_v41  ;;  %v2578_v43 = vmul.f32 0.03125, %v2576_v63 }
0x188e   :  { %v2580_v46 = vsub.f32 %v7725_v4, %v2578_v43  ;;  %v2581_v37 = vmul.f32 %v2579_v54, %v2579_v54 }
0x1890   :  { %v2583_v52 = vsel %vm93_vm0, %v2581_v37, 0.0  ;;  %v2582_v34 = vmul.f32 %v2580_v46, %v2580_v46 }
0x1891   :  { %2584 = vadd.xlane.f32.xlu0 %v2583_v52 }
0x1892   :  { %v2586_v47 = vsel %vm93_vm0, %v2582_v34, 0.0 }
0x1895   :  { %2587 = vadd.xlane.f32.xlu0 %v2586_v47 }
0x191e   :  { %v2585_v50 = vpop.xlane.xlu0 %2584 }
0x191f   :  { %v2589_v0 = vmul.f32 0.03125, %v2585_v50 }
0x1921   :  { %v2591_v51 = vadd.f32 1e-05, %v2589_v0 }
0x1922   :  { %v2588_v3 = vpop.xlane.xlu0 %2587 }
0x1923   :  { %6856 = vrsqrt.f32 %v2591_v51  ;;  %v2590_v9 = vmul.f32 0.03125, %v2588_v3 }
0x1925   :  { %v2592_v53 = vadd.f32 1e-05, %v2590_v9 }
0x1927   :  { %6858 = vrsqrt.f32 %v2592_v53  ;;  %v6744_v53 = vld [vmem:[%s8563_s26 + $0x10] sm:$0xff]  }
0x192d   :  { %v6857_v1 = vpop.eup %6856 }
0x192e   :  { %v2595_v56 = vmul.f32 %v6857_v1, %v2579_v54  ;;  %v6745_v1 = vld [vmem:[%s8563_s26 + $0x18] sm:$0xff]   ;;  %s8583_s26 = sld [smem:[#allocation13_spill]] }
0x1930   :  { %v2603_v44 = vmul.f32 %v5678_v15, %v2595_v56 }
0x1931   :  { %v6859_v58 = vpop.eup %6858 }
0x1932   :  { %v2596_v59 = vmul.f32 %v6859_v58, %v2580_v46  ;;  %v2611_v48 = vadd.f32 %v5679_v60, %v2603_v44 }
0x1934   :  { %v2604_v61 = vmul.f32 %v5678_v15, %v2596_v59 }
0x1936   :  { %v2612_v62 = vadd.f32 %v5679_v60, %v2604_v61 }
0x1938   :  { %v2613_v5 = vpack.c.bf16 %v2612_v62, %v2611_v48  ;;  %v5693_v48 = vld [vmem:[%s8564_s12 + $0x1] ss:$0 sm:$0xff]  ;;  %s8585_s12 = smov 64  }
0x193a   :  { %6315 = vmatmul.mubr.msk.bf16.vlgmr.msra.gmra.mrb[68].mxu0 %vm93_vm0, %v2613_v5 }
0x193b   :  { %6342 = vmatprep.mubr.msk.bf16.mxu0 %vm6962_vm1, %v6961_v14  ;;  %6339 = vmatpush3.bf16.msra.mxu0 %v6744_v53 }
0x193c   :  { %6340 = vmatprep.subr.bf16.mxu0 %v6961_v14 }
0x193f   :  { %6341 = vmatpush3.bf16.msra.mxu0 %v6745_v1 }
0x1940   :  { %6346 = vmatprep.subr.bf16.mxu0 %v6961_v14 }
0x1a0d   :  { %v2667_v16 = vpop.f32.mrb[68].mxu0 }
0x1a0e   :  { %v2674_v17 = vmul.f32 %v2667_v16, %v2667_v16  ;;  %v6316_v22 = vpop.f32.mrb[69].mxu0 }
0x1a0f   :  { %v2670_v23 = vpop.f32.mrb[70].mxu0 }
0x1a10   :  { %v2676_v29 = vmul.f32 %v2674_v17, %v2667_v16  ;;  %v2675_v55 = vmul.f32 %v2670_v23, %v2670_v23  ;;  %v6317_v24 = vpop.f32.mrb[71].mxu0  ;;  %v6956_v17 = vld [vmem:[%s8567_s27] sm:$0xff]  }
0x1a12   :  { %v2678_v27 = vmul.f32 0.044715, %v2676_v29  ;;  %v2677_v20 = vmul.f32 %v2675_v55, %v2670_v23 }
0x1a14   :  { %v2680_v25 = vadd.f32 %v2678_v27, %v2667_v16  ;;  %v2679_v19 = vmul.f32 0.044715, %v2677_v20 }
0x1a16   :  { %v2682_v26 = vmul.f32 0.7978846, %v2680_v25  ;;  %v2681_v45 = vadd.f32 %v2679_v19, %v2670_v23 }
0x1a18   :  { %6860 = vtanh.f32 %v2682_v26  ;;  %v2683_v28 = vmul.f32 0.7978846, %v2681_v45 }
0x1a1a   :  { %6862 = vtanh.f32 %v2683_v28 }
0x1a22   :  { %v6861_v42 = vpop.eup %6860 }
0x1a23   :  { %v2686_v31 = vadd.f32 1.0, %v6861_v42 }
0x1a24   :  { %v6863_v21 = vpop.eup %6862 }
0x1a25   :  { %v2688_v2 = vmul.f32 0.5, %v2686_v31  ;;  %v2687_v32 = vadd.f32 1.0, %v6863_v21 }
0x1a27   :  { %v2689_v35 = vmul.f32 0.5, %v2687_v32  ;;  %v2690_v36 = vmul.f32 %v2688_v2, %v2667_v16  ;;  %v6747_v16 = vld [vmem:[%s8566_s30 + $0x18] sm:$0xff]  }
0x1a29   :  { %v2691_v38 = vmul.f32 %v2689_v35, %v2670_v23 }
0x1a2b   :  { %v2692_v40 = vpack.c.bf16 %v2691_v38, %v2690_v36  ;;  %v7860_v38 = vld [vmem:[%s8568_s29] sm:$0xff] }
0x1a2d   :  { %6335 = vmatmul.mubr.bf16.vlgmr.msra.gmra.mrb[88].mxu1 %v2692_v40 }
0x1a2e   :  { %6368 = vmatprep.mubr.msk.bf16.mxu1 %vm6962_vm1, %v6961_v14 }
0x1b00   :  { %v2791_v41 = vpop.f32.mrb[88].mxu1 }
0x1b01   :  { %v7787_v63 = vadd.f32 %v2791_v41, %v7722_v57  ;;  %v6336_v54 = vpop.f32.mrb[89].mxu1 }
0x1b02   :  { %v2794_v43 = vpop.f32.mrb[90].mxu1 }
0x1b03   :  { %v7790_v46 = vadd.f32 %v2794_v43, %v7725_v4  ;;  %v6337_v37 = vpop.f32.mrb[91].mxu1  ;;  %v2804_v52 = vsel %vm93_vm0, %v7787_v63, 0.0 }
0x1b04   :  { %2805 = vadd.xlane.f32.xlu1 %v2804_v52 }
0x1b05   :  { %v2807_v34 = vsel %vm93_vm0, %v7790_v46, 0.0 }
0x1b06   :  { %2808 = vadd.xlane.f32.xlu0 %v2807_v34  ;;  %v7867_v34 = vld [vmem:[%s8568_s29 + $0x8] sm:$0xff] }
0x1b91   :  { %v2806_v47 = vpop.xlane.xlu1 %2805 }
0x1b92   :  { %v2810_v18 = vmul.f32 0.03125, %v2806_v47 }
0x1b93   :  { %v2809_v8 = vpop.xlane.xlu0 %2808 }
0x1b94   :  { %v2812_v57 = vsub.f32 %v7787_v63, %v2810_v18  ;;  %v2811_v50 = vmul.f32 0.03125, %v2809_v8 }
0x1b96   :  { %v2813_v0 = vsub.f32 %v7790_v46, %v2811_v50  ;;  %v2814_v51 = vmul.f32 %v2812_v57, %v2812_v57 }
0x1b98   :  { %v2816_v4 = vsel %vm93_vm0, %v2814_v51, 0.0  ;;  %v2815_v3 = vmul.f32 %v2813_v0, %v2813_v0 }
0x1b99   :  { %2817 = vadd.xlane.f32.xlu1 %v2816_v4 }
0x1b9a   :  { %v2819_v9 = vsel %vm93_vm0, %v2815_v3, 0.0 }
0x1b9b   :  { %2820 = vadd.xlane.f32.xlu0 %v2819_v9 }
0x1c26   :  { %v2818_v56 = vpop.xlane.xlu1 %2817 }
0x1c27   :  { %v2822_v15 = vmul.f32 0.03125, %v2818_v56 }
0x1c28   :  { %v2821_v58 = vpop.xlane.xlu0 %2820 }
0x1c29   :  { %v2824_v44 = vadd.f32 1e-05, %v2822_v15  ;;  %v2823_v59 = vmul.f32 0.03125, %v2821_v58 }
0x1c2b   :  { %6864 = vrsqrt.f32 %v2824_v44  ;;  %v2825_v60 = vadd.f32 1e-05, %v2823_v59 }
0x1c2d   :  { %6866 = vrsqrt.f32 %v2825_v60 }
0x1c35   :  { %v6865_v61 = vpop.eup %6864 }
0x1c36   :  { %v2828_v62 = vmul.f32 %v6865_v61, %v2812_v57 }
0x1c37   :  { %v6867_v5 = vpop.eup %6866 }
0x1c38   :  { %v2836_v7 = vmul.f32 %v5693_v48, %v2828_v62  ;;  %v2829_v10 = vmul.f32 %v6867_v5, %v2813_v0 }
0x1c3a   :  { %v2837_v11 = vmul.f32 %v5693_v48, %v2829_v10  ;;  %v2844_v12 = vadd.f32 %v5694_v6, %v2836_v7 }
0x1c3c   :  { %v2845_v13 = vadd.f32 %v5694_v6, %v2837_v11 }
0x1c3e   :  { %v2846_v49 = vpack.c.bf16 %v2845_v13, %v2844_v12 }
0x1c40   :  { %6343 = vmatmul.mubr.msk.bf16.vlgmr.msra.gmra.mrb[72].mxu0 %vm93_vm0, %v2846_v49 }
0x1c41   :  { %6347 = vmatpush3.bf16.msra.mxu0 %v6746_v30  ;;  %6350 = vmatprep.mubr.msk.bf16.mxu0 %vm6962_vm1, %v6961_v14 }
0x1c42   :  { %6348 = vmatprep.subr.bf16.mxu0 %v6961_v14 }
0x1c45   :  { %6349 = vmatpush3.bf16.msra.mxu0 %v6747_v16 }
0x1c46   :  { %6354 = vmatprep.subr.bf16.mxu0 %v6961_v14 }
0x1c48   :  { %6351 = vmatmul.mubr.msk.bf16.vlgmr.msra.gmra.mrb[76].mxu0 %vm93_vm0, %v6956_v17 }
0x1c49   :  { %6356 = vmatprep.mubr.msk.bf16.mxu0 %vm6962_vm1, %v6961_v14 }
0x1d13   :  { %v2901_v22 = vpop.f32.mrb[72].mxu0 }
0x1d14   :  { %v6344_v23 = vpop.f32.mrb[73].mxu0  ;;  %v2908_v45 = vmul.f32 0.35355338, %v2901_v22 }
0x1d15   :  { %v2904_v29 = vpop.f32.mrb[74].mxu0 }
0x1d16   :  { %v6345_v55 = vpop.f32.mrb[75].mxu0  ;;  %v7840_v42 = vpack.c.bf16 %v2908_v45, %v2908_v45  ;;  %v2909_v21 = vmul.f32 0.35355338, %v2904_v29 }
0x1d18   :  { %v7849_v2 = vpack.c.bf16 %v2909_v21, %v2909_v21 }
0x1d1b   :  { %v2963_v24 = vpop.f32.mrb[76].mxu0 }
0x1d1c   :  { %v7831_v27 = vpack.c.bf16 %v2963_v24, %v2963_v24  ;;  %v6352_v20 = vpop.f32.mrb[77].mxu0 }
0x1d1d   :  { %v2966_v25 = vpop.f32.mrb[78].mxu0 }
0x1d1e   :  { %3087 = vrot.lane.b32.xlu1 %v7831_v27, %s8572_s9  ;;  %v6353_v19 = vpop.f32.mrb[79].mxu0  ;;  %v2976_v26 = vsel %vm269_vm2, %v7831_v27, 0  ;;  %v7838_v28 = vpack.c.bf16 %v2966_v25, %v2966_v25 }
0x1d1f   :  { %6355 = vmatpush3.bf16.xpose.msra.mxu0 %v2976_v26 }
0x1d20   :  { %6360 = vmatprep.subr.bf16.mxu0 %v6961_v14  ;;  %v3022_v31 = vsel %vm269_vm2, %v7838_v28, 0 }
0x1d26   :  { %6357 = vmatmul.mubr.msk.bf16.vlgmr.msra.gmra.mrb[80].mxu0 %vm269_vm2, %v7840_v42 }
0x1d27   :  { %6361 = vmatpush3.bf16.xpose.msra.mxu0 %v3022_v31  ;;  %6362 = vmatprep.mubr.msk.bf16.mxu0 %vm6962_vm1, %v6961_v14 }
0x1d28   :  { %6372 = vmatprep.subr.bf16.mxu0 %v6961_v14 }
0x1d2e   :  { %6363 = vmatmul.mubr.msk.bf16.vlgmr.msra.gmra.mrb[84].mxu0 %vm269_vm2, %v7849_v2 }
0x1d2f   :  { %6374 = vmatprep.mubr.msk.bf16.mxu0 %vm6962_vm1, %v6961_v14 }
0x1d90   :  { %v3088_v32 = vpop.permute.xlu1 %3087 }
0x1d91   :  { %v3093_v35 = vsel %vm390_vm3, %v3088_v32, 0 }
0x1d92   :  { %6367 = vmatpush3.bf16.msra.mxu1 %v3093_v35 }
0x1d93   :  { %6378 = vmatprep.subr.bf16.mxu1 %v6961_v14 }
0x1df9   :  { %v3012_v36 = vpop.f32.mrb[80].mxu0 }
0x1dfa   :  { %v3013_v40 = vadd.f32 %v7860_v38, %v3012_v36  ;;  %v6358_v41 = vpop.f32.mrb[81].mxu0 }
0x1dfb   :  { %v3015_v54 = vpop.f32.mrb[82].mxu0 }
0x1dfc   :  { %v6359_v43 = vpop.f32.mrb[83].mxu0  ;;  %v3064_v37 = vsel %vm269_vm2, %v3013_v40, -inf }
0x1dfd   :  { %3065 = vmax.xlane.f32.xlu1 %v3064_v37 }
0x1e01   :  { %v3058_v52 = vpop.f32.mrb[84].mxu0 }
0x1e02   :  { %v3059_v47 = vadd.f32 %v7867_v34, %v3058_v52  ;;  %v6364_v18 = vpop.f32.mrb[85].mxu0 }
0x1e03   :  { %v3061_v8 = vpop.f32.mrb[86].mxu0 }
0x1e04   :  { %v6365_v57 = vpop.f32.mrb[87].mxu0  ;;  %v3067_v50 = vsel %vm269_vm2, %v3059_v47, -inf }
0x1e05   :  { %3068 = vmax.xlane.f32.xlu0 %v3067_v50 }
0x1e0e   :  { %3189 = vrot.lane.b32.xlu1 %v7831_v27, %s8574_s0 }
0x1e12   :  { %3240 = vrot.lane.b32.xlu1 %v7838_v28, %s8574_s0 }
0x1e16   :  { %3187 = vrot.lane.b32.xlu1 %v7840_v42, %s8574_s0 }
0x1e1a   :  { %3358 = vrot.lane.b32.xlu1 %v7838_v28, %s8573_s4 }
0x1e1b   :  { %3136 = vrot.lane.b32.xlu0 %v7838_v28, %s8572_s9 }
0x1e1f   :  { %3238 = vrot.lane.b32.xlu0 %v7849_v2, %s8574_s0 }
0x1e23   :  { %3310 = vrot.lane.b32.xlu0 %v7831_v27, %s8573_s4 }
0x1e8a   :  { %v3066_v0 = vpop.xlane.xlu1 %3065 }
0x1e8b   :  { %v3070_v51 = vsub.f32 %v3013_v40, %v3066_v0 }
0x1e8d   :  { %v3072_v4 = vmul.f32 1.442695, %v3070_v51 }
0x1e8e   :  { %v3190_v56 = vpop.permute.xlu1 %3189 }
0x1e8f   :  { %6868 = vpow2.f32 %v3072_v4  ;;  %v3195_v60 = vsel %vm269_vm2, %v3190_v56, 0 }
0x1e92   :  { %v3069_v3 = vpop.xlane.xlu0 %3068  ;;  %v3241_v61 = vpop.permute.xlu1 %3240 }
0x1e93   :  { %v3071_v9 = vsub.f32 %v3059_v47, %v3069_v3  ;;  %v3246_v7 = vsel %vm269_vm2, %v3241_v61, 0 }
0x1e95   :  { %v3074_v53 = vmul.f32 1.442695, %v3071_v9 }
0x1e96   :  { %v3137_v1 = vpop.permute.xlu0 %3136  ;;  %v3188_v6 = vpop.permute.xlu1 %3187 }
0x1e97   :  { %6870 = vpow2.f32 %v3074_v53  ;;  %v3142_v15 = vsel %vm390_vm3, %v3137_v1, 0 }
0x1e98   :  { %6373 = vmatpush3.bf16.msra.mxu0 %v3142_v15 }
0x1e99   :  { %v7886_v58 = vpop.eup %6868  ;;  %6384 = vmatprep.subr.bf16.mxu0 %v6961_v14 }
0x1e9a   :  { %v3084_v44 = vpack.c.bf16 %v7886_v58, %v7886_v58  ;;  %v3239_v59 = vpop.permute.xlu0 %3238  ;;  %v3359_v11 = vpop.permute.xlu1 %3358 }
0x1e9b   :  { %v3364_v12 = vsel %vm390_vm3, %v3359_v11, 0 }
0x1e9c   :  { %6369 = vmatmul.mubr.msk.bf16.vlgmr.msra.gmra.mrb[92].mxu1 %vm269_vm2, %v3084_v44 }
0x1e9d   :  { %6379 = vmatpush3.bf16.xpose.msra.mxu1 %v3195_v60  ;;  %6380 = vmatprep.mubr.msk.bf16.mxu1 %vm6962_vm1, %v6961_v14 }
0x1e9e   :  { %6390 = vmatprep.subr.bf16.mxu1 %v6961_v14  ;;  %v3311_v62 = vpop.permute.xlu0 %3310 }
0x1e9f   :  { %v3316_v10 = vsel %vm390_vm3, %v3311_v62, 0 }
0x1ea1   :  { %v7896_v48 = vpop.eup %6870 }
0x1ea2   :  { %v3085_v5 = vpack.c.bf16 %v7896_v48, %v7896_v48 }
0x1ea4   :  { %6375 = vmatmul.mubr.msk.bf16.vlgmr.msra.gmra.mrb[88].mxu0 %vm269_vm2, %v3085_v5  ;;  %6381 = vmatmul.mubr.msk.bf16.vlgmr.msra.gmra.mrb[96].mxu1 %vm269_vm2, %v3188_v6 }
0x1ea5   :  { %6385 = vmatpush3.bf16.xpose.msra.mxu0 %v3246_v7  ;;  %6391 = vmatpush3.bf16.msra.mxu1 %v3316_v10 }
0x1ea6   :  { %6386 = vmatprep.mubr.msk.bf16.mxu0 %vm6962_vm1, %v6961_v14  ;;  %6396 = vmatprep.subr.bf16.mxu0 %v6961_v14 }
0x1ea7   :  { %6392 = vmatprep.mubr.msk.bf16.mxu1 %vm6962_vm1, %v6961_v14  ;;  %6402 = vmatprep.subr.bf16.mxu1 %v6961_v14 }
0x1eac   :  { %6387 = vmatmul.mubr.msk.bf16.vlgmr.msra.gmra.mrb[92].mxu0 %vm269_vm2, %v3239_v59 }
0x1ead   :  { %6397 = vmatpush3.bf16.msra.mxu0 %v3364_v12  ;;  %6398 = vmatprep.mubr.msk.bf16.mxu0 %vm6962_vm1, %v6961_v14 }
0x1eae   :  { %6408 = vmatprep.subr.bf16.mxu0 %v6961_v14 }
0x1f6f   :  { %v7915_v13 = vpop.f32.mrb[92].mxu1 }
0x1f70   :  { %v6370_v30 = vpop.f32.mrb[93].mxu1 }
0x1f71   :  { %v3132_v49 = vpop.f32.mrb[94].mxu1 }
0x1f72   :  { %v6371_v16 = vpop.f32.mrb[95].mxu1 }
0x1f77   :  { %v7917_v17 = vpop.f32.mrb[88].mxu0  ;;  %v3231_v22 = vpop.f32.mrb[96].mxu1 }
0x1f78   :  { %v3232_v23 = vadd.f32 %v7860_v38, %v3231_v22  ;;  %v6376_v29 = vpop.f32.mrb[89].mxu0  ;;  %v6382_v55 = vpop.f32.mrb[97].mxu1 }
0x1f79   :  { %v3181_v24 = vpop.f32.mrb[90].mxu0  ;;  %v3234_v20 = vpop.f32.mrb[98].mxu1 }
0x1f7a   :  { %v6377_v25 = vpop.f32.mrb[91].mxu0  ;;  %v6383_v19 = vpop.f32.mrb[99].mxu1  ;;  %v3288_v26 = vsel %vm269_vm2, %v3232_v23, -inf }
0x1f7b   :  { %3289 = vmax.xlane.f32.xlu1 %v3288_v26 }
0x1f7f   :  { %v3282_v45 = vpop.f32.mrb[92].mxu0 }
0x1f80   :  { %v3283_v31 = vadd.f32 %v7867_v34, %v3282_v45  ;;  %v6388_v21 = vpop.f32.mrb[93].mxu0 }
0x1f81   :  { %v3285_v32 = vpop.f32.mrb[94].mxu0 }
0x1f82   :  { %v6389_v35 = vpop.f32.mrb[95].mxu0  ;;  %v3291_v36 = vsel %vm269_vm2, %v3283_v31, -inf }
0x1f83   :  { %3292 = vmax.xlane.f32.xlu0 %v3291_v36 }
0x1f8c   :  { %3410 = vrot.lane.b32.xlu1 %v7831_v27, %s8576_s5 }
0x1f90   :  { %3408 = vrot.lane.b32.xlu1 %v7840_v42, %s8576_s5 }
0x1f94   :  { %3578 = vrot.lane.b32.xlu1 %v7838_v28, %s8575_s7 }
0x1f99   :  { %3460 = vrot.lane.b32.xlu0 %v7838_v28, %s8576_s5 }
0x1f9d   :  { %3458 = vrot.lane.b32.xlu0 %v7849_v2, %s8576_s5 }
0x1fa1   :  { %3530 = vrot.lane.b32.xlu0 %v7831_v27, %s8575_s7 }
0x2008   :  { %v3290_v40 = vpop.xlane.xlu1 %3289 }
0x2009   :  { %v3294_v41 = vsub.f32 %v3232_v23, %v3290_v40 }
0x200b   :  { %v3296_v54 = vmul.f32 1.442695, %v3294_v41 }
0x200c   :  { %v3411_v8 = vpop.permute.xlu1 %3410 }
0x200d   :  { %6872 = vpow2.f32 %v3296_v54  ;;  %v3416_v0 = vsel %vm269_vm2, %v3411_v8, 0 }
0x2010   :  { %v3293_v43 = vpop.xlane.xlu0 %3292  ;;  %v3409_v9 = vpop.permute.xlu1 %3408 }
0x2011   :  { %v3295_v37 = vsub.f32 %v3283_v31, %v3293_v43 }
0x2013   :  { %v3298_v52 = vmul.f32 1.442695, %v3295_v37 }
0x2014   :  { %v3461_v47 = vpop.permute.xlu0 %3460  ;;  %v3579_v56 = vpop.permute.xlu1 %3578 }
0x2015   :  { %6874 = vpow2.f32 %v3298_v52  ;;  %v3466_v53 = vsel %vm269_vm2, %v3461_v47, 0  ;;  %v3584_v15 = vsel %vm390_vm3, %v3579_v56, 0 }
0x2017   :  { %v7935_v18 = vpop.eup %6872 }
0x2018   :  { %v3308_v57 = vpack.c.bf16 %v7935_v18, %v7935_v18  ;;  %v3459_v50 = vpop.permute.xlu0 %3458 }
0x201a   :  { %6393 = vmatmul.mubr.msk.bf16.vlgmr.msra.gmra.mrb[100].mxu1 %vm269_vm2, %v3308_v57 }
0x201b   :  { %6403 = vmatpush3.bf16.xpose.msra.mxu1 %v3416_v0  ;;  %6404 = vmatprep.mubr.msk.bf16.mxu1 %vm6962_vm1, %v6961_v14 }
0x201c   :  { %6414 = vmatprep.subr.bf16.mxu1 %v6961_v14  ;;  %v3531_v4 = vpop.permute.xlu0 %3530 }
0x201d   :  { %v3536_v1 = vsel %vm390_vm3, %v3531_v4, 0 }
0x201f   :  { %v7944_v51 = vpop.eup %6874 }
0x2020   :  { %v3309_v3 = vpack.c.bf16 %v7944_v51, %v7944_v51 }
0x2022   :  { %6399 = vmatmul.mubr.msk.bf16.vlgmr.msra.gmra.mrb[96].mxu0 %vm269_vm2, %v3309_v3  ;;  %6405 = vmatmul.mubr.msk.bf16.vlgmr.msra.gmra.mrb[104].mxu1 %vm269_vm2, %v3409_v9 }
0x2023   :  { %6409 = vmatpush3.bf16.xpose.msra.mxu0 %v3466_v53  ;;  %6415 = vmatpush3.bf16.msra.mxu1 %v3536_v1 }
0x2024   :  { %6410 = vmatprep.mubr.msk.bf16.mxu0 %vm6962_vm1, %v6961_v14  ;;  %6420 = vmatprep.subr.bf16.mxu0 %v6961_v14 }
0x2025   :  { %6416 = vmatprep.mubr.msk.bf16.mxu1 %vm6962_vm1, %v6961_v14  ;;  %6426 = vmatprep.subr.bf16.mxu1 %v6961_v14 }
0x202a   :  { %6411 = vmatmul.mubr.msk.bf16.vlgmr.msra.gmra.mrb[100].mxu0 %vm269_vm2, %v3459_v50 }
0x202b   :  { %6421 = vmatpush3.bf16.msra.mxu0 %v3584_v15  ;;  %6422 = vmatprep.mubr.msk.bf16.mxu0 %vm6962_vm1, %v6961_v14 }
0x202c   :  { %6432 = vmatprep.subr.bf16.mxu0 %v6961_v14 }
0x20ed   :  { %v7963_v44 = vpop.f32.mrb[100].mxu1 }
0x20ee   :  { %v6394_v59 = vpop.f32.mrb[101].mxu1 }
0x20ef   :  { %v3355_v60 = vpop.f32.mrb[102].mxu1 }
0x20f0   :  { %v6395_v61 = vpop.f32.mrb[103].mxu1 }
0x20f5   :  { %v7965_v62 = vpop.f32.mrb[96].mxu0  ;;  %v3452_v5 = vpop.f32.mrb[104].mxu1 }
0x20f6   :  { %v3453_v6 = vadd.f32 %v7860_v38, %v3452_v5  ;;  %v6400_v7 = vpop.f32.mrb[97].mxu0  ;;  %v6406_v10 = vpop.f32.mrb[105].mxu1 }
0x20f7   :  { %v3403_v11 = vpop.f32.mrb[98].mxu0  ;;  %v3455_v12 = vpop.f32.mrb[106].mxu1 }
0x20f8   :  { %v6401_v30 = vpop.f32.mrb[99].mxu0  ;;  %v6407_v49 = vpop.f32.mrb[107].mxu1  ;;  %v3508_v16 = vsel %vm269_vm2, %v3453_v6, -inf  ;;  %v3303_v11 = vsel %vm269_vm2, %v7944_v51, 0.0 }
0x20f9   :  { %3509 = vmax.xlane.f32.xlu1 %v3508_v16 }
0x20fd   :  { %v3502_v22 = vpop.f32.mrb[100].mxu0 }
0x20fe   :  { %v3503_v23 = vadd.f32 %v7867_v34, %v3502_v22  ;;  %v6412_v29 = vpop.f32.mrb[101].mxu0 }
0x20ff   :  { %v3505_v55 = vpop.f32.mrb[102].mxu0 }
0x2100   :  { %v6413_v24 = vpop.f32.mrb[103].mxu0  ;;  %v3511_v20 = vsel %vm269_vm2, %v3503_v23, -inf }
0x2101   :  { %3512 = vmax.xlane.f32.xlu0 %v3511_v20 }
0x210a   :  { %3630 = vrot.lane.b32.xlu1 %v7831_v27, %s8578_s28 }
0x210e   :  { %3628 = vrot.lane.b32.xlu1 %v7840_v42, %s8578_s28 }
0x2117   :  { %3680 = vrot.lane.b32.xlu0 %v7838_v28, %s8578_s28 }
0x211b   :  { %3678 = vrot.lane.b32.xlu0 %v7849_v2, %s8578_s28 }
0x2186   :  { %v3510_v25 = vpop.xlane.xlu1 %3509 }
0x2187   :  { %v3514_v19 = vsub.f32 %v3453_v6, %v3510_v25  ;;  %v3076_v25 = vsel %vm269_vm2, %v7886_v58, 0.0 }
0x2189   :  { %v3516_v26 = vmul.f32 1.442695, %v3514_v19 }
0x218a   :  { %v3631_v35 = vpop.permute.xlu1 %3630 }
0x218b   :  { %6876 = vpow2.f32 %v3516_v26  ;;  %v3636_v40 = vsel %vm269_vm2, %v3631_v35, 0 }
0x218e   :  { %v3513_v45 = vpop.xlane.xlu0 %3512  ;;  %v3629_v54 = vpop.permute.xlu1 %3628 }
0x218f   :  { %v3515_v31 = vsub.f32 %v3503_v23, %v3513_v45 }
0x2191   :  { %v3518_v21 = vmul.f32 1.442695, %v3515_v31  ;;  %v3079_v31 = vsel %vm269_vm2, %v7896_v48, 0.0 }
0x2192   :  { %v3681_v2 = vpop.permute.xlu0 %3680 }
0x2193   :  { %6878 = vpow2.f32 %v3518_v21  ;;  %v3686_v43 = vsel %vm269_vm2, %v3681_v2, 0 }
0x2195   :  { %v6877_v32 = vpop.eup %6876 }
0x2196   :  { %v3528_v36 = vpack.c.bf16 %v6877_v32, %v6877_v32  ;;  %v3679_v37 = vpop.permute.xlu0 %3678 }
0x2198   :  { %6417 = vmatmul.mubr.msk.bf16.vlgmr.msra.gmra.mrb[108].mxu1 %vm269_vm2, %v3528_v36 }
0x2199   :  { %6427 = vmatpush3.bf16.xpose.msra.mxu1 %v3636_v40  ;;  %6428 = vmatprep.mubr.msk.bf16.mxu1 %vm6962_vm1, %v6961_v14 }
0x219a   :  { %6438 = vmatprep.subr.bf16.mxu1 %v6961_v14 }
0x219d   :  { %v6879_v42 = vpop.eup %6878 }
0x219e   :  { %v3529_v41 = vpack.c.bf16 %v6879_v42, %v6879_v42  ;;  %v3523_v12 = vsel %vm269_vm2, %v6879_v42, 0.0 }
0x21a0   :  { %6423 = vmatmul.mubr.msk.bf16.vlgmr.msra.gmra.mrb[104].mxu0 %vm269_vm2, %v3529_v41  ;;  %6429 = vmatmul.mubr.msk.bf16.vlgmr.msra.gmra.mrb[112].mxu1 %vm269_vm2, %v3629_v54 }
0x21a1   :  { %6433 = vmatpush3.bf16.xpose.msra.mxu0 %v3686_v43  ;;  %6434 = vmatprep.mubr.msk.bf16.mxu0 %vm6962_vm1, %v6961_v14 }
0x21a2   :  { %6444 = vmatprep.subr.bf16.mxu0 %v6961_v14  ;;  %6440 = vmatprep.mubr.msk.bf16.mxu1 %vm6962_vm1, %v6961_v14 }
0x21a8   :  { %6435 = vmatmul.mubr.msk.bf16.vlgmr.msra.gmra.mrb[108].mxu0 %vm269_vm2, %v3679_v37 }
0x21a9   :  { %6446 = vmatprep.mubr.msk.bf16.mxu0 %vm6962_vm1, %v6961_v14 }
0x226b   :  { %v7995_v52 = vpop.f32.mrb[108].mxu1 }
0x226c   :  { %v6418_v47 = vpop.f32.mrb[109].mxu1 }
0x226d   :  { %v3575_v8 = vpop.f32.mrb[110].mxu1 }
0x226e   :  { %v6419_v57 = vpop.f32.mrb[111].mxu1  ;;  %v6748_v8 = vld [vmem:[%s8569_s3 + $0x10] sm:$0xff]  }
0x2273   :  { %v7997_v50 = vpop.f32.mrb[104].mxu0  ;;  %v3672_v0 = vpop.f32.mrb[112].mxu1 }
0x2274   :  { %v3673_v4 = vadd.f32 %v7860_v38, %v3672_v0  ;;  %v6424_v3 = vpop.f32.mrb[105].mxu0  ;;  %v6430_v9 = vpop.f32.mrb[113].mxu1  ;;  %v3300_v38 = vsel %vm269_vm2, %v7935_v18, 0.0 }
0x2275   :  { %v3623_v53 = vpop.f32.mrb[106].mxu0  ;;  %v3675_v1 = vpop.f32.mrb[114].mxu1 }
0x2276   :  { %v6425_v56 = vpop.f32.mrb[107].mxu0  ;;  %v6431_v15 = vpop.f32.mrb[115].mxu1  ;;  %v3728_v59 = vsel %vm269_vm2, %v3673_v4, -inf }
0x2277   :  { %3729 = vmax.xlane.f32.xlu1 %v3728_v59 }
0x227b   :  { %v3722_v60 = vpop.f32.mrb[108].mxu0 }
0x227c   :  { %v3723_v61 = vadd.f32 %v7867_v34, %v3722_v60  ;;  %v6436_v5 = vpop.f32.mrb[109].mxu0  ;;  %v3520_v34 = vsel %vm269_vm2, %v6877_v32, 0.0 }
0x227d   :  { %v3725_v6 = vpop.f32.mrb[110].mxu0 }
0x227e   :  { %v6437_v7 = vpop.f32.mrb[111].mxu0  ;;  %v3731_v10 = vsel %vm269_vm2, %v3723_v61, -inf }
0x227f   :  { %3732 = vmax.xlane.f32.xlu0 %v3731_v10 }
0x2288   :  { %3798 = vrot.lane.b32.xlu1 %v7838_v28, %s8577_s8 }
0x2295   :  { %3750 = vrot.lane.b32.xlu0 %v7831_v27, %s8577_s8 }
0x22ac   :  { %3301 = vadd.xlane.f32.xlu1 %v3300_v38 }
0x22b4   :  { %3304 = vadd.xlane.f32.xlu0 %v3303_v11 }
0x22b8   :  { %3521 = vadd.xlane.f32.xlu0 %v3520_v34 }
0x22bc   :  { %3524 = vadd.xlane.f32.xlu0 %v3523_v12 }
0x2304   :  { %v3730_v30 = vpop.xlane.xlu1 %3729 }
0x2305   :  { %v3734_v49 = vsub.f32 %v3673_v4, %v3730_v30 }
0x2307   :  { %v3736_v28 = vmul.f32 1.442695, %v3734_v49 }
0x2308   :  { %v3799_v16 = vpop.permute.xlu1 %3798 }
0x2309   :  { %6880 = vpow2.f32 %v3736_v28  ;;  %v3804_v27 = vsel %vm390_vm3, %v3799_v16, 0 }
0x230a   :  { %6445 = vmatpush3.bf16.msra.mxu0 %v3804_v27 }
0x230b   :  { %6458 = vmatprep.subr.bf16.mxu0 %v6961_v14 }
0x230c   :  { %v3733_v18 = vpop.xlane.xlu0 %3732 }
0x230d   :  { %v3735_v22 = vsub.f32 %v3723_v61, %v3733_v18 }
0x230f   :  { %v3738_v51 = vmul.f32 1.442695, %v3735_v22 }
0x2310   :  { %v3751_v23 = vpop.permute.xlu0 %3750 }
0x2311   :  { %6882 = vpow2.f32 %v3738_v51  ;;  %v3756_v29 = vsel %vm390_vm3, %v3751_v23, 0 }
0x2312   :  { %6439 = vmatpush3.bf16.msra.mxu1 %v3756_v29 }
0x2313   :  { %v6881_v55 = vpop.eup %6880  ;;  %6450 = vmatprep.subr.bf16.mxu1 %v6961_v14 }
0x2314   :  { %v3740_v24 = vsel %vm269_vm2, %v6881_v55, 0.0  ;;  %v3748_v20 = vpack.c.bf16 %v6881_v55, %v6881_v55 }
0x2315   :  { %3741 = vadd.xlane.f32.xlu1 %v3740_v24 }
0x2316   :  { %6441 = vmatmul.mubr.msk.bf16.vlgmr.msra.gmra.mrb[116].mxu1 %vm269_vm2, %v3748_v20 }
0x2317   :  { %6454 = vmatprep.mubr.msk.bf16.mxu1 %vm6962_vm1, %v6961_v14  ;;  %6451 = vmatpush3.bf16.msra.mxu1 %v6748_v8 }
0x2318   :  { %6452 = vmatprep.subr.bf16.mxu1 %v6961_v14 }
0x2319   :  { %3077 = vadd.xlane.f32.xlu1 %v3076_v25 }
0x231b   :  { %v6883_v19 = vpop.eup %6882 }
0x231c   :  { %v3743_v26 = vsel %vm269_vm2, %v6883_v19, 0.0  ;;  %v3749_v45 = vpack.c.bf16 %v6883_v19, %v6883_v19 }
0x231d   :  { %3744 = vadd.xlane.f32.xlu0 %v3743_v26 }
0x231e   :  { %6447 = vmatmul.mubr.msk.bf16.vlgmr.msra.gmra.mrb[112].mxu0 %vm269_vm2, %v3749_v45 }
0x231f   :  { %6462 = vmatprep.mubr.msk.bf16.mxu0 %vm6962_vm1, %v6961_v14 }
0x2321   :  { %3080 = vadd.xlane.f32.xlu0 %v3079_v31 }
0x2339   :  { %v3302_v21 = vpop.xlane.xlu1 %3301 }
0x233a   :  { %6884 = vrcp.f32 %v3302_v21 }
0x2341   :  { %v3305_v32 = vpop.xlane.xlu0 %3304 }
0x2342   :  { %6886 = vrcp.f32 %v3305_v32 }
0x2344   :  { %v6885_v36 = vpop.eup %6884 }
0x2345   :  { %v3522_v58 = vpop.xlane.xlu0 %3521  ;;  %v3406_v42 = vmul.f32 %v6885_v36, %v7963_v44 }
0x2346   :  { %6888 = vrcp.f32 %v3522_v58 }
0x2349   :  { %v3525_v35 = vpop.xlane.xlu0 %3524 }
0x234a   :  { %6890 = vrcp.f32 %v3525_v35 }
0x234c   :  { %v6887_v40 = vpop.eup %6886 }
0x234d   :  { %v3407_v2 = vmul.f32 %v6887_v40, %v7965_v62 }
0x234f   :  { %v6683_v41 = vpack.i.bf16 %v3407_v2, %v3406_v42 }
0x2350   :  { %v6889_v54 = vpop.eup %6888 }
0x2351   :  { %6684 = vrot.lane.b32.xlu1 %v6683_v41, %s8579_s25  ;;  %v3626_v43 = vmul.f32 %v6889_v54, %v7995_v52  ;;  %v6749_v52 = vld [vmem:[%s8569_s3 + $0x18] sm:$0xff]  }
0x2352   :  { %6453 = vmatpush3.bf16.msra.mxu1 %v6749_v52  ;;  %v5734_v52 = vld [vmem:[%s8477_s10 + $0x1] ss:$0 sm:$0xff]  ;;  %s8591_s10 = sld [smem:[#allocation17_spill]] }
0x2353   :  { %6466 = vmatprep.subr.bf16.mxu1 %v6961_v14 }
0x2354   :  { %v6891_v48 = vpop.eup %6890 }
0x2355   :  { %v3627_v37 = vmul.f32 %v6891_v48, %v7997_v50  ;;  %v6750_v48 = vld [vmem:[%s8571_s6 + $0x10] sm:$0xff]  }
0x2356   :  { %6459 = vmatpush3.bf16.msra.mxu0 %v6750_v48 }
0x2357   :  { %v6688_v47 = vpack.i.bf16 %v3627_v37, %v3626_v43  ;;  %v6751_v43 = vld [vmem:[%s8571_s6 + $0x18] sm:$0xff]   ;;  %6460 = vmatprep.subr.bf16.mxu0 %v6961_v14 }
0x2359   :  { %6689 = vrot.lane.b32.xlu0 %v6688_v47, %s8580_s23 }
0x235a   :  { %6461 = vmatpush3.bf16.msra.mxu0 %v6751_v43 }
0x235b   :  { %6486 = vmatprep.subr.bf16.mxu0 %v6961_v14 }
0x23a2   :  { %v3742_v44 = vpop.xlane.xlu1 %3741 }
0x23a3   :  { %6892 = vrcp.f32 %v3742_v44 }
0x23a6   :  { %v3078_v5 = vpop.xlane.xlu1 %3077 }
0x23aa   :  { %v3745_v62 = vpop.xlane.xlu0 %3744 }
0x23ab   :  { %6894 = vrcp.f32 %v3745_v62 }
0x23ac   :  { %6896 = vrcp.f32 %v3078_v5  ;;  %v6754_v5 = vld [vmem:[%s8479_s13 + $0x50] sm:$0xff]  }
0x23ad   :  { %v6893_v3 = vpop.eup %6892 }
0x23ae   :  { %v3081_v6 = vpop.xlane.xlu0 %3080 }
0x23af   :  { %6898 = vrcp.f32 %v3081_v6  ;;  %v6755_v6 = vld [vmem:[%s8479_s13 + $0x58] sm:$0xff]  }
0x23b5   :  { %v6895_v9 = vpop.eup %6894 }
0x23b6   :  { %v6897_v10 = vpop.eup %6896 }
0x23b7   :  { %v3184_v28 = vmul.f32 %v6897_v10, %v7915_v13  ;;  %v6757_v10 = vld [vmem:[%s8479_s13 + $0x68] sm:$0xff]  }
0x23b9   :  { %v6899_v11 = vpop.eup %6898 }
0x23ba   :  { %v3185_v16 = vmul.f32 %v6899_v11, %v7917_v17  ;;  %v6759_v11 = vld [vmem:[%s8479_s13 + $0x78] sm:$0xff]  }
0x23c3   :  { %v6685_v7 = vpop.permute.xlu1 %6684 }
0x23c4   :  { %v6687_v34 = vunpack.i.h.bf16 %v6685_v7  ;;  %v6686_v12 = vunpack.i.l.bf16 %v6685_v7  ;;  %v6756_v7 = vld [vmem:[%s8479_s13 + $0x60] sm:$0xff]  }
0x23c6   :  { %v3873_v18 = vsel %vm269_vm2, %v3185_v16, %v6687_v34  ;;  %v3872_v22 = vsel %vm269_vm2, %v3184_v28, %v6686_v12 }
0x23cb   :  { %v6690_v38 = vpop.permute.xlu0 %6689 }
0x23cc   :  { %v6692_v30 = vunpack.i.h.bf16 %v6690_v38  ;;  %v6691_v49 = vunpack.i.l.bf16 %v6690_v38  ;;  %v6758_v38 = vld [vmem:[%s8479_s13 + $0x70] sm:$0xff]  }
0x23ce   :  { %v3874_v29 = vsel %vm1173_vm4, %v3872_v22, %v6691_v49  ;;  %v3875_v55 = vsel %vm1173_vm4, %v3873_v18, %v6692_v30 }
0x23e9   :  { %v3792_v57 = vpop.f32.mrb[116].mxu1 }
0x23ea   :  { %v6442_v0 = vpop.f32.mrb[117].mxu1  ;;  %v3846_v1 = vmul.f32 %v6893_v3, %v3792_v57 }
0x23eb   :  { %v3795_v50 = vpop.f32.mrb[118].mxu1 }
0x23ec   :  { %v6443_v4 = vpop.f32.mrb[119].mxu1 }
0x23f1   :  { %v3840_v53 = vpop.f32.mrb[112].mxu0 }
0x23f2   :  { %v3847_v56 = vmul.f32 %v6895_v9, %v3840_v53  ;;  %v6448_v15 = vpop.f32.mrb[113].mxu0  ;;  %v5735_v53 = vld [vmem:[%s8478_s11 + $0x1] ss:$0 sm:$0xff]  ;;  %s8582_s11 = sld [smem:[#allocation12_spill]] }
0x23f3   :  { %v3843_v59 = vpop.f32.mrb[114].mxu0 }
0x23f4   :  { %v6693_v60 = vpack.i.bf16 %v3847_v56, %v3846_v1  ;;  %v6449_v61 = vpop.f32.mrb[115].mxu0 }
0x23f5   :  { %v6753_v61 = vld [vmem:[%s8479_s13 + $0x48] sm:$0xff]  }
0x23f6   :  { %6694 = vrot.lane.b32.xlu1 %v6693_v60, %s8581_s22  ;;  %v6752_v60 = vld [vmem:[%s8479_s13 + $0x40] sm:$0xff]   ;;  %s8594_s13 = sld [smem:[#allocation20_spill]] }
0x2468   :  { %v6695_v27 = vpop.permute.xlu1 %6694 }
0x2469   :  { %v6697_v51 = vunpack.i.h.bf16 %v6695_v27  ;;  %v6696_v23 = vunpack.i.l.bf16 %v6695_v27 }
0x246b   :  { %v3877_v24 = vsel %vm1176_vm5, %v3875_v55, %v6697_v51  ;;  %v3876_v20 = vsel %vm1176_vm5, %v3874_v29, %v6696_v23 }
0x246c   :  { %v3878_v25 = vpack.c.bf16 %v3877_v24, %v3876_v20 }
0x246e   :  { %6455 = vmatmul.mubr.msk.bf16.vlgmr.msra.gmra.mrb[120].mxu1 %vm93_vm0, %v3878_v25 }
0x246f   :  { %6482 = vmatprep.mubr.msk.bf16.mxu1 %vm6962_vm1, %v6961_v14  ;;  %6467 = vmatpush3.bf16.msra.mxu1 %v6752_v60  ;;  %v5770_v60 = vld [vmem:[%s8583_s26 + $0x1] ss:$0 sm:$0xff] }
0x2470   :  { %6468 = vmatprep.subr.bf16.mxu1 %v6961_v14 }
0x2473   :  { %6469 = vmatpush3.bf16.msra.mxu1 %v6753_v61 }
0x2474   :  { %6470 = vmatprep.subr.bf16.mxu1 %v6961_v14 }
0x2477   :  { %6471 = vmatpush3.bf16.msra.mxu1 %v6754_v5 }
0x2478   :  { %6472 = vmatprep.subr.bf16.mxu1 %v6961_v14 }
0x247b   :  { %6473 = vmatpush3.bf16.msra.mxu1 %v6755_v6 }
0x247c   :  { %6474 = vmatprep.subr.bf16.mxu1 %v6961_v14 }
0x247f   :  { %6475 = vmatpush3.bf16.msra.mxu1 %v6756_v7 }
0x2480   :  { %6476 = vmatprep.subr.bf16.mxu1 %v6961_v14 }
0x2483   :  { %6477 = vmatpush3.bf16.msra.mxu1 %v6757_v10 }
0x2484   :  { %6478 = vmatprep.subr.bf16.mxu1 %v6961_v14 }
0x2487   :  { %6479 = vmatpush3.bf16.msra.mxu1 %v6758_v38 }
0x2488   :  { %6480 = vmatprep.subr.bf16.mxu1 %v6961_v14 }
0x248b   :  { %6481 = vmatpush3.bf16.msra.mxu1 %v6759_v11 }
0x248c   :  { %6512 = vmatprep.subr.bf16.mxu1 %v6961_v14 }
0x2541   :  { %v3933_v13 = vpop.f32.mrb[120].mxu1 }
0x2542   :  { %v3940_v17 = vmul.f32 %v3933_v13, %v7393_v33  ;;  %v6456_v19 = vpop.f32.mrb[121].mxu1 }
0x2543   :  { %v3936_v26 = vpop.f32.mrb[122].mxu1 }
0x2544   :  { %v8057_v45 = vadd.f32 %v3940_v17, %v7787_v63  ;;  %v3941_v31 = vmul.f32 %v3936_v26, %v7395_v39  ;;  %v6457_v21 = vpop.f32.mrb[123].mxu1 }
0x2546   :  { %v8061_v32 = vadd.f32 %v3941_v31, %v7790_v46  ;;  %v3948_v58 = vsel %vm93_vm0, %v8057_v45, 0.0 }
0x2547   :  { %3949 = vadd.xlane.f32.xlu1 %v3948_v58 }
0x2548   :  { %v3951_v35 = vsel %vm93_vm0, %v8061_v32, 0.0 }
0x2549   :  { %3952 = vadd.xlane.f32.xlu0 %v3951_v35 }
0x25d4   :  { %v3950_v33 = vpop.xlane.xlu1 %3949 }
0x25d5   :  { %v3954_v36 = vmul.f32 0.03125, %v3950_v33 }
0x25d6   :  { %v3953_v40 = vpop.xlane.xlu0 %3952 }
0x25d7   :  { %v3956_v63 = vsub.f32 %v8057_v45, %v3954_v36  ;;  %v3955_v42 = vmul.f32 0.03125, %v3953_v40 }
0x25d9   :  { %v3957_v39 = vsub.f32 %v8061_v32, %v3955_v42  ;;  %v3958_v2 = vmul.f32 %v3956_v63, %v3956_v63 }
0x25db   :  { %v3960_v46 = vsel %vm93_vm0, %v3958_v2, 0.0  ;;  %v3959_v41 = vmul.f32 %v3957_v39, %v3957_v39 }
0x25dc   :  { %3961 = vadd.xlane.f32.xlu0 %v3960_v46 }
0x25dd   :  { %v3963_v54 = vsel %vm93_vm0, %v3959_v41, 0.0 }
0x25de   :  { %3964 = vadd.xlane.f32.xlu1 %v3963_v54 }
0x2669   :  { %v3962_v37 = vpop.xlane.xlu0 %3961 }
0x266a   :  { %v3966_v47 = vmul.f32 0.03125, %v3962_v37 }
0x266b   :  { %v3965_v8 = vpop.xlane.xlu1 %3964 }
0x266c   :  { %v3968_v44 = vadd.f32 1e-05, %v3966_v47  ;;  %v3967_v62 = vmul.f32 0.03125, %v3965_v8 }
0x266e   :  { %6900 = vrsqrt.f32 %v3968_v44  ;;  %v3969_v57 = vadd.f32 1e-05, %v3967_v62  ;;  %v6760_v44 = vld [vmem:[%s8480_s16 + $0x10] sm:$0xff]   ;;  %v6761_v62 = vld [vmem:[%s8480_s16 + $0x18] sm:$0xff]  }
0x2670   :  { %6902 = vrsqrt.f32 %v3969_v57 }
0x2678   :  { %v6901_v0 = vpop.eup %6900 }
0x2679   :  { %v3972_v50 = vmul.f32 %v6901_v0, %v3956_v63 }
0x267a   :  { %v6903_v4 = vpop.eup %6902 }
0x267b   :  { %v3980_v3 = vmul.f32 %v5734_v52, %v3972_v50  ;;  %v3973_v9 = vmul.f32 %v6903_v4, %v3957_v39 }
0x267d   :  { %v3981_v1 = vmul.f32 %v5734_v52, %v3973_v9  ;;  %v3988_v56 = vadd.f32 %v5735_v53, %v3980_v3 }
0x267f   :  { %v3989_v15 = vadd.f32 %v5735_v53, %v3981_v1  ;;  %v5769_v53 = vld [vmem:[%s8582_s11 + $0x1] ss:$0 sm:$0xff] }
0x2681   :  { %v3990_v59 = vpack.c.bf16 %v3989_v15, %v3988_v56 }
0x2683   :  { %6463 = vmatmul.mubr.msk.bf16.vlgmr.msra.gmra.mrb[116].mxu0 %vm93_vm0, %v3990_v59 }
0x2684   :  { %6490 = vmatprep.mubr.msk.bf16.mxu0 %vm6962_vm1, %v6961_v14  ;;  %6487 = vmatpush3.bf16.msra.mxu0 %v6760_v44 }
0x2685   :  { %6488 = vmatprep.subr.bf16.mxu0 %v6961_v14 }
0x2688   :  { %6489 = vmatpush3.bf16.msra.mxu0 %v6761_v62 }
0x2689   :  { %6494 = vmatprep.subr.bf16.mxu0 %v6961_v14 }
0x2756   :  { %v4045_v34 = vpop.f32.mrb[116].mxu0 }
0x2757   :  { %v4052_v12 = vmul.f32 %v4045_v34, %v4045_v34  ;;  %v6464_v30 = vpop.f32.mrb[117].mxu0 }
0x2758   :  { %v4048_v49 = vpop.f32.mrb[118].mxu0 }
0x2759   :  { %v4054_v28 = vmul.f32 %v4052_v12, %v4045_v34  ;;  %v4053_v16 = vmul.f32 %v4048_v49, %v4048_v49  ;;  %v6465_v27 = vpop.f32.mrb[119].mxu0 }
0x275b   :  { %v4056_v18 = vmul.f32 0.044715, %v4054_v28  ;;  %v4055_v22 = vmul.f32 %v4053_v16, %v4048_v49 }
0x275d   :  { %v4058_v51 = vadd.f32 %v4056_v18, %v4045_v34  ;;  %v4057_v23 = vmul.f32 0.044715, %v4055_v22 }
0x275f   :  { %v4060_v29 = vmul.f32 0.7978846, %v4058_v51  ;;  %v4059_v55 = vadd.f32 %v4057_v23, %v4048_v49 }
0x2761   :  { %6904 = vtanh.f32 %v4060_v29  ;;  %v4061_v24 = vmul.f32 0.7978846, %v4059_v55  ;;  %v8180_v55 = vld [vmem:[%s8584_s1] sm:$0xff] }
0x2763   :  { %6906 = vtanh.f32 %v4061_v24 }
0x276b   :  { %v6905_v20 = vpop.eup %6904 }
0x276c   :  { %v4064_v25 = vadd.f32 1.0, %v6905_v20 }
0x276d   :  { %v6907_v13 = vpop.eup %6906 }
0x276e   :  { %v4066_v17 = vmul.f32 0.5, %v4064_v25  ;;  %v4065_v19 = vadd.f32 1.0, %v6907_v13 }
0x2770   :  { %v4067_v26 = vmul.f32 0.5, %v4065_v19  ;;  %v4068_v31 = vmul.f32 %v4066_v17, %v4045_v34 }
0x2772   :  { %v4069_v21 = vmul.f32 %v4067_v26, %v4048_v49  ;;  %v8187_v26 = vld [vmem:[%s8584_s1 + $0x8] sm:$0xff] }
0x2774   :  { %v4070_v58 = vpack.c.bf16 %v4069_v21, %v4068_v31 }
0x2776   :  { %6483 = vmatmul.mubr.bf16.vlgmr.msra.gmra.mrb[124].mxu1 %v4070_v58 }
0x2777   :  { %6514 = vmatprep.mubr.msk.bf16.mxu1 %vm6962_vm1, %v6961_v14 }
0x2849   :  { %v4170_v35 = vpop.f32.mrb[124].mxu1 }
0x284a   :  { %v8123_v33 = vadd.f32 %v4170_v35, %v8057_v45  ;;  %v6484_v36 = vpop.f32.mrb[125].mxu1 }
0x284b   :  { %v4173_v40 = vpop.f32.mrb[126].mxu1 }
0x284c   :  { %v8126_v63 = vadd.f32 %v4173_v40, %v8061_v32  ;;  %v6485_v42 = vpop.f32.mrb[127].mxu1  ;;  %v4183_v39 = vsel %vm93_vm0, %v8123_v33, 0.0 }
0x284d   :  { %4184 = vadd.xlane.f32.xlu0 %v4183_v39 }
0x284e   :  { %v4186_v2 = vsel %vm93_vm0, %v8126_v63, 0.0 }
0x284f   :  { %4187 = vadd.xlane.f32.xlu1 %v4186_v2 }
0x28da   :  { %v4185_v46 = vpop.xlane.xlu0 %4184 }
0x28db   :  { %v4189_v41 = vmul.f32 0.03125, %v4185_v46 }
0x28dc   :  { %v4188_v54 = vpop.xlane.xlu1 %4187 }
0x28dd   :  { %v4191_v45 = vsub.f32 %v8123_v33, %v4189_v41  ;;  %v4190_v48 = vmul.f32 0.03125, %v4188_v54 }
0x28df   :  { %v4192_v43 = vsub.f32 %v8126_v63, %v4190_v48  ;;  %v4193_v37 = vmul.f32 %v4191_v45, %v4191_v45 }
0x28e1   :  { %v4195_v32 = vsel %vm93_vm0, %v4193_v37, 0.0  ;;  %v4194_v47 = vmul.f32 %v4192_v43, %v4192_v43 }
0x28e2   :  { %4196 = vadd.xlane.f32.xlu0 %v4195_v32 }
0x28e3   :  { %v4198_v8 = vsel %vm93_vm0, %v4194_v47, 0.0 }
0x28e4   :  { %4199 = vadd.xlane.f32.xlu1 %v4198_v8 }
0x296f   :  { %v4197_v57 = vpop.xlane.xlu0 %4196 }
0x2970   :  { %v4201_v0 = vmul.f32 0.03125, %v4197_v57 }
0x2971   :  { %v4200_v52 = vpop.xlane.xlu1 %4199 }
0x2972   :  { %v4203_v50 = vadd.f32 1e-05, %v4201_v0  ;;  %v4202_v4 = vmul.f32 0.03125, %v4200_v52 }
0x2974   :  { %6908 = vrsqrt.f32 %v4203_v50  ;;  %v4204_v3 = vadd.f32 1e-05, %v4202_v4 }
0x2976   :  { %6910 = vrsqrt.f32 %v4204_v3 }
0x297e   :  { %v6909_v9 = vpop.eup %6908 }
0x297f   :  { %v4207_v1 = vmul.f32 %v6909_v9, %v4191_v45 }
0x2980   :  { %v6911_v56 = vpop.eup %6910 }
0x2981   :  { %v4215_v15 = vmul.f32 %v5769_v53, %v4207_v1  ;;  %v4208_v59 = vmul.f32 %v6911_v56, %v4192_v43 }
0x2983   :  { %v4216_v61 = vmul.f32 %v5769_v53, %v4208_v59  ;;  %v4223_v5 = vadd.f32 %v5770_v60, %v4215_v15 }
0x2985   :  { %v4224_v6 = vadd.f32 %v5770_v60, %v4216_v61 }
0x2987   :  { %v4225_v7 = vpack.c.bf16 %v4224_v6, %v4223_v5 }
0x2989   :  { %6491 = vmatmul.mubr.msk.bf16.vlgmr.msra.gmra.mrb[120].mxu0 %vm93_vm0, %v4225_v7 }
0x298a   :  { %6496 = vmatprep.mubr.msk.bf16.mxu0 %vm6962_vm1, %v6961_v14 }
0x2a5c   :  { %v4280_v10 = vpop.f32.mrb[120].mxu0 }
0x2a5d   :  { %v8153_v38 = vpack.c.bf16 %v4280_v10, %v4280_v10  ;;  %v6492_v11 = vpop.f32.mrb[121].mxu0  ;;  %v4287_v16 = vmul.f32 0.35355338, %v4280_v10 }
0x2a5e   :  { %v4283_v34 = vpop.f32.mrb[122].mxu0 }
0x2a5f   :  { %v8155_v12 = vpack.c.bf16 %v4283_v34, %v4283_v34  ;;  %4294 = vrot.lane.b32.xlu0 %v8153_v38, %s8572_s9  ;;  %v6493_v30 = vpop.f32.mrb[123].mxu0  ;;  %v8163_v18 = vpack.c.bf16 %v4287_v16, %v4287_v16  ;;  %v4288_v51 = vmul.f32 0.35355338, %v4283_v34 }
0x2a61   :  { %4343 = vrot.lane.b32.xlu1 %v8155_v12, %s8572_s9  ;;  %v8171_v23 = vpack.c.bf16 %v4288_v51, %v4288_v51 }
0x2ad1   :  { %v4295_v49 = vpop.permute.xlu0 %4294 }
0x2ad2   :  { %v4300_v28 = vsel %vm269_vm2, %v4295_v49, 0 }
0x2ad3   :  { %6495 = vmatpush3.bf16.xpose.msra.mxu0 %v4300_v28  ;;  %v4344_v27 = vpop.permute.xlu1 %4343 }
0x2ad4   :  { %6500 = vmatprep.subr.bf16.mxu0 %v6961_v14  ;;  %v4349_v22 = vsel %vm269_vm2, %v4344_v27, 0 }
0x2ada   :  { %6497 = vmatmul.mubr.msk.bf16.vlgmr.msra.gmra.mrb[124].mxu0 %vm269_vm2, %v8163_v18 }
0x2adb   :  { %6501 = vmatpush3.bf16.xpose.msra.mxu0 %v4349_v22  ;;  %6502 = vmatprep.mubr.msk.bf16.mxu0 %vm6962_vm1, %v6961_v14 }
0x2adc   :  { %6506 = vmatprep.subr.bf16.mxu0 %v6961_v14 }
0x2ae2   :  { %6503 = vmatmul.mubr.msk.bf16.vlgmr.msra.gmra.mrb[128].mxu0 %vm269_vm2, %v8171_v23 }
0x2ae3   :  { %6508 = vmatprep.mubr.msk.bf16.mxu0 %vm6962_vm1, %v6961_v14 }
0x2bad   :  { %v4336_v29 = vpop.f32.mrb[124].mxu0 }
0x2bae   :  { %v4337_v24 = vadd.f32 %v8180_v55, %v4336_v29  ;;  %v6498_v20 = vpop.f32.mrb[125].mxu0 }
0x2baf   :  { %v4339_v25 = vpop.f32.mrb[126].mxu0 }
0x2bb0   :  { %v6499_v13 = vpop.f32.mrb[127].mxu0  ;;  %v4391_v17 = vsel %vm269_vm2, %v4337_v24, -inf }
0x2bb1   :  { %4392 = vmax.xlane.f32.xlu1 %v4391_v17 }
0x2bb5   :  { %v4385_v19 = vpop.f32.mrb[128].mxu0 }
0x2bb6   :  { %v4386_v31 = vadd.f32 %v8187_v26, %v4385_v19  ;;  %v6504_v21 = vpop.f32.mrb[129].mxu0 }
0x2bb7   :  { %v4388_v58 = vpop.f32.mrb[130].mxu0 }
0x2bb8   :  { %v6505_v35 = vpop.f32.mrb[131].mxu0  ;;  %v4394_v36 = vsel %vm269_vm2, %v4386_v31, -inf }
0x2bb9   :  { %4395 = vmax.xlane.f32.xlu0 %v4394_v36 }
0x2bc2   :  { %4461 = vrot.lane.b32.xlu1 %v8155_v12, %s8585_s12 }
0x2bc6   :  { %4514 = vrot.lane.b32.xlu1 %v8153_v38, %s8573_s4 }
0x2bca   :  { %4565 = vrot.lane.b32.xlu1 %v8155_v12, %s8573_s4  ;;  %s8587_s4 = smov 48  }
0x2bce   :  { %4563 = vrot.lane.b32.xlu1 %v8171_v23, %s8574_s0 }
0x2bcf   :  { %4413 = vrot.lane.b32.xlu0 %v8153_v38, %s8585_s12 }
0x2bd2   :  { %4683 = vrot.lane.b32.xlu1 %v8155_v12, %s8586_s17 }
0x2bd3   :  { %4512 = vrot.lane.b32.xlu0 %v8163_v18, %s8574_s0 }
0x2bd7   :  { %4635 = vrot.lane.b32.xlu0 %v8153_v38, %s8586_s17 }
0x2c3e   :  { %v4393_v40 = vpop.xlane.xlu1 %4392 }
0x2c3f   :  { %v4397_v42 = vsub.f32 %v4337_v24, %v4393_v40 }
0x2c41   :  { %v4399_v39 = vmul.f32 1.442695, %v4397_v42 }
0x2c42   :  { %v4462_v2 = vpop.permute.xlu1 %4461 }
0x2c43   :  { %6912 = vpow2.f32 %v4399_v39  ;;  %v4467_v46 = vsel %vm390_vm3, %v4462_v2, 0 }
0x2c44   :  { %6513 = vmatpush3.bf16.msra.mxu1 %v4467_v46 }
0x2c45   :  { %6524 = vmatprep.subr.bf16.mxu1 %v6961_v14 }
0x2c46   :  { %v4396_v41 = vpop.xlane.xlu0 %4395  ;;  %v4515_v43 = vpop.permute.xlu1 %4514 }
0x2c47   :  { %v4398_v54 = vsub.f32 %v4386_v31, %v4396_v41  ;;  %v4520_v62 = vsel %vm269_vm2, %v4515_v43, 0 }
0x2c49   :  { %v4401_v45 = vmul.f32 1.442695, %v4398_v54 }
0x2c4a   :  { %v4414_v48 = vpop.permute.xlu0 %4413  ;;  %v4566_v8 = vpop.permute.xlu1 %4565 }
0x2c4b   :  { %6914 = vpow2.f32 %v4401_v45  ;;  %v4419_v37 = vsel %vm390_vm3, %v4414_v48, 0  ;;  %v4571_v50 = vsel %vm269_vm2, %v4566_v8, 0 }
0x2c4c   :  { %6507 = vmatpush3.bf16.msra.mxu0 %v4419_v37 }
0x2c4d   :  { %v8210_v32 = vpop.eup %6912  ;;  %6518 = vmatprep.subr.bf16.mxu0 %v6961_v14 }
0x2c4e   :  { %v4411_v47 = vpack.c.bf16 %v8210_v32, %v8210_v32  ;;  %v4513_v44 = vpop.permute.xlu0 %4512  ;;  %v4564_v52 = vpop.permute.xlu1 %4563 }
0x2c50   :  { %6509 = vmatmul.mubr.msk.bf16.vlgmr.msra.gmra.mrb[132].mxu0 %vm269_vm2, %v4411_v47 }
0x2c51   :  { %6520 = vmatprep.mubr.msk.bf16.mxu0 %vm6962_vm1, %v6961_v14 }
0x2c52   :  { %v4636_v4 = vpop.permute.xlu0 %4635  ;;  %v4684_v9 = vpop.permute.xlu1 %4683 }
0x2c53   :  { %v4641_v3 = vsel %vm390_vm3, %v4636_v4, 0  ;;  %v4689_v53 = vsel %vm390_vm3, %v4684_v9, 0 }
0x2c55   :  { %v8219_v57 = vpop.eup %6914  ;;  %6519 = vmatpush3.bf16.xpose.msra.mxu0 %v4520_v62 }
0x2c56   :  { %v4412_v0 = vpack.c.bf16 %v8219_v57, %v8219_v57  ;;  %6530 = vmatprep.subr.bf16.mxu0 %v6961_v14 }
0x2c58   :  { %6515 = vmatmul.mubr.msk.bf16.vlgmr.msra.gmra.mrb[128].mxu1 %vm269_vm2, %v4412_v0 }
0x2c59   :  { %6525 = vmatpush3.bf16.xpose.msra.mxu1 %v4571_v50  ;;  %6526 = vmatprep.mubr.msk.bf16.mxu1 %vm6962_vm1, %v6961_v14 }
0x2c5a   :  { %6536 = vmatprep.subr.bf16.mxu1 %v6961_v14 }
0x2c5c   :  { %6521 = vmatmul.mubr.msk.bf16.vlgmr.msra.gmra.mrb[136].mxu0 %vm269_vm2, %v4513_v44 }
0x2c5d   :  { %6531 = vmatpush3.bf16.msra.mxu0 %v4641_v3  ;;  %6532 = vmatprep.mubr.msk.bf16.mxu0 %vm6962_vm1, %v6961_v14 }
0x2c5e   :  { %6542 = vmatprep.subr.bf16.mxu0 %v6961_v14 }
0x2c60   :  { %6527 = vmatmul.mubr.msk.bf16.vlgmr.msra.gmra.mrb[132].mxu1 %vm269_vm2, %v4564_v52 }
0x2c61   :  { %6537 = vmatpush3.bf16.msra.mxu1 %v4689_v53  ;;  %6538 = vmatprep.mubr.msk.bf16.mxu1 %vm6962_vm1, %v6961_v14 }
0x2c62   :  { %6548 = vmatprep.subr.bf16.mxu1 %v6961_v14 }
0x2d23   :  { %v8239_v1 = vpop.f32.mrb[132].mxu0 }
0x2d24   :  { %v6510_v56 = vpop.f32.mrb[133].mxu0 }
0x2d25   :  { %v4458_v15 = vpop.f32.mrb[134].mxu0 }
0x2d26   :  { %v6511_v59 = vpop.f32.mrb[135].mxu0 }
0x2d2b   :  { %v8241_v60 = vpop.f32.mrb[128].mxu1 }
0x2d2c   :  { %v6516_v61 = vpop.f32.mrb[129].mxu1 }
0x2d2d   :  { %v4506_v5 = vpop.f32.mrb[130].mxu1 }
0x2d2e   :  { %v6517_v6 = vpop.f32.mrb[131].mxu1 }
0x2d2f   :  { %v4556_v7 = vpop.f32.mrb[136].mxu0 }
0x2d30   :  { %v4557_v10 = vadd.f32 %v8180_v55, %v4556_v7  ;;  %v6522_v11 = vpop.f32.mrb[137].mxu0 }
0x2d31   :  { %v4559_v34 = vpop.f32.mrb[138].mxu0 }
0x2d32   :  { %v6523_v30 = vpop.f32.mrb[139].mxu0  ;;  %v4613_v49 = vsel %vm269_vm2, %v4557_v10, -inf }
0x2d33   :  { %4614 = vmax.xlane.f32.xlu0 %v4613_v49  ;;  %v4607_v28 = vpop.f32.mrb[132].mxu1 }
0x2d34   :  { %v4608_v16 = vadd.f32 %v8187_v26, %v4607_v28  ;;  %v6528_v27 = vpop.f32.mrb[133].mxu1 }
0x2d35   :  { %v4610_v22 = vpop.f32.mrb[134].mxu1 }
0x2d36   :  { %v6529_v51 = vpop.f32.mrb[135].mxu1  ;;  %v4616_v29 = vsel %vm269_vm2, %v4608_v16, -inf }
0x2d37   :  { %4617 = vmax.xlane.f32.xlu1 %v4616_v29 }
0x2d48   :  { %4785 = vrot.lane.b32.xlu1 %v8155_v12, %s8575_s7 }
0x2d49   :  { %4735 = vrot.lane.b32.xlu0 %v8153_v38, %s8575_s7  ;;  %s8589_s7 = sld [smem:[#allocation15_spill]] }
0x2d4c   :  { %4783 = vrot.lane.b32.xlu1 %v8171_v23, %s8576_s5 }
0x2d4d   :  { %4733 = vrot.lane.b32.xlu0 %v8163_v18, %s8576_s5 }
0x2d50   :  { %4903 = vrot.lane.b32.xlu1 %v8155_v12, %s8587_s4 }
0x2d51   :  { %4855 = vrot.lane.b32.xlu0 %v8153_v38, %s8587_s4 }
0x2dc0   :  { %v4615_v24 = vpop.xlane.xlu0 %4614 }
0x2dc1   :  { %v4619_v20 = vsub.f32 %v4557_v10, %v4615_v24 }
0x2dc3   :  { %v4621_v25 = vmul.f32 1.442695, %v4619_v20 }
0x2dc4   :  { %v4618_v13 = vpop.xlane.xlu1 %4617  ;;  %v4736_v31 = vpop.permute.xlu0 %4735 }
0x2dc5   :  { %6916 = vpow2.f32 %v4621_v25  ;;  %v4620_v17 = vsub.f32 %v4608_v16, %v4618_v13  ;;  %v4741_v40 = vsel %vm269_vm2, %v4736_v31, 0 }
0x2dc7   :  { %v4623_v19 = vmul.f32 1.442695, %v4620_v17 }
0x2dc8   :  { %v4786_v58 = vpop.permute.xlu1 %4785  ;;  %v4734_v36 = vpop.permute.xlu0 %4733 }
0x2dc9   :  { %6918 = vpow2.f32 %v4623_v19  ;;  %v4791_v46 = vsel %vm269_vm2, %v4786_v58, 0 }
0x2dcc   :  { %v4784_v2 = vpop.permute.xlu1 %4783  ;;  %v4856_v41 = vpop.permute.xlu0 %4855 }
0x2dcd   :  { %v4861_v54 = vsel %vm390_vm3, %v4856_v41, 0 }
0x2dcf   :  { %v8259_v21 = vpop.eup %6916 }
0x2dd0   :  { %v4633_v35 = vpack.c.bf16 %v8259_v21, %v8259_v21  ;;  %v4904_v45 = vpop.permute.xlu1 %4903 }
0x2dd1   :  { %v4909_v48 = vsel %vm390_vm3, %v4904_v45, 0 }
0x2dd2   :  { %6533 = vmatmul.mubr.msk.bf16.vlgmr.msra.gmra.mrb[140].mxu0 %vm269_vm2, %v4633_v35 }
0x2dd3   :  { %v8265_v42 = vpop.eup %6918  ;;  %6543 = vmatpush3.bf16.xpose.msra.mxu0 %v4741_v40  ;;  %6544 = vmatprep.mubr.msk.bf16.mxu0 %vm6962_vm1, %v6961_v14 }
0x2dd4   :  { %v4634_v39 = vpack.c.bf16 %v8265_v42, %v8265_v42  ;;  %6554 = vmatprep.subr.bf16.mxu0 %v6961_v14 }
0x2dd6   :  { %6539 = vmatmul.mubr.msk.bf16.vlgmr.msra.gmra.mrb[136].mxu1 %vm269_vm2, %v4634_v39 }
0x2dd7   :  { %6549 = vmatpush3.bf16.xpose.msra.mxu1 %v4791_v46  ;;  %6550 = vmatprep.mubr.msk.bf16.mxu1 %vm6962_vm1, %v6961_v14 }
0x2dd8   :  { %6560 = vmatprep.subr.bf16.mxu1 %v6961_v14 }
0x2dda   :  { %6545 = vmatmul.mubr.msk.bf16.vlgmr.msra.gmra.mrb[144].mxu0 %vm269_vm2, %v4734_v36 }
0x2ddb   :  { %6555 = vmatpush3.bf16.msra.mxu0 %v4861_v54  ;;  %6556 = vmatprep.mubr.msk.bf16.mxu0 %vm6962_vm1, %v6961_v14 }
0x2ddc   :  { %6566 = vmatprep.subr.bf16.mxu0 %v6961_v14 }
0x2dde   :  { %6551 = vmatmul.mubr.msk.bf16.vlgmr.msra.gmra.mrb[140].mxu1 %vm269_vm2, %v4784_v2 }
0x2ddf   :  { %6561 = vmatpush3.bf16.msra.mxu1 %v4909_v48  ;;  %6562 = vmatprep.mubr.msk.bf16.mxu1 %vm6962_vm1, %v6961_v14 }
0x2de0   :  { %6572 = vmatprep.subr.bf16.mxu1 %v6961_v14 }
0x2ea5   :  { %v8287_v43 = vpop.f32.mrb[140].mxu0 }
0x2ea6   :  { %v6534_v37 = vpop.f32.mrb[141].mxu0 }
0x2ea7   :  { %v4680_v47 = vpop.f32.mrb[142].mxu0 }
0x2ea8   :  { %v6535_v8 = vpop.f32.mrb[143].mxu0 }
0x2ea9   :  { %v8289_v44 = vpop.f32.mrb[136].mxu1 }
0x2eaa   :  { %v6540_v62 = vpop.f32.mrb[137].mxu1 }
0x2eab   :  { %v4728_v0 = vpop.f32.mrb[138].mxu1 }
0x2eac   :  { %v6541_v52 = vpop.f32.mrb[139].mxu1 }
0x2ead   :  { %v4777_v50 = vpop.f32.mrb[144].mxu0 }
0x2eae   :  { %v4778_v4 = vadd.f32 %v8180_v55, %v4777_v50  ;;  %v6546_v3 = vpop.f32.mrb[145].mxu0 }
0x2eaf   :  { %v4780_v9 = vpop.f32.mrb[146].mxu0 }
0x2eb0   :  { %v6547_v53 = vpop.f32.mrb[147].mxu0  ;;  %v4833_v56 = vsel %vm269_vm2, %v4778_v4, -inf }
0x2eb1   :  { %4834 = vmax.xlane.f32.xlu0 %v4833_v56  ;;  %v4827_v15 = vpop.f32.mrb[140].mxu1 }
0x2eb2   :  { %v4828_v59 = vadd.f32 %v8187_v26, %v4827_v15  ;;  %v6552_v61 = vpop.f32.mrb[141].mxu1 }
0x2eb3   :  { %v4830_v5 = vpop.f32.mrb[142].mxu1 }
0x2eb4   :  { %v6553_v6 = vpop.f32.mrb[143].mxu1  ;;  %v4836_v7 = vsel %vm269_vm2, %v4828_v59, -inf }
0x2eb5   :  { %4837 = vmax.xlane.f32.xlu1 %v4836_v7  ;;  %v4403_v7 = vsel %vm269_vm2, %v8210_v32, 0.0 }
0x2ec6   :  { %5005 = vrot.lane.b32.xlu1 %v8155_v12, %s8577_s8 }
0x2ec7   :  { %4955 = vrot.lane.b32.xlu0 %v8153_v38, %s8577_s8 }
0x2eca   :  { %5003 = vrot.lane.b32.xlu1 %v8171_v23, %s8578_s28 }
0x2ecb   :  { %4953 = vrot.lane.b32.xlu0 %v8163_v18, %s8578_s28  ;;  %s8588_s28 = smov 40  }
0x2f3e   :  { %v4835_v10 = vpop.xlane.xlu0 %4834 }
0x2f3f   :  { %v4839_v11 = vsub.f32 %v4778_v4, %v4835_v10 }
0x2f41   :  { %v4841_v34 = vmul.f32 1.442695, %v4839_v11 }
0x2f42   :  { %v4838_v30 = vpop.xlane.xlu1 %4837  ;;  %v4956_v27 = vpop.permute.xlu0 %4955 }
0x2f43   :  { %6920 = vpow2.f32 %v4841_v34  ;;  %v4840_v49 = vsub.f32 %v4828_v59, %v4838_v30  ;;  %v4961_v51 = vsel %vm269_vm2, %v4956_v27, 0  ;;  %v4406_v34 = vsel %vm269_vm2, %v8219_v57, 0.0 }
0x2f45   :  { %v4843_v28 = vmul.f32 1.442695, %v4840_v49 }
0x2f46   :  { %v5006_v23 = vpop.permute.xlu1 %5005  ;;  %v4954_v20 = vpop.permute.xlu0 %4953 }
0x2f47   :  { %6922 = vpow2.f32 %v4843_v28  ;;  %v5011_v24 = vsel %vm269_vm2, %v5006_v23, 0 }
0x2f4a   :  { %v5004_v25 = vpop.permute.xlu1 %5003 }
0x2f4d   :  { %v6921_v16 = vpop.eup %6920 }
0x2f4e   :  { %v4853_v22 = vpack.c.bf16 %v6921_v16, %v6921_v16  ;;  %v4845_v52 = vsel %vm269_vm2, %v6921_v16, 0.0 }
0x2f50   :  { %6557 = vmatmul.mubr.msk.bf16.vlgmr.msra.gmra.mrb[148].mxu0 %vm269_vm2, %v4853_v22 }
0x2f51   :  { %v6923_v29 = vpop.eup %6922  ;;  %6567 = vmatpush3.bf16.xpose.msra.mxu0 %v4961_v51  ;;  %6568 = vmatprep.mubr.msk.bf16.mxu0 %vm6962_vm1, %v6961_v14 }
0x2f52   :  { %v4854_v18 = vpack.c.bf16 %v6923_v29, %v6923_v29  ;;  %6578 = vmatprep.subr.bf16.mxu0 %v6961_v14  ;;  %v4848_v50 = vsel %vm269_vm2, %v6923_v29, 0.0 }
0x2f54   :  { %6563 = vmatmul.mubr.msk.bf16.vlgmr.msra.gmra.mrb[144].mxu1 %vm269_vm2, %v4854_v18 }
0x2f55   :  { %6573 = vmatpush3.bf16.xpose.msra.mxu1 %v5011_v24  ;;  %6574 = vmatprep.mubr.msk.bf16.mxu1 %vm6962_vm1, %v6961_v14 }
0x2f56   :  { %6584 = vmatprep.subr.bf16.mxu1 %v6961_v14 }
0x2f58   :  { %6569 = vmatmul.mubr.msk.bf16.vlgmr.msra.gmra.mrb[152].mxu0 %vm269_vm2, %v4954_v20 }
0x2f59   :  { %6580 = vmatprep.mubr.msk.bf16.mxu0 %vm6962_vm1, %v6961_v14 }
0x2f5c   :  { %6575 = vmatmul.mubr.msk.bf16.vlgmr.msra.gmra.mrb[148].mxu1 %vm269_vm2, %v5004_v25  ;;  %v6762_v25 = vld [vmem:[%s8589_s7 + $0x10] sm:$0xff]  }
0x2f5d   :  { %6586 = vmatprep.mubr.msk.bf16.mxu1 %vm6962_vm1, %v6961_v14 }
0x3023   :  { %v8319_v13 = vpop.f32.mrb[148].mxu0 }
0x3024   :  { %v6558_v17 = vpop.f32.mrb[149].mxu0 }
0x3025   :  { %v4900_v19 = vpop.f32.mrb[150].mxu0 }
0x3026   :  { %v6559_v31 = vpop.f32.mrb[151].mxu0 }
0x3027   :  { %v8321_v58 = vpop.f32.mrb[144].mxu1 }
0x3028   :  { %v6564_v35 = vpop.f32.mrb[145].mxu1 }
0x3029   :  { %v4948_v36 = vpop.f32.mrb[146].mxu1 }
0x302a   :  { %v6565_v40 = vpop.f32.mrb[147].mxu1 }
0x302b   :  { %v4997_v39 = vpop.f32.mrb[152].mxu0 }
0x302c   :  { %v4998_v2 = vadd.f32 %v8180_v55, %v4997_v39  ;;  %v6570_v46 = vpop.f32.mrb[153].mxu0  ;;  %v4625_v55 = vsel %vm269_vm2, %v8259_v21, 0.0 }
0x302d   :  { %v5000_v41 = vpop.f32.mrb[154].mxu0 }
0x302e   :  { %v6571_v54 = vpop.f32.mrb[155].mxu0  ;;  %v5053_v45 = vsel %vm269_vm2, %v4998_v2, -inf }
0x302f   :  { %5054 = vmax.xlane.f32.xlu0 %v5053_v45  ;;  %v5047_v48 = vpop.f32.mrb[148].mxu1 }
0x3030   :  { %v5048_v37 = vadd.f32 %v8187_v26, %v5047_v48  ;;  %v6576_v47 = vpop.f32.mrb[149].mxu1  ;;  %v4628_v26 = vsel %vm269_vm2, %v8265_v42, 0.0 }
0x3031   :  { %v5050_v8 = vpop.f32.mrb[150].mxu1 }
0x3032   :  { %v6577_v62 = vpop.f32.mrb[151].mxu1  ;;  %v5056_v0 = vsel %vm269_vm2, %v5048_v37, -inf }
0x3033   :  { %5057 = vmax.xlane.f32.xlu1 %v5056_v0 }
0x3044   :  { %5123 = vrot.lane.b32.xlu1 %v8155_v12, %s8588_s28 }
0x3045   :  { %5075 = vrot.lane.b32.xlu0 %v8153_v38, %s8588_s28 }
0x3064   :  { %4626 = vadd.xlane.f32.xlu0 %v4625_v55 }
0x3068   :  { %4846 = vadd.xlane.f32.xlu0 %v4845_v52  ;;  %4629 = vadd.xlane.f32.xlu1 %v4628_v26 }
0x306c   :  { %4849 = vadd.xlane.f32.xlu0 %v4848_v50 }
0x30bc   :  { %v5055_v4 = vpop.xlane.xlu0 %5054 }
0x30bd   :  { %v5059_v3 = vsub.f32 %v4998_v2, %v5055_v4 }
0x30bf   :  { %v5061_v12 = vmul.f32 1.442695, %v5059_v3 }
0x30c0   :  { %v5076_v9 = vpop.permute.xlu0 %5075  ;;  %v5058_v53 = vpop.xlane.xlu1 %5057 }
0x30c1   :  { %6924 = vpow2.f32 %v5061_v12  ;;  %v5081_v38 = vsel %vm390_vm3, %v5076_v9, 0  ;;  %v5060_v21 = vsub.f32 %v5048_v37, %v5058_v53 }
0x30c2   :  { %6579 = vmatpush3.bf16.msra.mxu0 %v5081_v38 }
0x30c3   :  { %v5063_v56 = vmul.f32 1.442695, %v5060_v21  ;;  %6590 = vmatprep.subr.bf16.mxu0 %v6961_v14 }
0x30c4   :  { %v5124_v15 = vpop.permute.xlu1 %5123 }
0x30c5   :  { %6926 = vpow2.f32 %v5063_v56  ;;  %v5129_v42 = vsel %vm390_vm3, %v5124_v15, 0 }
0x30c6   :  { %6585 = vmatpush3.bf16.msra.mxu1 %v5129_v42 }
0x30c7   :  { %6598 = vmatprep.subr.bf16.mxu1 %v6961_v14 }
0x30cb   :  { %v6925_v59 = vpop.eup %6924 }
0x30cc   :  { %v5065_v61 = vsel %vm269_vm2, %v6925_v59, 0.0  ;;  %v5073_v5 = vpack.c.bf16 %v6925_v59, %v6925_v59 }
0x30cd   :  { %5066 = vadd.xlane.f32.xlu0 %v5065_v61 }
0x30ce   :  { %6581 = vmatmul.mubr.msk.bf16.vlgmr.msra.gmra.mrb[156].mxu0 %vm269_vm2, %v5073_v5 }
0x30cf   :  { %v6927_v6 = vpop.eup %6926  ;;  %6594 = vmatprep.mubr.msk.bf16.mxu0 %vm6962_vm1, %v6961_v14  ;;  %6591 = vmatpush3.bf16.msra.mxu0 %v6762_v25 }
0x30d0   :  { %v5068_v10 = vsel %vm269_vm2, %v6927_v6, 0.0  ;;  %v5074_v11 = vpack.c.bf16 %v6927_v6, %v6927_v6  ;;  %6592 = vmatprep.subr.bf16.mxu0 %v6961_v14 }
0x30d1   :  { %4404 = vadd.xlane.f32.xlu0 %v4403_v7  ;;  %5069 = vadd.xlane.f32.xlu1 %v5068_v10 }
0x30d2   :  { %6587 = vmatmul.mubr.msk.bf16.vlgmr.msra.gmra.mrb[152].mxu1 %vm269_vm2, %v5074_v11 }
0x30d3   :  { %6602 = vmatprep.mubr.msk.bf16.mxu1 %vm6962_vm1, %v6961_v14 }
0x30d5   :  { %4407 = vadd.xlane.f32.xlu1 %v4406_v34 }
0x30f1   :  { %v4627_v30 = vpop.xlane.xlu0 %4626 }
0x30f2   :  { %6928 = vrcp.f32 %v4627_v30 }
0x30f5   :  { %v4847_v49 = vpop.xlane.xlu0 %4846  ;;  %v4630_v28 = vpop.xlane.xlu1 %4629 }
0x30f6   :  { %6930 = vrcp.f32 %v4630_v28 }
0x30f7   :  { %6932 = vrcp.f32 %v4847_v49 }
0x30f9   :  { %v4850_v32 = vpop.xlane.xlu0 %4849 }
0x30fa   :  { %6934 = vrcp.f32 %v4850_v32 }
0x30fc   :  { %v6929_v16 = vpop.eup %6928 }
0x30fd   :  { %v4731_v51 = vmul.f32 %v6929_v16, %v8287_v43 }
0x3100   :  { %v6931_v27 = vpop.eup %6930 }
0x3101   :  { %v6933_v22 = vpop.eup %6932  ;;  %v4732_v29 = vmul.f32 %v6931_v27, %v8289_v44 }
0x3102   :  { %v4951_v57 = vmul.f32 %v6933_v22, %v8319_v13  ;;  %v6763_v13 = vld [vmem:[%s8589_s7 + $0x18] sm:$0xff]   ;;  %s8592_s7 = sld [smem:[#allocation18_spill]] }
0x3103   :  { %v6698_v18 = vpack.i.bf16 %v4732_v29, %v4731_v51  ;;  %6593 = vmatpush3.bf16.msra.mxu0 %v6763_v13 }
0x3104   :  { %v6935_v23 = vpop.eup %6934  ;;  %6606 = vmatprep.subr.bf16.mxu0 %v6961_v14 }
0x3105   :  { %v4952_v24 = vmul.f32 %v6935_v23, %v8321_v58  ;;  %6699 = vrot.lane.b32.xlu0 %v6698_v18, %s8579_s25 }
0x3107   :  { %v6703_v20 = vpack.i.bf16 %v4952_v24, %v4951_v57 }
0x3109   :  { %6704 = vrot.lane.b32.xlu1 %v6703_v20, %s8580_s23 }
0x315a   :  { %v5067_v43 = vpop.xlane.xlu0 %5066 }
0x315b   :  { %6936 = vrcp.f32 %v5067_v43 }
0x315e   :  { %v5070_v44 = vpop.xlane.xlu1 %5069  ;;  %v4405_v48 = vpop.xlane.xlu0 %4404 }
0x315f   :  { %6938 = vrcp.f32 %v5070_v44 }
0x3160   :  { %6940 = vrcp.f32 %v4405_v48  ;;  %v6770_v48 = vld [vmem:[%s8488_s21 + $0x60] sm:$0xff]  }
0x3162   :  { %v4408_v37 = vpop.xlane.xlu1 %4407 }
0x3163   :  { %6942 = vrcp.f32 %v4408_v37  ;;  %v6771_v37 = vld [vmem:[%s8488_s21 + $0x68] sm:$0xff]  }
0x3165   :  { %v6937_v58 = vpop.eup %6936 }
0x3169   :  { %v6939_v36 = vpop.eup %6938 }
0x316a   :  { %v6941_v8 = vpop.eup %6940 }
0x316b   :  { %v4509_v4 = vmul.f32 %v6941_v8, %v8239_v1  ;;  %v6773_v8 = vld [vmem:[%s8488_s21 + $0x78] sm:$0xff]  }
0x316d   :  { %v6943_v0 = vpop.eup %6942 }
0x316e   :  { %v4510_v3 = vmul.f32 %v6943_v0, %v8241_v60 }
0x3177   :  { %v6700_v47 = vpop.permute.xlu0 %6699 }
0x3178   :  { %v6702_v55 = vunpack.i.h.bf16 %v6700_v47  ;;  %v6701_v52 = vunpack.i.l.bf16 %v6700_v47  ;;  %v6772_v47 = vld [vmem:[%s8488_s21 + $0x70] sm:$0xff]  }
0x317a   :  { %v5197_v9 = vsel %vm269_vm2, %v4509_v4, %v6701_v52  ;;  %v5198_v53 = vsel %vm269_vm2, %v4510_v3, %v6702_v55 }
0x317b   :  { %v6705_v62 = vpop.permute.xlu1 %6704 }
0x317c   :  { %v6707_v26 = vunpack.i.h.bf16 %v6705_v62  ;;  %v6706_v50 = vunpack.i.l.bf16 %v6705_v62 }
0x317e   :  { %v5200_v56 = vsel %vm1173_vm4, %v5198_v53, %v6707_v26  ;;  %v5199_v15 = vsel %vm1173_vm4, %v5197_v9, %v6706_v50 }
0x31a1   :  { %v5117_v17 = vpop.f32.mrb[156].mxu0 }
0x31a2   :  { %v6582_v19 = vpop.f32.mrb[157].mxu0  ;;  %v5171_v39 = vmul.f32 %v6937_v58, %v5117_v17  ;;  %v5803_v17 = vld [vmem:[%s8486_s18 + $0x1] ss:$0 sm:$0xff] }
0x31a3   :  { %v5120_v31 = vpop.f32.mrb[158].mxu0 }
0x31a4   :  { %v6583_v35 = vpop.f32.mrb[159].mxu0 }
0x31a5   :  { %v5165_v40 = vpop.f32.mrb[152].mxu1  ;;  %v5804_v35 = vld [vmem:[%s8591_s10 + $0x1] ss:$0 sm:$0xff] }
0x31a6   :  { %v5172_v2 = vmul.f32 %v6939_v36, %v5165_v40  ;;  %v6588_v46 = vpop.f32.mrb[153].mxu1 }
0x31a7   :  { %v5168_v41 = vpop.f32.mrb[154].mxu1  ;;  %v6766_v46 = vld [vmem:[%s8488_s21 + $0x40] sm:$0xff]  }
0x31a8   :  { %v6708_v54 = vpack.i.bf16 %v5172_v2, %v5171_v39  ;;  %v6589_v45 = vpop.f32.mrb[155].mxu1  ;;  %v6767_v41 = vld [vmem:[%s8488_s21 + $0x48] sm:$0xff]  }
0x31a9   :  { %v6769_v45 = vld [vmem:[%s8488_s21 + $0x58] sm:$0xff]  }
0x31aa   :  { %6709 = vrot.lane.b32.xlu1 %v6708_v54, %s8581_s22  ;;  %s8590_s22 = sld [smem:[#allocation16_spill]]  ;;  %v6768_v54 = vld [vmem:[%s8488_s21 + $0x50] sm:$0xff]  }
0x31b0   :  { %v6764_v29 = vld [vmem:[%s8590_s22 + $0x10] sm:$0xff]   ;;  %v6765_v23 = vld [vmem:[%s8590_s22 + $0x18] sm:$0xff]   ;;  %s8593_s22 = sld [smem:[#allocation19_spill]] }
0x31b1   :  { %6599 = vmatpush3.bf16.msra.mxu1 %v6764_v29 }
0x31b2   :  { %6600 = vmatprep.subr.bf16.mxu1 %v6961_v14 }
0x31b5   :  { %6601 = vmatpush3.bf16.msra.mxu1 %v6765_v23 }
0x31b6   :  { %6626 = vmatprep.subr.bf16.mxu1 %v6961_v14 }
0x321c   :  { %v6710_v12 = vpop.permute.xlu1 %6709 }
0x321d   :  { %v6712_v38 = vunpack.i.h.bf16 %v6710_v12  ;;  %v6711_v21 = vunpack.i.l.bf16 %v6710_v12 }
0x321f   :  { %v5202_v42 = vsel %vm1176_vm5, %v5200_v56, %v6712_v38  ;;  %v5201_v59 = vsel %vm1176_vm5, %v5199_v15, %v6711_v21 }
0x3220   :  { %v5203_v61 = vpack.c.bf16 %v5202_v42, %v5201_v59 }
0x3222   :  { %6595 = vmatmul.mubr.msk.bf16.vlgmr.msra.gmra.mrb[160].mxu0 %vm93_vm0, %v5203_v61 }
0x3223   :  { %6622 = vmatprep.mubr.msk.bf16.mxu0 %vm6962_vm1, %v6961_v14  ;;  %6607 = vmatpush3.bf16.msra.mxu0 %v6766_v46 }
0x3224   :  { %6608 = vmatprep.subr.bf16.mxu0 %v6961_v14 }
0x3227   :  { %6609 = vmatpush3.bf16.msra.mxu0 %v6767_v41 }
0x3228   :  { %6610 = vmatprep.subr.bf16.mxu0 %v6961_v14 }
0x322b   :  { %6611 = vmatpush3.bf16.msra.mxu0 %v6768_v54 }
0x322c   :  { %6612 = vmatprep.subr.bf16.mxu0 %v6961_v14 }
0x322f   :  { %6613 = vmatpush3.bf16.msra.mxu0 %v6769_v45 }
0x3230   :  { %6614 = vmatprep.subr.bf16.mxu0 %v6961_v14 }
0x3233   :  { %6615 = vmatpush3.bf16.msra.mxu0 %v6770_v48 }
0x3234   :  { %6616 = vmatprep.subr.bf16.mxu0 %v6961_v14 }
0x3237   :  { %6617 = vmatpush3.bf16.msra.mxu0 %v6771_v37 }
0x3238   :  { %6618 = vmatprep.subr.bf16.mxu0 %v6961_v14 }
0x323b   :  { %6619 = vmatpush3.bf16.msra.mxu0 %v6772_v47 }
0x323c   :  { %6620 = vmatprep.subr.bf16.mxu0 %v6961_v14 }
0x323f   :  { %6621 = vmatpush3.bf16.msra.mxu0 %v6773_v8 }
0x32f5   :  { %v5258_v1 = vpop.f32.mrb[160].mxu0 }
0x32f6   :  { %v8380_v60 = vadd.f32 %v5258_v1, %v8123_v33  ;;  %v6596_v5 = vpop.f32.mrb[161].mxu0 }
0x32f7   :  { %v5261_v6 = vpop.f32.mrb[162].mxu0 }
0x32f8   :  { %v8383_v7 = vadd.f32 %v5261_v6, %v8126_v63  ;;  %v6597_v10 = vpop.f32.mrb[163].mxu0  ;;  %v5271_v11 = vsel %vm93_vm0, %v8380_v60, 0.0 }
0x32f9   :  { %5272 = vadd.xlane.f32.xlu1 %v5271_v11 }
0x32fa   :  { %v5274_v34 = vsel %vm93_vm0, %v8383_v7, 0.0 }
0x32fb   :  { %5275 = vadd.xlane.f32.xlu0 %v5274_v34 }
0x3386   :  { %v5273_v30 = vpop.xlane.xlu1 %5272 }
0x3387   :  { %v5277_v49 = vmul.f32 0.03125, %v5273_v30 }
0x3388   :  { %v5276_v28 = vpop.xlane.xlu0 %5275 }
0x3389   :  { %v5279_v33 = vsub.f32 %v8380_v60, %v5277_v49  ;;  %v5278_v32 = vmul.f32 0.03125, %v5276_v28 }
0x338b   :  { %v5280_v16 = vsub.f32 %v8383_v7, %v5278_v32  ;;  %v5281_v27 = vmul.f32 %v5279_v33, %v5279_v33 }
0x338d   :  { %v5283_v63 = vsel %vm93_vm0, %v5281_v27, 0.0  ;;  %v5282_v22 = vmul.f32 %v5280_v16, %v5280_v16 }
0x338e   :  { %5284 = vadd.xlane.f32.xlu0 %v5283_v63 }
0x338f   :  { %v5286_v51 = vsel %vm93_vm0, %v5282_v22, 0.0 }
0x3392   :  { %5287 = vadd.xlane.f32.xlu0 %v5286_v51 }
0x341b   :  { %v5285_v18 = vpop.xlane.xlu0 %5284 }
0x341c   :  { %v5289_v57 = vmul.f32 0.03125, %v5285_v18 }
0x341e   :  { %v5291_v24 = vadd.f32 1e-05, %v5289_v57 }
0x341f   :  { %v5288_v20 = vpop.xlane.xlu0 %5287 }
0x3420   :  { %6944 = vrsqrt.f32 %v5291_v24  ;;  %v5290_v25 = vmul.f32 0.03125, %v5288_v20  ;;  %v6774_v20 = vld [vmem:[%s8592_s7] sm:$0xff]  }
0x3422   :  { %v5292_v43 = vadd.f32 1e-05, %v5290_v25  ;;  %v6775_v25 = vld [vmem:[%s8592_s7 + $0x8] sm:$0xff]  }
0x3424   :  { %6946 = vrsqrt.f32 %v5292_v43 }
0x342a   :  { %v6945_v44 = vpop.eup %6944 }
0x342b   :  { %v5295_v13 = vmul.f32 %v6945_v44, %v5279_v33 }
0x342d   :  { %v5303_v31 = vmul.f32 %v5803_v17, %v5295_v13 }
0x342e   :  { %v6947_v19 = vpop.eup %6946 }
0x342f   :  { %v5296_v58 = vmul.f32 %v6947_v19, %v5280_v16  ;;  %v5311_v40 = vadd.f32 %v5804_v35, %v5303_v31 }
0x3431   :  { %v5304_v36 = vmul.f32 %v5803_v17, %v5296_v58 }
0x3433   :  { %v5312_v39 = vadd.f32 %v5804_v35, %v5304_v36  ;;  %v5836_v35 = vld [vmem:[%s8593_s22] ss:$0 sm:$0xff] }
0x3435   :  { %v5313_v2 = vpack.c.bf16 %v5312_v39, %v5311_v40 }
0x3437   :  { %6603 = vmatmul.mubr.msk.bf16.vlgmr.msra.gmra.mrb[156].mxu1 %vm93_vm0, %v5313_v2 }
0x3438   :  { %6630 = vmatprep.mubr.msk.bf16.mxu1 %vm6962_vm1, %v6961_v14  ;;  %6627 = vmatpush3.bf16.msra.mxu1 %v6774_v20 }
0x3439   :  { %6628 = vmatprep.subr.bf16.mxu1 %v6961_v14  ;;  %v5837_v14 = vld [vmem:[%s8594_s13] ss:$0 sm:$0xff] }
0x343c   :  { %6629 = vmatpush3.bf16.msra.mxu1 %v6775_v25 }
0x350a   :  { %v5368_v62 = vpop.f32.mrb[156].mxu1 }
0x350b   :  { %v5375_v0 = vmul.f32 %v5368_v62, %v5368_v62  ;;  %v6604_v55 = vpop.f32.mrb[157].mxu1 }
0x350c   :  { %v5371_v52 = vpop.f32.mrb[158].mxu1 }
0x350d   :  { %v5377_v26 = vmul.f32 %v5375_v0, %v5368_v62  ;;  %v5376_v50 = vmul.f32 %v5371_v52, %v5371_v52  ;;  %v6605_v4 = vpop.f32.mrb[159].mxu1 }
0x350f   :  { %v5379_v3 = vmul.f32 0.044715, %v5377_v26  ;;  %v5378_v12 = vmul.f32 %v5376_v50, %v5371_v52 }
0x3511   :  { %v5381_v9 = vadd.f32 %v5379_v3, %v5368_v62  ;;  %v5380_v53 = vmul.f32 0.044715, %v5378_v12 }
0x3513   :  { %v5383_v38 = vmul.f32 0.7978846, %v5381_v9  ;;  %v5382_v21 = vadd.f32 %v5380_v53, %v5371_v52 }
0x3515   :  { %6948 = vtanh.f32 %v5383_v38  ;;  %v5384_v56 = vmul.f32 0.7978846, %v5382_v21 }
0x3517   :  { %6950 = vtanh.f32 %v5384_v56 }
0x351f   :  { %v6949_v15 = vpop.eup %6948 }
0x3520   :  { %v5387_v42 = vadd.f32 1.0, %v6949_v15 }
0x3521   :  { %v6951_v59 = vpop.eup %6950 }
0x3522   :  { %v5389_v61 = vmul.f32 0.5, %v5387_v42  ;;  %v5388_v1 = vadd.f32 1.0, %v6951_v59 }
0x3524   :  { %v5390_v5 = vmul.f32 0.5, %v5388_v1  ;;  %v5391_v6 = vmul.f32 %v5389_v61, %v5368_v62 }
0x3526   :  { %v5392_v10 = vmul.f32 %v5390_v5, %v5371_v52 }
0x3528   :  { %v5393_v11 = vpack.c.bf16 %v5392_v10, %v5391_v6 }
0x352a   :  { %6623 = vmatmul.mubr.bf16.vlgmr.msra.gmra.mrb[164].mxu0 %v5393_v11 }
0x35fd   :  { %v5493_v34 = vpop.f32.mrb[164].mxu0 }
0x35fe   :  { %v5500_v30 = vadd.f32 %v5493_v34, %v8380_v60  ;;  %v6624_v49 = vpop.f32.mrb[165].mxu0 }
0x35ff   :  { %v5496_v28 = vpop.f32.mrb[166].mxu0 }
0x3600   :  { %v5501_v33 = vadd.f32 %v5496_v28, %v8383_v7  ;;  %v6625_v32 = vpop.f32.mrb[167].mxu0  ;;  %v5504_v16 = vsel %vm93_vm0, %v5500_v30, 0.0 }
0x3601   :  { %5505 = vadd.xlane.f32.xlu1 %v5504_v16 }
0x3602   :  { %v5507_v27 = vsel %vm93_vm0, %v5501_v33, 0.0 }
0x3603   :  { %5508 = vadd.xlane.f32.xlu0 %v5507_v27 }
0x368e   :  { %v5506_v63 = vpop.xlane.xlu1 %5505 }
0x368f   :  { %v5510_v22 = vmul.f32 0.03125, %v5506_v63 }
0x3690   :  { %v5509_v51 = vpop.xlane.xlu0 %5508 }
0x3691   :  { %v5512_v29 = vsub.f32 %v5500_v30, %v5510_v22  ;;  %v5511_v23 = vmul.f32 0.03125, %v5509_v51 }
0x3693   :  { %v5513_v18 = vsub.f32 %v5501_v33, %v5511_v23  ;;  %v5514_v57 = vmul.f32 %v5512_v29, %v5512_v29 }
0x3695   :  { %v5516_v60 = vsel %vm93_vm0, %v5514_v57, 0.0  ;;  %v5515_v24 = vmul.f32 %v5513_v18, %v5513_v18 }
0x3696   :  { %5517 = vadd.xlane.f32.xlu1 %v5516_v60 }
0x3697   :  { %v5519_v7 = vsel %vm93_vm0, %v5515_v24, 0.0 }
0x3698   :  { %5520 = vadd.xlane.f32.xlu0 %v5519_v7 }
0x3723   :  { %v5518_v43 = vpop.xlane.xlu1 %5517 }
0x3724   :  { %v5522_v44 = vmul.f32 0.03125, %v5518_v43 }
0x3725   :  { %v5521_v13 = vpop.xlane.xlu0 %5520 }
0x3726   :  { %v5524_v17 = vadd.f32 1e-05, %v5522_v44  ;;  %v5523_v19 = vmul.f32 0.03125, %v5521_v13 }
0x3728   :  { %6952 = vrsqrt.f32 %v5524_v17  ;;  %v5525_v31 = vadd.f32 1e-05, %v5523_v19 }
0x372a   :  { %6954 = vrsqrt.f32 %v5525_v31 }
0x3732   :  { %v6953_v58 = vpop.eup %6952 }
0x3733   :  { %v5528_v36 = vmul.f32 %v6953_v58, %v5512_v29 }
0x3734   :  { %v6955_v40 = vpop.eup %6954 }
0x3735   :  { %v5536_v39 = vmul.f32 %v5836_v35, %v5528_v36  ;;  %v5529_v2 = vmul.f32 %v6955_v40, %v5513_v18 }
0x3737   :  { %v5537_v46 = vmul.f32 %v5836_v35, %v5529_v2  ;;  %v5544_v41 = vadd.f32 %v5837_v14, %v5536_v39 }
0x3739   :  { %v5545_v54 = vadd.f32 %v5837_v14, %v5537_v46 }
0x373b   :  { %v5546_v45 = vpack.c.bf16 %v5545_v54, %v5544_v41 }
0x373d   :  { %6631 = vmatmul.mubr.msk.bf16.vlgmr.msra.gmra.mrb[160].mxu1 %vm93_vm0, %v5546_v45 }
0x3810   :  { %v5600_v48 = vpop.f32.mrb[160].mxu1 }
0x3811   :  { %5607 = vst [vmem:[%s8595_s19] sm:$0xff] %v5600_v48  ;;  %v6632_v37 = vpop.f32.mrb[161].mxu1 }
0x3812   :  { %v5603_v47 = vpop.f32.mrb[162].mxu1 }
0x3813   :  { %5608 = vst [vmem:[%s8595_s19 + $0x8] sm:$0xff] %v5603_v47  ;;  %v6633_v8 = vpop.f32.mrb[163].mxu1 }

</bundles_post_ra>
